<compile_context>
chip_gen: v7x
topology: tpu7x:2x2x1
jax: 0.10.0
libtpu: 0.0.40
codegen_flags: <defaults>
</compile_context>

<pallas_src>
import functools
import math

import jax
import jax.numpy as jnp
from jax.experimental import pallas as pl
from jax.experimental.pallas import tpu as pltpu

# ----------------------------- small synthetic config -----------------------
HIDDEN = 64            # bert_config.hidden_size
NUM_HEADS = 4          # bert_config.num_attention_heads
HEAD_DIM = HIDDEN // NUM_HEADS
INTERMEDIATE = 128     # bert_config.intermediate_size
NUM_LAYERS = 2         # bert_config.num_hidden_layers (encoder & decoder)
VOCAB = 50             # bert_config.vocab_size
PAD_ID = 0             # bert_config.pad_token_id
POINT_DIM = 4          # point_dim (M of the Fourier PE)
F_DIM = HIDDEN         # F_dim of the Fourier PE (== hidden_size)
H_DIM = HIDDEN // 2    # H_dim of the Fourier PE
GAMMA = 10.0
SEQ_MAX_LEN = 6        # seq_max_length (pred_k output dim & seq_embeddings vocab)
MAX_LENGTH = 16        # max_legnth (sort_mlp output dim)
LN_EPS = 1e-12         # bert_config.layer_norm_eps (also used by the decoder)
NEG_INF = -1e9


def _gelu(x):
    # TODO(synk): PyTorch nn.GELU / HF BERT default to the exact erf GELU;
    # erf has no guaranteed Mosaic lowering, so the tanh approximation is used.
    return jax.nn.gelu(x, approximate=True)


# ----------------------------- fused forward kernel -------------------------
def _fused_forward_kernel(acts_ref, bias_ref, s64_ref, s128_ref, out_ref,
                          *, off64, off128, nr, drp):
    f32, bf16 = jnp.float32, jnp.bfloat16

    # ---- static slab views (offsets are Python ints, 8-row aligned) --------
    def w64(name, rows=HIDDEN):
        o = off64[name]
        return s64_ref[o:o + rows, :]

    def b64(name):
        o = off64[name]
        return s64_ref[o:o + 1, :]

    def w128(name, rows=HIDDEN):
        o = off128[name]
        return s128_ref[o:o + rows, :]

    def b128(name):
        o = off128[name]
        return s128_ref[o:o + 1, :]

    def mm(x, w, b=None):
        y = jnp.dot(x.astype(bf16), w.astype(bf16), preferred_element_type=f32)
        return y if b is None else y + b

    def ln(x, g, b):
        mu = jnp.mean(x, axis=-1, keepdims=True)
        xc = x - mu
        var = jnp.mean(xc * xc, axis=-1, keepdims=True)
        return xc * jax.lax.rsqrt(var + LN_EPS) * g + b

    # Per-head column masks (built once per kernel invocation).
    lane = jax.lax.broadcasted_iota(jnp.int32, (1, HIDDEN), 1)
    head_masks = [
        jnp.where((lane >= h * HEAD_DIM) & (lane < (h + 1) * HEAD_DIM),
                  1.0, 0.0).astype(f32)
        for h in range(NUM_HEADS)
    ]
    scale = 1.0 / math.sqrt(HEAD_DIM)

    def mha(q, k, v, o_w, o_b, bias_stk):
        # Sublane-stacked multi-head attention: 3 matmuls total.
        #   Q_stacked = concat_h(q * m_h)                 -> (H*nq, 64)
        #   S = Q_stacked @ k^T * scale + bias            -> (H*nq, nk)
        #   ctx_stacked = softmax(S) @ v                  -> (H*nq, 64)
        #   ctx = sum_h ctx_stacked[h-block] * m_h        -> (nq, 64)  (VPU)
        #   out = ctx @ Wo + bo
        nq = q.shape[0]
        q_stk = jnp.concatenate([q * m for m in head_masks], axis=0)
        s = jax.lax.dot_general(q_stk.astype(bf16), k.astype(bf16),
                                (((1,), (1,)), ((), ())),
                                preferred_element_type=f32) * scale
        s = s + bias_stk
        s = s - jnp.max(s, axis=-1, keepdims=True)
        p = jnp.exp(s)
        # TODO(synk): approx reciprocal -> attention rows don't sum to exactly 1.
        p = p * pl.reciprocal(jnp.sum(p, axis=-1, keepdims=True), approx=True)
        ctx_stk = jnp.dot(p.astype(bf16), v.astype(bf16),
                          preferred_element_type=f32)
        ctx = ctx_stk[0:nq, :] * head_masks[0]
        for h in range(1, NUM_HEADS):
            ctx = ctx + ctx_stk[h * nq:(h + 1) * nq, :] * head_masks[h]
        return mm(ctx, o_w, o_b)

    def enc_layer(hs, pref, bias_stk):
        q = mm(hs, w64(pref + "q_w"), b64(pref + "q_b"))
        k = mm(hs, w64(pref + "k_w"), b64(pref + "k_b"))
        v = mm(hs, w64(pref + "v_w"), b64(pref + "v_b"))
        attn = mha(q, k, v, w64(pref + "o_w"), b64(pref + "o_b"), bias_stk)
        hs = ln(hs + attn, b64(pref + "ln1_g"), b64(pref + "ln1_b"))
        ff = _gelu(mm(hs, w128(pref + "ffn1_w"), b128(pref + "ffn1_b")))
        ff = mm(ff, w64(pref + "ffn2_w", rows=INTERMEDIATE), b64(pref + "ffn2_b"))
        return ln(hs + ff, b64(pref + "ln2_g"), b64(pref + "ln2_b"))

    def dec_layer(x, mem, pref, self_stk, cross_stk):
        # nn.TransformerDecoderLayer, post-norm; the reference forward() passes
        # no tgt/memory masks, only the batch block-diagonal separation is added.
        q = mm(x, w64(pref + "sa_q_w"), b64(pref + "sa_q_b"))
        k = mm(x, w64(pref + "sa_k_w"), b64(pref + "sa_k_b"))
        v = mm(x, w64(pref + "sa_v_w"), b64(pref + "sa_v_b"))
        sa = mha(q, k, v, w64(pref + "sa_o_w"), b64(pref + "sa_o_b"), self_stk)
        x = ln(x + sa, b64(pref + "ln1_g"), b64(pref + "ln1_b"))
        q = mm(x, w64(pref + "ca_q_w"), b64(pref + "ca_q_b"))
        k = mm(mem, w64(pref + "ca_k_w"), b64(pref + "ca_k_b"))
        v = mm(mem, w64(pref + "ca_v_w"), b64(pref + "ca_v_b"))
        ca = mha(q, k, v, w64(pref + "ca_o_w"), b64(pref + "ca_o_b"), cross_stk)
        x = ln(x + ca, b64(pref + "ln2_g"), b64(pref + "ln2_b"))
        ff = _gelu(mm(x, w128(pref + "ffn1_w"), b128(pref + "ffn1_b")))
        ff = mm(ff, w64(pref + "ffn2_w", rows=INTERMEDIATE), b64(pref + "ffn2_b"))
        return ln(x + ff, b64(pref + "ln3_g"), b64(pref + "ln3_b"))

    # ---- activation slab views ----------------------------------------------
    emb = acts_ref[0:nr, :]                               # (B*N, 64)
    tgt = acts_ref[nr:nr + drp, :]                        # (B*L padded, 64)
    coords = acts_ref[nr + drp:nr + drp + nr, :]          # (B*N, 64), cols 0-3 real

    # Attention biases, tiled once for all heads.
    enc_stk = jnp.concatenate([bias_ref[0:nr, :]] * NUM_HEADS, axis=0)
    self_stk = jnp.concatenate([bias_ref[nr:nr + drp, :]] * NUM_HEADS, axis=0)
    cross_stk = jnp.concatenate(
        [bias_ref[nr + drp:nr + 2 * drp, :]] * NUM_HEADS, axis=0)

    # ---- Learnable Fourier positional encoding ------------------------------
    # Wr / Ws1 consume the full padded coords row-block (x1 in cols 0-1, x2 in
    # cols 2-3); their zero-padded weight rows select the right columns.
    inv_sqrt_f = 1.0 / math.sqrt(F_DIM)
    proj = mm(coords, w64("pe_Wr"))                                  # (nr, 64)
    sh = _gelu(mm(coords, w64("pe_Ws1_w"), b64("pe_Ws1_b")))         # (nr, 64)
    sp = mm(sh, w64("pe_Ws2_w"), b64("pe_Ws2_b"))                    # (nr, 64)
    pr = proj * sp
    cosv = inv_sqrt_f * jnp.cos(pr)
    sinv = inv_sqrt_f * jnp.sin(pr)
    # [cos|sin] concat folded into a split mlp[0] weight (zero rows kill the
    # cos() junk in the padded columns).
    pe_h = _gelu(mm(cosv, w64("pe_mlp1_cw")) + mm(sinv, w64("pe_mlp1_sw"))
                 + b64("pe_mlp1_b"))
    pe_x = mm(pe_h, w64("pe_mlp2_w"), b64("pe_mlp2_b"))              # (nr, 64)

    # ---- BertEmbeddings: word emb + PE, LayerNorm (dropout = id in eval) ----
    hs = ln(pe_x + emb, b64("emb_ln_g"), b64("emb_ln_b"))

    # ---- BERT encoder --------------------------------------------------------
    for l in range(NUM_LAYERS):
        hs = enc_layer(hs, f"enc{l}_", enc_stk)
    memory = hs                                                      # (nr, 64)

    # ---- seq_mlp head (all rows; per-batch CLS row dropped outside) ---------
    seq_h = jnp.maximum(mm(memory, w64("seq1_w"), b64("seq1_b")), 0.0)
    out_ref[0:nr, :] = mm(seq_h, w128("seq2_w"), b128("seq2_b"))     # (nr, 128)

    # ---- BertPooler + pred_k head (CLS rows picked outside) -----------------
    pooled = jnp.tanh(mm(memory, w64("pool_w"), b64("pool_b")))
    k_h = jnp.maximum(mm(pooled, w64("k1_w"), b64("k1_b")), 0.0)
    out_ref[nr + drp:nr + drp + nr, :] = mm(k_h, w128("k2_w"), b128("k2_b"))

    # ---- Transformer decoder over seq embeddings with encoder memory --------
    x = tgt
    for l in range(NUM_LAYERS):
        x = dec_layer(x, memory, f"dec{l}_", self_stk, cross_stk)

    # ---- sort head -----------------------------------------------------------
    sort_h = jnp.maximum(mm(x, w64("sort1_w"), b64("sort1_b")), 0.0)
    out_ref[nr:nr + drp, :] = mm(sort_h, w128("sort2_w"), b128("sort2_b"))


# ----------------------------- weight slab packing ---------------------------
def _build_slabs(p):
    """Pack every weight/bias into two f32 slabs (width 64 / 128).

    Each sub-block is zero padded: rows to the (padded) width of its input
    activation (multiple of 8), columns to the slab width.  Offsets are Python
    ints so the kernel can use static ref slices.
    """
    f32 = jnp.float32

    def place(rows, cols, arr, r0=0):
        blk = jnp.zeros((rows, cols), f32)
        return blk.at[r0:r0 + arr.shape[0], 0:arr.shape[1]].set(arr.astype(f32))

    e64, e128 = [], []

    def add64(name, arr, rows, r0=0):
        e64.append((name, place(rows, 64, arr, r0)))

    def add128(name, arr, rows, r0=0):
        e128.append((name, place(rows, 128, arr, r0)))

    pe = p["pe"]
    add64("pe_Wr", pe["Wr"], 64)                # (2,32) at rows 0-1 (x1 cols)
    add64("pe_Ws1_w", pe["Ws1_w"], 64, r0=2)    # (2,64) at rows 2-3 (x2 cols)
    add64("pe_Ws1_b", pe["Ws1_b"], 8)
    add64("pe_Ws2_w", pe["Ws2_w"], 64)
    add64("pe_Ws2_b", pe["Ws2_b"], 8)
    add64("pe_mlp1_cw", pe["mlp1_cw"], 64)
    add64("pe_mlp1_sw", pe["mlp1_sw"], 64)
    add64("pe_mlp1_b", pe["mlp1_b"], 8)
    add64("pe_mlp2_w", pe["mlp2_w"], 64)
    add64("pe_mlp2_b", pe["mlp2_b"], 8)
    add64("emb_ln_g", p["emb_ln_g"], 8)
    add64("emb_ln_b", p["emb_ln_b"], 8)

    for l, lp in enumerate(p["enc"]):
        pref = f"enc{l}_"
        for nm in ("q", "k", "v", "o"):
            add64(pref + nm + "_w", lp[nm + "_w"], 64)
            add64(pref + nm + "_b", lp[nm + "_b"], 8)
        add64(pref + "ln1_g", lp["ln1_g"], 8)
        add64(pref + "ln1_b", lp["ln1_b"], 8)
        add128(pref + "ffn1_w", lp["ffn1_w"], 64)
        add128(pref + "ffn1_b", lp["ffn1_b"], 8)
        add64(pref + "ffn2_w", lp["ffn2_w"], 128)
        add64(pref + "ffn2_b", lp["ffn2_b"], 8)
        add64(pref + "ln2_g", lp["ln2_g"], 8)
        add64(pref + "ln2_b", lp["ln2_b"], 8)

    add64("pool_w", p["pool_w"], 64)
    add64("pool_b", p["pool_b"], 8)

    for l, lp in enumerate(p["dec"]):
        pref = f"dec{l}_"
        for blk in ("sa", "ca"):
            for nm in ("q", "k", "v", "o"):
                add64(pref + blk + "_" + nm + "_w", lp[blk + "_" + nm + "_w"], 64)
                add64(pref + blk + "_" + nm + "_b", lp[blk + "_" + nm + "_b"], 8)
        for nm in ("ln1", "ln2", "ln3"):
            add64(pref + nm + "_g", lp[nm + "_g"], 8)
            add64(pref + nm + "_b", lp[nm + "_b"], 8)
        add128(pref + "ffn1_w", lp["ffn1_w"], 64)
        add128(pref + "ffn1_b", lp["ffn1_b"], 8)
        add64(pref + "ffn2_w", lp["ffn2_w"], 128)
        add64(pref + "ffn2_b", lp["ffn2_b"], 8)

    add64("seq1_w", p["seq1_w"], 64)
    add64("seq1_b", p["seq1_b"], 8)
    add64("k1_w", p["k1_w"], 64)
    add64("k1_b", p["k1_b"], 8)
    add64("sort1_w", p["sort1_w"], 64)
    add64("sort1_b", p["sort1_b"], 8)
    # Head output weights live in the 128-wide slab so the head outputs are
    # computed (and stored) lane-dense at 128 columns.
    add128("seq2_w", p["seq2_w"], 64)
    add128("seq2_b", p["seq2_b"], 8)
    add128("sort2_w", p["sort2_w"], 64)
    add128("sort2_b", p["sort2_b"], 8)
    add128("k2_w", p["k2_w"], 64)
    add128("k2_b", p["k2_b"], 8)

    def finish(entries):
        offs, row, blocks = {}, 0, []
        for name, blk in entries:
            offs[name] = row
            blocks.append(blk)
            row += blk.shape[0]
        return jnp.concatenate(blocks, axis=0), offs

    slab64, off64 = finish(e64)
    slab128, off128 = finish(e128)
    return slab64, off64, slab128, off128


# ----------------------------- wrapper ---------------------------------------
def forward(params, input_ids, attention_mask, position_coords, seq_ids):
    B, N = input_ids.shape
    L = seq_ids.shape[1]
    NR = B * N                                   # encoder rows (batch stacked)
    DR = B * L                                   # real decoder rows
    DRP = max(8, ((DR + 7) // 8) * 8)            # padded decoder rows
    assert DRP == NR, "bias-slab packing assumes padded decoder rows == encoder rows"

    # Embedding gathers / packing are tiny JAX glue.
    emb = jnp.take(params["word_emb"], input_ids.reshape(-1), axis=0)    # (NR, H)
    tgt = jnp.take(params["seq_emb"], seq_ids.reshape(-1), axis=0)       # (DR, H)
    tgt = jnp.pad(tgt, ((0, DRP - DR), (0, 0)))
    coords = jnp.pad(position_coords.reshape(NR, POINT_DIM),
                     ((0, 0), (0, HIDDEN - POINT_DIM)))                  # (NR, H)
    acts = jnp.concatenate([emb, tgt, coords], axis=0)                   # (NR+DRP+NR, H)

    # Block-diagonal attention biases (batch elements never attend to each
    # other once the batch is stacked into rows); encoder additionally masks
    # padded key positions, matching HF BERT's extended attention mask.
    mem_batch = jnp.repeat(jnp.arange(B, dtype=jnp.int32), N)
    tgt_batch = jnp.concatenate(
        [jnp.repeat(jnp.arange(B, dtype=jnp.int32), L),
         jnp.full((DRP - DR,), B, jnp.int32)])
    keep = attention_mask.reshape(-1) > 0
    enc_bias = jnp.where((mem_batch[:, None] == mem_batch[None, :]) & keep[None, :],
                         0.0, NEG_INF)
    dself_bias = jnp.where(tgt_batch[:, None] == tgt_batch[None, :], 0.0, NEG_INF)
    dcross_bias = jnp.where(tgt_batch[:, None] == mem_batch[None, :], 0.0, NEG_INF)
    bias_slab = jnp.concatenate([enc_bias, dself_bias, dcross_bias],
                                axis=0).astype(jnp.float32)

    slab64, off64, slab128, off128 = _build_slabs(params)

    kernel = functools.partial(_fused_forward_kernel,
                               off64=off64, off128=off128, nr=NR, drp=DRP)
    out_rows = NR + DRP + NR
    vmem_spec = pl.BlockSpec(memory_space=pltpu.MemorySpace.VMEM)
    out = pl.pallas_call(
        kernel,
        out_shape=jax.ShapeDtypeStruct((out_rows, 128), jnp.float32),
        in_specs=[vmem_spec, vmem_spec, vmem_spec, vmem_spec],
        out_specs=vmem_spec,
    )(acts, bias_slab, slab64, slab128)

    seq_logic = out[0:NR, 0:HIDDEN].reshape(B, N, HIDDEN)[:, 1:, :]
    sort_logic = out[NR:NR + DR, 0:MAX_LENGTH].reshape(B, L, MAX_LENGTH)
    k_pred = out[NR + DRP:NR + DRP + NR, 0:SEQ_MAX_LEN].reshape(
        B, N, SEQ_MAX_LEN)[:, 0, :]
    return seq_logic, sort_logic, k_pred


# ----------------------------- deterministic params -------------------------
def init_params(key):
    kit = iter(jax.random.split(key, 128))
    nxt = lambda: next(kit)

    def w(din, dout, std=0.02):
        return jax.random.normal(nxt(), (din, dout), jnp.float32) * std

    def b(dout, std=0.02):
        return jax.random.normal(nxt(), (1, dout), jnp.float32) * std

    ones = lambda d: jnp.ones((1, d), jnp.float32)
    zeros = lambda d: jnp.zeros((1, d), jnp.float32)
    half = POINT_DIM // 2

    p = {}
    word = jax.random.normal(nxt(), (VOCAB, HIDDEN), jnp.float32) * 0.02
    p["word_emb"] = word.at[PAD_ID].set(0.0)          # padding_idx = pad_token_id
    p["seq_emb"] = jax.random.normal(nxt(), (SEQ_MAX_LEN, HIDDEN), jnp.float32) * 0.02
    # cls_token exists in the module but is never used in forward().
    p["cls_token"] = jax.random.normal(nxt(), (1, 1, HIDDEN), jnp.float32)

    mlp1_w = w(F_DIM, H_DIM)
    p["pe"] = {
        "Wr": jax.random.normal(nxt(), (half, F_DIM // 2), jnp.float32) * (GAMMA ** -2),
        "Ws1_w": w(half, F_DIM), "Ws1_b": b(F_DIM),
        "Ws2_w": w(F_DIM, F_DIM // 2), "Ws2_b": b(F_DIM // 2),
        # mlp[0] weight split into cos/sin row blocks (no in-kernel concat).
        "mlp1_cw": mlp1_w[:F_DIM // 2, :], "mlp1_sw": mlp1_w[F_DIM // 2:, :],
        "mlp1_b": b(H_DIM),
        "mlp2_w": w(H_DIM, F_DIM), "mlp2_b": b(F_DIM),
    }
    p["emb_ln_g"] = ones(HIDDEN)
    p["emb_ln_b"] = zeros(HIDDEN)

    p["enc"] = []
    for _ in range(NUM_LAYERS):
        p["enc"].append({
            "q_w": w(HIDDEN, HIDDEN), "q_b": b(HIDDEN),
            "k_w": w(HIDDEN, HIDDEN), "k_b": b(HIDDEN),
            "v_w": w(HIDDEN, HIDDEN), "v_b": b(HIDDEN),
            "o_w": w(HIDDEN, HIDDEN), "o_b": b(HIDDEN),
            "ln1_g": ones(HIDDEN), "ln1_b": zeros(HIDDEN),
            "ffn1_w": w(HIDDEN, INTERMEDIATE), "ffn1_b": b(INTERMEDIATE),
            "ffn2_w": w(INTERMEDIATE, HIDDEN), "ffn2_b": b(HIDDEN),
            "ln2_g": ones(HIDDEN), "ln2_b": zeros(HIDDEN),
        })
    p["pool_w"] = w(HIDDEN, HIDDEN)
    p["pool_b"] = b(HIDDEN)

    p["dec"] = []
    for _ in range(NUM_LAYERS):
        p["dec"].append({
            "sa_q_w": w(HIDDEN, HIDDEN), "sa_q_b": b(HIDDEN),
            "sa_k_w": w(HIDDEN, HIDDEN), "sa_k_b": b(HIDDEN),
            "sa_v_w": w(HIDDEN, HIDDEN), "sa_v_b": b(HIDDEN),
            "sa_o_w": w(HIDDEN, HIDDEN), "sa_o_b": b(HIDDEN),
            "ln1_g": ones(HIDDEN), "ln1_b": zeros(HIDDEN),
            "ca_q_w": w(HIDDEN, HIDDEN), "ca_q_b": b(HIDDEN),
            "ca_k_w": w(HIDDEN, HIDDEN), "ca_k_b": b(HIDDEN),
            "ca_v_w": w(HIDDEN, HIDDEN), "ca_v_b": b(HIDDEN),
            "ca_o_w": w(HIDDEN, HIDDEN), "ca_o_b": b(HIDDEN),
            "ln2_g": ones(HIDDEN), "ln2_b": zeros(HIDDEN),
            "ffn1_w": w(HIDDEN, INTERMEDIATE), "ffn1_b": b(INTERMEDIATE),
            "ffn2_w": w(INTERMEDIATE, HIDDEN), "ffn2_b": b(HIDDEN),
            "ln3_g": ones(HIDDEN), "ln3_b": zeros(HIDDEN),
        })

    p["seq1_w"] = w(HIDDEN, HIDDEN // 2); p["seq1_b"] = b(HIDDEN // 2)
    p["seq2_w"] = w(HIDDEN // 2, HIDDEN); p["seq2_b"] = b(HIDDEN)
    p["k1_w"] = w(HIDDEN, HIDDEN // 2);   p["k1_b"] = b(HIDDEN // 2)
    p["k2_w"] = w(HIDDEN // 2, SEQ_MAX_LEN); p["k2_b"] = b(SEQ_MAX_LEN)
    p["sort1_w"] = w(HIDDEN, HIDDEN // 2); p["sort1_b"] = b(HIDDEN // 2)
    p["sort2_w"] = w(HIDDEN // 2, MAX_LENGTH); p["sort2_b"] = b(MAX_LENGTH)
    return p


if __name__ == "__main__":
    key = jax.random.PRNGKey(0)
    k_par, k_ids, k_pos, k_seq = jax.random.split(key, 4)
    params = init_params(k_par)

    B, N, L = 2, 8, SEQ_MAX_LEN
    input_ids = jax.random.randint(k_ids, (B, N), 1, VOCAB)
    attention_mask = jnp.array([[1, 1, 1, 1, 1, 1, 1, 1],
                                [1, 1, 1, 1, 1, 1, 0, 0]], jnp.int32)
    # position_ids here are float point coordinates (B, N, point_dim) as the
    # cluster-sentence task feeds them to the Fourier positional encoder.
    position_coords = jax.random.normal(k_pos, (B, N, POINT_DIM), jnp.float32)
    seq_ids = jax.random.randint(k_seq, (B, L), 0, SEQ_MAX_LEN)

    fwd = jax.jit(forward)
    seq_logic, sort_logic, k_pred = fwd(params, input_ids, attention_mask,
                                        position_coords, seq_ids)
    jax.block_until_ready((seq_logic, sort_logic, k_pred))

    assert seq_logic.shape == (B, N - 1, HIDDEN)
    assert sort_logic.shape == (B, L, MAX_LENGTH)
    assert k_pred.shape == (B, SEQ_MAX_LEN)
    assert bool(jnp.all(jnp.isfinite(seq_logic)))
    assert bool(jnp.all(jnp.isfinite(sort_logic)))
    assert bool(jnp.all(jnp.isfinite(k_pred)))
    print("KERNEL_OK")
</pallas_src>

<mosaic_0001>
module attributes {stable_mosaic.version = 11 : i64} {
  func.func @_fused_forward_kernel(%arg0: memref<48x64xf32, #tpu.memory_space<vmem>>, %arg1: memref<48x16xf32, #tpu.memory_space<vmem>>, %arg2: memref<3152x64xf32, #tpu.memory_space<vmem>>, %arg3: memref<504x128xf32, #tpu.memory_space<vmem>>, %arg4: memref<48x128xf32, #tpu.memory_space<vmem>>) attributes {dimension_semantics = [], scalar_prefetch = 0 : i64, scratch_operands = 0 : i64, tpu.core_type = #tpu.core_type<tc>} {
    %0 = tpu.iota {dimensions = array<i32: 1>} : vector<1x64xi32>
    %c0_i32 = arith.constant 0 : i32
    %1 = vector.broadcast %c0_i32 : i32 to vector<1x64xi32>
    %2 = arith.cmpi sge, %0, %1 : vector<1x64xi32>
    %c16_i32 = arith.constant 16 : i32
    %3 = vector.broadcast %c16_i32 : i32 to vector<1x64xi32>
    %4 = arith.cmpi slt, %0, %3 : vector<1x64xi32>
    %5 = arith.andi %2, %4 : vector<1x64xi1>
    %cst = arith.constant 1.000000e+00 : f32
    %cst_0 = arith.constant 0.000000e+00 : f32
    %6 = vector.broadcast %cst : f32 to vector<1x64xf32>
    %7 = vector.broadcast %cst_0 : f32 to vector<1x64xf32>
    %8 = arith.select %5, %6, %7 : vector<1x64xi1>, vector<1x64xf32>
    %c16_i32_1 = arith.constant 16 : i32
    %9 = vector.broadcast %c16_i32_1 : i32 to vector<1x64xi32>
    %10 = arith.cmpi sge, %0, %9 : vector<1x64xi32>
    %c32_i32 = arith.constant 32 : i32
    %11 = vector.broadcast %c32_i32 : i32 to vector<1x64xi32>
    %12 = arith.cmpi slt, %0, %11 : vector<1x64xi32>
    %13 = arith.andi %10, %12 : vector<1x64xi1>
    %cst_2 = arith.constant 1.000000e+00 : f32
    %cst_3 = arith.constant 0.000000e+00 : f32
    %14 = vector.broadcast %cst_2 : f32 to vector<1x64xf32>
    %15 = vector.broadcast %cst_3 : f32 to vector<1x64xf32>
    %16 = arith.select %13, %14, %15 : vector<1x64xi1>, vector<1x64xf32>
    %c32_i32_4 = arith.constant 32 : i32
    %17 = vector.broadcast %c32_i32_4 : i32 to vector<1x64xi32>
    %18 = arith.cmpi sge, %0, %17 : vector<1x64xi32>
    %c48_i32 = arith.constant 48 : i32
    %19 = vector.broadcast %c48_i32 : i32 to vector<1x64xi32>
    %20 = arith.cmpi slt, %0, %19 : vector<1x64xi32>
    %21 = arith.andi %18, %20 : vector<1x64xi1>
    %cst_5 = arith.constant 1.000000e+00 : f32
    %cst_6 = arith.constant 0.000000e+00 : f32
    %22 = vector.broadcast %cst_5 : f32 to vector<1x64xf32>
    %23 = vector.broadcast %cst_6 : f32 to vector<1x64xf32>
    %24 = arith.select %21, %22, %23 : vector<1x64xi1>, vector<1x64xf32>
    %c48_i32_7 = arith.constant 48 : i32
    %25 = vector.broadcast %c48_i32_7 : i32 to vector<1x64xi32>
    %26 = arith.cmpi sge, %0, %25 : vector<1x64xi32>
    %c64_i32 = arith.constant 64 : i32
    %27 = vector.broadcast %c64_i32 : i32 to vector<1x64xi32>
    %28 = arith.cmpi slt, %0, %27 : vector<1x64xi32>
    %29 = arith.andi %26, %28 : vector<1x64xi1>
    %cst_8 = arith.constant 1.000000e+00 : f32
    %cst_9 = arith.constant 0.000000e+00 : f32
    %30 = vector.broadcast %cst_8 : f32 to vector<1x64xf32>
    %31 = vector.broadcast %cst_9 : f32 to vector<1x64xf32>
    %32 = arith.select %29, %30, %31 : vector<1x64xi1>, vector<1x64xf32>
    %c0 = arith.constant 0 : index
    %c0_10 = arith.constant 0 : index
    %33 = vector.load %arg0[%c0, %c0_10] : memref<48x64xf32, #tpu.memory_space<vmem>>, vector<16x64xf32>
    %c16 = arith.constant 16 : index
    %c0_11 = arith.constant 0 : index
    %34 = vector.load %arg0[%c16, %c0_11] : memref<48x64xf32, #tpu.memory_space<vmem>>, vector<16x64xf32>
    %c32 = arith.constant 32 : index
    %c0_12 = arith.constant 0 : index
    %35 = vector.load %arg0[%c32, %c0_12] : memref<48x64xf32, #tpu.memory_space<vmem>>, vector<16x64xf32>
    %c0_13 = arith.constant 0 : index
    %c0_14 = arith.constant 0 : index
    %36 = vector.load %arg1[%c0_13, %c0_14] : memref<48x16xf32, #tpu.memory_space<vmem>>, vector<16x16xf32>
    %37 = tpu.concatenate %36, %36, %36, %36 in 0 : vector<16x16xf32>, vector<16x16xf32>, vector<16x16xf32>, vector<16x16xf32> -> vector<64x16xf32>
    %c16_15 = arith.constant 16 : index
    %c0_16 = arith.constant 0 : index
    %38 = vector.load %arg1[%c16_15, %c0_16] : memref<48x16xf32, #tpu.memory_space<vmem>>, vector<16x16xf32>
    %39 = tpu.concatenate %38, %38, %38, %38 in 0 : vector<16x16xf32>, vector<16x16xf32>, vector<16x16xf32>, vector<16x16xf32> -> vector<64x16xf32>
    %c32_17 = arith.constant 32 : index
    %c0_18 = arith.constant 0 : index
    %40 = vector.load %arg1[%c32_17, %c0_18] : memref<48x16xf32, #tpu.memory_space<vmem>>, vector<16x16xf32>
    %41 = tpu.concatenate %40, %40, %40, %40 in 0 : vector<16x16xf32>, vector<16x16xf32>, vector<16x16xf32>, vector<16x16xf32> -> vector<64x16xf32>
    %c0_19 = arith.constant 0 : index
    %c0_20 = arith.constant 0 : index
    %42 = vector.load %arg2[%c0_19, %c0_20] : memref<3152x64xf32, #tpu.memory_space<vmem>>, vector<64x64xf32>
    %43 = arith.truncf %35 : vector<16x64xf32> to vector<16x64xbf16>
    %44 = arith.truncf %42 : vector<64x64xf32> to vector<64x64xbf16>
    %cst_21 = arith.constant dense<0.000000e+00> : vector<16x64xf32>
    %45 = tpu.matmul %43, %44, %cst_21 {dimension_numbers = #tpu.dot_dimension_numbers<[1], [0], [0], [1], [0, 0, 1, 1], [], []>} : vector<16x64xbf16>, vector<64x64xbf16>, vector<16x64xf32> -> vector<16x64xf32>
    %c64 = arith.constant 64 : index
    %c0_22 = arith.constant 0 : index
    %46 = vector.load %arg2[%c64, %c0_22] : memref<3152x64xf32, #tpu.memory_space<vmem>>, vector<64x64xf32>
    %c128 = arith.constant 128 : index
    %c0_23 = arith.constant 0 : index
    %47 = vector.load %arg2[%c128, %c0_23] : memref<3152x64xf32, #tpu.memory_space<vmem>>, vector<1x64xf32>
    %48 = arith.truncf %35 : vector<16x64xf32> to vector<16x64xbf16>
    %49 = arith.truncf %46 : vector<64x64xf32> to vector<64x64xbf16>
    %cst_24 = arith.constant dense<0.000000e+00> : vector<16x64xf32>
    %50 = tpu.matmul %48, %49, %cst_24 {dimension_numbers = #tpu.dot_dimension_numbers<[1], [0], [0], [1], [0, 0, 1, 1], [], []>} : vector<16x64xbf16>, vector<64x64xbf16>, vector<16x64xf32> -> vector<16x64xf32>
    %51 = vector.broadcast %47 : vector<1x64xf32> to vector<16x64xf32>
    %52 = arith.addf %50, %51 : vector<16x64xf32>
    %53 = arith.mulf %52, %52 : vector<16x64xf32>
    %54 = arith.mulf %52, %53 : vector<16x64xf32>
    %cst_25 = arith.constant 4.471500e-02 : f32
    %55 = vector.broadcast %cst_25 : f32 to vector<16x64xf32>
    %56 = arith.mulf %55, %54 : vector<16x64xf32>
    %57 = arith.addf %52, %56 : vector<16x64xf32>
    %cst_26 = arith.constant 0.797884583 : f32
    %58 = vector.broadcast %cst_26 : f32 to vector<16x64xf32>
    %59 = arith.mulf %58, %57 : vector<16x64xf32>
    %60 = math.tanh %59 : vector<16x64xf32>
    %cst_27 = arith.constant 1.000000e+00 : f32
    %61 = vector.broadcast %cst_27 : f32 to vector<16x64xf32>
    %62 = arith.addf %61, %60 : vector<16x64xf32>
    %cst_28 = arith.constant 5.000000e-01 : f32
    %63 = vector.broadcast %cst_28 : f32 to vector<16x64xf32>
    %64 = arith.mulf %63, %62 : vector<16x64xf32>
    %65 = arith.mulf %52, %64 : vector<16x64xf32>
    %c136 = arith.constant 136 : index
    %c0_29 = arith.constant 0 : index
    %66 = vector.load %arg2[%c136, %c0_29] : memref<3152x64xf32, #tpu.memory_space<vmem>>, vector<64x64xf32>
    %c200 = arith.constant 200 : index
    %c0_30 = arith.constant 0 : index
    %67 = vector.load %arg2[%c200, %c0_30] : memref<3152x64xf32, #tpu.memory_space<vmem>>, vector<1x64xf32>
    %68 = arith.truncf %65 : vector<16x64xf32> to vector<16x64xbf16>
    %69 = arith.truncf %66 : vector<64x64xf32> to vector<64x64xbf16>
    %cst_31 = arith.constant dense<0.000000e+00> : vector<16x64xf32>
    %70 = tpu.matmul %68, %69, %cst_31 {dimension_numbers = #tpu.dot_dimension_numbers<[1], [0], [0], [1], [0, 0, 1, 1], [], []>} : vector<16x64xbf16>, vector<64x64xbf16>, vector<16x64xf32> -> vector<16x64xf32>
    %71 = vector.broadcast %67 : vector<1x64xf32> to vector<16x64xf32>
    %72 = arith.addf %70, %71 : vector<16x64xf32>
    %73 = arith.mulf %45, %72 : vector<16x64xf32>
    %74 = math.cos %73 : vector<16x64xf32>
    %cst_32 = arith.constant 1.250000e-01 : f32
    %75 = vector.broadcast %cst_32 : f32 to vector<16x64xf32>
    %76 = arith.mulf %75, %74 : vector<16x64xf32>
    %77 = math.sin %73 : vector<16x64xf32>
    %cst_33 = arith.constant 1.250000e-01 : f32
    %78 = vector.broadcast %cst_33 : f32 to vector<16x64xf32>
    %79 = arith.mulf %78, %77 : vector<16x64xf32>
    %c208 = arith.constant 208 : index
    %c0_34 = arith.constant 0 : index
    %80 = vector.load %arg2[%c208, %c0_34] : memref<3152x64xf32, #tpu.memory_space<vmem>>, vector<64x64xf32>
    %81 = arith.truncf %76 : vector<16x64xf32> to vector<16x64xbf16>
    %82 = arith.truncf %80 : vector<64x64xf32> to vector<64x64xbf16>
    %cst_35 = arith.constant dense<0.000000e+00> : vector<16x64xf32>
    %83 = tpu.matmul %81, %82, %cst_35 {dimension_numbers = #tpu.dot_dimension_numbers<[1], [0], [0], [1], [0, 0, 1, 1], [], []>} : vector<16x64xbf16>, vector<64x64xbf16>, vector<16x64xf32> -> vector<16x64xf32>
    %c272 = arith.constant 272 : index
    %c0_36 = arith.constant 0 : index
    %84 = vector.load %arg2[%c272, %c0_36] : memref<3152x64xf32, #tpu.memory_space<vmem>>, vector<64x64xf32>
    %85 = arith.truncf %79 : vector<16x64xf32> to vector<16x64xbf16>
    %86 = arith.truncf %84 : vector<64x64xf32> to vector<64x64xbf16>
    %cst_37 = arith.constant dense<0.000000e+00> : vector<16x64xf32>
    %87 = tpu.matmul %85, %86, %cst_37 {dimension_numbers = #tpu.dot_dimension_numbers<[1], [0], [0], [1], [0, 0, 1, 1], [], []>} : vector<16x64xbf16>, vector<64x64xbf16>, vector<16x64xf32> -> vector<16x64xf32>
    %88 = arith.addf %83, %87 : vector<16x64xf32>
    %c336 = arith.constant 336 : index
    %c0_38 = arith.constant 0 : index
    %89 = vector.load %arg2[%c336, %c0_38] : memref<3152x64xf32, #tpu.memory_space<vmem>>, vector<1x64xf32>
    %90 = vector.broadcast %89 : vector<1x64xf32> to vector<16x64xf32>
    %91 = arith.addf %88, %90 : vector<16x64xf32>
    %92 = arith.mulf %91, %91 : vector<16x64xf32>
    %93 = arith.mulf %91, %92 : vector<16x64xf32>
    %cst_39 = arith.constant 4.471500e-02 : f32
    %94 = vector.broadcast %cst_39 : f32 to vector<16x64xf32>
    %95 = arith.mulf %94, %93 : vector<16x64xf32>
    %96 = arith.addf %91, %95 : vector<16x64xf32>
    %cst_40 = arith.constant 0.797884583 : f32
    %97 = vector.broadcast %cst_40 : f32 to vector<16x64xf32>
    %98 = arith.mulf %97, %96 : vector<16x64xf32>
    %99 = math.tanh %98 : vector<16x64xf32>
    %cst_41 = arith.constant 1.000000e+00 : f32
    %100 = vector.broadcast %cst_41 : f32 to vector<16x64xf32>
    %101 = arith.addf %100, %99 : vector<16x64xf32>
    %cst_42 = arith.constant 5.000000e-01 : f32
    %102 = vector.broadcast %cst_42 : f32 to vector<16x64xf32>
    %103 = arith.mulf %102, %101 : vector<16x64xf32>
    %104 = arith.mulf %91, %103 : vector<16x64xf32>
    %c344 = arith.constant 344 : index
    %c0_43 = arith.constant 0 : index
    %105 = vector.load %arg2[%c344, %c0_43] : memref<3152x64xf32, #tpu.memory_space<vmem>>, vector<64x64xf32>
    %c408 = arith.constant 408 : index
    %c0_44 = arith.constant 0 : index
    %106 = vector.load %arg2[%c408, %c0_44] : memref<3152x64xf32, #tpu.memory_space<vmem>>, vector<1x64xf32>
    %107 = arith.truncf %104 : vector<16x64xf32> to vector<16x64xbf16>
    %108 = arith.truncf %105 : vector<64x64xf32> to vector<64x64xbf16>
    %cst_45 = arith.constant dense<0.000000e+00> : vector<16x64xf32>
    %109 = tpu.matmul %107, %108, %cst_45 {dimension_numbers = #tpu.dot_dimension_numbers<[1], [0], [0], [1], [0, 0, 1, 1], [], []>} : vector<16x64xbf16>, vector<64x64xbf16>, vector<16x64xf32> -> vector<16x64xf32>
    %110 = vector.broadcast %106 : vector<1x64xf32> to vector<16x64xf32>
    %111 = arith.addf %109, %110 : vector<16x64xf32>
    %112 = arith.addf %111, %33 : vector<16x64xf32>
    %c416 = arith.constant 416 : index
    %c0_46 = arith.constant 0 : index
    %113 = vector.load %arg2[%c416, %c0_46] : memref<3152x64xf32, #tpu.memory_space<vmem>>, vector<1x64xf32>
    %c424 = arith.constant 424 : index
    %c0_47 = arith.constant 0 : index
    %114 = vector.load %arg2[%c424, %c0_47] : memref<3152x64xf32, #tpu.memory_space<vmem>>, vector<1x64xf32>
    %cst_48 = arith.constant dense<0.000000e+00> : vector<16xf32>
    %115 = vector.multi_reduction <add>, %112, %cst_48 [1] : vector<16x64xf32> to vector<16xf32>
    %116 = vector.shape_cast %115 : vector<16xf32> to vector<16x1xf32>
    %cst_49 = arith.constant 6.400000e+01 : f32
    %117 = vector.broadcast %cst_49 : f32 to vector<16x1xf32>
    %118 = arith.divf %116, %117 : vector<16x1xf32>
    %119 = vector.broadcast %118 : vector<16x1xf32> to vector<16x64xf32>
    %120 = arith.subf %112, %119 : vector<16x64xf32>
    %121 = arith.mulf %120, %120 : vector<16x64xf32>
    %cst_50 = arith.constant dense<0.000000e+00> : vector<16xf32>
    %122 = vector.multi_reduction <add>, %121, %cst_50 [1] : vector<16x64xf32> to vector<16xf32>
    %123 = vector.shape_cast %122 : vector<16xf32> to vector<16x1xf32>
    %cst_51 = arith.constant 6.400000e+01 : f32
    %124 = vector.broadcast %cst_51 : f32 to vector<16x1xf32>
    %125 = arith.divf %123, %124 : vector<16x1xf32>
    %cst_52 = arith.constant 9.99999996E-13 : f32
    %126 = vector.broadcast %cst_52 : f32 to vector<16x1xf32>
    %127 = arith.addf %125, %126 : vector<16x1xf32>
    %128 = math.rsqrt %127 : vector<16x1xf32>
    %129 = vector.broadcast %128 : vector<16x1xf32> to vector<16x64xf32>
    %130 = arith.mulf %120, %129 : vector<16x64xf32>
    %131 = vector.broadcast %113 : vector<1x64xf32> to vector<16x64xf32>
    %132 = arith.mulf %130, %131 : vector<16x64xf32>
    %133 = vector.broadcast %114 : vector<1x64xf32> to vector<16x64xf32>
    %134 = arith.addf %132, %133 : vector<16x64xf32>
    %c432 = arith.constant 432 : index
    %c0_53 = arith.constant 0 : index
    %135 = vector.load %arg2[%c432, %c0_53] : memref<3152x64xf32, #tpu.memory_space<vmem>>, vector<64x64xf32>
    %c496 = arith.constant 496 : index
    %c0_54 = arith.constant 0 : index
    %136 = vector.load %arg2[%c496, %c0_54] : memref<3152x64xf32, #tpu.memory_space<vmem>>, vector<1x64xf32>
    %137 = arith.truncf %134 : vector<16x64xf32> to vector<16x64xbf16>
    %138 = arith.truncf %135 : vector<64x64xf32> to vector<64x64xbf16>
    %cst_55 = arith.constant dense<0.000000e+00> : vector<16x64xf32>
    %139 = tpu.matmul %137, %138, %cst_55 {dimension_numbers = #tpu.dot_dimension_numbers<[1], [0], [0], [1], [0, 0, 1, 1], [], []>} : vector<16x64xbf16>, vector<64x64xbf16>, vector<16x64xf32> -> vector<16x64xf32>
    %140 = vector.broadcast %136 : vector<1x64xf32> to vector<16x64xf32>
    %141 = arith.addf %139, %140 : vector<16x64xf32>
    %c504 = arith.constant 504 : index
    %c0_56 = arith.constant 0 : index
    %142 = vector.load %arg2[%c504, %c0_56] : memref<3152x64xf32, #tpu.memory_space<vmem>>, vector<64x64xf32>
    %c568 = arith.constant 568 : index
    %c0_57 = arith.constant 0 : index
    %143 = vector.load %arg2[%c568, %c0_57] : memref<3152x64xf32, #tpu.memory_space<vmem>>, vector<1x64xf32>
    %144 = arith.truncf %134 : vector<16x64xf32> to vector<16x64xbf16>
    %145 = arith.truncf %142 : vector<64x64xf32> to vector<64x64xbf16>
    %cst_58 = arith.constant dense<0.000000e+00> : vector<16x64xf32>
    %146 = tpu.matmul %144, %145, %cst_58 {dimension_numbers = #tpu.dot_dimension_numbers<[1], [0], [0], [1], [0, 0, 1, 1], [], []>} : vector<16x64xbf16>, vector<64x64xbf16>, vector<16x64xf32> -> vector<16x64xf32>
    %147 = vector.broadcast %143 : vector<1x64xf32> to vector<16x64xf32>
    %148 = arith.addf %146, %147 : vector<16x64xf32>
    %c576 = arith.constant 576 : index
    %c0_59 = arith.constant 0 : index
    %149 = vector.load %arg2[%c576, %c0_59] : memref<3152x64xf32, #tpu.memory_space<vmem>>, vector<64x64xf32>
    %c640 = arith.constant 640 : index
    %c0_60 = arith.constant 0 : index
    %150 = vector.load %arg2[%c640, %c0_60] : memref<3152x64xf32, #tpu.memory_space<vmem>>, vector<1x64xf32>
    %151 = arith.truncf %134 : vector<16x64xf32> to vector<16x64xbf16>
    %152 = arith.truncf %149 : vector<64x64xf32> to vector<64x64xbf16>
    %cst_61 = arith.constant dense<0.000000e+00> : vector<16x64xf32>
    %153 = tpu.matmul %151, %152, %cst_61 {dimension_numbers = #tpu.dot_dimension_numbers<[1], [0], [0], [1], [0, 0, 1, 1], [], []>} : vector<16x64xbf16>, vector<64x64xbf16>, vector<16x64xf32> -> vector<16x64xf32>
    %154 = vector.broadcast %150 : vector<1x64xf32> to vector<16x64xf32>
    %155 = arith.addf %153, %154 : vector<16x64xf32>
    %c648 = arith.constant 648 : index
    %c0_62 = arith.constant 0 : index
    %156 = vector.load %arg2[%c648, %c0_62] : memref<3152x64xf32, #tpu.memory_space<vmem>>, vector<64x64xf32>
    %c712 = arith.constant 712 : index
    %c0_63 = arith.constant 0 : index
    %157 = vector.load %arg2[%c712, %c0_63] : memref<3152x64xf32, #tpu.memory_space<vmem>>, vector<1x64xf32>
    %158 = vector.broadcast %8 : vector<1x64xf32> to vector<16x64xf32>
    %159 = arith.mulf %141, %158 : vector<16x64xf32>
    %160 = vector.broadcast %16 : vector<1x64xf32> to vector<16x64xf32>
    %161 = arith.mulf %141, %160 : vector<16x64xf32>
    %162 = vector.broadcast %24 : vector<1x64xf32> to vector<16x64xf32>
    %163 = arith.mulf %141, %162 : vector<16x64xf32>
    %164 = vector.broadcast %32 : vector<1x64xf32> to vector<16x64xf32>
    %165 = arith.mulf %141, %164 : vector<16x64xf32>
    %166 = tpu.concatenate %159, %161, %163, %165 in 0 : vector<16x64xf32>, vector<16x64xf32>, vector<16x64xf32>, vector<16x64xf32> -> vector<64x64xf32>
    %167 = arith.truncf %166 : vector<64x64xf32> to vector<64x64xbf16>
    %168 = arith.truncf %148 : vector<16x64xf32> to vector<16x64xbf16>
    %cst_64 = arith.constant dense<0.000000e+00> : vector<64x16xf32>
    %169 = tpu.matmul %167, %168, %cst_64 {dimension_numbers = #tpu.dot_dimension_numbers<[1], [1], [0], [0], [0, 0, 1, 0], [], []>} : vector<64x64xbf16>, vector<16x64xbf16>, vector<64x16xf32> -> vector<64x16xf32>
    %cst_65 = arith.constant 2.500000e-01 : f32
    %170 = vector.broadcast %cst_65 : f32 to vector<64x16xf32>
    %171 = arith.mulf %169, %170 : vector<64x16xf32>
    %172 = arith.addf %171, %37 : vector<64x16xf32>
    %cst_66 = arith.constant dense<0xFF800000> : vector<64xf32>
    %173 = vector.multi_reduction <maximumf>, %172, %cst_66 [1] : vector<64x16xf32> to vector<64xf32>
    %174 = vector.shape_cast %173 : vector<64xf32> to vector<64x1xf32>
    %175 = vector.broadcast %174 : vector<64x1xf32> to vector<64x16xf32>
    %176 = arith.subf %172, %175 : vector<64x16xf32>
    %177 = math.exp %176 : vector<64x16xf32>
    %cst_67 = arith.constant dense<0.000000e+00> : vector<64xf32>
    %178 = vector.multi_reduction <add>, %177, %cst_67 [1] : vector<64x16xf32> to vector<64xf32>
    %179 = vector.shape_cast %178 : vector<64xf32> to vector<64x1xf32>
    %180 = tpu.reciprocal %179 {approx = true} : vector<64x1xf32> -> vector<64x1xf32>
    %181 = vector.broadcast %180 : vector<64x1xf32> to vector<64x16xf32>
    %182 = arith.mulf %177, %181 : vector<64x16xf32>
    %183 = arith.truncf %182 : vector<64x16xf32> to vector<64x16xbf16>
    %184 = arith.truncf %155 : vector<16x64xf32> to vector<16x64xbf16>
    %cst_68 = arith.constant dense<0.000000e+00> : vector<64x64xf32>
    %185 = tpu.matmul %183, %184, %cst_68 {dimension_numbers = #tpu.dot_dimension_numbers<[1], [0], [0], [1], [0, 0, 1, 1], [], []>} : vector<64x16xbf16>, vector<16x64xbf16>, vector<64x64xf32> -> vector<64x64xf32>
    %186 = vector.extract_strided_slice %185 {offsets = [0, 0], sizes = [16, 64], strides = [1, 1]} : vector<64x64xf32> to vector<16x64xf32>
    %187 = vector.broadcast %8 : vector<1x64xf32> to vector<16x64xf32>
    %188 = arith.mulf %186, %187 : vector<16x64xf32>
    %189 = vector.extract_strided_slice %185 {offsets = [16, 0], sizes = [16, 64], strides = [1, 1]} : vector<64x64xf32> to vector<16x64xf32>
    %190 = vector.broadcast %16 : vector<1x64xf32> to vector<16x64xf32>
    %191 = arith.mulf %189, %190 : vector<16x64xf32>
    %192 = arith.addf %188, %191 : vector<16x64xf32>
    %193 = vector.extract_strided_slice %185 {offsets = [32, 0], sizes = [16, 64], strides = [1, 1]} : vector<64x64xf32> to vector<16x64xf32>
    %194 = vector.broadcast %24 : vector<1x64xf32> to vector<16x64xf32>
    %195 = arith.mulf %193, %194 : vector<16x64xf32>
    %196 = arith.addf %192, %195 : vector<16x64xf32>
    %197 = vector.extract_strided_slice %185 {offsets = [48, 0], sizes = [16, 64], strides = [1, 1]} : vector<64x64xf32> to vector<16x64xf32>
    %198 = vector.broadcast %32 : vector<1x64xf32> to vector<16x64xf32>
    %199 = arith.mulf %197, %198 : vector<16x64xf32>
    %200 = arith.addf %196, %199 : vector<16x64xf32>
    %201 = arith.truncf %200 : vector<16x64xf32> to vector<16x64xbf16>
    %202 = arith.truncf %156 : vector<64x64xf32> to vector<64x64xbf16>
    %cst_69 = arith.constant dense<0.000000e+00> : vector<16x64xf32>
    %203 = tpu.matmul %201, %202, %cst_69 {dimension_numbers = #tpu.dot_dimension_numbers<[1], [0], [0], [1], [0, 0, 1, 1], [], []>} : vector<16x64xbf16>, vector<64x64xbf16>, vector<16x64xf32> -> vector<16x64xf32>
    %204 = vector.broadcast %157 : vector<1x64xf32> to vector<16x64xf32>
    %205 = arith.addf %203, %204 : vector<16x64xf32>
    %206 = arith.addf %134, %205 : vector<16x64xf32>
    %c720 = arith.constant 720 : index
    %c0_70 = arith.constant 0 : index
    %207 = vector.load %arg2[%c720, %c0_70] : memref<3152x64xf32, #tpu.memory_space<vmem>>, vector<1x64xf32>
    %c728 = arith.constant 728 : index
    %c0_71 = arith.constant 0 : index
    %208 = vector.load %arg2[%c728, %c0_71] : memref<3152x64xf32, #tpu.memory_space<vmem>>, vector<1x64xf32>
    %cst_72 = arith.constant dense<0.000000e+00> : vector<16xf32>
    %209 = vector.multi_reduction <add>, %206, %cst_72 [1] : vector<16x64xf32> to vector<16xf32>
    %210 = vector.shape_cast %209 : vector<16xf32> to vector<16x1xf32>
    %cst_73 = arith.constant 6.400000e+01 : f32
    %211 = vector.broadcast %cst_73 : f32 to vector<16x1xf32>
    %212 = arith.divf %210, %211 : vector<16x1xf32>
    %213 = vector.broadcast %212 : vector<16x1xf32> to vector<16x64xf32>
    %214 = arith.subf %206, %213 : vector<16x64xf32>
    %215 = arith.mulf %214, %214 : vector<16x64xf32>
    %cst_74 = arith.constant dense<0.000000e+00> : vector<16xf32>
    %216 = vector.multi_reduction <add>, %215, %cst_74 [1] : vector<16x64xf32> to vector<16xf32>
    %217 = vector.shape_cast %216 : vector<16xf32> to vector<16x1xf32>
    %cst_75 = arith.constant 6.400000e+01 : f32
    %218 = vector.broadcast %cst_75 : f32 to vector<16x1xf32>
    %219 = arith.divf %217, %218 : vector<16x1xf32>
    %cst_76 = arith.constant 9.99999996E-13 : f32
    %220 = vector.broadcast %cst_76 : f32 to vector<16x1xf32>
    %221 = arith.addf %219, %220 : vector<16x1xf32>
    %222 = math.rsqrt %221 : vector<16x1xf32>
    %223 = vector.broadcast %222 : vector<16x1xf32> to vector<16x64xf32>
    %224 = arith.mulf %214, %223 : vector<16x64xf32>
    %225 = vector.broadcast %207 : vector<1x64xf32> to vector<16x64xf32>
    %226 = arith.mulf %224, %225 : vector<16x64xf32>
    %227 = vector.broadcast %208 : vector<1x64xf32> to vector<16x64xf32>
    %228 = arith.addf %226, %227 : vector<16x64xf32>
    %c0_77 = arith.constant 0 : index
    %c0_78 = arith.constant 0 : index
    %229 = vector.load %arg3[%c0_77, %c0_78] : memref<504x128xf32, #tpu.memory_space<vmem>>, vector<64x128xf32>
    %c64_79 = arith.constant 64 : index
    %c0_80 = arith.constant 0 : index
    %230 = vector.load %arg3[%c64_79, %c0_80] : memref<504x128xf32, #tpu.memory_space<vmem>>, vector<1x128xf32>
    %231 = arith.truncf %228 : vector<16x64xf32> to vector<16x64xbf16>
    %232 = arith.truncf %229 : vector<64x128xf32> to vector<64x128xbf16>
    %cst_81 = arith.constant dense<0.000000e+00> : vector<16x128xf32>
    %233 = tpu.matmul %231, %232, %cst_81 {dimension_numbers = #tpu.dot_dimension_numbers<[1], [0], [0], [1], [0, 0, 1, 1], [], []>} : vector<16x64xbf16>, vector<64x128xbf16>, vector<16x128xf32> -> vector<16x128xf32>
    %234 = vector.broadcast %230 : vector<1x128xf32> to vector<16x128xf32>
    %235 = arith.addf %233, %234 : vector<16x128xf32>
    %236 = arith.mulf %235, %235 : vector<16x128xf32>
    %237 = arith.mulf %235, %236 : vector<16x128xf32>
    %cst_82 = arith.constant 4.471500e-02 : f32
    %238 = vector.broadcast %cst_82 : f32 to vector<16x128xf32>
    %239 = arith.mulf %238, %237 : vector<16x128xf32>
    %240 = arith.addf %235, %239 : vector<16x128xf32>
    %cst_83 = arith.constant 0.797884583 : f32
    %241 = vector.broadcast %cst_83 : f32 to vector<16x128xf32>
    %242 = arith.mulf %241, %240 : vector<16x128xf32>
    %243 = math.tanh %242 : vector<16x128xf32>
    %cst_84 = arith.constant 1.000000e+00 : f32
    %244 = vector.broadcast %cst_84 : f32 to vector<16x128xf32>
    %245 = arith.addf %244, %243 : vector<16x128xf32>
    %cst_85 = arith.constant 5.000000e-01 : f32
    %246 = vector.broadcast %cst_85 : f32 to vector<16x128xf32>
    %247 = arith.mulf %246, %245 : vector<16x128xf32>
    %248 = arith.mulf %235, %247 : vector<16x128xf32>
    %c736 = arith.constant 736 : index
    %c0_86 = arith.constant 0 : index
    %249 = vector.load %arg2[%c736, %c0_86] : memref<3152x64xf32, #tpu.memory_space<vmem>>, vector<128x64xf32>
    %c864 = arith.constant 864 : index
    %c0_87 = arith.constant 0 : index
    %250 = vector.load %arg2[%c864, %c0_87] : memref<3152x64xf32, #tpu.memory_space<vmem>>, vector<1x64xf32>
    %251 = arith.truncf %248 : vector<16x128xf32> to vector<16x128xbf16>
    %252 = arith.truncf %249 : vector<128x64xf32> to vector<128x64xbf16>
    %cst_88 = arith.constant dense<0.000000e+00> : vector<16x64xf32>
    %253 = tpu.matmul %251, %252, %cst_88 {dimension_numbers = #tpu.dot_dimension_numbers<[1], [0], [0], [1], [0, 0, 1, 1], [], []>} : vector<16x128xbf16>, vector<128x64xbf16>, vector<16x64xf32> -> vector<16x64xf32>
    %254 = vector.broadcast %250 : vector<1x64xf32> to vector<16x64xf32>
    %255 = arith.addf %253, %254 : vector<16x64xf32>
    %256 = arith.addf %228, %255 : vector<16x64xf32>
    %c872 = arith.constant 872 : index
    %c0_89 = arith.constant 0 : index
    %257 = vector.load %arg2[%c872, %c0_89] : memref<3152x64xf32, #tpu.memory_space<vmem>>, vector<1x64xf32>
    %c880 = arith.constant 880 : index
    %c0_90 = arith.constant 0 : index
    %258 = vector.load %arg2[%c880, %c0_90] : memref<3152x64xf32, #tpu.memory_space<vmem>>, vector<1x64xf32>
    %cst_91 = arith.constant dense<0.000000e+00> : vector<16xf32>
    %259 = vector.multi_reduction <add>, %256, %cst_91 [1] : vector<16x64xf32> to vector<16xf32>
    %260 = vector.shape_cast %259 : vector<16xf32> to vector<16x1xf32>
    %cst_92 = arith.constant 6.400000e+01 : f32
    %261 = vector.broadcast %cst_92 : f32 to vector<16x1xf32>
    %262 = arith.divf %260, %261 : vector<16x1xf32>
    %263 = vector.broadcast %262 : vector<16x1xf32> to vector<16x64xf32>
    %264 = arith.subf %256, %263 : vector<16x64xf32>
    %265 = arith.mulf %264, %264 : vector<16x64xf32>
    %cst_93 = arith.constant dense<0.000000e+00> : vector<16xf32>
    %266 = vector.multi_reduction <add>, %265, %cst_93 [1] : vector<16x64xf32> to vector<16xf32>
    %267 = vector.shape_cast %266 : vector<16xf32> to vector<16x1xf32>
    %cst_94 = arith.constant 6.400000e+01 : f32
    %268 = vector.broadcast %cst_94 : f32 to vector<16x1xf32>
    %269 = arith.divf %267, %268 : vector<16x1xf32>
    %cst_95 = arith.constant 9.99999996E-13 : f32
    %270 = vector.broadcast %cst_95 : f32 to vector<16x1xf32>
    %271 = arith.addf %269, %270 : vector<16x1xf32>
    %272 = math.rsqrt %271 : vector<16x1xf32>
    %273 = vector.broadcast %272 : vector<16x1xf32> to vector<16x64xf32>
    %274 = arith.mulf %264, %273 : vector<16x64xf32>
    %275 = vector.broadcast %257 : vector<1x64xf32> to vector<16x64xf32>
    %276 = arith.mulf %274, %275 : vector<16x64xf32>
    %277 = vector.broadcast %258 : vector<1x64xf32> to vector<16x64xf32>
    %278 = arith.addf %276, %277 : vector<16x64xf32>
    %c888 = arith.constant 888 : index
    %c0_96 = arith.constant 0 : index
    %279 = vector.load %arg2[%c888, %c0_96] : memref<3152x64xf32, #tpu.memory_space<vmem>>, vector<64x64xf32>
    %c952 = arith.constant 952 : index
    %c0_97 = arith.constant 0 : index
    %280 = vector.load %arg2[%c952, %c0_97] : memref<3152x64xf32, #tpu.memory_space<vmem>>, vector<1x64xf32>
    %281 = arith.truncf %278 : vector<16x64xf32> to vector<16x64xbf16>
    %282 = arith.truncf %279 : vector<64x64xf32> to vector<64x64xbf16>
    %cst_98 = arith.constant dense<0.000000e+00> : vector<16x64xf32>
    %283 = tpu.matmul %281, %282, %cst_98 {dimension_numbers = #tpu.dot_dimension_numbers<[1], [0], [0], [1], [0, 0, 1, 1], [], []>} : vector<16x64xbf16>, vector<64x64xbf16>, vector<16x64xf32> -> vector<16x64xf32>
    %284 = vector.broadcast %280 : vector<1x64xf32> to vector<16x64xf32>
    %285 = arith.addf %283, %284 : vector<16x64xf32>
    %c960 = arith.constant 960 : index
    %c0_99 = arith.constant 0 : index
    %286 = vector.load %arg2[%c960, %c0_99] : memref<3152x64xf32, #tpu.memory_space<vmem>>, vector<64x64xf32>
    %c1024 = arith.constant 1024 : index
    %c0_100 = arith.constant 0 : index
    %287 = vector.load %arg2[%c1024, %c0_100] : memref<3152x64xf32, #tpu.memory_space<vmem>>, vector<1x64xf32>
    %288 = arith.truncf %278 : vector<16x64xf32> to vector<16x64xbf16>
    %289 = arith.truncf %286 : vector<64x64xf32> to vector<64x64xbf16>
    %cst_101 = arith.constant dense<0.000000e+00> : vector<16x64xf32>
    %290 = tpu.matmul %288, %289, %cst_101 {dimension_numbers = #tpu.dot_dimension_numbers<[1], [0], [0], [1], [0, 0, 1, 1], [], []>} : vector<16x64xbf16>, vector<64x64xbf16>, vector<16x64xf32> -> vector<16x64xf32>
    %291 = vector.broadcast %287 : vector<1x64xf32> to vector<16x64xf32>
    %292 = arith.addf %290, %291 : vector<16x64xf32>
    %c1032 = arith.constant 1032 : index
    %c0_102 = arith.constant 0 : index
    %293 = vector.load %arg2[%c1032, %c0_102] : memref<3152x64xf32, #tpu.memory_space<vmem>>, vector<64x64xf32>
    %c1096 = arith.constant 1096 : index
    %c0_103 = arith.constant 0 : index
    %294 = vector.load %arg2[%c1096, %c0_103] : memref<3152x64xf32, #tpu.memory_space<vmem>>, vector<1x64xf32>
    %295 = arith.truncf %278 : vector<16x64xf32> to vector<16x64xbf16>
    %296 = arith.truncf %293 : vector<64x64xf32> to vector<64x64xbf16>
    %cst_104 = arith.constant dense<0.000000e+00> : vector<16x64xf32>
    %297 = tpu.matmul %295, %296, %cst_104 {dimension_numbers = #tpu.dot_dimension_numbers<[1], [0], [0], [1], [0, 0, 1, 1], [], []>} : vector<16x64xbf16>, vector<64x64xbf16>, vector<16x64xf32> -> vector<16x64xf32>
    %298 = vector.broadcast %294 : vector<1x64xf32> to vector<16x64xf32>
    %299 = arith.addf %297, %298 : vector<16x64xf32>
    %c1104 = arith.constant 1104 : index
    %c0_105 = arith.constant 0 : index
    %300 = vector.load %arg2[%c1104, %c0_105] : memref<3152x64xf32, #tpu.memory_space<vmem>>, vector<64x64xf32>
    %c1168 = arith.constant 1168 : index
    %c0_106 = arith.constant 0 : index
    %301 = vector.load %arg2[%c1168, %c0_106] : memref<3152x64xf32, #tpu.memory_space<vmem>>, vector<1x64xf32>
    %302 = vector.broadcast %8 : vector<1x64xf32> to vector<16x64xf32>
    %303 = arith.mulf %285, %302 : vector<16x64xf32>
    %304 = vector.broadcast %16 : vector<1x64xf32> to vector<16x64xf32>
    %305 = arith.mulf %285, %304 : vector<16x64xf32>
    %306 = vector.broadcast %24 : vector<1x64xf32> to vector<16x64xf32>
    %307 = arith.mulf %285, %306 : vector<16x64xf32>
    %308 = vector.broadcast %32 : vector<1x64xf32> to vector<16x64xf32>
    %309 = arith.mulf %285, %308 : vector<16x64xf32>
    %310 = tpu.concatenate %303, %305, %307, %309 in 0 : vector<16x64xf32>, vector<16x64xf32>, vector<16x64xf32>, vector<16x64xf32> -> vector<64x64xf32>
    %311 = arith.truncf %310 : vector<64x64xf32> to vector<64x64xbf16>
    %312 = arith.truncf %292 : vector<16x64xf32> to vector<16x64xbf16>
    %cst_107 = arith.constant dense<0.000000e+00> : vector<64x16xf32>
    %313 = tpu.matmul %311, %312, %cst_107 {dimension_numbers = #tpu.dot_dimension_numbers<[1], [1], [0], [0], [0, 0, 1, 0], [], []>} : vector<64x64xbf16>, vector<16x64xbf16>, vector<64x16xf32> -> vector<64x16xf32>
    %cst_108 = arith.constant 2.500000e-01 : f32
    %314 = vector.broadcast %cst_108 : f32 to vector<64x16xf32>
    %315 = arith.mulf %313, %314 : vector<64x16xf32>
    %316 = arith.addf %315, %37 : vector<64x16xf32>
    %cst_109 = arith.constant dense<0xFF800000> : vector<64xf32>
    %317 = vector.multi_reduction <maximumf>, %316, %cst_109 [1] : vector<64x16xf32> to vector<64xf32>
    %318 = vector.shape_cast %317 : vector<64xf32> to vector<64x1xf32>
    %319 = vector.broadcast %318 : vector<64x1xf32> to vector<64x16xf32>
    %320 = arith.subf %316, %319 : vector<64x16xf32>
    %321 = math.exp %320 : vector<64x16xf32>
    %cst_110 = arith.constant dense<0.000000e+00> : vector<64xf32>
    %322 = vector.multi_reduction <add>, %321, %cst_110 [1] : vector<64x16xf32> to vector<64xf32>
    %323 = vector.shape_cast %322 : vector<64xf32> to vector<64x1xf32>
    %324 = tpu.reciprocal %323 {approx = true} : vector<64x1xf32> -> vector<64x1xf32>
    %325 = vector.broadcast %324 : vector<64x1xf32> to vector<64x16xf32>
    %326 = arith.mulf %321, %325 : vector<64x16xf32>
    %327 = arith.truncf %326 : vector<64x16xf32> to vector<64x16xbf16>
    %328 = arith.truncf %299 : vector<16x64xf32> to vector<16x64xbf16>
    %cst_111 = arith.constant dense<0.000000e+00> : vector<64x64xf32>
    %329 = tpu.matmul %327, %328, %cst_111 {dimension_numbers = #tpu.dot_dimension_numbers<[1], [0], [0], [1], [0, 0, 1, 1], [], []>} : vector<64x16xbf16>, vector<16x64xbf16>, vector<64x64xf32> -> vector<64x64xf32>
    %330 = vector.extract_strided_slice %329 {offsets = [0, 0], sizes = [16, 64], strides = [1, 1]} : vector<64x64xf32> to vector<16x64xf32>
    %331 = vector.broadcast %8 : vector<1x64xf32> to vector<16x64xf32>
    %332 = arith.mulf %330, %331 : vector<16x64xf32>
    %333 = vector.extract_strided_slice %329 {offsets = [16, 0], sizes = [16, 64], strides = [1, 1]} : vector<64x64xf32> to vector<16x64xf32>
    %334 = vector.broadcast %16 : vector<1x64xf32> to vector<16x64xf32>
    %335 = arith.mulf %333, %334 : vector<16x64xf32>
    %336 = arith.addf %332, %335 : vector<16x64xf32>
    %337 = vector.extract_strided_slice %329 {offsets = [32, 0], sizes = [16, 64], strides = [1, 1]} : vector<64x64xf32> to vector<16x64xf32>
    %338 = vector.broadcast %24 : vector<1x64xf32> to vector<16x64xf32>
    %339 = arith.mulf %337, %338 : vector<16x64xf32>
    %340 = arith.addf %336, %339 : vector<16x64xf32>
    %341 = vector.extract_strided_slice %329 {offsets = [48, 0], sizes = [16, 64], strides = [1, 1]} : vector<64x64xf32> to vector<16x64xf32>
    %342 = vector.broadcast %32 : vector<1x64xf32> to vector<16x64xf32>
    %343 = arith.mulf %341, %342 : vector<16x64xf32>
    %344 = arith.addf %340, %343 : vector<16x64xf32>
    %345 = arith.truncf %344 : vector<16x64xf32> to vector<16x64xbf16>
    %346 = arith.truncf %300 : vector<64x64xf32> to vector<64x64xbf16>
    %cst_112 = arith.constant dense<0.000000e+00> : vector<16x64xf32>
    %347 = tpu.matmul %345, %346, %cst_112 {dimension_numbers = #tpu.dot_dimension_numbers<[1], [0], [0], [1], [0, 0, 1, 1], [], []>} : vector<16x64xbf16>, vector<64x64xbf16>, vector<16x64xf32> -> vector<16x64xf32>
    %348 = vector.broadcast %301 : vector<1x64xf32> to vector<16x64xf32>
    %349 = arith.addf %347, %348 : vector<16x64xf32>
    %350 = arith.addf %278, %349 : vector<16x64xf32>
    %c1176 = arith.constant 1176 : index
    %c0_113 = arith.constant 0 : index
    %351 = vector.load %arg2[%c1176, %c0_113] : memref<3152x64xf32, #tpu.memory_space<vmem>>, vector<1x64xf32>
    %c1184 = arith.constant 1184 : index
    %c0_114 = arith.constant 0 : index
    %352 = vector.load %arg2[%c1184, %c0_114] : memref<3152x64xf32, #tpu.memory_space<vmem>>, vector<1x64xf32>
    %cst_115 = arith.constant dense<0.000000e+00> : vector<16xf32>
    %353 = vector.multi_reduction <add>, %350, %cst_115 [1] : vector<16x64xf32> to vector<16xf32>
    %354 = vector.shape_cast %353 : vector<16xf32> to vector<16x1xf32>
    %cst_116 = arith.constant 6.400000e+01 : f32
    %355 = vector.broadcast %cst_116 : f32 to vector<16x1xf32>
    %356 = arith.divf %354, %355 : vector<16x1xf32>
    %357 = vector.broadcast %356 : vector<16x1xf32> to vector<16x64xf32>
    %358 = arith.subf %350, %357 : vector<16x64xf32>
    %359 = arith.mulf %358, %358 : vector<16x64xf32>
    %cst_117 = arith.constant dense<0.000000e+00> : vector<16xf32>
    %360 = vector.multi_reduction <add>, %359, %cst_117 [1] : vector<16x64xf32> to vector<16xf32>
    %361 = vector.shape_cast %360 : vector<16xf32> to vector<16x1xf32>
    %cst_118 = arith.constant 6.400000e+01 : f32
    %362 = vector.broadcast %cst_118 : f32 to vector<16x1xf32>
    %363 = arith.divf %361, %362 : vector<16x1xf32>
    %cst_119 = arith.constant 9.99999996E-13 : f32
    %364 = vector.broadcast %cst_119 : f32 to vector<16x1xf32>
    %365 = arith.addf %363, %364 : vector<16x1xf32>
    %366 = math.rsqrt %365 : vector<16x1xf32>
    %367 = vector.broadcast %366 : vector<16x1xf32> to vector<16x64xf32>
    %368 = arith.mulf %358, %367 : vector<16x64xf32>
    %369 = vector.broadcast %351 : vector<1x64xf32> to vector<16x64xf32>
    %370 = arith.mulf %368, %369 : vector<16x64xf32>
    %371 = vector.broadcast %352 : vector<1x64xf32> to vector<16x64xf32>
    %372 = arith.addf %370, %371 : vector<16x64xf32>
    %c72 = arith.constant 72 : index
    %c0_120 = arith.constant 0 : index
    %373 = vector.load %arg3[%c72, %c0_120] : memref<504x128xf32, #tpu.memory_space<vmem>>, vector<64x128xf32>
    %c136_121 = arith.constant 136 : index
    %c0_122 = arith.constant 0 : index
    %374 = vector.load %arg3[%c136_121, %c0_122] : memref<504x128xf32, #tpu.memory_space<vmem>>, vector<1x128xf32>
    %375 = arith.truncf %372 : vector<16x64xf32> to vector<16x64xbf16>
    %376 = arith.truncf %373 : vector<64x128xf32> to vector<64x128xbf16>
    %cst_123 = arith.constant dense<0.000000e+00> : vector<16x128xf32>
    %377 = tpu.matmul %375, %376, %cst_123 {dimension_numbers = #tpu.dot_dimension_numbers<[1], [0], [0], [1], [0, 0, 1, 1], [], []>} : vector<16x64xbf16>, vector<64x128xbf16>, vector<16x128xf32> -> vector<16x128xf32>
    %378 = vector.broadcast %374 : vector<1x128xf32> to vector<16x128xf32>
    %379 = arith.addf %377, %378 : vector<16x128xf32>
    %380 = arith.mulf %379, %379 : vector<16x128xf32>
    %381 = arith.mulf %379, %380 : vector<16x128xf32>
    %cst_124 = arith.constant 4.471500e-02 : f32
    %382 = vector.broadcast %cst_124 : f32 to vector<16x128xf32>
    %383 = arith.mulf %382, %381 : vector<16x128xf32>
    %384 = arith.addf %379, %383 : vector<16x128xf32>
    %cst_125 = arith.constant 0.797884583 : f32
    %385 = vector.broadcast %cst_125 : f32 to vector<16x128xf32>
    %386 = arith.mulf %385, %384 : vector<16x128xf32>
    %387 = math.tanh %386 : vector<16x128xf32>
    %cst_126 = arith.constant 1.000000e+00 : f32
    %388 = vector.broadcast %cst_126 : f32 to vector<16x128xf32>
    %389 = arith.addf %388, %387 : vector<16x128xf32>
    %cst_127 = arith.constant 5.000000e-01 : f32
    %390 = vector.broadcast %cst_127 : f32 to vector<16x128xf32>
    %391 = arith.mulf %390, %389 : vector<16x128xf32>
    %392 = arith.mulf %379, %391 : vector<16x128xf32>
    %c1192 = arith.constant 1192 : index
    %c0_128 = arith.constant 0 : index
    %393 = vector.load %arg2[%c1192, %c0_128] : memref<3152x64xf32, #tpu.memory_space<vmem>>, vector<128x64xf32>
    %c1320 = arith.constant 1320 : index
    %c0_129 = arith.constant 0 : index
    %394 = vector.load %arg2[%c1320, %c0_129] : memref<3152x64xf32, #tpu.memory_space<vmem>>, vector<1x64xf32>
    %395 = arith.truncf %392 : vector<16x128xf32> to vector<16x128xbf16>
    %396 = arith.truncf %393 : vector<128x64xf32> to vector<128x64xbf16>
    %cst_130 = arith.constant dense<0.000000e+00> : vector<16x64xf32>
    %397 = tpu.matmul %395, %396, %cst_130 {dimension_numbers = #tpu.dot_dimension_numbers<[1], [0], [0], [1], [0, 0, 1, 1], [], []>} : vector<16x128xbf16>, vector<128x64xbf16>, vector<16x64xf32> -> vector<16x64xf32>
    %398 = vector.broadcast %394 : vector<1x64xf32> to vector<16x64xf32>
    %399 = arith.addf %397, %398 : vector<16x64xf32>
    %400 = arith.addf %372, %399 : vector<16x64xf32>
    %c1328 = arith.constant 1328 : index
    %c0_131 = arith.constant 0 : index
    %401 = vector.load %arg2[%c1328, %c0_131] : memref<3152x64xf32, #tpu.memory_space<vmem>>, vector<1x64xf32>
    %c1336 = arith.constant 1336 : index
    %c0_132 = arith.constant 0 : index
    %402 = vector.load %arg2[%c1336, %c0_132] : memref<3152x64xf32, #tpu.memory_space<vmem>>, vector<1x64xf32>
    %cst_133 = arith.constant dense<0.000000e+00> : vector<16xf32>
    %403 = vector.multi_reduction <add>, %400, %cst_133 [1] : vector<16x64xf32> to vector<16xf32>
    %404 = vector.shape_cast %403 : vector<16xf32> to vector<16x1xf32>
    %cst_134 = arith.constant 6.400000e+01 : f32
    %405 = vector.broadcast %cst_134 : f32 to vector<16x1xf32>
    %406 = arith.divf %404, %405 : vector<16x1xf32>
    %407 = vector.broadcast %406 : vector<16x1xf32> to vector<16x64xf32>
    %408 = arith.subf %400, %407 : vector<16x64xf32>
    %409 = arith.mulf %408, %408 : vector<16x64xf32>
    %cst_135 = arith.constant dense<0.000000e+00> : vector<16xf32>
    %410 = vector.multi_reduction <add>, %409, %cst_135 [1] : vector<16x64xf32> to vector<16xf32>
    %411 = vector.shape_cast %410 : vector<16xf32> to vector<16x1xf32>
    %cst_136 = arith.constant 6.400000e+01 : f32
    %412 = vector.broadcast %cst_136 : f32 to vector<16x1xf32>
    %413 = arith.divf %411, %412 : vector<16x1xf32>
    %cst_137 = arith.constant 9.99999996E-13 : f32
    %414 = vector.broadcast %cst_137 : f32 to vector<16x1xf32>
    %415 = arith.addf %413, %414 : vector<16x1xf32>
    %416 = math.rsqrt %415 : vector<16x1xf32>
    %417 = vector.broadcast %416 : vector<16x1xf32> to vector<16x64xf32>
    %418 = arith.mulf %408, %417 : vector<16x64xf32>
    %419 = vector.broadcast %401 : vector<1x64xf32> to vector<16x64xf32>
    %420 = arith.mulf %418, %419 : vector<16x64xf32>
    %421 = vector.broadcast %402 : vector<1x64xf32> to vector<16x64xf32>
    %422 = arith.addf %420, %421 : vector<16x64xf32>
    %c2936 = arith.constant 2936 : index
    %c0_138 = arith.constant 0 : index
    %423 = vector.load %arg2[%c2936, %c0_138] : memref<3152x64xf32, #tpu.memory_space<vmem>>, vector<64x64xf32>
    %c3000 = arith.constant 3000 : index
    %c0_139 = arith.constant 0 : index
    %424 = vector.load %arg2[%c3000, %c0_139] : memref<3152x64xf32, #tpu.memory_space<vmem>>, vector<1x64xf32>
    %425 = arith.truncf %422 : vector<16x64xf32> to vector<16x64xbf16>
    %426 = arith.truncf %423 : vector<64x64xf32> to vector<64x64xbf16>
    %cst_140 = arith.constant dense<0.000000e+00> : vector<16x64xf32>
    %427 = tpu.matmul %425, %426, %cst_140 {dimension_numbers = #tpu.dot_dimension_numbers<[1], [0], [0], [1], [0, 0, 1, 1], [], []>} : vector<16x64xbf16>, vector<64x64xbf16>, vector<16x64xf32> -> vector<16x64xf32>
    %428 = vector.broadcast %424 : vector<1x64xf32> to vector<16x64xf32>
    %429 = arith.addf %427, %428 : vector<16x64xf32>
    %cst_141 = arith.constant 0.000000e+00 : f32
    %430 = vector.broadcast %cst_141 : f32 to vector<16x64xf32>
    %431 = arith.maximumf %429, %430 : vector<16x64xf32>
    %c288 = arith.constant 288 : index
    %c0_142 = arith.constant 0 : index
    %432 = vector.load %arg3[%c288, %c0_142] : memref<504x128xf32, #tpu.memory_space<vmem>>, vector<64x128xf32>
    %c352 = arith.constant 352 : index
    %c0_143 = arith.constant 0 : index
    %433 = vector.load %arg3[%c352, %c0_143] : memref<504x128xf32, #tpu.memory_space<vmem>>, vector<1x128xf32>
    %434 = arith.truncf %431 : vector<16x64xf32> to vector<16x64xbf16>
    %435 = arith.truncf %432 : vector<64x128xf32> to vector<64x128xbf16>
    %cst_144 = arith.constant dense<0.000000e+00> : vector<16x128xf32>
    %436 = tpu.matmul %434, %435, %cst_144 {dimension_numbers = #tpu.dot_dimension_numbers<[1], [0], [0], [1], [0, 0, 1, 1], [], []>} : vector<16x64xbf16>, vector<64x128xbf16>, vector<16x128xf32> -> vector<16x128xf32>
    %437 = vector.broadcast %433 : vector<1x128xf32> to vector<16x128xf32>
    %438 = arith.addf %436, %437 : vector<16x128xf32>
    %c0_145 = arith.constant 0 : index
    %c0_146 = arith.constant 0 : index
    %439 = vector.load %arg4[%c0_145, %c0_146] : memref<48x128xf32, #tpu.memory_space<vmem>>, vector<16x128xf32>
    tpu.vector_store %arg4[%c0_145, %c0_146], %438 {strides = array<i32>} : memref<48x128xf32, #tpu.memory_space<vmem>>, vector<16x128xf32>,
    %c1344 = arith.constant 1344 : index
    %c0_147 = arith.constant 0 : index
    %440 = vector.load %arg2[%c1344, %c0_147] : memref<3152x64xf32, #tpu.memory_space<vmem>>, vector<64x64xf32>
    %c1408 = arith.constant 1408 : index
    %c0_148 = arith.constant 0 : index
    %441 = vector.load %arg2[%c1408, %c0_148] : memref<3152x64xf32, #tpu.memory_space<vmem>>, vector<1x64xf32>
    %442 = arith.truncf %422 : vector<16x64xf32> to vector<16x64xbf16>
    %443 = arith.truncf %440 : vector<64x64xf32> to vector<64x64xbf16>
    %cst_149 = arith.constant dense<0.000000e+00> : vector<16x64xf32>
    %444 = tpu.matmul %442, %443, %cst_149 {dimension_numbers = #tpu.dot_dimension_numbers<[1], [0], [0], [1], [0, 0, 1, 1], [], []>} : vector<16x64xbf16>, vector<64x64xbf16>, vector<16x64xf32> -> vector<16x64xf32>
    %445 = vector.broadcast %441 : vector<1x64xf32> to vector<16x64xf32>
    %446 = arith.addf %444, %445 : vector<16x64xf32>
    %447 = math.tanh %446 : vector<16x64xf32>
    %c3008 = arith.constant 3008 : index
    %c0_150 = arith.constant 0 : index
    %448 = vector.load %arg2[%c3008, %c0_150] : memref<3152x64xf32, #tpu.memory_space<vmem>>, vector<64x64xf32>
    %c3072 = arith.constant 3072 : index
    %c0_151 = arith.constant 0 : index
    %449 = vector.load %arg2[%c3072, %c0_151] : memref<3152x64xf32, #tpu.memory_space<vmem>>, vector<1x64xf32>
    %450 = arith.truncf %447 : vector<16x64xf32> to vector<16x64xbf16>
    %451 = arith.truncf %448 : vector<64x64xf32> to vector<64x64xbf16>
    %cst_152 = arith.constant dense<0.000000e+00> : vector<16x64xf32>
    %452 = tpu.matmul %450, %451, %cst_152 {dimension_numbers = #tpu.dot_dimension_numbers<[1], [0], [0], [1], [0, 0, 1, 1], [], []>} : vector<16x64xbf16>, vector<64x64xbf16>, vector<16x64xf32> -> vector<16x64xf32>
    %453 = vector.broadcast %449 : vector<1x64xf32> to vector<16x64xf32>
    %454 = arith.addf %452, %453 : vector<16x64xf32>
    %cst_153 = arith.constant 0.000000e+00 : f32
    %455 = vector.broadcast %cst_153 : f32 to vector<16x64xf32>
    %456 = arith.maximumf %454, %455 : vector<16x64xf32>
    %c432_154 = arith.constant 432 : index
    %c0_155 = arith.constant 0 : index
    %457 = vector.load %arg3[%c432_154, %c0_155] : memref<504x128xf32, #tpu.memory_space<vmem>>, vector<64x128xf32>
    %c496_156 = arith.constant 496 : index
    %c0_157 = arith.constant 0 : index
    %458 = vector.load %arg3[%c496_156, %c0_157] : memref<504x128xf32, #tpu.memory_space<vmem>>, vector<1x128xf32>
    %459 = arith.truncf %456 : vector<16x64xf32> to vector<16x64xbf16>
    %460 = arith.truncf %457 : vector<64x128xf32> to vector<64x128xbf16>
    %cst_158 = arith.constant dense<0.000000e+00> : vector<16x128xf32>
    %461 = tpu.matmul %459, %460, %cst_158 {dimension_numbers = #tpu.dot_dimension_numbers<[1], [0], [0], [1], [0, 0, 1, 1], [], []>} : vector<16x64xbf16>, vector<64x128xbf16>, vector<16x128xf32> -> vector<16x128xf32>
    %462 = vector.broadcast %458 : vector<1x128xf32> to vector<16x128xf32>
    %463 = arith.addf %461, %462 : vector<16x128xf32>
    %c32_159 = arith.constant 32 : index
    %c0_160 = arith.constant 0 : index
    %464 = vector.load %arg4[%c32_159, %c0_160] : memref<48x128xf32, #tpu.memory_space<vmem>>, vector<16x128xf32>
    tpu.vector_store %arg4[%c32_159, %c0_160], %463 {strides = array<i32>} : memref<48x128xf32, #tpu.memory_space<vmem>>, vector<16x128xf32>,
    %c1416 = arith.constant 1416 : index
    %c0_161 = arith.constant 0 : index
    %465 = vector.load %arg2[%c1416, %c0_161] : memref<3152x64xf32, #tpu.memory_space<vmem>>, vector<64x64xf32>
    %c1480 = arith.constant 1480 : index
    %c0_162 = arith.constant 0 : index
    %466 = vector.load %arg2[%c1480, %c0_162] : memref<3152x64xf32, #tpu.memory_space<vmem>>, vector<1x64xf32>
    %467 = arith.truncf %34 : vector<16x64xf32> to vector<16x64xbf16>
    %468 = arith.truncf %465 : vector<64x64xf32> to vector<64x64xbf16>
    %cst_163 = arith.constant dense<0.000000e+00> : vector<16x64xf32>
    %469 = tpu.matmul %467, %468, %cst_163 {dimension_numbers = #tpu.dot_dimension_numbers<[1], [0], [0], [1], [0, 0, 1, 1], [], []>} : vector<16x64xbf16>, vector<64x64xbf16>, vector<16x64xf32> -> vector<16x64xf32>
    %470 = vector.broadcast %466 : vector<1x64xf32> to vector<16x64xf32>
    %471 = arith.addf %469, %470 : vector<16x64xf32>
    %c1488 = arith.constant 1488 : index
    %c0_164 = arith.constant 0 : index
    %472 = vector.load %arg2[%c1488, %c0_164] : memref<3152x64xf32, #tpu.memory_space<vmem>>, vector<64x64xf32>
    %c1552 = arith.constant 1552 : index
    %c0_165 = arith.constant 0 : index
    %473 = vector.load %arg2[%c1552, %c0_165] : memref<3152x64xf32, #tpu.memory_space<vmem>>, vector<1x64xf32>
    %474 = arith.truncf %34 : vector<16x64xf32> to vector<16x64xbf16>
    %475 = arith.truncf %472 : vector<64x64xf32> to vector<64x64xbf16>
    %cst_166 = arith.constant dense<0.000000e+00> : vector<16x64xf32>
    %476 = tpu.matmul %474, %475, %cst_166 {dimension_numbers = #tpu.dot_dimension_numbers<[1], [0], [0], [1], [0, 0, 1, 1], [], []>} : vector<16x64xbf16>, vector<64x64xbf16>, vector<16x64xf32> -> vector<16x64xf32>
    %477 = vector.broadcast %473 : vector<1x64xf32> to vector<16x64xf32>
    %478 = arith.addf %476, %477 : vector<16x64xf32>
    %c1560 = arith.constant 1560 : index
    %c0_167 = arith.constant 0 : index
    %479 = vector.load %arg2[%c1560, %c0_167] : memref<3152x64xf32, #tpu.memory_space<vmem>>, vector<64x64xf32>
    %c1624 = arith.constant 1624 : index
    %c0_168 = arith.constant 0 : index
    %480 = vector.load %arg2[%c1624, %c0_168] : memref<3152x64xf32, #tpu.memory_space<vmem>>, vector<1x64xf32>
    %481 = arith.truncf %34 : vector<16x64xf32> to vector<16x64xbf16>
    %482 = arith.truncf %479 : vector<64x64xf32> to vector<64x64xbf16>
    %cst_169 = arith.constant dense<0.000000e+00> : vector<16x64xf32>
    %483 = tpu.matmul %481, %482, %cst_169 {dimension_numbers = #tpu.dot_dimension_numbers<[1], [0], [0], [1], [0, 0, 1, 1], [], []>} : vector<16x64xbf16>, vector<64x64xbf16>, vector<16x64xf32> -> vector<16x64xf32>
    %484 = vector.broadcast %480 : vector<1x64xf32> to vector<16x64xf32>
    %485 = arith.addf %483, %484 : vector<16x64xf32>
    %c1632 = arith.constant 1632 : index
    %c0_170 = arith.constant 0 : index
    %486 = vector.load %arg2[%c1632, %c0_170] : memref<3152x64xf32, #tpu.memory_space<vmem>>, vector<64x64xf32>
    %c1696 = arith.constant 1696 : index
    %c0_171 = arith.constant 0 : index
    %487 = vector.load %arg2[%c1696, %c0_171] : memref<3152x64xf32, #tpu.memory_space<vmem>>, vector<1x64xf32>
    %488 = vector.broadcast %8 : vector<1x64xf32> to vector<16x64xf32>
    %489 = arith.mulf %471, %488 : vector<16x64xf32>
    %490 = vector.broadcast %16 : vector<1x64xf32> to vector<16x64xf32>
    %491 = arith.mulf %471, %490 : vector<16x64xf32>
    %492 = vector.broadcast %24 : vector<1x64xf32> to vector<16x64xf32>
    %493 = arith.mulf %471, %492 : vector<16x64xf32>
    %494 = vector.broadcast %32 : vector<1x64xf32> to vector<16x64xf32>
    %495 = arith.mulf %471, %494 : vector<16x64xf32>
    %496 = tpu.concatenate %489, %491, %493, %495 in 0 : vector<16x64xf32>, vector<16x64xf32>, vector<16x64xf32>, vector<16x64xf32> -> vector<64x64xf32>
    %497 = arith.truncf %496 : vector<64x64xf32> to vector<64x64xbf16>
    %498 = arith.truncf %478 : vector<16x64xf32> to vector<16x64xbf16>
    %cst_172 = arith.constant dense<0.000000e+00> : vector<64x16xf32>
    %499 = tpu.matmul %497, %498, %cst_172 {dimension_numbers = #tpu.dot_dimension_numbers<[1], [1], [0], [0], [0, 0, 1, 0], [], []>} : vector<64x64xbf16>, vector<16x64xbf16>, vector<64x16xf32> -> vector<64x16xf32>
    %cst_173 = arith.constant 2.500000e-01 : f32
    %500 = vector.broadcast %cst_173 : f32 to vector<64x16xf32>
    %501 = arith.mulf %499, %500 : vector<64x16xf32>
    %502 = arith.addf %501, %39 : vector<64x16xf32>
    %cst_174 = arith.constant dense<0xFF800000> : vector<64xf32>
    %503 = vector.multi_reduction <maximumf>, %502, %cst_174 [1] : vector<64x16xf32> to vector<64xf32>
    %504 = vector.shape_cast %503 : vector<64xf32> to vector<64x1xf32>
    %505 = vector.broadcast %504 : vector<64x1xf32> to vector<64x16xf32>
    %506 = arith.subf %502, %505 : vector<64x16xf32>
    %507 = math.exp %506 : vector<64x16xf32>
    %cst_175 = arith.constant dense<0.000000e+00> : vector<64xf32>
    %508 = vector.multi_reduction <add>, %507, %cst_175 [1] : vector<64x16xf32> to vector<64xf32>
    %509 = vector.shape_cast %508 : vector<64xf32> to vector<64x1xf32>
    %510 = tpu.reciprocal %509 {approx = true} : vector<64x1xf32> -> vector<64x1xf32>
    %511 = vector.broadcast %510 : vector<64x1xf32> to vector<64x16xf32>
    %512 = arith.mulf %507, %511 : vector<64x16xf32>
    %513 = arith.truncf %512 : vector<64x16xf32> to vector<64x16xbf16>
    %514 = arith.truncf %485 : vector<16x64xf32> to vector<16x64xbf16>
    %cst_176 = arith.constant dense<0.000000e+00> : vector<64x64xf32>
    %515 = tpu.matmul %513, %514, %cst_176 {dimension_numbers = #tpu.dot_dimension_numbers<[1], [0], [0], [1], [0, 0, 1, 1], [], []>} : vector<64x16xbf16>, vector<16x64xbf16>, vector<64x64xf32> -> vector<64x64xf32>
    %516 = vector.extract_strided_slice %515 {offsets = [0, 0], sizes = [16, 64], strides = [1, 1]} : vector<64x64xf32> to vector<16x64xf32>
    %517 = vector.broadcast %8 : vector<1x64xf32> to vector<16x64xf32>
    %518 = arith.mulf %516, %517 : vector<16x64xf32>
    %519 = vector.extract_strided_slice %515 {offsets = [16, 0], sizes = [16, 64], strides = [1, 1]} : vector<64x64xf32> to vector<16x64xf32>
    %520 = vector.broadcast %16 : vector<1x64xf32> to vector<16x64xf32>
    %521 = arith.mulf %519, %520 : vector<16x64xf32>
    %522 = arith.addf %518, %521 : vector<16x64xf32>
    %523 = vector.extract_strided_slice %515 {offsets = [32, 0], sizes = [16, 64], strides = [1, 1]} : vector<64x64xf32> to vector<16x64xf32>
    %524 = vector.broadcast %24 : vector<1x64xf32> to vector<16x64xf32>
    %525 = arith.mulf %523, %524 : vector<16x64xf32>
    %526 = arith.addf %522, %525 : vector<16x64xf32>
    %527 = vector.extract_strided_slice %515 {offsets = [48, 0], sizes = [16, 64], strides = [1, 1]} : vector<64x64xf32> to vector<16x64xf32>
    %528 = vector.broadcast %32 : vector<1x64xf32> to vector<16x64xf32>
    %529 = arith.mulf %527, %528 : vector<16x64xf32>
    %530 = arith.addf %526, %529 : vector<16x64xf32>
    %531 = arith.truncf %530 : vector<16x64xf32> to vector<16x64xbf16>
    %532 = arith.truncf %486 : vector<64x64xf32> to vector<64x64xbf16>
    %cst_177 = arith.constant dense<0.000000e+00> : vector<16x64xf32>
    %533 = tpu.matmul %531, %532, %cst_177 {dimension_numbers = #tpu.dot_dimension_numbers<[1], [0], [0], [1], [0, 0, 1, 1], [], []>} : vector<16x64xbf16>, vector<64x64xbf16>, vector<16x64xf32> -> vector<16x64xf32>
    %534 = vector.broadcast %487 : vector<1x64xf32> to vector<16x64xf32>
    %535 = arith.addf %533, %534 : vector<16x64xf32>
    %536 = arith.addf %34, %535 : vector<16x64xf32>
    %c1992 = arith.constant 1992 : index
    %c0_178 = arith.constant 0 : index
    %537 = vector.load %arg2[%c1992, %c0_178] : memref<3152x64xf32, #tpu.memory_space<vmem>>, vector<1x64xf32>
    %c2000 = arith.constant 2000 : index
    %c0_179 = arith.constant 0 : index
    %538 = vector.load %arg2[%c2000, %c0_179] : memref<3152x64xf32, #tpu.memory_space<vmem>>, vector<1x64xf32>
    %cst_180 = arith.constant dense<0.000000e+00> : vector<16xf32>
    %539 = vector.multi_reduction <add>, %536, %cst_180 [1] : vector<16x64xf32> to vector<16xf32>
    %540 = vector.shape_cast %539 : vector<16xf32> to vector<16x1xf32>
    %cst_181 = arith.constant 6.400000e+01 : f32
    %541 = vector.broadcast %cst_181 : f32 to vector<16x1xf32>
    %542 = arith.divf %540, %541 : vector<16x1xf32>
    %543 = vector.broadcast %542 : vector<16x1xf32> to vector<16x64xf32>
    %544 = arith.subf %536, %543 : vector<16x64xf32>
    %545 = arith.mulf %544, %544 : vector<16x64xf32>
    %cst_182 = arith.constant dense<0.000000e+00> : vector<16xf32>
    %546 = vector.multi_reduction <add>, %545, %cst_182 [1] : vector<16x64xf32> to vector<16xf32>
    %547 = vector.shape_cast %546 : vector<16xf32> to vector<16x1xf32>
    %cst_183 = arith.constant 6.400000e+01 : f32
    %548 = vector.broadcast %cst_183 : f32 to vector<16x1xf32>
    %549 = arith.divf %547, %548 : vector<16x1xf32>
    %cst_184 = arith.constant 9.99999996E-13 : f32
    %550 = vector.broadcast %cst_184 : f32 to vector<16x1xf32>
    %551 = arith.addf %549, %550 : vector<16x1xf32>
    %552 = math.rsqrt %551 : vector<16x1xf32>
    %553 = vector.broadcast %552 : vector<16x1xf32> to vector<16x64xf32>
    %554 = arith.mulf %544, %553 : vector<16x64xf32>
    %555 = vector.broadcast %537 : vector<1x64xf32> to vector<16x64xf32>
    %556 = arith.mulf %554, %555 : vector<16x64xf32>
    %557 = vector.broadcast %538 : vector<1x64xf32> to vector<16x64xf32>
    %558 = arith.addf %556, %557 : vector<16x64xf32>
    %c1704 = arith.constant 1704 : index
    %c0_185 = arith.constant 0 : index
    %559 = vector.load %arg2[%c1704, %c0_185] : memref<3152x64xf32, #tpu.memory_space<vmem>>, vector<64x64xf32>
    %c1768 = arith.constant 1768 : index
    %c0_186 = arith.constant 0 : index
    %560 = vector.load %arg2[%c1768, %c0_186] : memref<3152x64xf32, #tpu.memory_space<vmem>>, vector<1x64xf32>
    %561 = arith.truncf %558 : vector<16x64xf32> to vector<16x64xbf16>
    %562 = arith.truncf %559 : vector<64x64xf32> to vector<64x64xbf16>
    %cst_187 = arith.constant dense<0.000000e+00> : vector<16x64xf32>
    %563 = tpu.matmul %561, %562, %cst_187 {dimension_numbers = #tpu.dot_dimension_numbers<[1], [0], [0], [1], [0, 0, 1, 1], [], []>} : vector<16x64xbf16>, vector<64x64xbf16>, vector<16x64xf32> -> vector<16x64xf32>
    %564 = vector.broadcast %560 : vector<1x64xf32> to vector<16x64xf32>
    %565 = arith.addf %563, %564 : vector<16x64xf32>
    %c1776 = arith.constant 1776 : index
    %c0_188 = arith.constant 0 : index
    %566 = vector.load %arg2[%c1776, %c0_188] : memref<3152x64xf32, #tpu.memory_space<vmem>>, vector<64x64xf32>
    %c1840 = arith.constant 1840 : index
    %c0_189 = arith.constant 0 : index
    %567 = vector.load %arg2[%c1840, %c0_189] : memref<3152x64xf32, #tpu.memory_space<vmem>>, vector<1x64xf32>
    %568 = arith.truncf %422 : vector<16x64xf32> to vector<16x64xbf16>
    %569 = arith.truncf %566 : vector<64x64xf32> to vector<64x64xbf16>
    %cst_190 = arith.constant dense<0.000000e+00> : vector<16x64xf32>
    %570 = tpu.matmul %568, %569, %cst_190 {dimension_numbers = #tpu.dot_dimension_numbers<[1], [0], [0], [1], [0, 0, 1, 1], [], []>} : vector<16x64xbf16>, vector<64x64xbf16>, vector<16x64xf32> -> vector<16x64xf32>
    %571 = vector.broadcast %567 : vector<1x64xf32> to vector<16x64xf32>
    %572 = arith.addf %570, %571 : vector<16x64xf32>
    %c1848 = arith.constant 1848 : index
    %c0_191 = arith.constant 0 : index
    %573 = vector.load %arg2[%c1848, %c0_191] : memref<3152x64xf32, #tpu.memory_space<vmem>>, vector<64x64xf32>
    %c1912 = arith.constant 1912 : index
    %c0_192 = arith.constant 0 : index
    %574 = vector.load %arg2[%c1912, %c0_192] : memref<3152x64xf32, #tpu.memory_space<vmem>>, vector<1x64xf32>
    %575 = arith.truncf %422 : vector<16x64xf32> to vector<16x64xbf16>
    %576 = arith.truncf %573 : vector<64x64xf32> to vector<64x64xbf16>
    %cst_193 = arith.constant dense<0.000000e+00> : vector<16x64xf32>
    %577 = tpu.matmul %575, %576, %cst_193 {dimension_numbers = #tpu.dot_dimension_numbers<[1], [0], [0], [1], [0, 0, 1, 1], [], []>} : vector<16x64xbf16>, vector<64x64xbf16>, vector<16x64xf32> -> vector<16x64xf32>
    %578 = vector.broadcast %574 : vector<1x64xf32> to vector<16x64xf32>
    %579 = arith.addf %577, %578 : vector<16x64xf32>
    %c1920 = arith.constant 1920 : index
    %c0_194 = arith.constant 0 : index
    %580 = vector.load %arg2[%c1920, %c0_194] : memref<3152x64xf32, #tpu.memory_space<vmem>>, vector<64x64xf32>
    %c1984 = arith.constant 1984 : index
    %c0_195 = arith.constant 0 : index
    %581 = vector.load %arg2[%c1984, %c0_195] : memref<3152x64xf32, #tpu.memory_space<vmem>>, vector<1x64xf32>
    %582 = vector.broadcast %8 : vector<1x64xf32> to vector<16x64xf32>
    %583 = arith.mulf %565, %582 : vector<16x64xf32>
    %584 = vector.broadcast %16 : vector<1x64xf32> to vector<16x64xf32>
    %585 = arith.mulf %565, %584 : vector<16x64xf32>
    %586 = vector.broadcast %24 : vector<1x64xf32> to vector<16x64xf32>
    %587 = arith.mulf %565, %586 : vector<16x64xf32>
    %588 = vector.broadcast %32 : vector<1x64xf32> to vector<16x64xf32>
    %589 = arith.mulf %565, %588 : vector<16x64xf32>
    %590 = tpu.concatenate %583, %585, %587, %589 in 0 : vector<16x64xf32>, vector<16x64xf32>, vector<16x64xf32>, vector<16x64xf32> -> vector<64x64xf32>
    %591 = arith.truncf %590 : vector<64x64xf32> to vector<64x64xbf16>
    %592 = arith.truncf %572 : vector<16x64xf32> to vector<16x64xbf16>
    %cst_196 = arith.constant dense<0.000000e+00> : vector<64x16xf32>
    %593 = tpu.matmul %591, %592, %cst_196 {dimension_numbers = #tpu.dot_dimension_numbers<[1], [1], [0], [0], [0, 0, 1, 0], [], []>} : vector<64x64xbf16>, vector<16x64xbf16>, vector<64x16xf32> -> vector<64x16xf32>
    %cst_197 = arith.constant 2.500000e-01 : f32
    %594 = vector.broadcast %cst_197 : f32 to vector<64x16xf32>
    %595 = arith.mulf %593, %594 : vector<64x16xf32>
    %596 = arith.addf %595, %41 : vector<64x16xf32>
    %cst_198 = arith.constant dense<0xFF800000> : vector<64xf32>
    %597 = vector.multi_reduction <maximumf>, %596, %cst_198 [1] : vector<64x16xf32> to vector<64xf32>
    %598 = vector.shape_cast %597 : vector<64xf32> to vector<64x1xf32>
    %599 = vector.broadcast %598 : vector<64x1xf32> to vector<64x16xf32>
    %600 = arith.subf %596, %599 : vector<64x16xf32>
    %601 = math.exp %600 : vector<64x16xf32>
    %cst_199 = arith.constant dense<0.000000e+00> : vector<64xf32>
    %602 = vector.multi_reduction <add>, %601, %cst_199 [1] : vector<64x16xf32> to vector<64xf32>
    %603 = vector.shape_cast %602 : vector<64xf32> to vector<64x1xf32>
    %604 = tpu.reciprocal %603 {approx = true} : vector<64x1xf32> -> vector<64x1xf32>
    %605 = vector.broadcast %604 : vector<64x1xf32> to vector<64x16xf32>
    %606 = arith.mulf %601, %605 : vector<64x16xf32>
    %607 = arith.truncf %606 : vector<64x16xf32> to vector<64x16xbf16>
    %608 = arith.truncf %579 : vector<16x64xf32> to vector<16x64xbf16>
    %cst_200 = arith.constant dense<0.000000e+00> : vector<64x64xf32>
    %609 = tpu.matmul %607, %608, %cst_200 {dimension_numbers = #tpu.dot_dimension_numbers<[1], [0], [0], [1], [0, 0, 1, 1], [], []>} : vector<64x16xbf16>, vector<16x64xbf16>, vector<64x64xf32> -> vector<64x64xf32>
    %610 = vector.extract_strided_slice %609 {offsets = [0, 0], sizes = [16, 64], strides = [1, 1]} : vector<64x64xf32> to vector<16x64xf32>
    %611 = vector.broadcast %8 : vector<1x64xf32> to vector<16x64xf32>
    %612 = arith.mulf %610, %611 : vector<16x64xf32>
    %613 = vector.extract_strided_slice %609 {offsets = [16, 0], sizes = [16, 64], strides = [1, 1]} : vector<64x64xf32> to vector<16x64xf32>
    %614 = vector.broadcast %16 : vector<1x64xf32> to vector<16x64xf32>
    %615 = arith.mulf %613, %614 : vector<16x64xf32>
    %616 = arith.addf %612, %615 : vector<16x64xf32>
    %617 = vector.extract_strided_slice %609 {offsets = [32, 0], sizes = [16, 64], strides = [1, 1]} : vector<64x64xf32> to vector<16x64xf32>
    %618 = vector.broadcast %24 : vector<1x64xf32> to vector<16x64xf32>
    %619 = arith.mulf %617, %618 : vector<16x64xf32>
    %620 = arith.addf %616, %619 : vector<16x64xf32>
    %621 = vector.extract_strided_slice %609 {offsets = [48, 0], sizes = [16, 64], strides = [1, 1]} : vector<64x64xf32> to vector<16x64xf32>
    %622 = vector.broadcast %32 : vector<1x64xf32> to vector<16x64xf32>
    %623 = arith.mulf %621, %622 : vector<16x64xf32>
    %624 = arith.addf %620, %623 : vector<16x64xf32>
    %625 = arith.truncf %624 : vector<16x64xf32> to vector<16x64xbf16>
    %626 = arith.truncf %580 : vector<64x64xf32> to vector<64x64xbf16>
    %cst_201 = arith.constant dense<0.000000e+00> : vector<16x64xf32>
    %627 = tpu.matmul %625, %626, %cst_201 {dimension_numbers = #tpu.dot_dimension_numbers<[1], [0], [0], [1], [0, 0, 1, 1], [], []>} : vector<16x64xbf16>, vector<64x64xbf16>, vector<16x64xf32> -> vector<16x64xf32>
    %628 = vector.broadcast %581 : vector<1x64xf32> to vector<16x64xf32>
    %629 = arith.addf %627, %628 : vector<16x64xf32>
    %630 = arith.addf %558, %629 : vector<16x64xf32>
    %c2008 = arith.constant 2008 : index
    %c0_202 = arith.constant 0 : index
    %631 = vector.load %arg2[%c2008, %c0_202] : memref<3152x64xf32, #tpu.memory_space<vmem>>, vector<1x64xf32>
    %c2016 = arith.constant 2016 : index
    %c0_203 = arith.constant 0 : index
    %632 = vector.load %arg2[%c2016, %c0_203] : memref<3152x64xf32, #tpu.memory_space<vmem>>, vector<1x64xf32>
    %cst_204 = arith.constant dense<0.000000e+00> : vector<16xf32>
    %633 = vector.multi_reduction <add>, %630, %cst_204 [1] : vector<16x64xf32> to vector<16xf32>
    %634 = vector.shape_cast %633 : vector<16xf32> to vector<16x1xf32>
    %cst_205 = arith.constant 6.400000e+01 : f32
    %635 = vector.broadcast %cst_205 : f32 to vector<16x1xf32>
    %636 = arith.divf %634, %635 : vector<16x1xf32>
    %637 = vector.broadcast %636 : vector<16x1xf32> to vector<16x64xf32>
    %638 = arith.subf %630, %637 : vector<16x64xf32>
    %639 = arith.mulf %638, %638 : vector<16x64xf32>
    %cst_206 = arith.constant dense<0.000000e+00> : vector<16xf32>
    %640 = vector.multi_reduction <add>, %639, %cst_206 [1] : vector<16x64xf32> to vector<16xf32>
    %641 = vector.shape_cast %640 : vector<16xf32> to vector<16x1xf32>
    %cst_207 = arith.constant 6.400000e+01 : f32
    %642 = vector.broadcast %cst_207 : f32 to vector<16x1xf32>
    %643 = arith.divf %641, %642 : vector<16x1xf32>
    %cst_208 = arith.constant 9.99999996E-13 : f32
    %644 = vector.broadcast %cst_208 : f32 to vector<16x1xf32>
    %645 = arith.addf %643, %644 : vector<16x1xf32>
    %646 = math.rsqrt %645 : vector<16x1xf32>
    %647 = vector.broadcast %646 : vector<16x1xf32> to vector<16x64xf32>
    %648 = arith.mulf %638, %647 : vector<16x64xf32>
    %649 = vector.broadcast %631 : vector<1x64xf32> to vector<16x64xf32>
    %650 = arith.mulf %648, %649 : vector<16x64xf32>
    %651 = vector.broadcast %632 : vector<1x64xf32> to vector<16x64xf32>
    %652 = arith.addf %650, %651 : vector<16x64xf32>
    %c144 = arith.constant 144 : index
    %c0_209 = arith.constant 0 : index
    %653 = vector.load %arg3[%c144, %c0_209] : memref<504x128xf32, #tpu.memory_space<vmem>>, vector<64x128xf32>
    %c208_210 = arith.constant 208 : index
    %c0_211 = arith.constant 0 : index
    %654 = vector.load %arg3[%c208_210, %c0_211] : memref<504x128xf32, #tpu.memory_space<vmem>>, vector<1x128xf32>
    %655 = arith.truncf %652 : vector<16x64xf32> to vector<16x64xbf16>
    %656 = arith.truncf %653 : vector<64x128xf32> to vector<64x128xbf16>
    %cst_212 = arith.constant dense<0.000000e+00> : vector<16x128xf32>
    %657 = tpu.matmul %655, %656, %cst_212 {dimension_numbers = #tpu.dot_dimension_numbers<[1], [0], [0], [1], [0, 0, 1, 1], [], []>} : vector<16x64xbf16>, vector<64x128xbf16>, vector<16x128xf32> -> vector<16x128xf32>
    %658 = vector.broadcast %654 : vector<1x128xf32> to vector<16x128xf32>
    %659 = arith.addf %657, %658 : vector<16x128xf32>
    %660 = arith.mulf %659, %659 : vector<16x128xf32>
    %661 = arith.mulf %659, %660 : vector<16x128xf32>
    %cst_213 = arith.constant 4.471500e-02 : f32
    %662 = vector.broadcast %cst_213 : f32 to vector<16x128xf32>
    %663 = arith.mulf %662, %661 : vector<16x128xf32>
    %664 = arith.addf %659, %663 : vector<16x128xf32>
    %cst_214 = arith.constant 0.797884583 : f32
    %665 = vector.broadcast %cst_214 : f32 to vector<16x128xf32>
    %666 = arith.mulf %665, %664 : vector<16x128xf32>
    %667 = math.tanh %666 : vector<16x128xf32>
    %cst_215 = arith.constant 1.000000e+00 : f32
    %668 = vector.broadcast %cst_215 : f32 to vector<16x128xf32>
    %669 = arith.addf %668, %667 : vector<16x128xf32>
    %cst_216 = arith.constant 5.000000e-01 : f32
    %670 = vector.broadcast %cst_216 : f32 to vector<16x128xf32>
    %671 = arith.mulf %670, %669 : vector<16x128xf32>
    %672 = arith.mulf %659, %671 : vector<16x128xf32>
    %c2040 = arith.constant 2040 : index
    %c0_217 = arith.constant 0 : index
    %673 = vector.load %arg2[%c2040, %c0_217] : memref<3152x64xf32, #tpu.memory_space<vmem>>, vector<128x64xf32>
    %c2168 = arith.constant 2168 : index
    %c0_218 = arith.constant 0 : index
    %674 = vector.load %arg2[%c2168, %c0_218] : memref<3152x64xf32, #tpu.memory_space<vmem>>, vector<1x64xf32>
    %675 = arith.truncf %672 : vector<16x128xf32> to vector<16x128xbf16>
    %676 = arith.truncf %673 : vector<128x64xf32> to vector<128x64xbf16>
    %cst_219 = arith.constant dense<0.000000e+00> : vector<16x64xf32>
    %677 = tpu.matmul %675, %676, %cst_219 {dimension_numbers = #tpu.dot_dimension_numbers<[1], [0], [0], [1], [0, 0, 1, 1], [], []>} : vector<16x128xbf16>, vector<128x64xbf16>, vector<16x64xf32> -> vector<16x64xf32>
    %678 = vector.broadcast %674 : vector<1x64xf32> to vector<16x64xf32>
    %679 = arith.addf %677, %678 : vector<16x64xf32>
    %680 = arith.addf %652, %679 : vector<16x64xf32>
    %c2024 = arith.constant 2024 : index
    %c0_220 = arith.constant 0 : index
    %681 = vector.load %arg2[%c2024, %c0_220] : memref<3152x64xf32, #tpu.memory_space<vmem>>, vector<1x64xf32>
    %c2032 = arith.constant 2032 : index
    %c0_221 = arith.constant 0 : index
    %682 = vector.load %arg2[%c2032, %c0_221] : memref<3152x64xf32, #tpu.memory_space<vmem>>, vector<1x64xf32>
    %cst_222 = arith.constant dense<0.000000e+00> : vector<16xf32>
    %683 = vector.multi_reduction <add>, %680, %cst_222 [1] : vector<16x64xf32> to vector<16xf32>
    %684 = vector.shape_cast %683 : vector<16xf32> to vector<16x1xf32>
    %cst_223 = arith.constant 6.400000e+01 : f32
    %685 = vector.broadcast %cst_223 : f32 to vector<16x1xf32>
    %686 = arith.divf %684, %685 : vector<16x1xf32>
    %687 = vector.broadcast %686 : vector<16x1xf32> to vector<16x64xf32>
    %688 = arith.subf %680, %687 : vector<16x64xf32>
    %689 = arith.mulf %688, %688 : vector<16x64xf32>
    %cst_224 = arith.constant dense<0.000000e+00> : vector<16xf32>
    %690 = vector.multi_reduction <add>, %689, %cst_224 [1] : vector<16x64xf32> to vector<16xf32>
    %691 = vector.shape_cast %690 : vector<16xf32> to vector<16x1xf32>
    %cst_225 = arith.constant 6.400000e+01 : f32
    %692 = vector.broadcast %cst_225 : f32 to vector<16x1xf32>
    %693 = arith.divf %691, %692 : vector<16x1xf32>
    %cst_226 = arith.constant 9.99999996E-13 : f32
    %694 = vector.broadcast %cst_226 : f32 to vector<16x1xf32>
    %695 = arith.addf %693, %694 : vector<16x1xf32>
    %696 = math.rsqrt %695 : vector<16x1xf32>
    %697 = vector.broadcast %696 : vector<16x1xf32> to vector<16x64xf32>
    %698 = arith.mulf %688, %697 : vector<16x64xf32>
    %699 = vector.broadcast %681 : vector<1x64xf32> to vector<16x64xf32>
    %700 = arith.mulf %698, %699 : vector<16x64xf32>
    %701 = vector.broadcast %682 : vector<1x64xf32> to vector<16x64xf32>
    %702 = arith.addf %700, %701 : vector<16x64xf32>
    %c2176 = arith.constant 2176 : index
    %c0_227 = arith.constant 0 : index
    %703 = vector.load %arg2[%c2176, %c0_227] : memref<3152x64xf32, #tpu.memory_space<vmem>>, vector<64x64xf32>
    %c2240 = arith.constant 2240 : index
    %c0_228 = arith.constant 0 : index
    %704 = vector.load %arg2[%c2240, %c0_228] : memref<3152x64xf32, #tpu.memory_space<vmem>>, vector<1x64xf32>
    %705 = arith.truncf %702 : vector<16x64xf32> to vector<16x64xbf16>
    %706 = arith.truncf %703 : vector<64x64xf32> to vector<64x64xbf16>
    %cst_229 = arith.constant dense<0.000000e+00> : vector<16x64xf32>
    %707 = tpu.matmul %705, %706, %cst_229 {dimension_numbers = #tpu.dot_dimension_numbers<[1], [0], [0], [1], [0, 0, 1, 1], [], []>} : vector<16x64xbf16>, vector<64x64xbf16>, vector<16x64xf32> -> vector<16x64xf32>
    %708 = vector.broadcast %704 : vector<1x64xf32> to vector<16x64xf32>
    %709 = arith.addf %707, %708 : vector<16x64xf32>
    %c2248 = arith.constant 2248 : index
    %c0_230 = arith.constant 0 : index
    %710 = vector.load %arg2[%c2248, %c0_230] : memref<3152x64xf32, #tpu.memory_space<vmem>>, vector<64x64xf32>
    %c2312 = arith.constant 2312 : index
    %c0_231 = arith.constant 0 : index
    %711 = vector.load %arg2[%c2312, %c0_231] : memref<3152x64xf32, #tpu.memory_space<vmem>>, vector<1x64xf32>
    %712 = arith.truncf %702 : vector<16x64xf32> to vector<16x64xbf16>
    %713 = arith.truncf %710 : vector<64x64xf32> to vector<64x64xbf16>
    %cst_232 = arith.constant dense<0.000000e+00> : vector<16x64xf32>
    %714 = tpu.matmul %712, %713, %cst_232 {dimension_numbers = #tpu.dot_dimension_numbers<[1], [0], [0], [1], [0, 0, 1, 1], [], []>} : vector<16x64xbf16>, vector<64x64xbf16>, vector<16x64xf32> -> vector<16x64xf32>
    %715 = vector.broadcast %711 : vector<1x64xf32> to vector<16x64xf32>
    %716 = arith.addf %714, %715 : vector<16x64xf32>
    %c2320 = arith.constant 2320 : index
    %c0_233 = arith.constant 0 : index
    %717 = vector.load %arg2[%c2320, %c0_233] : memref<3152x64xf32, #tpu.memory_space<vmem>>, vector<64x64xf32>
    %c2384 = arith.constant 2384 : index
    %c0_234 = arith.constant 0 : index
    %718 = vector.load %arg2[%c2384, %c0_234] : memref<3152x64xf32, #tpu.memory_space<vmem>>, vector<1x64xf32>
    %719 = arith.truncf %702 : vector<16x64xf32> to vector<16x64xbf16>
    %720 = arith.truncf %717 : vector<64x64xf32> to vector<64x64xbf16>
    %cst_235 = arith.constant dense<0.000000e+00> : vector<16x64xf32>
    %721 = tpu.matmul %719, %720, %cst_235 {dimension_numbers = #tpu.dot_dimension_numbers<[1], [0], [0], [1], [0, 0, 1, 1], [], []>} : vector<16x64xbf16>, vector<64x64xbf16>, vector<16x64xf32> -> vector<16x64xf32>
    %722 = vector.broadcast %718 : vector<1x64xf32> to vector<16x64xf32>
    %723 = arith.addf %721, %722 : vector<16x64xf32>
    %c2392 = arith.constant 2392 : index
    %c0_236 = arith.constant 0 : index
    %724 = vector.load %arg2[%c2392, %c0_236] : memref<3152x64xf32, #tpu.memory_space<vmem>>, vector<64x64xf32>
    %c2456 = arith.constant 2456 : index
    %c0_237 = arith.constant 0 : index
    %725 = vector.load %arg2[%c2456, %c0_237] : memref<3152x64xf32, #tpu.memory_space<vmem>>, vector<1x64xf32>
    %726 = vector.broadcast %8 : vector<1x64xf32> to vector<16x64xf32>
    %727 = arith.mulf %709, %726 : vector<16x64xf32>
    %728 = vector.broadcast %16 : vector<1x64xf32> to vector<16x64xf32>
    %729 = arith.mulf %709, %728 : vector<16x64xf32>
    %730 = vector.broadcast %24 : vector<1x64xf32> to vector<16x64xf32>
    %731 = arith.mulf %709, %730 : vector<16x64xf32>
    %732 = vector.broadcast %32 : vector<1x64xf32> to vector<16x64xf32>
    %733 = arith.mulf %709, %732 : vector<16x64xf32>
    %734 = tpu.concatenate %727, %729, %731, %733 in 0 : vector<16x64xf32>, vector<16x64xf32>, vector<16x64xf32>, vector<16x64xf32> -> vector<64x64xf32>
    %735 = arith.truncf %734 : vector<64x64xf32> to vector<64x64xbf16>
    %736 = arith.truncf %716 : vector<16x64xf32> to vector<16x64xbf16>
    %cst_238 = arith.constant dense<0.000000e+00> : vector<64x16xf32>
    %737 = tpu.matmul %735, %736, %cst_238 {dimension_numbers = #tpu.dot_dimension_numbers<[1], [1], [0], [0], [0, 0, 1, 0], [], []>} : vector<64x64xbf16>, vector<16x64xbf16>, vector<64x16xf32> -> vector<64x16xf32>
    %cst_239 = arith.constant 2.500000e-01 : f32
    %738 = vector.broadcast %cst_239 : f32 to vector<64x16xf32>
    %739 = arith.mulf %737, %738 : vector<64x16xf32>
    %740 = arith.addf %739, %39 : vector<64x16xf32>
    %cst_240 = arith.constant dense<0xFF800000> : vector<64xf32>
    %741 = vector.multi_reduction <maximumf>, %740, %cst_240 [1] : vector<64x16xf32> to vector<64xf32>
    %742 = vector.shape_cast %741 : vector<64xf32> to vector<64x1xf32>
    %743 = vector.broadcast %742 : vector<64x1xf32> to vector<64x16xf32>
    %744 = arith.subf %740, %743 : vector<64x16xf32>
    %745 = math.exp %744 : vector<64x16xf32>
    %cst_241 = arith.constant dense<0.000000e+00> : vector<64xf32>
    %746 = vector.multi_reduction <add>, %745, %cst_241 [1] : vector<64x16xf32> to vector<64xf32>
    %747 = vector.shape_cast %746 : vector<64xf32> to vector<64x1xf32>
    %748 = tpu.reciprocal %747 {approx = true} : vector<64x1xf32> -> vector<64x1xf32>
    %749 = vector.broadcast %748 : vector<64x1xf32> to vector<64x16xf32>
    %750 = arith.mulf %745, %749 : vector<64x16xf32>
    %751 = arith.truncf %750 : vector<64x16xf32> to vector<64x16xbf16>
    %752 = arith.truncf %723 : vector<16x64xf32> to vector<16x64xbf16>
    %cst_242 = arith.constant dense<0.000000e+00> : vector<64x64xf32>
    %753 = tpu.matmul %751, %752, %cst_242 {dimension_numbers = #tpu.dot_dimension_numbers<[1], [0], [0], [1], [0, 0, 1, 1], [], []>} : vector<64x16xbf16>, vector<16x64xbf16>, vector<64x64xf32> -> vector<64x64xf32>
    %754 = vector.extract_strided_slice %753 {offsets = [0, 0], sizes = [16, 64], strides = [1, 1]} : vector<64x64xf32> to vector<16x64xf32>
    %755 = vector.broadcast %8 : vector<1x64xf32> to vector<16x64xf32>
    %756 = arith.mulf %754, %755 : vector<16x64xf32>
    %757 = vector.extract_strided_slice %753 {offsets = [16, 0], sizes = [16, 64], strides = [1, 1]} : vector<64x64xf32> to vector<16x64xf32>
    %758 = vector.broadcast %16 : vector<1x64xf32> to vector<16x64xf32>
    %759 = arith.mulf %757, %758 : vector<16x64xf32>
    %760 = arith.addf %756, %759 : vector<16x64xf32>
    %761 = vector.extract_strided_slice %753 {offsets = [32, 0], sizes = [16, 64], strides = [1, 1]} : vector<64x64xf32> to vector<16x64xf32>
    %762 = vector.broadcast %24 : vector<1x64xf32> to vector<16x64xf32>
    %763 = arith.mulf %761, %762 : vector<16x64xf32>
    %764 = arith.addf %760, %763 : vector<16x64xf32>
    %765 = vector.extract_strided_slice %753 {offsets = [48, 0], sizes = [16, 64], strides = [1, 1]} : vector<64x64xf32> to vector<16x64xf32>
    %766 = vector.broadcast %32 : vector<1x64xf32> to vector<16x64xf32>
    %767 = arith.mulf %765, %766 : vector<16x64xf32>
    %768 = arith.addf %764, %767 : vector<16x64xf32>
    %769 = arith.truncf %768 : vector<16x64xf32> to vector<16x64xbf16>
    %770 = arith.truncf %724 : vector<64x64xf32> to vector<64x64xbf16>
    %cst_243 = arith.constant dense<0.000000e+00> : vector<16x64xf32>
    %771 = tpu.matmul %769, %770, %cst_243 {dimension_numbers = #tpu.dot_dimension_numbers<[1], [0], [0], [1], [0, 0, 1, 1], [], []>} : vector<16x64xbf16>, vector<64x64xbf16>, vector<16x64xf32> -> vector<16x64xf32>
    %772 = vector.broadcast %725 : vector<1x64xf32> to vector<16x64xf32>
    %773 = arith.addf %771, %772 : vector<16x64xf32>
    %774 = arith.addf %702, %773 : vector<16x64xf32>
    %c2752 = arith.constant 2752 : index
    %c0_244 = arith.constant 0 : index
    %775 = vector.load %arg2[%c2752, %c0_244] : memref<3152x64xf32, #tpu.memory_space<vmem>>, vector<1x64xf32>
    %c2760 = arith.constant 2760 : index
    %c0_245 = arith.constant 0 : index
    %776 = vector.load %arg2[%c2760, %c0_245] : memref<3152x64xf32, #tpu.memory_space<vmem>>, vector<1x64xf32>
    %cst_246 = arith.constant dense<0.000000e+00> : vector<16xf32>
    %777 = vector.multi_reduction <add>, %774, %cst_246 [1] : vector<16x64xf32> to vector<16xf32>
    %778 = vector.shape_cast %777 : vector<16xf32> to vector<16x1xf32>
    %cst_247 = arith.constant 6.400000e+01 : f32
    %779 = vector.broadcast %cst_247 : f32 to vector<16x1xf32>
    %780 = arith.divf %778, %779 : vector<16x1xf32>
    %781 = vector.broadcast %780 : vector<16x1xf32> to vector<16x64xf32>
    %782 = arith.subf %774, %781 : vector<16x64xf32>
    %783 = arith.mulf %782, %782 : vector<16x64xf32>
    %cst_248 = arith.constant dense<0.000000e+00> : vector<16xf32>
    %784 = vector.multi_reduction <add>, %783, %cst_248 [1] : vector<16x64xf32> to vector<16xf32>
    %785 = vector.shape_cast %784 : vector<16xf32> to vector<16x1xf32>
    %cst_249 = arith.constant 6.400000e+01 : f32
    %786 = vector.broadcast %cst_249 : f32 to vector<16x1xf32>
    %787 = arith.divf %785, %786 : vector<16x1xf32>
    %cst_250 = arith.constant 9.99999996E-13 : f32
    %788 = vector.broadcast %cst_250 : f32 to vector<16x1xf32>
    %789 = arith.addf %787, %788 : vector<16x1xf32>
    %790 = math.rsqrt %789 : vector<16x1xf32>
    %791 = vector.broadcast %790 : vector<16x1xf32> to vector<16x64xf32>
    %792 = arith.mulf %782, %791 : vector<16x64xf32>
    %793 = vector.broadcast %775 : vector<1x64xf32> to vector<16x64xf32>
    %794 = arith.mulf %792, %793 : vector<16x64xf32>
    %795 = vector.broadcast %776 : vector<1x64xf32> to vector<16x64xf32>
    %796 = arith.addf %794, %795 : vector<16x64xf32>
    %c2464 = arith.constant 2464 : index
    %c0_251 = arith.constant 0 : index
    %797 = vector.load %arg2[%c2464, %c0_251] : memref<3152x64xf32, #tpu.memory_space<vmem>>, vector<64x64xf32>
    %c2528 = arith.constant 2528 : index
    %c0_252 = arith.constant 0 : index
    %798 = vector.load %arg2[%c2528, %c0_252] : memref<3152x64xf32, #tpu.memory_space<vmem>>, vector<1x64xf32>
    %799 = arith.truncf %796 : vector<16x64xf32> to vector<16x64xbf16>
    %800 = arith.truncf %797 : vector<64x64xf32> to vector<64x64xbf16>
    %cst_253 = arith.constant dense<0.000000e+00> : vector<16x64xf32>
    %801 = tpu.matmul %799, %800, %cst_253 {dimension_numbers = #tpu.dot_dimension_numbers<[1], [0], [0], [1], [0, 0, 1, 1], [], []>} : vector<16x64xbf16>, vector<64x64xbf16>, vector<16x64xf32> -> vector<16x64xf32>
    %802 = vector.broadcast %798 : vector<1x64xf32> to vector<16x64xf32>
    %803 = arith.addf %801, %802 : vector<16x64xf32>
    %c2536 = arith.constant 2536 : index
    %c0_254 = arith.constant 0 : index
    %804 = vector.load %arg2[%c2536, %c0_254] : memref<3152x64xf32, #tpu.memory_space<vmem>>, vector<64x64xf32>
    %c2600 = arith.constant 2600 : index
    %c0_255 = arith.constant 0 : index
    %805 = vector.load %arg2[%c2600, %c0_255] : memref<3152x64xf32, #tpu.memory_space<vmem>>, vector<1x64xf32>
    %806 = arith.truncf %422 : vector<16x64xf32> to vector<16x64xbf16>
    %807 = arith.truncf %804 : vector<64x64xf32> to vector<64x64xbf16>
    %cst_256 = arith.constant dense<0.000000e+00> : vector<16x64xf32>
    %808 = tpu.matmul %806, %807, %cst_256 {dimension_numbers = #tpu.dot_dimension_numbers<[1], [0], [0], [1], [0, 0, 1, 1], [], []>} : vector<16x64xbf16>, vector<64x64xbf16>, vector<16x64xf32> -> vector<16x64xf32>
    %809 = vector.broadcast %805 : vector<1x64xf32> to vector<16x64xf32>
    %810 = arith.addf %808, %809 : vector<16x64xf32>
    %c2608 = arith.constant 2608 : index
    %c0_257 = arith.constant 0 : index
    %811 = vector.load %arg2[%c2608, %c0_257] : memref<3152x64xf32, #tpu.memory_space<vmem>>, vector<64x64xf32>
    %c2672 = arith.constant 2672 : index
    %c0_258 = arith.constant 0 : index
    %812 = vector.load %arg2[%c2672, %c0_258] : memref<3152x64xf32, #tpu.memory_space<vmem>>, vector<1x64xf32>
    %813 = arith.truncf %422 : vector<16x64xf32> to vector<16x64xbf16>
    %814 = arith.truncf %811 : vector<64x64xf32> to vector<64x64xbf16>
    %cst_259 = arith.constant dense<0.000000e+00> : vector<16x64xf32>
    %815 = tpu.matmul %813, %814, %cst_259 {dimension_numbers = #tpu.dot_dimension_numbers<[1], [0], [0], [1], [0, 0, 1, 1], [], []>} : vector<16x64xbf16>, vector<64x64xbf16>, vector<16x64xf32> -> vector<16x64xf32>
    %816 = vector.broadcast %812 : vector<1x64xf32> to vector<16x64xf32>
    %817 = arith.addf %815, %816 : vector<16x64xf32>
    %c2680 = arith.constant 2680 : index
    %c0_260 = arith.constant 0 : index
    %818 = vector.load %arg2[%c2680, %c0_260] : memref<3152x64xf32, #tpu.memory_space<vmem>>, vector<64x64xf32>
    %c2744 = arith.constant 2744 : index
    %c0_261 = arith.constant 0 : index
    %819 = vector.load %arg2[%c2744, %c0_261] : memref<3152x64xf32, #tpu.memory_space<vmem>>, vector<1x64xf32>
    %820 = vector.broadcast %8 : vector<1x64xf32> to vector<16x64xf32>
    %821 = arith.mulf %803, %820 : vector<16x64xf32>
    %822 = vector.broadcast %16 : vector<1x64xf32> to vector<16x64xf32>
    %823 = arith.mulf %803, %822 : vector<16x64xf32>
    %824 = vector.broadcast %24 : vector<1x64xf32> to vector<16x64xf32>
    %825 = arith.mulf %803, %824 : vector<16x64xf32>
    %826 = vector.broadcast %32 : vector<1x64xf32> to vector<16x64xf32>
    %827 = arith.mulf %803, %826 : vector<16x64xf32>
    %828 = tpu.concatenate %821, %823, %825, %827 in 0 : vector<16x64xf32>, vector<16x64xf32>, vector<16x64xf32>, vector<16x64xf32> -> vector<64x64xf32>
    %829 = arith.truncf %828 : vector<64x64xf32> to vector<64x64xbf16>
    %830 = arith.truncf %810 : vector<16x64xf32> to vector<16x64xbf16>
    %cst_262 = arith.constant dense<0.000000e+00> : vector<64x16xf32>
    %831 = tpu.matmul %829, %830, %cst_262 {dimension_numbers = #tpu.dot_dimension_numbers<[1], [1], [0], [0], [0, 0, 1, 0], [], []>} : vector<64x64xbf16>, vector<16x64xbf16>, vector<64x16xf32> -> vector<64x16xf32>
    %cst_263 = arith.constant 2.500000e-01 : f32
    %832 = vector.broadcast %cst_263 : f32 to vector<64x16xf32>
    %833 = arith.mulf %831, %832 : vector<64x16xf32>
    %834 = arith.addf %833, %41 : vector<64x16xf32>
    %cst_264 = arith.constant dense<0xFF800000> : vector<64xf32>
    %835 = vector.multi_reduction <maximumf>, %834, %cst_264 [1] : vector<64x16xf32> to vector<64xf32>
    %836 = vector.shape_cast %835 : vector<64xf32> to vector<64x1xf32>
    %837 = vector.broadcast %836 : vector<64x1xf32> to vector<64x16xf32>
    %838 = arith.subf %834, %837 : vector<64x16xf32>
    %839 = math.exp %838 : vector<64x16xf32>
    %cst_265 = arith.constant dense<0.000000e+00> : vector<64xf32>
    %840 = vector.multi_reduction <add>, %839, %cst_265 [1] : vector<64x16xf32> to vector<64xf32>
    %841 = vector.shape_cast %840 : vector<64xf32> to vector<64x1xf32>
    %842 = tpu.reciprocal %841 {approx = true} : vector<64x1xf32> -> vector<64x1xf32>
    %843 = vector.broadcast %842 : vector<64x1xf32> to vector<64x16xf32>
    %844 = arith.mulf %839, %843 : vector<64x16xf32>
    %845 = arith.truncf %844 : vector<64x16xf32> to vector<64x16xbf16>
    %846 = arith.truncf %817 : vector<16x64xf32> to vector<16x64xbf16>
    %cst_266 = arith.constant dense<0.000000e+00> : vector<64x64xf32>
    %847 = tpu.matmul %845, %846, %cst_266 {dimension_numbers = #tpu.dot_dimension_numbers<[1], [0], [0], [1], [0, 0, 1, 1], [], []>} : vector<64x16xbf16>, vector<16x64xbf16>, vector<64x64xf32> -> vector<64x64xf32>
    %848 = vector.extract_strided_slice %847 {offsets = [0, 0], sizes = [16, 64], strides = [1, 1]} : vector<64x64xf32> to vector<16x64xf32>
    %849 = vector.broadcast %8 : vector<1x64xf32> to vector<16x64xf32>
    %850 = arith.mulf %848, %849 : vector<16x64xf32>
    %851 = vector.extract_strided_slice %847 {offsets = [16, 0], sizes = [16, 64], strides = [1, 1]} : vector<64x64xf32> to vector<16x64xf32>
    %852 = vector.broadcast %16 : vector<1x64xf32> to vector<16x64xf32>
    %853 = arith.mulf %851, %852 : vector<16x64xf32>
    %854 = arith.addf %850, %853 : vector<16x64xf32>
    %855 = vector.extract_strided_slice %847 {offsets = [32, 0], sizes = [16, 64], strides = [1, 1]} : vector<64x64xf32> to vector<16x64xf32>
    %856 = vector.broadcast %24 : vector<1x64xf32> to vector<16x64xf32>
    %857 = arith.mulf %855, %856 : vector<16x64xf32>
    %858 = arith.addf %854, %857 : vector<16x64xf32>
    %859 = vector.extract_strided_slice %847 {offsets = [48, 0], sizes = [16, 64], strides = [1, 1]} : vector<64x64xf32> to vector<16x64xf32>
    %860 = vector.broadcast %32 : vector<1x64xf32> to vector<16x64xf32>
    %861 = arith.mulf %859, %860 : vector<16x64xf32>
    %862 = arith.addf %858, %861 : vector<16x64xf32>
    %863 = arith.truncf %862 : vector<16x64xf32> to vector<16x64xbf16>
    %864 = arith.truncf %818 : vector<64x64xf32> to vector<64x64xbf16>
    %cst_267 = arith.constant dense<0.000000e+00> : vector<16x64xf32>
    %865 = tpu.matmul %863, %864, %cst_267 {dimension_numbers = #tpu.dot_dimension_numbers<[1], [0], [0], [1], [0, 0, 1, 1], [], []>} : vector<16x64xbf16>, vector<64x64xbf16>, vector<16x64xf32> -> vector<16x64xf32>
    %866 = vector.broadcast %819 : vector<1x64xf32> to vector<16x64xf32>
    %867 = arith.addf %865, %866 : vector<16x64xf32>
    %868 = arith.addf %796, %867 : vector<16x64xf32>
    %c2768 = arith.constant 2768 : index
    %c0_268 = arith.constant 0 : index
    %869 = vector.load %arg2[%c2768, %c0_268] : memref<3152x64xf32, #tpu.memory_space<vmem>>, vector<1x64xf32>
    %c2776 = arith.constant 2776 : index
    %c0_269 = arith.constant 0 : index
    %870 = vector.load %arg2[%c2776, %c0_269] : memref<3152x64xf32, #tpu.memory_space<vmem>>, vector<1x64xf32>
    %cst_270 = arith.constant dense<0.000000e+00> : vector<16xf32>
    %871 = vector.multi_reduction <add>, %868, %cst_270 [1] : vector<16x64xf32> to vector<16xf32>
    %872 = vector.shape_cast %871 : vector<16xf32> to vector<16x1xf32>
    %cst_271 = arith.constant 6.400000e+01 : f32
    %873 = vector.broadcast %cst_271 : f32 to vector<16x1xf32>
    %874 = arith.divf %872, %873 : vector<16x1xf32>
    %875 = vector.broadcast %874 : vector<16x1xf32> to vector<16x64xf32>
    %876 = arith.subf %868, %875 : vector<16x64xf32>
    %877 = arith.mulf %876, %876 : vector<16x64xf32>
    %cst_272 = arith.constant dense<0.000000e+00> : vector<16xf32>
    %878 = vector.multi_reduction <add>, %877, %cst_272 [1] : vector<16x64xf32> to vector<16xf32>
    %879 = vector.shape_cast %878 : vector<16xf32> to vector<16x1xf32>
    %cst_273 = arith.constant 6.400000e+01 : f32
    %880 = vector.broadcast %cst_273 : f32 to vector<16x1xf32>
    %881 = arith.divf %879, %880 : vector<16x1xf32>
    %cst_274 = arith.constant 9.99999996E-13 : f32
    %882 = vector.broadcast %cst_274 : f32 to vector<16x1xf32>
    %883 = arith.addf %881, %882 : vector<16x1xf32>
    %884 = math.rsqrt %883 : vector<16x1xf32>
    %885 = vector.broadcast %884 : vector<16x1xf32> to vector<16x64xf32>
    %886 = arith.mulf %876, %885 : vector<16x64xf32>
    %887 = vector.broadcast %869 : vector<1x64xf32> to vector<16x64xf32>
    %888 = arith.mulf %886, %887 : vector<16x64xf32>
    %889 = vector.broadcast %870 : vector<1x64xf32> to vector<16x64xf32>
    %890 = arith.addf %888, %889 : vector<16x64xf32>
    %c216 = arith.constant 216 : index
    %c0_275 = arith.constant 0 : index
    %891 = vector.load %arg3[%c216, %c0_275] : memref<504x128xf32, #tpu.memory_space<vmem>>, vector<64x128xf32>
    %c280 = arith.constant 280 : index
    %c0_276 = arith.constant 0 : index
    %892 = vector.load %arg3[%c280, %c0_276] : memref<504x128xf32, #tpu.memory_space<vmem>>, vector<1x128xf32>
    %893 = arith.truncf %890 : vector<16x64xf32> to vector<16x64xbf16>
    %894 = arith.truncf %891 : vector<64x128xf32> to vector<64x128xbf16>
    %cst_277 = arith.constant dense<0.000000e+00> : vector<16x128xf32>
    %895 = tpu.matmul %893, %894, %cst_277 {dimension_numbers = #tpu.dot_dimension_numbers<[1], [0], [0], [1], [0, 0, 1, 1], [], []>} : vector<16x64xbf16>, vector<64x128xbf16>, vector<16x128xf32> -> vector<16x128xf32>
    %896 = vector.broadcast %892 : vector<1x128xf32> to vector<16x128xf32>
    %897 = arith.addf %895, %896 : vector<16x128xf32>
    %898 = arith.mulf %897, %897 : vector<16x128xf32>
    %899 = arith.mulf %897, %898 : vector<16x128xf32>
    %cst_278 = arith.constant 4.471500e-02 : f32
    %900 = vector.broadcast %cst_278 : f32 to vector<16x128xf32>
    %901 = arith.mulf %900, %899 : vector<16x128xf32>
    %902 = arith.addf %897, %901 : vector<16x128xf32>
    %cst_279 = arith.constant 0.797884583 : f32
    %903 = vector.broadcast %cst_279 : f32 to vector<16x128xf32>
    %904 = arith.mulf %903, %902 : vector<16x128xf32>
    %905 = math.tanh %904 : vector<16x128xf32>
    %cst_280 = arith.constant 1.000000e+00 : f32
    %906 = vector.broadcast %cst_280 : f32 to vector<16x128xf32>
    %907 = arith.addf %906, %905 : vector<16x128xf32>
    %cst_281 = arith.constant 5.000000e-01 : f32
    %908 = vector.broadcast %cst_281 : f32 to vector<16x128xf32>
    %909 = arith.mulf %908, %907 : vector<16x128xf32>
    %910 = arith.mulf %897, %909 : vector<16x128xf32>
    %c2800 = arith.constant 2800 : index
    %c0_282 = arith.constant 0 : index
    %911 = vector.load %arg2[%c2800, %c0_282] : memref<3152x64xf32, #tpu.memory_space<vmem>>, vector<128x64xf32>
    %c2928 = arith.constant 2928 : index
    %c0_283 = arith.constant 0 : index
    %912 = vector.load %arg2[%c2928, %c0_283] : memref<3152x64xf32, #tpu.memory_space<vmem>>, vector<1x64xf32>
    %913 = arith.truncf %910 : vector<16x128xf32> to vector<16x128xbf16>
    %914 = arith.truncf %911 : vector<128x64xf32> to vector<128x64xbf16>
    %cst_284 = arith.constant dense<0.000000e+00> : vector<16x64xf32>
    %915 = tpu.matmul %913, %914, %cst_284 {dimension_numbers = #tpu.dot_dimension_numbers<[1], [0], [0], [1], [0, 0, 1, 1], [], []>} : vector<16x128xbf16>, vector<128x64xbf16>, vector<16x64xf32> -> vector<16x64xf32>
    %916 = vector.broadcast %912 : vector<1x64xf32> to vector<16x64xf32>
    %917 = arith.addf %915, %916 : vector<16x64xf32>
    %918 = arith.addf %890, %917 : vector<16x64xf32>
    %c2784 = arith.constant 2784 : index
    %c0_285 = arith.constant 0 : index
    %919 = vector.load %arg2[%c2784, %c0_285] : memref<3152x64xf32, #tpu.memory_space<vmem>>, vector<1x64xf32>
    %c2792 = arith.constant 2792 : index
    %c0_286 = arith.constant 0 : index
    %920 = vector.load %arg2[%c2792, %c0_286] : memref<3152x64xf32, #tpu.memory_space<vmem>>, vector<1x64xf32>
    %cst_287 = arith.constant dense<0.000000e+00> : vector<16xf32>
    %921 = vector.multi_reduction <add>, %918, %cst_287 [1] : vector<16x64xf32> to vector<16xf32>
    %922 = vector.shape_cast %921 : vector<16xf32> to vector<16x1xf32>
    %cst_288 = arith.constant 6.400000e+01 : f32
    %923 = vector.broadcast %cst_288 : f32 to vector<16x1xf32>
    %924 = arith.divf %922, %923 : vector<16x1xf32>
    %925 = vector.broadcast %924 : vector<16x1xf32> to vector<16x64xf32>
    %926 = arith.subf %918, %925 : vector<16x64xf32>
    %927 = arith.mulf %926, %926 : vector<16x64xf32>
    %cst_289 = arith.constant dense<0.000000e+00> : vector<16xf32>
    %928 = vector.multi_reduction <add>, %927, %cst_289 [1] : vector<16x64xf32> to vector<16xf32>
    %929 = vector.shape_cast %928 : vector<16xf32> to vector<16x1xf32>
    %cst_290 = arith.constant 6.400000e+01 : f32
    %930 = vector.broadcast %cst_290 : f32 to vector<16x1xf32>
    %931 = arith.divf %929, %930 : vector<16x1xf32>
    %cst_291 = arith.constant 9.99999996E-13 : f32
    %932 = vector.broadcast %cst_291 : f32 to vector<16x1xf32>
    %933 = arith.addf %931, %932 : vector<16x1xf32>
    %934 = math.rsqrt %933 : vector<16x1xf32>
    %935 = vector.broadcast %934 : vector<16x1xf32> to vector<16x64xf32>
    %936 = arith.mulf %926, %935 : vector<16x64xf32>
    %937 = vector.broadcast %919 : vector<1x64xf32> to vector<16x64xf32>
    %938 = arith.mulf %936, %937 : vector<16x64xf32>
    %939 = vector.broadcast %920 : vector<1x64xf32> to vector<16x64xf32>
    %940 = arith.addf %938, %939 : vector<16x64xf32>
    %c3080 = arith.constant 3080 : index
    %c0_292 = arith.constant 0 : index
    %941 = vector.load %arg2[%c3080, %c0_292] : memref<3152x64xf32, #tpu.memory_space<vmem>>, vector<64x64xf32>
    %c3144 = arith.constant 3144 : index
    %c0_293 = arith.constant 0 : index
    %942 = vector.load %arg2[%c3144, %c0_293] : memref<3152x64xf32, #tpu.memory_space<vmem>>, vector<1x64xf32>
    %943 = arith.truncf %940 : vector<16x64xf32> to vector<16x64xbf16>
    %944 = arith.truncf %941 : vector<64x64xf32> to vector<64x64xbf16>
    %cst_294 = arith.constant dense<0.000000e+00> : vector<16x64xf32>
    %945 = tpu.matmul %943, %944, %cst_294 {dimension_numbers = #tpu.dot_dimension_numbers<[1], [0], [0], [1], [0, 0, 1, 1], [], []>} : vector<16x64xbf16>, vector<64x64xbf16>, vector<16x64xf32> -> vector<16x64xf32>
    %946 = vector.broadcast %942 : vector<1x64xf32> to vector<16x64xf32>
    %947 = arith.addf %945, %946 : vector<16x64xf32>
    %cst_295 = arith.constant 0.000000e+00 : f32
    %948 = vector.broadcast %cst_295 : f32 to vector<16x64xf32>
    %949 = arith.maximumf %947, %948 : vector<16x64xf32>
    %c360 = arith.constant 360 : index
    %c0_296 = arith.constant 0 : index
    %950 = vector.load %arg3[%c360, %c0_296] : memref<504x128xf32, #tpu.memory_space<vmem>>, vector<64x128xf32>
    %c424_297 = arith.constant 424 : index
    %c0_298 = arith.constant 0 : index
    %951 = vector.load %arg3[%c424_297, %c0_298] : memref<504x128xf32, #tpu.memory_space<vmem>>, vector<1x128xf32>
    %952 = arith.truncf %949 : vector<16x64xf32> to vector<16x64xbf16>
    %953 = arith.truncf %950 : vector<64x128xf32> to vector<64x128xbf16>
    %cst_299 = arith.constant dense<0.000000e+00> : vector<16x128xf32>
    %954 = tpu.matmul %952, %953, %cst_299 {dimension_numbers = #tpu.dot_dimension_numbers<[1], [0], [0], [1], [0, 0, 1, 1], [], []>} : vector<16x64xbf16>, vector<64x128xbf16>, vector<16x128xf32> -> vector<16x128xf32>
    %955 = vector.broadcast %951 : vector<1x128xf32> to vector<16x128xf32>
    %956 = arith.addf %954, %955 : vector<16x128xf32>
    %c16_300 = arith.constant 16 : index
    %c0_301 = arith.constant 0 : index
    %957 = vector.load %arg4[%c16_300, %c0_301] : memref<48x128xf32, #tpu.memory_space<vmem>>, vector<16x128xf32>
    tpu.vector_store %arg4[%c16_300, %c0_301], %956 {strides = array<i32>} : memref<48x128xf32, #tpu.memory_space<vmem>>, vector<16x128xf32>,
    return
  }
}

</mosaic_0001>

<bundles_post_ra>
// kernel: eq.22
= control target key start
LH: loop header
LB: loop body
LE: loop exit
PB: predicated region body
PF: predicated region fallthrough
CT: control target
= control target key end

     0   :  { %vm7_vm0 = vcmask 64512   ;;  %vm13_vm1 = vcmask 130112   ;;  %s39_s0 = inlined_call_operand.vmem [shape: s32[2,8], index: 0, kind: input, shape index: {}]   ;;  %s40_s1 = inlined_call_operand.vmem [shape: s32[16], index: 1, kind: output, shape index: {}]  }
   0x1   :  { %v4_v0 = vld [vmem:[%s39_s0] sm:$0x3]  ;;  %s22_s0 = smov 8  }
   0x2   :  { %5 = vst [vmem:[#allocation1] sm:$0x3] %v4_v0 }
   0x9   :  { %v10_v1 = vld [vmem:[#allocation1 + $0x1] sm:$0x1]   ;;  %v6_v2 = vld [vmem:[#allocation1] sm:$0x1]  }
   0xa   :  { %11 = vrot.lane.b32.xlu0 %v10_v1, %s22_s0  ;;  %8 = vst.msk [vmem:[#allocation0] sm:$0x1] %vm7_vm0, %v6_v2  }
  0x7c   :  { %v12_v3 = vpop.permute.xlu0 %11  }
  0x7d   :  { %14 = vst.msk [vmem:[#allocation0] sm:$0x1] %vm13_vm1, %v12_v3  }
  0x84   :  { %v18_v4 = vld [vmem:[#allocation0] sm:$0x1] }
  0x85   :  { %20 = vst [vmem:[%s40_s1] sm:$0x1] %v18_v4 }

// kernel: forward.1
= control target key start
LH: loop header
LB: loop body
LE: loop exit
PB: predicated region body
PF: predicated region fallthrough
CT: control target
= control target key end

     0   :  { %v7040_v0 = vmov 0.0   ;;  %vm7041_vm0 = vmmov 0   ;;  %vm61_vm1 = vcmask 523264   ;;  %s9323_s2 = inlined_call_operand.vmem [shape: f32[3152,64], index: 2, kind: input, shape index: {}]   ;;  %s9324_s0 = inlined_call_operand.vmem [shape: f32[48,64], index: 0, kind: input, shape index: {}]   ;;  %s9325_s1 = inlined_call_operand.vmem [shape: f32[48,16], index: 1, kind: input, shape index: {}]   ;;  %s9326_s3 = inlined_call_operand.vmem [shape: f32[504,128], index: 3, kind: input, shape index: {}]   ;;  %s9327_s4 = inlined_call_operand.vmem [shape: f32[48,128], index: 4, kind: output, shape index: {}]  }
   0x1   :  { %6062 = vmatprep.subr.bf16.mxu1 %v7040_v0  ;;  %v106_v1 = vld [vmem:[%s9323_s2 + $0x40] sm:$0xff]  ;;  %v107_v2 = vld [vmem:[%s9323_s2 + $0x48] sm:$0xff]  ;;  %v108_v3 = vld [vmem:[%s9323_s2 + $0x50] sm:$0xff]  ;;  %6070 = vmatprep.mubr.msk.bf16.mxu1 %vm7041_vm0, %v7040_v0 }
   0x2   :  { %v115_v4 = vpack.c.bf16 %v107_v2, %v106_v1  ;;  %v109_v5 = vld [vmem:[%s9323_s2 + $0x58] sm:$0xff]  ;;  %6050 = vmatprep.subr.bf16.mxu0 %v7040_v0  ;;  %6058 = vmatprep.mubr.msk.bf16.mxu0 %vm7041_vm0, %v7040_v0  ;;  %v110_v7 = vld [vmem:[%s9323_s2 + $0x60] sm:$0xff]  ;;  %v111_v8 = vld [vmem:[%s9323_s2 + $0x68] sm:$0xff] }
   0x3   :  { %v116_v6 = vpack.c.bf16 %v109_v5, %v108_v3  ;;  %v117_v9 = vpack.c.bf16 %v111_v8, %v110_v7  ;;  %v112_v10 = vld [vmem:[%s9323_s2 + $0x70] sm:$0xff]  ;;  %v113_v11 = vld [vmem:[%s9323_s2 + $0x78] sm:$0xff]  ;;  %v40_v13 = vld [vmem:[%s9324_s0 + $0x20] sm:$0xff] }
   0x4   :  { %6063 = vmatpush3.bf16.msra.mxu1 %v115_v4  ;;  %v118_v12 = vpack.c.bf16 %v113_v11, %v112_v10  ;;  %v41_v14 = vld [vmem:[%s9324_s0 + $0x28] sm:$0xff]  ;;  %v48_v16 = vld [vmem:[%s9323_s2] sm:$0xff]  ;;  %v50_v19 = vld [vmem:[%s9323_s2 + $0x10] sm:$0xff] }
   0x5   :  { %6064 = vmatprep.subr.bf16.mxu1 %v7040_v0  ;;  %v56_v15 = vpack.c.bf16 %v41_v14, %v40_v13  ;;  %v49_v17 = vld [vmem:[%s9323_s2 + $0x8] sm:$0xff]  ;;  %v51_v20 = vld [vmem:[%s9323_s2 + $0x18] sm:$0xff]  ;;  %v52_v22 = vld [vmem:[%s9323_s2 + $0x20] sm:$0xff] }
   0x6   :  { %v57_v18 = vpack.c.bf16 %v49_v17, %v48_v16  ;;  %v58_v21 = vpack.c.bf16 %v51_v20, %v50_v19  ;;  %v53_v23 = vld [vmem:[%s9323_s2 + $0x28] sm:$0xff]  ;;  %v54_v25 = vld [vmem:[%s9323_s2 + $0x30] sm:$0xff]  ;;  %v55_v26 = vld [vmem:[%s9323_s2 + $0x38] sm:$0xff] }
   0x7   :  { %v59_v24 = vpack.c.bf16 %v53_v23, %v52_v22  ;;  %v60_v27 = vpack.c.bf16 %v55_v26, %v54_v25  ;;  %v182_v28 = vld [vmem:[%s9323_s2 + $0x88] sm:$0xff]  ;;  %v183_v29 = vld [vmem:[%s9323_s2 + $0x90] sm:$0xff]  ;;  %v184_v31 = vld [vmem:[%s9323_s2 + $0x98] sm:$0xff] }
   0x8   :  { %6065 = vmatpush3.bf16.msra.mxu1 %v116_v6  ;;  %6051 = vmatpush3.bf16.msra.mxu0 %v57_v18  ;;  %v192_v30 = vpack.c.bf16 %v183_v29, %v182_v28  ;;  %v185_v32 = vld [vmem:[%s9323_s2 + $0xa0] sm:$0xff]  ;;  %v186_v34 = vld [vmem:[%s9323_s2 + $0xa8] sm:$0xff]  ;;  %v187_v35 = vld [vmem:[%s9323_s2 + $0xb0] sm:$0xff] }
   0x9   :  { %6066 = vmatprep.subr.bf16.mxu1 %v7040_v0  ;;  %6052 = vmatprep.subr.bf16.mxu0 %v7040_v0  ;;  %v193_v33 = vpack.c.bf16 %v185_v32, %v184_v31  ;;  %v194_v36 = vpack.c.bf16 %v187_v35, %v186_v34  ;;  %v188_v37 = vld [vmem:[%s9323_s2 + $0xb8] sm:$0xff]  ;;  %v189_v38 = vld [vmem:[%s9323_s2 + $0xc0] sm:$0xff]  ;;  %v677_v7 = vld [vmem:[%s9323_s2 + $0x110] sm:$0xff] }
   0xa   :  { %v195_v39 = vpack.c.bf16 %v189_v38, %v188_v37  ;;  %v5580_v40 = vld [vmem:[%s9323_s2 + $0x80] ss:$0 sm:$0xff]  ;;  %v678_v8 = vld [vmem:[%s9323_s2 + $0x118] sm:$0xff]  ;;  %v680_v13 = vld [vmem:[%s9323_s2 + $0x128] sm:$0xff] }
   0xb   :  { %v686_v10 = vpack.c.bf16 %v678_v8, %v677_v7  ;;  %v665_v11 = vld [vmem:[%s9323_s2 + $0xd8] sm:$0xff]  ;;  %v667_v16 = vld [vmem:[%s9323_s2 + $0xe8] sm:$0xff]  ;;  %v681_v19 = vld [vmem:[%s9323_s2 + $0x130] sm:$0xff] }
   0xc   :  { %6067 = vmatpush3.bf16.msra.mxu1 %v117_v9  ;;  %6053 = vmatpush3.bf16.msra.mxu0 %v58_v21  ;;  %v664_v9 = vld [vmem:[%s9323_s2 + $0xd0] sm:$0xff]  ;;  %v682_v20 = vld [vmem:[%s9323_s2 + $0x138] sm:$0xff]  ;;  %v683_v25 = vld [vmem:[%s9323_s2 + $0x140] sm:$0xff] }
   0xd   :  { %6068 = vmatprep.subr.bf16.mxu1 %v7040_v0  ;;  %6054 = vmatprep.subr.bf16.mxu0 %v7040_v0  ;;  %v673_v14 = vpack.c.bf16 %v665_v11, %v664_v9  ;;  %v668_v21 = vld [vmem:[%s9323_s2 + $0xf0] sm:$0xff]  ;;  %v669_v22 = vld [vmem:[%s9323_s2 + $0xf8] sm:$0xff]  ;;  %v688_v23 = vpack.c.bf16 %v682_v20, %v681_v19  ;;  %v684_v26 = vld [vmem:[%s9323_s2 + $0x148] sm:$0xff]  ;;  %v7047_v11 = vmov 1326507024  }
   0xe   :  { %v671_v28 = vld [vmem:[%s9323_s2 + $0x108] sm:$0xff]  ;;  %v689_v29 = vpack.c.bf16 %v684_v26, %v683_v25 }
   0xf   :  { %v5582_v31 = vld [vmem:[%s9323_s2 + $0xc8] ss:$0 sm:$0xff] }
  0x10   :  { %6069 = vmatpush3.bf16.msra.mxu1 %v118_v12  ;;  %6055 = vmatpush3.bf16.msra.mxu0 %v59_v24  ;;  %v679_v12 = vld [vmem:[%s9323_s2 + $0x120] sm:$0xff]  ;;  %v675_v24 = vpack.c.bf16 %v669_v22, %v668_v21 }
  0x11   :  { %6086 = vmatprep.subr.bf16.mxu1 %v7040_v0  ;;  %6056 = vmatprep.subr.bf16.mxu0 %v7040_v0  ;;  %v687_v17 = vpack.c.bf16 %v680_v13, %v679_v12 }
  0x13   :  { %6071 = vmatmul.mubr.msk.bf16.vlgmr.msra.gmra.mrb[0].mxu1 %vm61_vm1, %v56_v15 }
  0x14   :  { %6094 = vmatprep.mubr.msk.bf16.mxu1 %vm7041_vm0, %v7040_v0  ;;  %6057 = vmatpush3.bf16.msra.mxu0 %v60_v27  ;;  %v670_v27 = vld [vmem:[%s9323_s2 + $0x100] sm:$0xff] }
  0x15   :  { %6074 = vmatprep.subr.bf16.mxu0 %v7040_v0  ;;  %6087 = vmatpush3.bf16.msra.mxu1 %v686_v10 }
  0x16   :  { %6088 = vmatprep.subr.bf16.mxu1 %v7040_v0 }
  0x17   :  { %6059 = vmatmul.mubr.msk.bf16.vlgmr.msra.gmra.mrb[0].mxu0 %vm61_vm1, %v56_v15  ;;  %v666_v15 = vld [vmem:[%s9323_s2 + $0xe0] sm:$0xff] }
  0x18   :  { %6082 = vmatprep.mubr.msk.bf16.mxu0 %vm7041_vm0, %v7040_v0  ;;  %6075 = vmatpush3.bf16.msra.mxu0 %v192_v30  ;;  %v674_v18 = vpack.c.bf16 %v667_v16, %v666_v15  ;;  %v676_v30 = vpack.c.bf16 %v671_v28, %v670_v27 }
  0x19   :  { %6076 = vmatprep.subr.bf16.mxu0 %v7040_v0  ;;  %6089 = vmatpush3.bf16.msra.mxu1 %v687_v17 }
  0x1a   :  { %6090 = vmatprep.subr.bf16.mxu1 %v7040_v0 }
  0x1c   :  { %6077 = vmatpush3.bf16.msra.mxu0 %v193_v33 }
  0x1d   :  { %6078 = vmatprep.subr.bf16.mxu0 %v7040_v0  ;;  %6091 = vmatpush3.bf16.msra.mxu1 %v688_v23 }
  0x1e   :  { %6092 = vmatprep.subr.bf16.mxu1 %v7040_v0 }
  0x20   :  { %6079 = vmatpush3.bf16.msra.mxu0 %v194_v36 }
  0x21   :  { %6080 = vmatprep.subr.bf16.mxu0 %v7040_v0  ;;  %6093 = vmatpush3.bf16.msra.mxu1 %v689_v29 }
  0x22   :  { %6110 = vmatprep.subr.bf16.mxu1 %v7040_v0 }
  0x24   :  { %6081 = vmatpush3.bf16.msra.mxu0 %v195_v39 }
  0x25   :  { %6098 = vmatprep.subr.bf16.mxu0 %v7040_v0 }
  0xe6   :  { %v157_v41 = vpop.f32.mrb[0].mxu1 }
  0xe7   :  { %v158_v42 = vadd.f32 %v5580_v40, %v157_v41  ;;  %v6072_v43 = vpop.f32.mrb[1].mxu1 }
  0xe8   :  { %v160_v44 = vpop.f32.mrb[2].mxu1 }
  0xe9   :  { %v164_v45 = vmul.f32 %v158_v42, %v158_v42  ;;  %v161_v46 = vadd.f32 %v5580_v40, %v160_v44  ;;  %v6073_v47 = vpop.f32.mrb[3].mxu1 }
  0xea   :  { %v99_v3 = vpop.f32.mrb[0].mxu0 }
  0xeb   :  { %v166_v48 = vmul.f32 %v164_v45, %v158_v42  ;;  %v165_v49 = vmul.f32 %v161_v46, %v161_v46  ;;  %v6060_v4 = vpop.f32.mrb[1].mxu0 }
  0xec   :  { %v102_v5 = vpop.f32.mrb[2].mxu0  ;;  %v7046_v4 = vmov 920167782  }
  0xed   :  { %v168_v50 = vmul.f32 0.044715, %v166_v48  ;;  %v167_v51 = vmul.f32 %v165_v49, %v161_v46  ;;  %v6061_v6 = vpop.f32.mrb[3].mxu0 }
  0xef   :  { %v170_v52 = vadd.f32 %v168_v50, %v158_v42  ;;  %v169_v53 = vmul.f32 0.044715, %v167_v51 }
  0xf1   :  { %v172_v54 = vmul.f32 0.7978846, %v170_v52  ;;  %v171_v55 = vadd.f32 %v169_v53, %v161_v46 }
  0xf3   :  { %6764 = vtanh.f32 %v172_v54  ;;  %v173_v56 = vmul.f32 0.7978846, %v171_v55 }
  0xf5   :  { %6766 = vtanh.f32 %v173_v56 }
  0xfd   :  { %v6765_v57 = vpop.eup %6764 }
  0xfe   :  { %v176_v58 = vadd.f32 1.0, %v6765_v57 }
  0xff   :  { %v6767_v59 = vpop.eup %6766 }
 0x100   :  { %v178_v60 = vmul.f32 0.5, %v176_v58  ;;  %v177_v61 = vadd.f32 1.0, %v6767_v59  ;;  %v7042_v58 = vmov 683565275  }
 0x102   :  { %v179_v62 = vmul.f32 0.5, %v177_v61  ;;  %v180_v63 = vmul.f32 %v178_v60, %v158_v42  ;;  %v7043_v61 = vmov 2475754826  }
 0x104   :  { %v181_v1 = vmul.f32 %v179_v62, %v161_v46 }
 0x106   :  { %v191_v2 = vpack.c.bf16 %v181_v1, %v180_v63  ;;  %v7044_v63 = vmov 2131351028  }
 0x108   :  { %6083 = vmatmul.mubr.msk.bf16.vlgmr.msra.gmra.mrb[4].mxu0 %vm61_vm1, %v191_v2  ;;  %v7045_v2 = vmov 2102212464  }
 0x109   :  { %6106 = vmatprep.mubr.msk.bf16.mxu0 %vm7041_vm0, %v7040_v0  ;;  %6099 = vmatpush3.bf16.msra.mxu0 %v673_v14 }
 0x10a   :  { %6100 = vmatprep.subr.bf16.mxu0 %v7040_v0 }
 0x10d   :  { %6101 = vmatpush3.bf16.msra.mxu0 %v674_v18 }
 0x10e   :  { %6102 = vmatprep.subr.bf16.mxu0 %v7040_v0 }
 0x111   :  { %6103 = vmatpush3.bf16.msra.mxu0 %v675_v24 }
 0x112   :  { %6104 = vmatprep.subr.bf16.mxu0 %v7040_v0 }
 0x115   :  { %6105 = vmatpush3.bf16.msra.mxu0 %v676_v30 }
 0x116   :  { %6122 = vmatprep.subr.bf16.mxu0 %v7040_v0 }
 0x1db   :  { %v237_v32 = vpop.f32.mrb[4].mxu0 }
 0x1dc   :  { %v238_v33 = vadd.f32 %v5582_v31, %v237_v32  ;;  %v6084_v34 = vpop.f32.mrb[5].mxu0 }
 0x1dd   :  { %v240_v35 = vpop.f32.mrb[6].mxu0 }
 0x1de   :  { %v7240_v36 = vmul.f32 %v238_v33, %v99_v3  ;;  %v241_v37 = vadd.f32 %v5582_v31, %v240_v35  ;;  %v6085_v38 = vpop.f32.mrb[7].mxu0 }
 0x1e0   :  { %v246_v39 = vand.u32 2147483647, %v7240_v36  ;;  %v249_v40 = vand.u32 2139095040, %v7240_v36  ;;  %v7244_v41 = vmul.f32 %v241_v37, %v102_v5 }
 0x1e2   :  { %v250_v42 = vshrl.u32 %v249_v40, 23  ;;  %v253_v43 = vand.u32 8388607, %v246_v39  ;;  %v352_v44 = vand.u32 2139095040, %v7244_v41  ;;  %v349_v46 = vand.u32 2147483647, %v7244_v41 }
 0x1e4   :  { %v5584_v45 = vadd.s32 4294967169, %v250_v42  ;;  %v353_v47 = vshrl.u32 %v352_v44, 23  ;;  %v254_v49 = vor.u32 8388608, %v253_v43  ;;  %v356_v51 = vand.u32 8388607, %v349_v46 }
 0x1e6   :  { %v256_v48 = vadd.s32 1, %v5584_v45  ;;  %v5588_v50 = vadd.s32 4294967169, %v353_v47  ;;  %v7252_v56 = vshll.u32 %v254_v49, 8  ;;  %v357_v60 = vor.u32 8388608, %v356_v51 }
 0x1e8   :  { %vm257_vm2 = vcmp.gt.s32.totalorder %v256_v48, 0  ;;  %v359_v53 = vadd.s32 1, %v5588_v50  ;;  %v397_v30 = vshll.u32 %v357_v60, 8 }
 0x1e9   :  { %v258_v52 = vsel %vm257_vm2, %v256_v48, 0  ;;  %vm248_vm2 = vcmp.lt.s32.totalorder %v7240_v36, 0 }
 0x1ea   :  { %v259_v54 = vshrl.u32 %v258_v52, 5  ;;  %v260_v55 = vand.u32 31, %v258_v52  ;;  %vm360_vm3 = vcmp.gt.s32.totalorder %v359_v53, 0 }
 0x1eb   :  { %v361_v16 = vsel %vm360_vm3, %v359_v53, 0  ;;  %vm247_vm3 = vcmp.le.f32.partialorder %v246_v39, 0.7853982 }
 0x1ec   :  { %v261_v57 = vsub.s32 32, %v260_v55  ;;  %v263_v59 = vshll.u32 %v7042_v58, %v260_v55  ;;  %v266_v62 = vshll.u32 %v7043_v61, %v260_v55  ;;  %v269_v1 = vshll.u32 %v7044_v63, %v260_v55 }
 0x1ed   :  { %v272_v3 = vshll.u32 %v7045_v2, %v260_v55  ;;  %v275_v5 = vshll.u32 %v7046_v4, %v260_v55  ;;  %vm278_vm4 = vcmp.lt.s32.totalorder %v259_v54, 1  ;;  %vm280_vm5 = vcmp.lt.s32.totalorder %v259_v54, 3 }
 0x1ee   :  { %v264_v6 = vshrl.u32 %v7043_v61, %v261_v57  ;;  %v267_v7 = vshrl.u32 %v7044_v63, %v261_v57  ;;  %v270_v8 = vshrl.u32 %v7045_v2, %v261_v57  ;;  %v262_v9 = vshrl.u32 %v7042_v58, %v261_v57 }
 0x1ef   :  { %v273_v10 = vshrl.u32 %v7046_v4, %v261_v57  ;;  %v276_v12 = vshrl.u32 %v7047_v11, %v261_v57  ;;  %vm281_vm6 = vcmp.lt.s32.totalorder %v259_v54, 4  ;;  %v363_v19 = vand.u32 31, %v361_v16 }
 0x1f0   :  { %v265_v13 = vor.u32 %v264_v6, %v263_v59  ;;  %v268_v14 = vor.u32 %v267_v7, %v266_v62  ;;  %v271_v15 = vor.u32 %v270_v8, %v269_v1  ;;  %vm279_vm7 = vcmp.lt.s32.totalorder %v259_v54, 2 }
 0x1f1   :  { %v274_v17 = vor.u32 %v273_v10, %v272_v3  ;;  %v277_v18 = vor.u32 %v276_v12, %v275_v5  ;;  %v364_v27 = vsub.s32 32, %v363_v19  ;;  %v362_v34 = vshrl.u32 %v361_v16, 5 }
 0x1f2   :  { %v282_v20 = vsel %vm278_vm4, %v262_v9, %v265_v13  ;;  %v283_v21 = vsel %vm281_vm6, %v271_v15, 2102212464  ;;  %v286_v22 = vsel %vm278_vm4, %v265_v13, %v268_v14  ;;  %v290_v23 = vsel %vm278_vm4, %v268_v14, %v271_v15 }
 0x1f3   :  { %v284_v24 = vsel %vm280_vm5, %v268_v14, %v283_v21  ;;  %v287_v25 = vsel %vm281_vm6, %v274_v17, 920167782  ;;  %v291_v26 = vsel %vm281_vm6, %v277_v18, 1326507024  ;;  %v366_v42 = vshll.u32 %v7042_v58, %v363_v19 }
 0x1f4   :  { %v288_v28 = vsel %vm280_vm5, %v271_v15, %v287_v25  ;;  %v292_v29 = vsel %vm280_vm5, %v274_v17, %v291_v26  ;;  %v285_v31 = vsel %vm279_vm7, %v282_v20, %v284_v24  ;;  %v367_v43 = vshrl.u32 %v7043_v61, %v364_v27 }
 0x1f5   :  { %v289_v32 = vsel %vm279_vm7, %v286_v22, %v288_v28  ;;  %v293_v33 = vsel %vm279_vm7, %v290_v23, %v292_v29  ;;  %v369_v44 = vshll.u32 %v7043_v61, %v363_v19  ;;  %v370_v45 = vshrl.u32 %v7044_v63, %v364_v27 }
 0x1f6   :  { %v7264_v35 = vmul.u32.u64.low %v7252_v56, %v293_v33  ;;  %v7265_v37 = vmul.u32.u64.high %v7252_v56, %v293_v33, %v7264_v35  ;;  %v7268_v38 = vmul.u32.u64.low %v7252_v56, %v289_v32  ;;  %v7269_v40 = vmul.u32.u64.high %v7252_v56, %v289_v32, %v7268_v38 }
 0x1f7   :  { %v372_v47 = vshll.u32 %v7044_v63, %v363_v19  ;;  %v373_v48 = vshrl.u32 %v7045_v2, %v364_v27  ;;  %v375_v49 = vshll.u32 %v7045_v2, %v363_v19  ;;  %v376_v50 = vshrl.u32 %v7046_v4, %v364_v27 }
 0x1f8   :  { %v368_v51 = vor.u32 %v367_v43, %v366_v42  ;;  %v371_v52 = vor.u32 %v370_v45, %v369_v44  ;;  %v378_v53 = vshll.u32 %v7046_v4, %v363_v19  ;;  %v379_v54 = vshrl.u32 %v7047_v11, %v364_v27 }
 0x1f9   :  { %v301_v55 = vmul.u32 %v7252_v56, %v285_v31  ;;  %vm303_vm8 = vc.u32 %v7265_v37, %v7268_v38  ;;  %v304_v57 = vadd.s32 1, %v7269_v40  ;;  %v374_v59 = vor.u32 %v373_v48, %v372_v47 }
 0x1fa   :  { %v365_v60 = vshrl.u32 %v7042_v58, %v364_v27  ;;  %v377_v61 = vor.u32 %v376_v50, %v375_v49  ;;  %v380_v62 = vor.u32 %v379_v54, %v378_v53  ;;  %vm381_vm9 = vcmp.lt.s32.totalorder %v362_v34, 1 }
 0x1fb   :  { %v305_v63 = vsel %vm303_vm8, %v304_v57, %v7269_v40  ;;  %vm383_vm10 = vcmp.lt.s32.totalorder %v362_v34, 3  ;;  %vm384_vm11 = vcmp.lt.s32.totalorder %v362_v34, 4  ;;  %v389_v1 = vsel %vm381_vm9, %v368_v51, %v371_v52 }
 0x1fc   :  { %v306_v2 = vadd.s32 %v305_v63, %v301_v55  ;;  %v386_v3 = vsel %vm384_vm11, %v374_v59, 2102212464  ;;  %v390_v4 = vsel %vm384_vm11, %v377_v61, 920167782  ;;  %v393_v56 = vsel %vm381_vm9, %v371_v52, %v374_v59 }
 0x1fd   :  { %vm382_vm12 = vcmp.lt.s32.totalorder %v362_v34, 2  ;;  %v385_v5 = vsel %vm381_vm9, %v365_v60, %v368_v51  ;;  %v391_v6 = vsel %vm383_vm10, %v374_v59, %v390_v4  ;;  %v394_v7 = vsel %vm384_vm11, %v380_v62, 1326507024 }
 0x1fe   :  { %v307_v8 = vadd.s32 536870912, %v306_v2  ;;  %v387_v9 = vsel %vm383_vm10, %v371_v52, %v386_v3  ;;  %v392_v10 = vsel %vm382_vm12, %v389_v1, %v391_v6  ;;  %v395_v58 = vsel %vm383_vm10, %v377_v61, %v394_v7 }
 0x1ff   :  { %v396_v11 = vsel %vm382_vm12, %v393_v56, %v395_v58  ;;  %v7279_v12 = vmul.u32.u64.low %v397_v30, %v392_v10  ;;  %v7280_v13 = vmul.u32.u64.high %v397_v30, %v392_v10, %v7279_v12  ;;  %v388_v17 = vsel %vm382_vm12, %v385_v5, %v387_v9 }
 0x200   :  { %v308_v14 = vshrl.u32 %v307_v8, 30  ;;  %v7282_v15 = vmul.u32.u64.low %v397_v30, %v396_v11  ;;  %v7283_v16 = vmul.u32.u64.high %v397_v30, %v396_v11, %v7282_v15  ;;  %v404_v21 = vmul.u32 %v397_v30, %v388_v17 }
 0x201   :  { %v407_v19 = vadd.s32 1, %v7280_v13  ;;  %v302_v34 = vadd.s32 %v7268_v38, %v7265_v37  ;;  %vm351_vm4 = vcmp.lt.s32.totalorder %v7244_v41, 0  ;;  %vm350_vm5 = vcmp.le.f32.partialorder %v349_v46, 0.7853982 }
 0x202   :  { %v309_v18 = vshll.u32 %v308_v14, 30  ;;  %vm406_vm13 = vc.u32 %v7283_v16, %v7279_v12  ;;  %v405_v57 = vadd.s32 %v7279_v12, %v7283_v16  ;;  %v332_v3 = vsub.s32 4, %v308_v14 }
 0x203   :  { %v408_v22 = vsel %vm406_vm13, %v407_v19, %v7280_v13  ;;  %vm338_vm10 = vweird.f32 %v7240_v36 }
 0x204   :  { %v310_v20 = vsub.s32 %v306_v2, %v309_v18  ;;  %v409_v24 = vadd.s32 %v408_v22, %v404_v21  ;;  %v333_v7 = vsel %vm248_vm2, %v332_v3, %v308_v14 }
 0x205   :  { %v335_v10 = vsel %vm247_vm3, 0, %v333_v7 }
 0x206   :  { %v312_v23 = vsub.s32 0, %v310_v20  ;;  %v410_v26 = vadd.s32 536870912, %v409_v24  ;;  %v547_v12 = vadd.s32 3, %v335_v10  ;;  %v339_v14 = vand.u32 3, %v335_v10 }
 0x208   :  { %v5585_v25 = vmin.u32 %v312_v23, %v310_v20  ;;  %v411_v28 = vshrl.u32 %v410_v26, 30  ;;  %v548_v18 = vand.u32 3, %v547_v12  ;;  %vm341_vm6 = vcmp.eq.s32.totalorder %v339_v14, 0 }
 0x209   :  { %vm344_vm7 = vcmp.eq.s32.totalorder %v339_v14, 2  ;;  %vm340_vm12 = vcmp.lt.s32.totalorder %v339_v14, 2 }
 0x20a   :  { %v314_v27 = vclz %v5585_v25  ;;  %v412_v31 = vshll.u32 %v411_v28, 30  ;;  %v435_v8 = vsub.s32 4, %v411_v28  ;;  %vm550_vm8 = vcmp.eq.s32.totalorder %v548_v18, 0 }
 0x20b   :  { %vm553_vm9 = vcmp.eq.s32.totalorder %v548_v18, 2  ;;  %vm549_vm11 = vcmp.lt.s32.totalorder %v548_v18, 2 }
 0x20c   :  { %v5586_v29 = vadd.s32 4294967294, %v314_v27  ;;  %v413_v32 = vsub.s32 %v409_v24, %v412_v31  ;;  %v436_v11 = vsel %vm351_vm4, %v435_v8, %v411_v28 }
 0x20d   :  { %v438_v16 = vsel %vm350_vm5, 0, %v436_v11 }
 0x20e   :  { %vm5587_vm14 = vcmp.lt.s32.totalorder %v5586_v29, 0  ;;  %v415_v40 = vsub.s32 0, %v413_v32  ;;  %v651_v19 = vadd.s32 3, %v438_v16  ;;  %v442_v22 = vand.u32 3, %v438_v16 }
 0x20f   :  { %v317_v33 = vsel %vm5587_vm14, 0, %v5586_v29 }
 0x210   :  { %v318_v35 = vsub.s32 32, %v317_v33  ;;  %v322_v30 = vsub.s32 4294967266, %v317_v33  ;;  %v319_v42 = vshll.u32 %v310_v20, %v317_v33  ;;  %v5589_v45 = vmin.u32 %v415_v40, %v413_v32 }
 0x211   :  { %v652_v23 = vand.u32 3, %v651_v19  ;;  %vm443_vm13 = vcmp.lt.s32.totalorder %v442_v22, 2 }
 0x212   :  { %v320_v43 = vshrl.u32 %v302_v34, %v318_v35  ;;  %v323_v44 = vadd.s32 127, %v322_v30  ;;  %v417_v49 = vclz %v5589_v45 }
 0x213   :  { %vm657_vm14 = vcmp.eq.s32.totalorder %v652_v23, 2 }
 0x214   :  { %v321_v47 = vor.u32 %v320_v43, %v319_v42  ;;  %v324_v48 = vshll.u32 %v323_v44, 23  ;;  %v5590_v51 = vadd.s32 4294967294, %v417_v49 }
 0x216   :  { %v325_v50 = vor.u32 4788187, %v324_v48  ;;  %v328_v53 = vcvt.s32.f32 %v321_v47  ;;  %vm5591_vm15 = vcmp.lt.s32.totalorder %v5590_v51, 0 }
 0x217   :  { %v420_v54 = vsel %vm5591_vm15, 0, %v5590_v51  ;;  %vm444_vm15 = vcmp.eq.s32.totalorder %v442_v22, 0 }
 0x218   :  { %v326_v52 = vand.u32 2147483647, %v325_v50  ;;  %v421_v37 = vsub.s32 32, %v420_v54  ;;  %v425_v38 = vsub.s32 4294967266, %v420_v54  ;;  %v422_v60 = vshll.u32 %v413_v32, %v420_v54 }
 0x21a   :  { %v329_v55 = vmul.f32 %v328_v53, %v326_v52  ;;  %v423_v61 = vshrl.u32 %v405_v57, %v421_v37  ;;  %v426_v62 = vadd.s32 127, %v425_v38  ;;  %v805_v57 = vld [vmem:[%s9323_s2 + $0x168] sm:$0xff]  ;;  %v806_v37 = vld [vmem:[%s9323_s2 + $0x170] sm:$0xff] }
 0x21b   :  { %v814_v38 = vpack.c.bf16 %v806_v37, %v805_v57  ;;  %v908_v37 = vld [vmem:[%s9323_s2 + $0x1b0] sm:$0xff] }
 0x21c   :  { %v330_v59 = vxor.u32 2147483648, %v329_v55  ;;  %v424_v1 = vor.u32 %v423_v61, %v422_v60  ;;  %v427_v2 = vshll.u32 %v426_v62, 23  ;;  %v808_v60 = vld [vmem:[%s9323_s2 + $0x180] sm:$0xff]  ;;  %v809_v62 = vld [vmem:[%s9323_s2 + $0x188] sm:$0xff] }
 0x21e   :  { %v331_v63 = vsel %vm248_vm2, %v330_v59, %v329_v55  ;;  %v428_v56 = vor.u32 4788187, %v427_v2  ;;  %v431_v6 = vcvt.s32.f32 %v424_v1  ;;  %vm447_vm2 = vcmp.eq.s32.totalorder %v442_v22, 2  ;;  %v807_v59 = vld [vmem:[%s9323_s2 + $0x178] sm:$0xff] }
 0x21f   :  { %v334_v4 = vsel %vm247_vm3, %v7240_v36, %v331_v63  ;;  %vm653_vm3 = vcmp.lt.s32.totalorder %v652_v23, 2  ;;  %v803_v36 = vld [vmem:[%s9323_s2 + $0x158] sm:$0xff]  ;;  %v815_v61 = vpack.c.bf16 %v808_v60, %v807_v59  ;;  %v810_v63 = vld [vmem:[%s9323_s2 + $0x190] sm:$0xff] }
 0x220   :  { %6768 = vcosq.f32 %v334_v4  ;;  %v429_v5 = vand.u32 2147483647, %v428_v56  ;;  %v816_v1 = vpack.c.bf16 %v810_v63, %v809_v62  ;;  %v970_v60 = vld [vmem:[%s9323_s2 + $0x1f8] sm:$0xff]  ;;  %v910_v63 = vld [vmem:[%s9323_s2 + $0x1c0] sm:$0xff] }
 0x221   :  { %6770 = vsinq.f32 %v334_v4  ;;  %v5602_v4 = vld [vmem:[%s9323_s2 + $0x150] ss:$0 sm:$0xff] }
 0x222   :  { %v432_v9 = vmul.f32 %v431_v6, %v429_v5 }
 0x224   :  { %v433_v58 = vxor.u32 2147483648, %v432_v9 }
 0x226   :  { %v434_v39 = vsel %vm351_vm4, %v433_v58, %v432_v9  ;;  %vm654_vm4 = vcmp.eq.s32.totalorder %v652_v23, 0 }
 0x227   :  { %v437_v13 = vsel %vm350_vm5, %v7244_v41, %v434_v39  ;;  %vm441_vm5 = vweird.f32 %v7244_v41  ;;  %v804_v41 = vld [vmem:[%s9323_s2 + $0x160] sm:$0xff] }
 0x228   :  { %6772 = vcosq.f32 %v437_v13  ;;  %v813_v55 = vpack.c.bf16 %v804_v41, %v803_v36 }
 0x229   :  { %6774 = vsinq.f32 %v437_v13 }
 0x22a   :  { %v6769_v15 = vpop.eup %6768 }
 0x22b   :  { %v6771_v17 = vpop.eup %6770  ;;  %v345_v21 = vxor.u32 2147483648, %v6769_v15 }
 0x22c   :  { %v342_v20 = vxor.u32 2147483648, %v6771_v17 }
 0x22d   :  { %v555_v24 = vsel %vm553_vm9, %v345_v21, %v6771_v17  ;;  %v346_v26 = vsel %vm344_vm7, %v345_v21, %v6771_v17 }
 0x22e   :  { %v552_v46 = vsel %vm550_vm8, %v6769_v15, %v342_v20  ;;  %v343_v25 = vsel %vm341_vm6, %v6769_v15, %v342_v20 }
 0x22f   :  { %v556_v31 = vsel %vm549_vm11, %v552_v46, %v555_v24  ;;  %v347_v32 = vsel %vm340_vm12, %v343_v25, %v346_v26 }
 0x230   :  { %v557_v30 = vsel %vm338_vm10, nan, %v556_v31  ;;  %v348_v42 = vsel %vm338_vm10, nan, %v347_v32  ;;  %v5603_v31 = vld [vmem:[%s9323_s2 + $0x198] ss:$0 sm:$0xff] }
 0x231   :  { %v662_v49 = vmul.f32 0.125, %v557_v30  ;;  %v452_v51 = vmul.f32 0.125, %v348_v42 }
 0x232   :  { %v6773_v27 = vpop.eup %6772 }
 0x233   :  { %v6775_v28 = vpop.eup %6774  ;;  %v448_v29 = vxor.u32 2147483648, %v6773_v27 }
 0x234   :  { %v445_v33 = vxor.u32 2147483648, %v6775_v28 }
 0x235   :  { %v659_v34 = vsel %vm657_vm14, %v448_v29, %v6775_v28  ;;  %v449_v35 = vsel %vm447_vm2, %v448_v29, %v6775_v28  ;;  %vm1204_vm2 = vcmask 130048  }
 0x236   :  { %v656_v40 = vsel %vm654_vm4, %v6773_v27, %v445_v33  ;;  %v446_v43 = vsel %vm444_vm15, %v6773_v27, %v445_v33  ;;  %v36_v33 = vld [vmem:[%s9324_s0] sm:$0xff] }
 0x237   :  { %v660_v44 = vsel %vm653_vm3, %v656_v40, %v659_v34  ;;  %v450_v45 = vsel %vm443_vm13, %v446_v43, %v449_v35  ;;  %v37_v40 = vld [vmem:[%s9324_s0 + $0x8] sm:$0xff] }
 0x238   :  { %v661_v47 = vsel %vm441_vm5, nan, %v660_v44  ;;  %v451_v48 = vsel %vm441_vm5, nan, %v450_v45 }
 0x239   :  { %v663_v50 = vmul.f32 0.125, %v661_v47  ;;  %v453_v52 = vmul.f32 0.125, %v451_v48 }
 0x23b   :  { %v685_v53 = vpack.c.bf16 %v663_v50, %v662_v49  ;;  %v672_v54 = vpack.c.bf16 %v453_v52, %v452_v51 }
 0x23d   :  { %6095 = vmatmul.mubr.msk.bf16.vlgmr.msra.gmra.mrb[4].mxu1 %vm61_vm1, %v685_v53  ;;  %6107 = vmatmul.mubr.msk.bf16.vlgmr.msra.gmra.mrb[8].mxu0 %vm61_vm1, %v672_v54 }
 0x23e   :  { %6118 = vmatprep.mubr.msk.bf16.mxu1 %vm7041_vm0, %v7040_v0  ;;  %6130 = vmatprep.mubr.msk.bf16.mxu0 %vm7041_vm0, %v7040_v0 }
 0x23f   :  { %6111 = vmatpush3.bf16.msra.mxu1 %v813_v55 }
 0x240   :  { %6112 = vmatprep.subr.bf16.mxu1 %v7040_v0 }
 0x243   :  { %6113 = vmatpush3.bf16.msra.mxu1 %v814_v38  ;;  %v909_v38 = vld [vmem:[%s9323_s2 + $0x1b8] sm:$0xff] }
 0x244   :  { %6114 = vmatprep.subr.bf16.mxu1 %v7040_v0  ;;  %v918_v59 = vpack.c.bf16 %v909_v38, %v908_v37 }
 0x246   :  { %6123 = vmatpush3.bf16.msra.mxu0 %v918_v59 }
 0x247   :  { %6115 = vmatpush3.bf16.msra.mxu1 %v815_v61  ;;  %v971_v61 = vld [vmem:[%s9323_s2 + $0x200] sm:$0xff]  ;;  %6124 = vmatprep.subr.bf16.mxu0 %v7040_v0 }
 0x248   :  { %6116 = vmatprep.subr.bf16.mxu1 %v7040_v0  ;;  %v979_v62 = vpack.c.bf16 %v971_v61, %v970_v60 }
 0x24b   :  { %6117 = vmatpush3.bf16.msra.mxu1 %v816_v1  ;;  %v911_v1 = vld [vmem:[%s9323_s2 + $0x1c8] sm:$0xff] }
 0x24c   :  { %6134 = vmatprep.subr.bf16.mxu1 %v7040_v0 }
 0x310   :  { %v727_v2 = vpop.f32.mrb[4].mxu1  ;;  %v771_v3 = vpop.f32.mrb[8].mxu0 }
 0x311   :  { %v772_v56 = vadd.f32 %v771_v3, %v727_v2  ;;  %v6096_v5 = vpop.f32.mrb[5].mxu1  ;;  %v6108_v6 = vpop.f32.mrb[9].mxu0  ;;  %v919_v2 = vpack.c.bf16 %v911_v1, %v910_v63  ;;  %v972_v3 = vld [vmem:[%s9323_s2 + $0x208] sm:$0xff] }
 0x312   :  { %v730_v7 = vpop.f32.mrb[6].mxu1  ;;  %v774_v8 = vpop.f32.mrb[10].mxu0  ;;  %v912_v5 = vld [vmem:[%s9323_s2 + $0x1d0] sm:$0xff]  ;;  %v913_v6 = vld [vmem:[%s9323_s2 + $0x1d8] sm:$0xff] }
 0x313   :  { %v783_v9 = vadd.f32 %v5602_v4, %v772_v56  ;;  %v775_v10 = vadd.f32 %v774_v8, %v730_v7  ;;  %v6097_v58 = vpop.f32.mrb[7].mxu1  ;;  %v6109_v11 = vpop.f32.mrb[11].mxu0  ;;  %6125 = vmatpush3.bf16.msra.mxu0 %v919_v2  ;;  %v920_v7 = vpack.c.bf16 %v913_v6, %v912_v5  ;;  %v974_v8 = vld [vmem:[%s9323_s2 + $0x218] sm:$0xff] }
 0x314   :  { %6126 = vmatprep.subr.bf16.mxu0 %v7040_v0  ;;  %v915_v11 = vld [vmem:[%s9323_s2 + $0x1e8] sm:$0xff] }
 0x315   :  { %v785_v39 = vmul.f32 %v783_v9, %v783_v9  ;;  %v784_v12 = vadd.f32 %v5602_v4, %v775_v10  ;;  %v973_v4 = vld [vmem:[%s9323_s2 + $0x210] sm:$0xff]  ;;  %v914_v10 = vld [vmem:[%s9323_s2 + $0x1e0] sm:$0xff] }
 0x316   :  { %v980_v56 = vpack.c.bf16 %v973_v4, %v972_v3 }
 0x317   :  { %v787_v13 = vmul.f32 %v785_v39, %v783_v9  ;;  %v786_v15 = vmul.f32 %v784_v12, %v784_v12  ;;  %v976_v39 = vld [vmem:[%s9323_s2 + $0x228] sm:$0xff]  ;;  %6127 = vmatpush3.bf16.msra.mxu0 %v920_v7 }
 0x318   :  { %6128 = vmatprep.subr.bf16.mxu0 %v7040_v0 }
 0x319   :  { %v789_v16 = vmul.f32 0.044715, %v787_v13  ;;  %v788_v17 = vmul.f32 %v786_v15, %v784_v12  ;;  %v921_v13 = vpack.c.bf16 %v915_v11, %v914_v10 }
 0x31b   :  { %v791_v14 = vadd.f32 %v789_v16, %v783_v9  ;;  %v790_v18 = vmul.f32 0.044715, %v788_v17  ;;  %6129 = vmatpush3.bf16.msra.mxu0 %v921_v13 }
 0x31c   :  { %6146 = vmatprep.subr.bf16.mxu0 %v7040_v0 }
 0x31d   :  { %v793_v19 = vmul.f32 0.7978846, %v791_v14  ;;  %v792_v20 = vadd.f32 %v790_v18, %v784_v12 }
 0x31f   :  { %6776 = vtanh.f32 %v793_v19  ;;  %v794_v21 = vmul.f32 0.7978846, %v792_v20 }
 0x321   :  { %6778 = vtanh.f32 %v794_v21 }
 0x329   :  { %v6777_v22 = vpop.eup %6776 }
 0x32a   :  { %v797_v23 = vadd.f32 1.0, %v6777_v22 }
 0x32b   :  { %v6779_v46 = vpop.eup %6778 }
 0x32c   :  { %v799_v24 = vmul.f32 0.5, %v797_v23  ;;  %v798_v25 = vadd.f32 1.0, %v6779_v46  ;;  %v5605_v23 = vld [vmem:[%s9323_s2 + $0x1a0] ss:$0 sm:$0xff] }
 0x32e   :  { %v800_v26 = vmul.f32 0.5, %v798_v25  ;;  %v801_v27 = vmul.f32 %v799_v24, %v783_v9  ;;  %v975_v9 = vld [vmem:[%s9323_s2 + $0x220] sm:$0xff] }
 0x32f   :  { %v981_v58 = vpack.c.bf16 %v975_v9, %v974_v8 }
 0x330   :  { %v802_v28 = vmul.f32 %v800_v26, %v784_v12  ;;  %v977_v12 = vld [vmem:[%s9323_s2 + $0x230] sm:$0xff]  ;;  %v5606_v26 = vld [vmem:[%s9323_s2 + $0x1a8] ss:$0 sm:$0xff] }
 0x331   :  { %v982_v15 = vpack.c.bf16 %v977_v12, %v976_v39 }
 0x332   :  { %v812_v29 = vpack.c.bf16 %v802_v28, %v801_v27  ;;  %v1028_v28 = vld [vmem:[%s9323_s2 + $0x240] sm:$0xff] }
 0x334   :  { %6119 = vmatmul.mubr.msk.bf16.vlgmr.msra.gmra.mrb[8].mxu1 %vm61_vm1, %v812_v29  ;;  %v1029_v29 = vld [vmem:[%s9323_s2 + $0x248] sm:$0xff] }
 0x335   :  { %6142 = vmatprep.mubr.msk.bf16.mxu1 %vm7041_vm0, %v7040_v0  ;;  %6135 = vmatpush3.bf16.msra.mxu1 %v979_v62 }
 0x336   :  { %6136 = vmatprep.subr.bf16.mxu1 %v7040_v0 }
 0x339   :  { %6137 = vmatpush3.bf16.msra.mxu1 %v980_v56 }
 0x33a   :  { %6138 = vmatprep.subr.bf16.mxu1 %v7040_v0 }
 0x33d   :  { %6139 = vmatpush3.bf16.msra.mxu1 %v981_v58 }
 0x33e   :  { %6140 = vmatprep.subr.bf16.mxu1 %v7040_v0 }
 0x341   :  { %6141 = vmatpush3.bf16.msra.mxu1 %v982_v15 }
 0x407   :  { %v858_v32 = vpop.f32.mrb[8].mxu1 }
 0x408   :  { %v859_v34 = vadd.f32 %v5603_v31, %v858_v32  ;;  %v6120_v35 = vpop.f32.mrb[9].mxu1 }
 0x409   :  { %v861_v30 = vpop.f32.mrb[10].mxu1  ;;  %v1030_v35 = vld [vmem:[%s9323_s2 + $0x250] sm:$0xff] }
 0x40a   :  { %v862_v42 = vadd.f32 %v5603_v31, %v861_v30  ;;  %v6121_v43 = vpop.f32.mrb[11].mxu1  ;;  %v865_v44 = vadd.f32 %v859_v34, %v36_v33  ;;  %v1037_v33 = vpack.c.bf16 %v1029_v29, %v1028_v28  ;;  %v1031_v30 = vld [vmem:[%s9323_s2 + $0x258] sm:$0xff]  ;;  %v7504_v29 = vld [vmem:[%s9325_s1 + $0x8] sm:$0xff] }
 0x40b   :  { %v1033_v43 = vld [vmem:[%s9323_s2 + $0x268] sm:$0xff] }
 0x40c   :  { %v869_v45 = vsel %vm61_vm1, %v865_v44, 0.0  ;;  %v866_v47 = vadd.f32 %v862_v42, %v37_v40  ;;  %v1038_v40 = vpack.c.bf16 %v1031_v30, %v1030_v35  ;;  %v1032_v42 = vld [vmem:[%s9323_s2 + $0x260] sm:$0xff] }
 0x40d   :  { %870 = vadd.xlane.f32.xlu0 %v869_v45  ;;  %v1034_v45 = vld [vmem:[%s9323_s2 + $0x270] sm:$0xff] }
 0x40e   :  { %v872_v48 = vsel %vm61_vm1, %v866_v47, 0.0 }
 0x411   :  { %873 = vadd.xlane.f32.xlu0 %v872_v48 }
 0x49a   :  { %v871_v49 = vpop.xlane.xlu0 %870 }
 0x49b   :  { %v876_v50 = vmul.f32 0.015625, %v871_v49  ;;  %v18_v49 = vlaneseq }
 0x49d   :  { %v878_v51 = vsub.f32 %v865_v44, %v876_v50  ;;  %v1039_v44 = vpack.c.bf16 %v1033_v43, %v1032_v42  ;;  %v19_v50 = vand.u32 127, %v18_v49 }
 0x49e   :  { %v874_v52 = vpop.xlane.xlu0 %873 }
 0x49f   :  { %v877_v53 = vmul.f32 0.015625, %v874_v52  ;;  %v880_v54 = vmul.f32 %v878_v51, %v878_v51  ;;  %vm24_vm6 = vcmp.ge.s32.totalorder %v19_v50, 16  ;;  %vm25_vm7 = vcmp.lt.s32.totalorder %v19_v50, 32 }
 0x4a0   :  { %vm28_vm8 = vcmp.ge.s32.totalorder %v19_v50, 32  ;;  %vm29_vm9 = vcmp.lt.s32.totalorder %v19_v50, 48  ;;  %vm32_vm10 = vcmp.ge.s32.totalorder %v19_v50, 48  ;;  %vm33_vm11 = vcmp.lt.s32.totalorder %v19_v50, 64  ;;  %vm26_vm12 = vmand %vm24_vm6, %vm25_vm7 }
 0x4a1   :  { %v879_v36 = vsub.f32 %v866_v47, %v877_v53  ;;  %v882_v41 = vsel %vm61_vm1, %v880_v54, 0.0  ;;  %v1035_v47 = vld [vmem:[%s9323_s2 + $0x278] sm:$0xff]  ;;  %vm30_vm13 = vmand %vm28_vm8, %vm29_vm9  ;;  %vm21_vm14 = vcmp.lt.s32.totalorder %v19_v50, 16  ;;  %v7467_v37 = vsel %vm26_vm12, 1.0, %v7040_v0 }
 0x4a2   :  { %883 = vadd.xlane.f32.xlu1 %v882_v41  ;;  %v1040_v48 = vpack.c.bf16 %v1035_v47, %v1034_v45  ;;  %vm34_vm15 = vmand %vm32_vm10, %vm33_vm11  ;;  %v7470_v38 = vsel %vm30_vm13, 1.0, %v7040_v0 }
 0x4a3   :  { %v881_v55 = vmul.f32 %v879_v36, %v879_v36  ;;  %v7473_v59 = vsel %vm34_vm15, 1.0, %v7040_v0 }
 0x4a5   :  { %v885_v57 = vsel %vm61_vm1, %v881_v55, 0.0 }
 0x4a6   :  { %886 = vadd.xlane.f32.xlu1 %v885_v57  ;;  %v7464_v57 = vsel %vm21_vm14, 1.0, %v7040_v0 }
 0x52f   :  { %v884_v16 = vpop.xlane.xlu1 %883 }
 0x530   :  { %v888_v17 = vmul.f32 0.015625, %v884_v16  ;;  %v5611_v16 = vld [vmem:[%s9323_s2 + $0x280] ss:$0 sm:$0xff] }
 0x532   :  { %v890_v14 = vadd.f32 1e-12, %v888_v17 }
 0x533   :  { %v887_v18 = vpop.xlane.xlu1 %886 }
 0x534   :  { %6780 = vrsqrt.f32 %v890_v14  ;;  %v889_v19 = vmul.f32 0.015625, %v887_v18 }
 0x536   :  { %v891_v20 = vadd.f32 1e-12, %v889_v19 }
 0x538   :  { %6782 = vrsqrt.f32 %v891_v20 }
 0x53e   :  { %v6781_v21 = vpop.eup %6780 }
 0x53f   :  { %v894_v22 = vmul.f32 %v6781_v21, %v878_v51  ;;  %v5607_v51 = vld [vmem:[%s9323_s2 + $0x1f0] ss:$0 sm:$0xff] }
 0x541   :  { %v900_v24 = vmul.f32 %v5605_v23, %v894_v22 }
 0x542   :  { %v6783_v46 = vpop.eup %6782 }
 0x543   :  { %v895_v25 = vmul.f32 %v6783_v46, %v879_v36  ;;  %v7425_v31 = vadd.f32 %v5606_v26, %v900_v24  ;;  %v5609_v36 = vld [vmem:[%s9323_s2 + $0x238] ss:$0 sm:$0xff]  ;;  %v7499_v24 = vld [vmem:[%s9325_s1] sm:$0xff] }
 0x545   :  { %v901_v27 = vmul.f32 %v5605_v23, %v895_v25 }
 0x547   :  { %v7427_v32 = vadd.f32 %v5606_v26, %v901_v27 }
 0x549   :  { %v917_v34 = vpack.c.bf16 %v7427_v32, %v7425_v31 }
 0x54b   :  { %6131 = vmatmul.mubr.msk.bf16.vlgmr.msra.gmra.mrb[12].mxu0 %vm61_vm1, %v917_v34  ;;  %6143 = vmatmul.mubr.msk.bf16.vlgmr.msra.gmra.mrb[12].mxu1 %vm61_vm1, %v917_v34 }
 0x54c   :  { %6147 = vmatpush3.bf16.msra.mxu0 %v1037_v33  ;;  %6154 = vmatprep.mubr.msk.bf16.mxu0 %vm7041_vm0, %v7040_v0 }
 0x54d   :  { %6148 = vmatprep.subr.bf16.mxu0 %v7040_v0 }
 0x550   :  { %6149 = vmatpush3.bf16.msra.mxu0 %v1038_v40 }
 0x551   :  { %6150 = vmatprep.subr.bf16.mxu0 %v7040_v0 }
 0x554   :  { %6151 = vmatpush3.bf16.msra.mxu0 %v1039_v44 }
 0x555   :  { %6152 = vmatprep.subr.bf16.mxu0 %v7040_v0 }
 0x558   :  { %6153 = vmatpush3.bf16.msra.mxu0 %v1040_v48 }
 0x55b   :  { %6155 = vmatmul.mubr.msk.bf16.vlgmr.msra.gmra.mrb[16].mxu0 %vm61_vm1, %v917_v34 }
 0x61e   :  { %v963_v52 = vpop.f32.mrb[12].mxu0  ;;  %v1021_v53 = vpop.f32.mrb[12].mxu1 }
 0x61f   :  { %v964_v54 = vadd.f32 %v5607_v51, %v963_v52  ;;  %v6132_v41 = vpop.f32.mrb[13].mxu0  ;;  %v6144_v55 = vpop.f32.mrb[13].mxu1  ;;  %v1022_v1 = vadd.f32 %v5609_v36, %v1021_v53 }
 0x620   :  { %v966_v60 = vpop.f32.mrb[14].mxu0  ;;  %v1024_v61 = vpop.f32.mrb[14].mxu1 }
 0x621   :  { %v6133_v62 = vpop.f32.mrb[15].mxu0  ;;  %v6145_v63 = vpop.f32.mrb[15].mxu1  ;;  %v967_v2 = vadd.f32 %v5607_v51, %v966_v60  ;;  %v1025_v3 = vadd.f32 %v5609_v36, %v1024_v61  ;;  %v1095_v4 = vmul.f32 %v964_v54, %v7464_v57  ;;  %v1097_v56 = vmul.f32 %v964_v54, %v7467_v37 }
 0x622   :  { %v1099_v5 = vmul.f32 %v964_v54, %v7470_v38  ;;  %v1101_v6 = vmul.f32 %v964_v54, %v7473_v59 }
 0x623   :  { %v1096_v7 = vmul.f32 %v967_v2, %v7464_v57  ;;  %v1098_v8 = vmul.f32 %v967_v2, %v7467_v37  ;;  %v1100_v9 = vmul.f32 %v967_v2, %v7470_v38  ;;  %v1102_v10 = vmul.f32 %v967_v2, %v7473_v59 }
 0x624   :  { %v1107_v58 = vpack.c.bf16 %v1025_v3, %v1022_v1 }
 0x625   :  { %v1104_v11 = vpack.c.bf16 %v1098_v8, %v1097_v56  ;;  %v1103_v39 = vpack.c.bf16 %v1096_v7, %v1095_v4  ;;  %v1105_v12 = vpack.c.bf16 %v1100_v9, %v1099_v5  ;;  %v1106_v13 = vpack.c.bf16 %v1102_v10, %v1101_v6 }
 0x626   :  { %6742 = vmatprep.subr.msk.bf16.mxu1 %vm61_vm1, %v1107_v58  ;;  %v1121_v15 = vsel %vm61_vm1, %v1107_v58, 0 }
 0x627   :  { %6159 = vmatpush3.bf16.xpose.msra.mxu1 %v1121_v15  ;;  %6160 = vmatprep.mubr.msk.bf16.mxu1 %vm61_vm1, %v1103_v39 }
 0x628   :  { %6178 = vmatprep.subr.bf16.mxu1 %v7040_v0 }
 0x62e   :  { %v1079_v17 = vpop.f32.mrb[16].mxu0  ;;  %6161 = vmatmul.mubr.msk.bf16.vlgmr.msra.gmra.mrb[16].mxu1 %vm61_vm1, %v1104_v11 }
 0x62f   :  { %v6156_v14 = vpop.f32.mrb[17].mxu0  ;;  %6164 = vmatprep.mubr.msk.bf16.mxu1 %vm61_vm1, %v1105_v12  ;;  %v1080_v19 = vadd.f32 %v5611_v16, %v1079_v17 }
 0x630   :  { %v1082_v18 = vpop.f32.mrb[18].mxu0 }
 0x631   :  { %v1083_v20 = vadd.f32 %v5611_v16, %v1082_v18  ;;  %v6157_v21 = vpop.f32.mrb[19].mxu0 }
 0x633   :  { %v1297_v22 = vpack.c.bf16 %v1083_v20, %v1080_v19 }
 0x635   :  { %6168 = vmatprep.subr.bf16.mxu0 %v1297_v22 }
 0x636   :  { %6169 = vmatpush3.bf16.msra.mxu0 %v1297_v22  ;;  %6165 = vmatmul.mubr.msk.bf16.gmra.mrb[20].mxu1 %vm61_vm1, %v1106_v13 }
 0x637   :  { %6190 = vmatprep.subr.bf16.mxu0 %v7040_v0  ;;  %6186 = vmatprep.mubr.msk.bf16.mxu1 %vm7041_vm0, %v7040_v0 }
 0x701   :  { %v6162_v23 = vpop.f32.mrb[16].mxu1 }
 0x702   :  { %v1157_v46 = vpop.f32.mrb[17].mxu1  ;;  %v1190_v25 = vmul.f32 0.25, %v6162_v23 }
 0x703   :  { %v1188_v26 = vmul.f32 0.25, %v1157_v46  ;;  %v6163_v27 = vpop.f32.mrb[18].mxu1 }
 0x704   :  { %v1160_v28 = vpop.f32.mrb[19].mxu1  ;;  %v1191_v33 = vmul.f32 0.25, %v6163_v27  ;;  %v1198_v42 = vadd.f32 %v1190_v25, %v7499_v24 }
 0x705   :  { %v1189_v34 = vmul.f32 0.25, %v1160_v28  ;;  %v1196_v35 = vadd.f32 %v1188_v26, %v7499_v24 }
 0x706   :  { %v1199_v45 = vadd.f32 %v1191_v33, %v7504_v29  ;;  %v1211_v51 = vsel %vm1204_vm2, %v1198_v42, -inf }
 0x707   :  { %v1205_v30 = vsel %vm1204_vm2, %v1196_v35, -inf  ;;  %v1197_v40 = vadd.f32 %v1189_v34, %v7504_v29 }
 0x708   :  { %1206 = vmax.xlane.f32.xlu0 %v1205_v30  ;;  %v1214_v36 = vsel %vm1204_vm2, %v1199_v45, -inf }
 0x709   :  { %v6166_v43 = vpop.f32.mrb[20].mxu1  ;;  %v1208_v44 = vsel %vm1204_vm2, %v1197_v40, -inf }
 0x70a   :  { %1209 = vmax.xlane.f32.xlu1 %v1208_v44  ;;  %v1173_v47 = vpop.f32.mrb[21].mxu1  ;;  %v1194_v48 = vmul.f32 0.25, %v6166_v43 }
 0x70b   :  { %v1192_v49 = vmul.f32 0.25, %v1173_v47  ;;  %v6167_v50 = vpop.f32.mrb[22].mxu1 }
 0x70c   :  { %1212 = vmax.xlane.f32.xlu0 %v1211_v51  ;;  %v1176_v52 = vpop.f32.mrb[23].mxu1  ;;  %v1195_v53 = vmul.f32 0.25, %v6167_v50  ;;  %v1202_v61 = vadd.f32 %v1194_v48, %v7499_v24 }
 0x70d   :  { %v1193_v54 = vmul.f32 0.25, %v1176_v52  ;;  %v1200_v41 = vadd.f32 %v1192_v49, %v7499_v24 }
 0x70e   :  { %1215 = vmax.xlane.f32.xlu1 %v1214_v36  ;;  %v1203_v63 = vadd.f32 %v1195_v53, %v7504_v29  ;;  %v1223_v1 = vsel %vm1204_vm2, %v1202_v61, -inf }
 0x70f   :  { %v1217_v55 = vsel %vm1204_vm2, %v1200_v41, -inf  ;;  %v1201_v60 = vadd.f32 %v1193_v54, %v7504_v29 }
 0x710   :  { %1218 = vmax.xlane.f32.xlu0 %v1217_v55  ;;  %v1226_v2 = vsel %vm1204_vm2, %v1203_v63, -inf }
 0x711   :  { %v1220_v62 = vsel %vm1204_vm2, %v1201_v60, -inf }
 0x712   :  { %1221 = vmax.xlane.f32.xlu1 %v1220_v62 }
 0x714   :  { %1224 = vmax.xlane.f32.xlu0 %v1223_v1 }
 0x716   :  { %1227 = vmax.xlane.f32.xlu1 %v1226_v2 }
 0x795   :  { %v1207_v3 = vpop.xlane.xlu0 %1206 }
 0x796   :  { %v1229_v4 = vsub.f32 %v1196_v35, %v1207_v3 }
 0x797   :  { %v1210_v56 = vpop.xlane.xlu1 %1209 }
 0x798   :  { %v1237_v5 = vmul.f32 1.442695, %v1229_v4  ;;  %v1230_v6 = vsub.f32 %v1197_v40, %v1210_v56 }
 0x799   :  { %v1213_v7 = vpop.xlane.xlu0 %1212 }
 0x79a   :  { %6784 = vpow2.f32 %v1237_v5  ;;  %v1239_v8 = vmul.f32 1.442695, %v1230_v6  ;;  %v1231_v9 = vsub.f32 %v1198_v42, %v1213_v7 }
 0x79b   :  { %v1216_v10 = vpop.xlane.xlu1 %1215 }
 0x79c   :  { %6786 = vpow2.f32 %v1239_v8  ;;  %v1241_v58 = vmul.f32 1.442695, %v1231_v9  ;;  %v1232_v11 = vsub.f32 %v1199_v45, %v1216_v10 }
 0x79d   :  { %v1219_v39 = vpop.xlane.xlu0 %1218 }
 0x79e   :  { %6788 = vpow2.f32 %v1241_v58  ;;  %v1243_v12 = vmul.f32 1.442695, %v1232_v11  ;;  %v1233_v13 = vsub.f32 %v1200_v41, %v1219_v39 }
 0x79f   :  { %v1222_v15 = vpop.xlane.xlu1 %1221 }
 0x7a0   :  { %6790 = vpow2.f32 %v1243_v12  ;;  %v1245_v16 = vmul.f32 1.442695, %v1233_v13  ;;  %v1234_v17 = vsub.f32 %v1201_v60, %v1222_v15  ;;  %v1086_v13 = vld [vmem:[%s9323_s2 + $0x288] sm:$0xff]  ;;  %v1087_v15 = vld [vmem:[%s9323_s2 + $0x290] sm:$0xff] }
 0x7a1   :  { %v1225_v14 = vpop.xlane.xlu0 %1224 }
 0x7a2   :  { %6792 = vpow2.f32 %v1245_v16  ;;  %v1247_v18 = vmul.f32 1.442695, %v1234_v17  ;;  %v1235_v19 = vsub.f32 %v1202_v61, %v1225_v14  ;;  %v1390_v16 = vpack.c.bf16 %v1087_v15, %v1086_v13  ;;  %v1088_v17 = vld [vmem:[%s9323_s2 + $0x298] sm:$0xff]  ;;  %v1089_v14 = vld [vmem:[%s9323_s2 + $0x2a0] sm:$0xff]  ;;  %v1485_v13 = vld [vmem:[%s9326_s3 + $0x8] sm:$0xff] }
 0x7a3   :  { %v1228_v20 = vpop.xlane.xlu1 %1227 }
 0x7a4   :  { %v6785_v21 = vpop.eup %6784  ;;  %6794 = vpow2.f32 %v1247_v18  ;;  %v1249_v22 = vmul.f32 1.442695, %v1235_v19  ;;  %v1236_v23 = vsub.f32 %v1203_v63, %v1228_v20  ;;  %6179 = vmatpush3.bf16.msra.mxu1 %v1390_v16  ;;  %v1391_v18 = vpack.c.bf16 %v1089_v14, %v1088_v17  ;;  %v1090_v19 = vld [vmem:[%s9323_s2 + $0x2a8] sm:$0xff]  ;;  %v1091_v20 = vld [vmem:[%s9323_s2 + $0x2b0] sm:$0xff]  ;;  %v1487_v17 = vld [vmem:[%s9326_s3 + $0x18] sm:$0xff] }
 0x7a5   :  { %v1253_v46 = vsel %vm1204_vm2, %v6785_v21, 0.0  ;;  %6180 = vmatprep.subr.bf16.mxu1 %v7040_v0  ;;  %v1486_v16 = vld [vmem:[%s9326_s3 + $0x10] sm:$0xff] }
 0x7a6   :  { %v6787_v25 = vpop.eup %6786  ;;  %6796 = vpow2.f32 %v1249_v22  ;;  %v1251_v26 = vmul.f32 1.442695, %v1236_v23  ;;  %1254 = vadd.xlane.f32.xlu0 %v1253_v46  ;;  %v1092_v22 = vld [vmem:[%s9323_s2 + $0x2b8] sm:$0xff]  ;;  %v1093_v23 = vld [vmem:[%s9323_s2 + $0x2c0] sm:$0xff]  ;;  %v1495_v14 = vpack.c.bf16 %v1487_v17, %v1486_v16 }
 0x7a7   :  { %v1256_v27 = vsel %vm1204_vm2, %v6787_v25, 0.0  ;;  %v1393_v46 = vpack.c.bf16 %v1093_v23, %v1092_v22  ;;  %v1491_v22 = vld [vmem:[%s9326_s3 + $0x38] sm:$0xff] }
 0x7a8   :  { %v6789_v28 = vpop.eup %6788  ;;  %6798 = vpow2.f32 %v1251_v26  ;;  %1257 = vadd.xlane.f32.xlu1 %v1256_v27  ;;  %6181 = vmatpush3.bf16.msra.mxu1 %v1391_v18  ;;  %v1488_v18 = vld [vmem:[%s9326_s3 + $0x20] sm:$0xff] }
 0x7a9   :  { %v1259_v33 = vsel %vm1204_vm2, %v6789_v28, 0.0  ;;  %6182 = vmatprep.subr.bf16.mxu1 %v7040_v0 }
 0x7aa   :  { %v6791_v34 = vpop.eup %6790  ;;  %1260 = vadd.xlane.f32.xlu0 %v1259_v33 }
 0x7ab   :  { %v1262_v35 = vsel %vm1204_vm2, %v6791_v34, 0.0 }
 0x7ac   :  { %v6793_v30 = vpop.eup %6792  ;;  %1263 = vadd.xlane.f32.xlu1 %v1262_v35 }
 0x7ad   :  { %v1265_v40 = vsel %vm1204_vm2, %v6793_v30, 0.0 }
 0x7ae   :  { %v6795_v42 = vpop.eup %6794  ;;  %1266 = vadd.xlane.f32.xlu0 %v1265_v40 }
 0x7af   :  { %v1268_v43 = vsel %vm1204_vm2, %v6795_v42, 0.0 }
 0x7b0   :  { %v6797_v44 = vpop.eup %6796  ;;  %1269 = vadd.xlane.f32.xlu1 %v1268_v43 }
 0x7b1   :  { %v1271_v45 = vsel %vm1204_vm2, %v6797_v44, 0.0 }
 0x7b2   :  { %v6799_v47 = vpop.eup %6798  ;;  %1272 = vadd.xlane.f32.xlu0 %v1271_v45 }
 0x7b3   :  { %v1274_v48 = vsel %vm1204_vm2, %v6799_v47, 0.0 }
 0x7b4   :  { %1275 = vadd.xlane.f32.xlu1 %v1274_v48 }
 0x833   :  { %v1255_v49 = vpop.xlane.xlu0 %1254 }
 0x834   :  { %6800 = vrcp.f32 %v1255_v49 }
 0x835   :  { %v1258_v50 = vpop.xlane.xlu1 %1257 }
 0x836   :  { %6802 = vrcp.f32 %v1258_v50 }
 0x837   :  { %v1261_v51 = vpop.xlane.xlu0 %1260 }
 0x838   :  { %6804 = vrcp.f32 %v1261_v51 }
 0x839   :  { %v1264_v52 = vpop.xlane.xlu1 %1263 }
 0x83a   :  { %6806 = vrcp.f32 %v1264_v52 }
 0x83b   :  { %v1267_v53 = vpop.xlane.xlu0 %1266 }
 0x83c   :  { %6808 = vrcp.f32 %v1267_v53 }
 0x83d   :  { %v1270_v54 = vpop.xlane.xlu1 %1269 }
 0x83e   :  { %v6801_v36 = vpop.eup %6800  ;;  %6810 = vrcp.f32 %v1270_v54 }
 0x83f   :  { %v1273_v41 = vpop.xlane.xlu0 %1272  ;;  %v1285_v61 = vmul.f32 %v6801_v36, %v6785_v21  ;;  %v1392_v21 = vpack.c.bf16 %v1091_v20, %v1090_v19  ;;  %v1489_v19 = vld [vmem:[%s9326_s3 + $0x28] sm:$0xff] }
 0x840   :  { %v6803_v55 = vpop.eup %6802  ;;  %6812 = vrcp.f32 %v1273_v41  ;;  %v1496_v20 = vpack.c.bf16 %v1489_v19, %v1488_v18 }
 0x841   :  { %v1276_v60 = vpop.xlane.xlu1 %1275  ;;  %v1286_v62 = vmul.f32 %v6803_v55, %v6787_v25  ;;  %6183 = vmatpush3.bf16.msra.mxu1 %v1392_v21  ;;  %v5621_v55 = vld [vmem:[%s9323_s2 + $0x2c8] ss:$0 sm:$0xff]  ;;  %v1490_v21 = vld [vmem:[%s9326_s3 + $0x30] sm:$0xff] }
 0x842   :  { %v6805_v63 = vpop.eup %6804  ;;  %6814 = vrcp.f32 %v1276_v60  ;;  %6184 = vmatprep.subr.bf16.mxu1 %v7040_v0  ;;  %v1497_v23 = vpack.c.bf16 %v1491_v22, %v1490_v21 }
 0x843   :  { %v1293_v1 = vpack.c.bf16 %v1286_v62, %v1285_v61  ;;  %v1287_v3 = vmul.f32 %v6805_v63, %v6789_v28 }
 0x844   :  { %v6807_v2 = vpop.eup %6806 }
 0x845   :  { %v1288_v4 = vmul.f32 %v6807_v2, %v6791_v34  ;;  %6170 = vmatprep.mubr.msk.bf16.mxu0 %vm1204_vm2, %v1293_v1  ;;  %6185 = vmatpush3.bf16.msra.mxu1 %v1393_v46 }
 0x846   :  { %v6809_v56 = vpop.eup %6808  ;;  %6202 = vmatprep.subr.bf16.mxu1 %v7040_v0 }
 0x847   :  { %v1294_v5 = vpack.c.bf16 %v1288_v4, %v1287_v3  ;;  %v1289_v7 = vmul.f32 %v6809_v56, %v6793_v30 }
 0x848   :  { %v6811_v6 = vpop.eup %6810 }
 0x849   :  { %6171 = vmatmul.mubr.msk.bf16.vlgmr.msra.gmra.mrb[20].mxu0 %vm1204_vm2, %v1294_v5  ;;  %v1290_v8 = vmul.f32 %v6811_v6, %v6795_v42 }
 0x84a   :  { %v6813_v9 = vpop.eup %6812 }
 0x84b   :  { %v1295_v10 = vpack.c.bf16 %v1290_v8, %v1289_v7  ;;  %v1291_v11 = vmul.f32 %v6813_v9, %v6797_v44 }
 0x84c   :  { %v6815_v58 = vpop.eup %6814 }
 0x84d   :  { %6174 = vmatprep.mubr.msk.bf16.mxu0 %vm1204_vm2, %v1295_v10  ;;  %v1292_v39 = vmul.f32 %v6815_v58, %v6799_v47 }
 0x84f   :  { %v1296_v12 = vpack.c.bf16 %v1292_v39, %v1291_v11 }
 0x851   :  { %6175 = vmatmul.mubr.msk.bf16.gmra.mrb[24].mxu0 %vm1204_vm2, %v1296_v12 }
 0x852   :  { %6198 = vmatprep.mubr.msk.bf16.mxu0 %vm7041_vm0, %v7040_v0 }
 0x91c   :  { %v6172_v25 = vpop.f32.mrb[20].mxu0 }
 0x91d   :  { %v1377_v26 = vmul.f32 %v6172_v25, %v7467_v37  ;;  %v1344_v27 = vpop.f32.mrb[21].mxu0 }
 0x91e   :  { %v1375_v28 = vmul.f32 %v1344_v27, %v7464_v57  ;;  %v6173_v33 = vpop.f32.mrb[22].mxu0 }
 0x91f   :  { %v1378_v34 = vmul.f32 %v6173_v33, %v7467_v37  ;;  %v1347_v35 = vpop.f32.mrb[23].mxu0 }
 0x920   :  { %v1379_v30 = vadd.f32 %v1377_v26, %v1375_v28  ;;  %v1376_v40 = vmul.f32 %v1347_v35, %v7464_v57  ;;  %v5623_v35 = vld [vmem:[%s9323_s2 + $0x2d0] ss:$0 sm:$0xff] }
 0x922   :  { %v1380_v42 = vadd.f32 %v1378_v34, %v1376_v40 }
 0x924   :  { %v6176_v43 = vpop.f32.mrb[24].mxu0 }
 0x925   :  { %v1360_v44 = vpop.f32.mrb[25].mxu0  ;;  %v1385_v49 = vmul.f32 %v6176_v43, %v7473_v59 }
 0x926   :  { %v1381_v45 = vmul.f32 %v1360_v44, %v7470_v38  ;;  %v6177_v47 = vpop.f32.mrb[26].mxu0  ;;  %v5624_v44 = vld [vmem:[%s9323_s2 + $0x2d8] ss:$0 sm:$0xff] }
 0x927   :  { %v1363_v48 = vpop.f32.mrb[27].mxu0  ;;  %v1386_v53 = vmul.f32 %v6177_v47, %v7473_v59 }
 0x928   :  { %v1383_v50 = vadd.f32 %v1381_v45, %v1379_v30  ;;  %v1382_v51 = vmul.f32 %v1363_v48, %v7470_v38 }
 0x92a   :  { %v1387_v52 = vadd.f32 %v1385_v49, %v1383_v50  ;;  %v1384_v54 = vadd.f32 %v1382_v51, %v1380_v42  ;;  %v1564_v50 = vld [vmem:[%s9323_s2 + $0x2e0] sm:$0xff]  ;;  %v1565_v51 = vld [vmem:[%s9323_s2 + $0x2e8] sm:$0xff] }
 0x92c   :  { %v1388_v36 = vadd.f32 %v1386_v53, %v1384_v54  ;;  %v1566_v53 = vld [vmem:[%s9323_s2 + $0x2f0] sm:$0xff]  ;;  %v1567_v54 = vld [vmem:[%s9323_s2 + $0x2f8] sm:$0xff] }
 0x92e   :  { %v1389_v41 = vpack.c.bf16 %v1388_v36, %v1387_v52  ;;  %v1582_v52 = vpack.c.bf16 %v1565_v51, %v1564_v50  ;;  %v1583_v36 = vpack.c.bf16 %v1567_v54, %v1566_v53 }
 0x930   :  { %6187 = vmatmul.mubr.msk.bf16.vlgmr.msra.gmra.mrb[24].mxu1 %vm61_vm1, %v1389_v41  ;;  %v1568_v41 = vld [vmem:[%s9323_s2 + $0x300] sm:$0xff] }
 0x931   :  { %6218 = vmatprep.mubr.msk.bf16.mxu1 %vm7041_vm0, %v7040_v0  ;;  %6203 = vmatpush3.bf16.msra.mxu1 %v1582_v52 }
 0x932   :  { %6204 = vmatprep.subr.bf16.mxu1 %v7040_v0 }
 0x935   :  { %6205 = vmatpush3.bf16.msra.mxu1 %v1583_v36 }
 0x936   :  { %6206 = vmatprep.subr.bf16.mxu1 %v7040_v0 }
 0xa03   :  { %v1435_v60 = vpop.f32.mrb[24].mxu1 }
 0xa04   :  { %v1436_v61 = vadd.f32 %v5621_v55, %v1435_v60  ;;  %v6188_v62 = vpop.f32.mrb[25].mxu1 }
 0xa05   :  { %v1438_v63 = vpop.f32.mrb[26].mxu1  ;;  %v1571_v62 = vld [vmem:[%s9323_s2 + $0x318] sm:$0xff] }
 0xa06   :  { %v1439_v1 = vadd.f32 %v5621_v55, %v1438_v63  ;;  %v6189_v2 = vpop.f32.mrb[27].mxu1  ;;  %v1442_v3 = vadd.f32 %v1436_v61, %v7425_v31  ;;  %v1569_v55 = vld [vmem:[%s9323_s2 + $0x308] sm:$0xff]  ;;  %v1570_v61 = vld [vmem:[%s9323_s2 + $0x310] sm:$0xff] }
 0xa07   :  { %v1584_v60 = vpack.c.bf16 %v1569_v55, %v1568_v41  ;;  %v1585_v63 = vpack.c.bf16 %v1571_v62, %v1570_v61  ;;  %v1573_v2 = vld [vmem:[%s9323_s2 + $0x328] sm:$0xff] }
 0xa08   :  { %v1446_v4 = vsel %vm61_vm1, %v1442_v3, 0.0  ;;  %v1443_v56 = vadd.f32 %v1439_v1, %v7427_v32  ;;  %v1484_v32 = vld [vmem:[%s9326_s3] sm:$0xff] }
 0xa09   :  { %1447 = vadd.xlane.f32.xlu0 %v1446_v4  ;;  %v1494_v15 = vpack.c.bf16 %v1485_v13, %v1484_v32  ;;  %6207 = vmatpush3.bf16.msra.mxu1 %v1584_v60  ;;  %v1572_v1 = vld [vmem:[%s9323_s2 + $0x320] sm:$0xff]  ;;  %v1574_v4 = vld [vmem:[%s9323_s2 + $0x330] sm:$0xff] }
 0xa0a   :  { %v1449_v5 = vsel %vm61_vm1, %v1443_v56, 0.0  ;;  %6208 = vmatprep.subr.bf16.mxu1 %v7040_v0 }
 0xa0b   :  { %1450 = vadd.xlane.f32.xlu1 %v1449_v5  ;;  %6191 = vmatpush3.bf16.msra.mxu0 %v1494_v15 }
 0xa0c   :  { %6192 = vmatprep.subr.bf16.mxu0 %v7040_v0 }
 0xa0d   :  { %6209 = vmatpush3.bf16.msra.mxu1 %v1585_v63 }
 0xa0e   :  { %6210 = vmatprep.subr.bf16.mxu1 %v7040_v0 }
 0xa0f   :  { %6193 = vmatpush3.bf16.msra.mxu0 %v1495_v14 }
 0xa10   :  { %6194 = vmatprep.subr.bf16.mxu0 %v7040_v0 }
 0xa13   :  { %6195 = vmatpush3.bf16.msra.mxu0 %v1496_v20 }
 0xa14   :  { %6196 = vmatprep.subr.bf16.mxu0 %v7040_v0 }
 0xa17   :  { %6197 = vmatpush3.bf16.msra.mxu0 %v1497_v23 }
 0xa18   :  { %6222 = vmatprep.subr.bf16.mxu0 %v7040_v0 }
 0xa96   :  { %v1448_v6 = vpop.xlane.xlu0 %1447 }
 0xa97   :  { %v1452_v7 = vmul.f32 0.015625, %v1448_v6  ;;  %v1576_v6 = vld [vmem:[%s9323_s2 + $0x340] sm:$0xff] }
 0xa98   :  { %v1451_v8 = vpop.xlane.xlu1 %1450 }
 0xa99   :  { %v1454_v9 = vsub.f32 %v1442_v3, %v1452_v7  ;;  %v1453_v10 = vmul.f32 0.015625, %v1451_v8  ;;  %v1586_v3 = vpack.c.bf16 %v1573_v2, %v1572_v1  ;;  %v1577_v7 = vld [vmem:[%s9323_s2 + $0x348] sm:$0xff] }
 0xa9a   :  { %v1588_v8 = vpack.c.bf16 %v1577_v7, %v1576_v6  ;;  %v1798_v6 = vld [vmem:[%s9323_s2 + $0x410] sm:$0xff] }
 0xa9b   :  { %v1455_v58 = vsub.f32 %v1443_v56, %v1453_v10  ;;  %v1456_v11 = vmul.f32 %v1454_v9, %v1454_v9  ;;  %6211 = vmatpush3.bf16.msra.mxu1 %v1586_v3  ;;  %v1575_v56 = vld [vmem:[%s9323_s2 + $0x338] sm:$0xff] }
 0xa9c   :  { %6212 = vmatprep.subr.bf16.mxu1 %v7040_v0  ;;  %v1587_v5 = vpack.c.bf16 %v1575_v56, %v1574_v4  ;;  %v1579_v10 = vld [vmem:[%s9323_s2 + $0x358] sm:$0xff]  ;;  %v1678_v4 = vld [vmem:[%s9323_s2 + $0x380] sm:$0xff] }
 0xa9d   :  { %v1458_v39 = vsel %vm61_vm1, %v1456_v11, 0.0  ;;  %v1457_v12 = vmul.f32 %v1455_v58, %v1455_v58  ;;  %v5625_v11 = vld [vmem:[%s9326_s3 + $0x40] ss:$0 sm:$0xff] }
 0xa9e   :  { %1459 = vadd.xlane.f32.xlu0 %v1458_v39 }
 0xa9f   :  { %v1461_v31 = vsel %vm61_vm1, %v1457_v12, 0.0  ;;  %6213 = vmatpush3.bf16.msra.mxu1 %v1587_v5  ;;  %v1797_v5 = vld [vmem:[%s9323_s2 + $0x408] sm:$0xff] }
 0xaa0   :  { %1462 = vadd.xlane.f32.xlu1 %v1461_v31  ;;  %6214 = vmatprep.subr.bf16.mxu1 %v7040_v0  ;;  %v1806_v7 = vpack.c.bf16 %v1798_v6, %v1797_v5 }
 0xaa3   :  { %6215 = vmatpush3.bf16.msra.mxu1 %v1588_v8  ;;  %v1679_v8 = vld [vmem:[%s9323_s2 + $0x388] sm:$0xff] }
 0xaa4   :  { %6216 = vmatprep.subr.bf16.mxu1 %v7040_v0 }
 0xb2b   :  { %v1460_v46 = vpop.xlane.xlu0 %1459 }
 0xb2c   :  { %v1464_v25 = vmul.f32 0.015625, %v1460_v46 }
 0xb2d   :  { %v1463_v26 = vpop.xlane.xlu1 %1462 }
 0xb2e   :  { %v1466_v27 = vadd.f32 1e-12, %v1464_v25  ;;  %v1465_v28 = vmul.f32 0.015625, %v1463_v26 }
 0xb30   :  { %6816 = vrsqrt.f32 %v1466_v27  ;;  %v1467_v33 = vadd.f32 1e-12, %v1465_v28 }
 0xb32   :  { %6818 = vrsqrt.f32 %v1467_v33 }
 0xb3a   :  { %v6817_v34 = vpop.eup %6816 }
 0xb3b   :  { %v1470_v30 = vmul.f32 %v6817_v34, %v1454_v9  ;;  %v1578_v9 = vld [vmem:[%s9323_s2 + $0x350] sm:$0xff] }
 0xb3c   :  { %v6819_v40 = vpop.eup %6818 }
 0xb3d   :  { %v1476_v42 = vmul.f32 %v5623_v35, %v1470_v30  ;;  %v1471_v43 = vmul.f32 %v6819_v40, %v1455_v58  ;;  %v1589_v58 = vpack.c.bf16 %v1579_v10, %v1578_v9  ;;  %v1680_v9 = vld [vmem:[%s9323_s2 + $0x390] sm:$0xff] }
 0xb3e   :  { %v1688_v10 = vpack.c.bf16 %v1680_v9, %v1679_v8 }
 0xb3f   :  { %v1477_v45 = vmul.f32 %v5623_v35, %v1471_v43  ;;  %v7618_v47 = vadd.f32 %v5624_v44, %v1476_v42  ;;  %6217 = vmatpush3.bf16.msra.mxu1 %v1589_v58  ;;  %v5627_v42 = vld [vmem:[%s9323_s2 + $0x360] ss:$0 sm:$0xff]  ;;  %v1799_v58 = vld [vmem:[%s9323_s2 + $0x418] sm:$0xff] }
 0xb40   :  { %6246 = vmatprep.subr.bf16.mxu1 %v7040_v0 }
 0xb41   :  { %v7620_v48 = vadd.f32 %v5624_v44, %v1477_v45 }
 0xb43   :  { %v1493_v49 = vpack.c.bf16 %v7620_v48, %v7618_v47 }
 0xb45   :  { %6199 = vmatmul.mubr.msk.bf16.vlgmr.msra.gmra.mrb[28].mxu0 %vm61_vm1, %v1493_v49 }
 0xb46   :  { %6230 = vmatprep.mubr.msk.bf16.mxu0 %vm7041_vm0, %v7040_v0 }
 0xc18   :  { %v1539_v39 = vpop.f32.mrb[28].mxu0 }
 0xc19   :  { %v1540_v12 = vadd.f32 %v5625_v11, %v1539_v39  ;;  %v6200_v31 = vpop.f32.mrb[29].mxu0 }
 0xc1a   :  { %v1542_v32 = vpop.f32.mrb[30].mxu0  ;;  %v1682_v31 = vld [vmem:[%s9323_s2 + $0x3a0] sm:$0xff] }
 0xc1b   :  { %v1546_v13 = vmul.f32 %v1540_v12, %v1540_v12  ;;  %v1543_v15 = vadd.f32 %v5625_v11, %v1542_v32  ;;  %v6201_v16 = vpop.f32.mrb[31].mxu0  ;;  %v1800_v11 = vld [vmem:[%s9323_s2 + $0x420] sm:$0xff] }
 0xc1c   :  { %v1807_v39 = vpack.c.bf16 %v1800_v11, %v1799_v58 }
 0xc1d   :  { %v1548_v17 = vmul.f32 %v1546_v13, %v1540_v12  ;;  %v1547_v14 = vmul.f32 %v1543_v15, %v1543_v15  ;;  %v1801_v13 = vld [vmem:[%s9323_s2 + $0x428] sm:$0xff] }
 0xc1f   :  { %v1550_v18 = vmul.f32 0.044715, %v1548_v17  ;;  %v1549_v19 = vmul.f32 %v1547_v14, %v1543_v15  ;;  %v1683_v17 = vld [vmem:[%s9323_s2 + $0x3a8] sm:$0xff]  ;;  %v1684_v14 = vld [vmem:[%s9323_s2 + $0x3b0] sm:$0xff] }
 0xc21   :  { %v1552_v20 = vadd.f32 %v1550_v18, %v1540_v12  ;;  %v1551_v21 = vmul.f32 0.044715, %v1549_v19  ;;  %v1803_v18 = vld [vmem:[%s9323_s2 + $0x438] sm:$0xff]  ;;  %v1690_v19 = vpack.c.bf16 %v1684_v14, %v1683_v17 }
 0xc23   :  { %v1554_v22 = vmul.f32 0.7978846, %v1552_v20  ;;  %v1553_v23 = vadd.f32 %v1551_v21, %v1543_v15  ;;  %v1804_v20 = vld [vmem:[%s9323_s2 + $0x440] sm:$0xff] }
 0xc24   :  { %v1809_v21 = vpack.c.bf16 %v1804_v20, %v1803_v18 }
 0xc25   :  { %6820 = vtanh.f32 %v1554_v22  ;;  %v1555_v46 = vmul.f32 0.7978846, %v1553_v23 }
 0xc27   :  { %6822 = vtanh.f32 %v1555_v46 }
 0xc2f   :  { %v6821_v25 = vpop.eup %6820 }
 0xc30   :  { %v1558_v26 = vadd.f32 1.0, %v6821_v25 }
 0xc31   :  { %v6823_v27 = vpop.eup %6822 }
 0xc32   :  { %v1560_v28 = vmul.f32 0.5, %v1558_v26  ;;  %v1559_v33 = vadd.f32 1.0, %v6823_v27 }
 0xc34   :  { %v1561_v34 = vmul.f32 0.5, %v1559_v33  ;;  %v1562_v35 = vmul.f32 %v1560_v28, %v1540_v12  ;;  %v1681_v12 = vld [vmem:[%s9323_s2 + $0x398] sm:$0xff]  ;;  %v5628_v33 = vld [vmem:[%s9323_s2 + $0x368] ss:$0 sm:$0xff] }
 0xc35   :  { %v1689_v32 = vpack.c.bf16 %v1682_v31, %v1681_v12 }
 0xc36   :  { %v1563_v30 = vmul.f32 %v1561_v34, %v1543_v15  ;;  %v1802_v15 = vld [vmem:[%s9323_s2 + $0x430] sm:$0xff] }
 0xc37   :  { %v1808_v16 = vpack.c.bf16 %v1802_v15, %v1801_v13 }
 0xc38   :  { %v1581_v40 = vpack.c.bf16 %v1563_v30, %v1562_v35 }
 0xc3a   :  { %6219 = vmatmul.mubr.bf16.vlgmr.msra.gmra.mrb[28].mxu1 %v1581_v40 }
 0xc3b   :  { %6254 = vmatprep.mubr.msk.bf16.mxu1 %vm7041_vm0, %v7040_v0  ;;  %6247 = vmatpush3.bf16.msra.mxu1 %v1806_v7 }
 0xc3c   :  { %6248 = vmatprep.subr.bf16.mxu1 %v7040_v0 }
 0xc3f   :  { %6249 = vmatpush3.bf16.msra.mxu1 %v1807_v39 }
 0xc40   :  { %6250 = vmatprep.subr.bf16.mxu1 %v7040_v0 }
 0xc43   :  { %6251 = vmatpush3.bf16.msra.mxu1 %v1808_v16 }
 0xc44   :  { %6252 = vmatprep.subr.bf16.mxu1 %v7040_v0 }
 0xc47   :  { %6253 = vmatpush3.bf16.msra.mxu1 %v1809_v21  ;;  %v5632_v21 = vld [vmem:[%s9323_s2 + $0x400] ss:$0 sm:$0xff] }
 0xd0d   :  { %v1628_v43 = vpop.f32.mrb[28].mxu1 }
 0xd0e   :  { %v1629_v44 = vadd.f32 %v5627_v42, %v1628_v43  ;;  %v6220_v45 = vpop.f32.mrb[29].mxu1 }
 0xd0f   :  { %v1631_v49 = vpop.f32.mrb[30].mxu1  ;;  %v1740_v45 = vld [vmem:[%s9323_s2 + $0x3c8] sm:$0xff] }
 0xd10   :  { %v1632_v50 = vadd.f32 %v5627_v42, %v1631_v49  ;;  %v6221_v51 = vpop.f32.mrb[31].mxu1  ;;  %v1635_v52 = vadd.f32 %v1629_v44, %v7618_v47  ;;  %v5629_v42 = vld [vmem:[%s9323_s2 + $0x370] ss:$0 sm:$0xff]  ;;  %v1739_v44 = vld [vmem:[%s9323_s2 + $0x3c0] sm:$0xff] }
 0xd11   :  { %v1748_v51 = vpack.c.bf16 %v1740_v45, %v1739_v44 }
 0xd12   :  { %v1639_v53 = vsel %vm61_vm1, %v1635_v52, 0.0  ;;  %v1636_v54 = vadd.f32 %v1632_v50, %v7620_v48  ;;  %v1677_v48 = vld [vmem:[%s9323_s2 + $0x378] sm:$0xff] }
 0xd13   :  { %1640 = vadd.xlane.f32.xlu0 %v1639_v53  ;;  %v1687_v56 = vpack.c.bf16 %v1678_v4, %v1677_v48  ;;  %v1741_v53 = vld [vmem:[%s9323_s2 + $0x3d0] sm:$0xff]  ;;  %v5634_v48 = vld [vmem:[%s9323_s2 + $0x448] ss:$0 sm:$0xff] }
 0xd14   :  { %v1642_v36 = vsel %vm61_vm1, %v1636_v54, 0.0 }
 0xd15   :  { %1643 = vadd.xlane.f32.xlu1 %v1642_v36  ;;  %6223 = vmatpush3.bf16.msra.mxu0 %v1687_v56 }
 0xd16   :  { %6224 = vmatprep.subr.bf16.mxu0 %v7040_v0 }
 0xd19   :  { %6225 = vmatpush3.bf16.msra.mxu0 %v1688_v10 }
 0xd1a   :  { %6226 = vmatprep.subr.bf16.mxu0 %v7040_v0 }
 0xd1d   :  { %6227 = vmatpush3.bf16.msra.mxu0 %v1689_v32 }
 0xd1e   :  { %6228 = vmatprep.subr.bf16.mxu0 %v7040_v0 }
 0xd21   :  { %6229 = vmatpush3.bf16.msra.mxu0 %v1690_v19 }
 0xd22   :  { %6234 = vmatprep.subr.bf16.mxu0 %v7040_v0 }
 0xda0   :  { %v1641_v41 = vpop.xlane.xlu0 %1640 }
 0xda1   :  { %v1645_v55 = vmul.f32 0.015625, %v1641_v41  ;;  %v1743_v41 = vld [vmem:[%s9323_s2 + $0x3e0] sm:$0xff] }
 0xda2   :  { %v1644_v60 = vpop.xlane.xlu1 %1643 }
 0xda3   :  { %v1647_v61 = vsub.f32 %v1635_v52, %v1645_v55  ;;  %v1646_v62 = vmul.f32 0.015625, %v1644_v60  ;;  %v1744_v55 = vld [vmem:[%s9323_s2 + $0x3e8] sm:$0xff] }
 0xda4   :  { %v1750_v60 = vpack.c.bf16 %v1744_v55, %v1743_v41 }
 0xda5   :  { %v1648_v63 = vsub.f32 %v1636_v54, %v1646_v62  ;;  %v1649_v1 = vmul.f32 %v1647_v61, %v1647_v61  ;;  %v1742_v54 = vld [vmem:[%s9323_s2 + $0x3d8] sm:$0xff] }
 0xda6   :  { %v1749_v36 = vpack.c.bf16 %v1742_v54, %v1741_v53  ;;  %v1746_v62 = vld [vmem:[%s9323_s2 + $0x3f8] sm:$0xff] }
 0xda7   :  { %v1651_v2 = vsel %vm61_vm1, %v1649_v1, 0.0  ;;  %v1650_v3 = vmul.f32 %v1648_v63, %v1648_v63  ;;  %v5630_v1 = vld [vmem:[%s9323_s2 + $0x3b8] ss:$0 sm:$0xff] }
 0xda8   :  { %1652 = vadd.xlane.f32.xlu0 %v1651_v2 }
 0xda9   :  { %v1654_v47 = vsel %vm61_vm1, %v1650_v3, 0.0 }
 0xdaa   :  { %1655 = vadd.xlane.f32.xlu1 %v1654_v47 }
 0xe35   :  { %v1653_v22 = vpop.xlane.xlu0 %1652 }
 0xe36   :  { %v1657_v23 = vmul.f32 0.015625, %v1653_v22 }
 0xe37   :  { %v1656_v46 = vpop.xlane.xlu1 %1655 }
 0xe38   :  { %v1659_v25 = vadd.f32 1e-12, %v1657_v23  ;;  %v1658_v26 = vmul.f32 0.015625, %v1656_v46 }
 0xe3a   :  { %6824 = vrsqrt.f32 %v1659_v25  ;;  %v1660_v27 = vadd.f32 1e-12, %v1658_v26 }
 0xe3c   :  { %6826 = vrsqrt.f32 %v1660_v27 }
 0xe44   :  { %v6825_v28 = vpop.eup %6824 }
 0xe45   :  { %v1663_v34 = vmul.f32 %v6825_v28, %v1647_v61  ;;  %v1745_v61 = vld [vmem:[%s9323_s2 + $0x3f0] sm:$0xff] }
 0xe46   :  { %v6827_v35 = vpop.eup %6826 }
 0xe47   :  { %v1669_v30 = vmul.f32 %v5628_v33, %v1663_v34  ;;  %v1664_v40 = vmul.f32 %v6827_v35, %v1648_v63  ;;  %v1751_v63 = vpack.c.bf16 %v1746_v62, %v1745_v61 }
 0xe49   :  { %v1670_v43 = vmul.f32 %v5628_v33, %v1664_v40  ;;  %v7764_v49 = vadd.f32 %v5629_v42, %v1669_v30 }
 0xe4b   :  { %v7766_v50 = vadd.f32 %v5629_v42, %v1670_v43 }
 0xe4d   :  { %v1686_v52 = vpack.c.bf16 %v7766_v50, %v7764_v49 }
 0xe4f   :  { %6231 = vmatmul.mubr.msk.bf16.vlgmr.msra.gmra.mrb[32].mxu0 %vm61_vm1, %v1686_v52  ;;  %6255 = vmatmul.mubr.msk.bf16.vlgmr.msra.gmra.mrb[32].mxu1 %vm61_vm1, %v1686_v52 }
 0xe50   :  { %6235 = vmatpush3.bf16.msra.mxu0 %v1748_v51  ;;  %6242 = vmatprep.mubr.msk.bf16.mxu0 %vm7041_vm0, %v7040_v0 }
 0xe51   :  { %6236 = vmatprep.subr.bf16.mxu0 %v7040_v0 }
 0xe54   :  { %6237 = vmatpush3.bf16.msra.mxu0 %v1749_v36 }
 0xe55   :  { %6238 = vmatprep.subr.bf16.mxu0 %v7040_v0 }
 0xe58   :  { %6239 = vmatpush3.bf16.msra.mxu0 %v1750_v60 }
 0xe59   :  { %6240 = vmatprep.subr.bf16.mxu0 %v7040_v0 }
 0xe5c   :  { %6241 = vmatpush3.bf16.msra.mxu0 %v1751_v63 }
 0xe5f   :  { %6243 = vmatmul.mubr.msk.bf16.vlgmr.msra.gmra.mrb[36].mxu0 %vm61_vm1, %v1686_v52 }
 0xf22   :  { %v1732_v2 = vpop.f32.mrb[32].mxu0  ;;  %v1848_v3 = vpop.f32.mrb[32].mxu1 }
 0xf23   :  { %v1733_v47 = vadd.f32 %v5630_v1, %v1732_v2  ;;  %v6232_v4 = vpop.f32.mrb[33].mxu0  ;;  %v6256_v56 = vpop.f32.mrb[33].mxu1  ;;  %v1849_v9 = vadd.f32 %v5634_v48, %v1848_v3 }
 0xf24   :  { %v1735_v5 = vpop.f32.mrb[34].mxu0  ;;  %v1851_v6 = vpop.f32.mrb[34].mxu1 }
 0xf25   :  { %v6233_v7 = vpop.f32.mrb[35].mxu0  ;;  %v6257_v8 = vpop.f32.mrb[35].mxu1  ;;  %v1736_v10 = vadd.f32 %v5630_v1, %v1735_v5  ;;  %v1852_v58 = vadd.f32 %v5634_v48, %v1851_v6  ;;  %v1864_v11 = vmul.f32 %v1733_v47, %v7464_v57  ;;  %v1866_v39 = vmul.f32 %v1733_v47, %v7467_v37 }
 0xf26   :  { %v1868_v12 = vmul.f32 %v1733_v47, %v7470_v38  ;;  %v1870_v31 = vmul.f32 %v1733_v47, %v7473_v59 }
 0xf27   :  { %v1865_v32 = vmul.f32 %v1736_v10, %v7464_v57  ;;  %v1867_v13 = vmul.f32 %v1736_v10, %v7467_v37  ;;  %v1869_v15 = vmul.f32 %v1736_v10, %v7470_v38  ;;  %v1871_v16 = vmul.f32 %v1736_v10, %v7473_v59 }
 0xf28   :  { %v2065_v17 = vpack.c.bf16 %v1852_v58, %v1849_v9 }
 0xf29   :  { %v1873_v14 = vpack.c.bf16 %v1867_v13, %v1866_v39  ;;  %v1872_v18 = vpack.c.bf16 %v1865_v32, %v1864_v11  ;;  %v1874_v19 = vpack.c.bf16 %v1869_v15, %v1868_v12  ;;  %v1875_v20 = vpack.c.bf16 %v1871_v16, %v1870_v31 }
 0xf2a   :  { %6268 = vmatprep.subr.bf16.mxu1 %v2065_v17 }
 0xf2b   :  { %6269 = vmatpush3.bf16.msra.mxu1 %v2065_v17  ;;  %6260 = vmatprep.mubr.msk.bf16.mxu0 %vm61_vm1, %v1872_v18 }
 0xf2c   :  { %6290 = vmatprep.subr.bf16.mxu1 %v7040_v0 }
 0xf32   :  { %v1790_v22 = vpop.f32.mrb[36].mxu0 }
 0xf33   :  { %v6244_v23 = vpop.f32.mrb[37].mxu0  ;;  %v1791_v25 = vadd.f32 %v5632_v21, %v1790_v22 }
 0xf34   :  { %v1793_v46 = vpop.f32.mrb[38].mxu0 }
 0xf35   :  { %v1794_v26 = vadd.f32 %v5632_v21, %v1793_v46  ;;  %v6245_v27 = vpop.f32.mrb[39].mxu0 }
 0xf37   :  { %v1876_v28 = vpack.c.bf16 %v1794_v26, %v1791_v25 }
 0xf39   :  { %6743 = vmatprep.subr.msk.bf16.mxu0 %vm61_vm1, %v1876_v28  ;;  %v1890_v33 = vsel %vm61_vm1, %v1876_v28, 0 }
 0xf3a   :  { %6259 = vmatpush3.bf16.xpose.msra.mxu0 %v1890_v33 }
 0xf3b   :  { %6278 = vmatprep.subr.bf16.mxu0 %v7040_v0 }
 0xf41   :  { %6261 = vmatmul.mubr.msk.bf16.vlgmr.msra.gmra.mrb[40].mxu0 %vm61_vm1, %v1873_v14 }
 0xf42   :  { %6264 = vmatprep.mubr.msk.bf16.mxu0 %vm61_vm1, %v1874_v19 }
 0xf49   :  { %6265 = vmatmul.mubr.msk.bf16.gmra.mrb[44].mxu0 %vm61_vm1, %v1875_v20 }
 0xf4a   :  { %6286 = vmatprep.mubr.msk.bf16.mxu0 %vm7041_vm0, %v7040_v0 }
0x1014   :  { %v6262_v34 = vpop.f32.mrb[40].mxu0 }
0x1015   :  { %v1926_v35 = vpop.f32.mrb[41].mxu0  ;;  %v1959_v30 = vmul.f32 0.25, %v6262_v34 }
0x1016   :  { %v1957_v40 = vmul.f32 0.25, %v1926_v35  ;;  %v6263_v42 = vpop.f32.mrb[42].mxu0 }
0x1017   :  { %v1929_v43 = vpop.f32.mrb[43].mxu0  ;;  %v1960_v44 = vmul.f32 0.25, %v6263_v42  ;;  %v1967_v54 = vadd.f32 %v1959_v30, %v7499_v24 }
0x1018   :  { %v1958_v45 = vmul.f32 0.25, %v1929_v43  ;;  %v1965_v51 = vadd.f32 %v1957_v40, %v7499_v24 }
0x1019   :  { %v1968_v55 = vadd.f32 %v1960_v44, %v7504_v29  ;;  %v1979_v1 = vsel %vm1204_vm2, %v1967_v54, -inf }
0x101a   :  { %v1973_v52 = vsel %vm1204_vm2, %v1965_v51, -inf  ;;  %v1966_v53 = vadd.f32 %v1958_v45, %v7504_v29 }
0x101b   :  { %1974 = vmax.xlane.f32.xlu0 %v1973_v52  ;;  %v1982_v48 = vsel %vm1204_vm2, %v1968_v55, -inf }
0x101c   :  { %v6266_v36 = vpop.f32.mrb[44].mxu0  ;;  %v1976_v41 = vsel %vm1204_vm2, %v1966_v53, -inf }
0x101d   :  { %1977 = vmax.xlane.f32.xlu1 %v1976_v41  ;;  %v1942_v60 = vpop.f32.mrb[45].mxu0  ;;  %v1963_v61 = vmul.f32 0.25, %v6266_v36 }
0x101e   :  { %v1961_v62 = vmul.f32 0.25, %v1942_v60  ;;  %v6267_v63 = vpop.f32.mrb[46].mxu0 }
0x101f   :  { %1980 = vmax.xlane.f32.xlu0 %v1979_v1  ;;  %v1945_v2 = vpop.f32.mrb[47].mxu0  ;;  %v1964_v3 = vmul.f32 0.25, %v6267_v63  ;;  %v1971_v6 = vadd.f32 %v1963_v61, %v7499_v24 }
0x1020   :  { %v1962_v47 = vmul.f32 0.25, %v1945_v2  ;;  %v1969_v4 = vadd.f32 %v1961_v62, %v7499_v24 }
0x1021   :  { %1983 = vmax.xlane.f32.xlu1 %v1982_v48  ;;  %v1972_v8 = vadd.f32 %v1964_v3, %v7504_v29  ;;  %v1991_v9 = vsel %vm1204_vm2, %v1971_v6, -inf }
0x1022   :  { %v1985_v56 = vsel %vm1204_vm2, %v1969_v4, -inf  ;;  %v1970_v5 = vadd.f32 %v1962_v47, %v7504_v29 }
0x1023   :  { %1986 = vmax.xlane.f32.xlu0 %v1985_v56  ;;  %v1994_v10 = vsel %vm1204_vm2, %v1972_v8, -inf }
0x1024   :  { %v1988_v7 = vsel %vm1204_vm2, %v1970_v5, -inf }
0x1025   :  { %1989 = vmax.xlane.f32.xlu1 %v1988_v7 }
0x1027   :  { %1992 = vmax.xlane.f32.xlu0 %v1991_v9 }
0x1029   :  { %1995 = vmax.xlane.f32.xlu1 %v1994_v10 }
0x10a8   :  { %v1975_v58 = vpop.xlane.xlu0 %1974 }
0x10a9   :  { %v1997_v11 = vsub.f32 %v1965_v51, %v1975_v58 }
0x10aa   :  { %v1978_v39 = vpop.xlane.xlu1 %1977 }
0x10ab   :  { %v2005_v12 = vmul.f32 1.442695, %v1997_v11  ;;  %v1998_v31 = vsub.f32 %v1966_v53, %v1978_v39 }
0x10ac   :  { %v1981_v32 = vpop.xlane.xlu0 %1980 }
0x10ad   :  { %6828 = vpow2.f32 %v2005_v12  ;;  %v2007_v24 = vmul.f32 1.442695, %v1998_v31  ;;  %v1999_v13 = vsub.f32 %v1967_v54, %v1981_v32 }
0x10ae   :  { %v1984_v15 = vpop.xlane.xlu1 %1983 }
0x10af   :  { %6830 = vpow2.f32 %v2007_v24  ;;  %v2009_v16 = vmul.f32 1.442695, %v1999_v13  ;;  %v2000_v29 = vsub.f32 %v1968_v55, %v1984_v15 }
0x10b0   :  { %v1987_v17 = vpop.xlane.xlu0 %1986 }
0x10b1   :  { %6832 = vpow2.f32 %v2009_v16  ;;  %v2011_v14 = vmul.f32 1.442695, %v2000_v29  ;;  %v2001_v18 = vsub.f32 %v1969_v4, %v1987_v17  ;;  %v1855_v17 = vld [vmem:[%s9323_s2 + $0x450] sm:$0xff] }
0x10b2   :  { %v1990_v19 = vpop.xlane.xlu1 %1989 }
0x10b3   :  { %6834 = vpow2.f32 %v2011_v14  ;;  %v2013_v20 = vmul.f32 1.442695, %v2001_v18  ;;  %v2002_v21 = vsub.f32 %v1970_v5, %v1990_v19  ;;  %v1856_v14 = vld [vmem:[%s9323_s2 + $0x458] sm:$0xff]  ;;  %v1857_v19 = vld [vmem:[%s9323_s2 + $0x460] sm:$0xff] }
0x10b4   :  { %v1993_v22 = vpop.xlane.xlu0 %1992  ;;  %v2158_v18 = vpack.c.bf16 %v1856_v14, %v1855_v17  ;;  %v2254_v17 = vld [vmem:[%s9326_s3 + $0x58] sm:$0xff]  ;;  %v2255_v14 = vld [vmem:[%s9326_s3 + $0x60] sm:$0xff] }
0x10b5   :  { %6836 = vpow2.f32 %v2013_v20  ;;  %v2015_v23 = vmul.f32 1.442695, %v2002_v21  ;;  %v2003_v46 = vsub.f32 %v1971_v6, %v1993_v22  ;;  %v1858_v20 = vld [vmem:[%s9323_s2 + $0x468] sm:$0xff]  ;;  %v1859_v22 = vld [vmem:[%s9323_s2 + $0x470] sm:$0xff] }
0x10b6   :  { %v1996_v25 = vpop.xlane.xlu1 %1995  ;;  %6279 = vmatpush3.bf16.msra.mxu0 %v2158_v18  ;;  %v2159_v21 = vpack.c.bf16 %v1858_v20, %v1857_v19  ;;  %v2263_v18 = vpack.c.bf16 %v2255_v14, %v2254_v17  ;;  %v2256_v19 = vld [vmem:[%s9326_s3 + $0x68] sm:$0xff]  ;;  %v2257_v20 = vld [vmem:[%s9326_s3 + $0x70] sm:$0xff] }
0x10b7   :  { %v6829_v26 = vpop.eup %6828  ;;  %6838 = vpow2.f32 %v2015_v23  ;;  %v2017_v27 = vmul.f32 1.442695, %v2003_v46  ;;  %v2004_v28 = vsub.f32 %v1972_v8, %v1996_v25  ;;  %6280 = vmatprep.subr.bf16.mxu0 %v7040_v0  ;;  %v1860_v23 = vld [vmem:[%s9323_s2 + $0x478] sm:$0xff]  ;;  %v1861_v25 = vld [vmem:[%s9323_s2 + $0x480] sm:$0xff] }
0x10b8   :  { %v2021_v33 = vsel %vm1204_vm2, %v6829_v26, 0.0  ;;  %v2160_v46 = vpack.c.bf16 %v1860_v23, %v1859_v22  ;;  %v2258_v22 = vld [vmem:[%s9326_s3 + $0x78] sm:$0xff]  ;;  %v2259_v23 = vld [vmem:[%s9326_s3 + $0x80] sm:$0xff] }
0x10b9   :  { %v6831_v34 = vpop.eup %6830  ;;  %6840 = vpow2.f32 %v2017_v27  ;;  %v2019_v35 = vmul.f32 1.442695, %v2004_v28  ;;  %2022 = vadd.xlane.f32.xlu0 %v2021_v33 }
0x10ba   :  { %v2024_v30 = vsel %vm1204_vm2, %v6831_v34, 0.0  ;;  %6281 = vmatpush3.bf16.msra.mxu0 %v2159_v21  ;;  %v2264_v21 = vpack.c.bf16 %v2257_v20, %v2256_v19 }
0x10bb   :  { %v6833_v40 = vpop.eup %6832  ;;  %6842 = vpow2.f32 %v2019_v35  ;;  %2025 = vadd.xlane.f32.xlu1 %v2024_v30  ;;  %6282 = vmatprep.subr.bf16.mxu0 %v7040_v0 }
0x10bc   :  { %v2027_v42 = vsel %vm1204_vm2, %v6833_v40, 0.0 }
0x10bd   :  { %v6835_v43 = vpop.eup %6834  ;;  %2028 = vadd.xlane.f32.xlu0 %v2027_v42 }
0x10be   :  { %v2030_v44 = vsel %vm1204_vm2, %v6835_v43, 0.0  ;;  %6283 = vmatpush3.bf16.msra.mxu0 %v2160_v46  ;;  %v2265_v46 = vpack.c.bf16 %v2259_v23, %v2258_v22 }
0x10bf   :  { %v6837_v45 = vpop.eup %6836  ;;  %2031 = vadd.xlane.f32.xlu1 %v2030_v44  ;;  %6284 = vmatprep.subr.bf16.mxu0 %v7040_v0 }
0x10c0   :  { %v2033_v51 = vsel %vm1204_vm2, %v6837_v45, 0.0 }
0x10c1   :  { %v6839_v52 = vpop.eup %6838  ;;  %2034 = vadd.xlane.f32.xlu0 %v2033_v51 }
0x10c2   :  { %v2036_v53 = vsel %vm1204_vm2, %v6839_v52, 0.0 }
0x10c3   :  { %v6841_v54 = vpop.eup %6840  ;;  %2037 = vadd.xlane.f32.xlu1 %v2036_v53 }
0x10c4   :  { %v2039_v36 = vsel %vm1204_vm2, %v6841_v54, 0.0 }
0x10c5   :  { %v6843_v41 = vpop.eup %6842  ;;  %2040 = vadd.xlane.f32.xlu0 %v2039_v36 }
0x10c6   :  { %v2042_v55 = vsel %vm1204_vm2, %v6843_v41, 0.0 }
0x10c7   :  { %2043 = vadd.xlane.f32.xlu1 %v2042_v55 }
0x1146   :  { %v2023_v60 = vpop.xlane.xlu0 %2022 }
0x1147   :  { %6844 = vrcp.f32 %v2023_v60 }
0x1148   :  { %v2026_v61 = vpop.xlane.xlu1 %2025 }
0x1149   :  { %6846 = vrcp.f32 %v2026_v61 }
0x114a   :  { %v2029_v62 = vpop.xlane.xlu0 %2028 }
0x114b   :  { %6848 = vrcp.f32 %v2029_v62 }
0x114c   :  { %v2032_v63 = vpop.xlane.xlu1 %2031 }
0x114d   :  { %6850 = vrcp.f32 %v2032_v63 }
0x114e   :  { %v2035_v1 = vpop.xlane.xlu0 %2034 }
0x114f   :  { %6852 = vrcp.f32 %v2035_v1 }
0x1150   :  { %v2038_v2 = vpop.xlane.xlu1 %2037 }
0x1151   :  { %v6845_v3 = vpop.eup %6844  ;;  %6854 = vrcp.f32 %v2038_v2 }
0x1152   :  { %v2041_v47 = vpop.xlane.xlu0 %2040  ;;  %v2053_v56 = vmul.f32 %v6845_v3, %v6829_v26  ;;  %v1862_v26 = vld [vmem:[%s9323_s2 + $0x488] sm:$0xff]  ;;  %v5644_v3 = vld [vmem:[%s9323_s2 + $0x490] ss:$0 sm:$0xff] }
0x1153   :  { %v6847_v48 = vpop.eup %6846  ;;  %6856 = vrcp.f32 %v2041_v47  ;;  %v2161_v27 = vpack.c.bf16 %v1862_v26, %v1861_v25 }
0x1154   :  { %v2044_v4 = vpop.xlane.xlu1 %2043  ;;  %v2054_v5 = vmul.f32 %v6847_v48, %v6831_v34 }
0x1155   :  { %v6849_v6 = vpop.eup %6848  ;;  %6858 = vrcp.f32 %v2044_v4  ;;  %6285 = vmatpush3.bf16.msra.mxu0 %v2161_v27 }
0x1156   :  { %v2061_v7 = vpack.c.bf16 %v2054_v5, %v2053_v56  ;;  %v2055_v9 = vmul.f32 %v6849_v6, %v6833_v40  ;;  %6302 = vmatprep.subr.bf16.mxu0 %v7040_v0 }
0x1157   :  { %v6851_v8 = vpop.eup %6850 }
0x1158   :  { %v2056_v10 = vmul.f32 %v6851_v8, %v6835_v43  ;;  %6270 = vmatprep.mubr.msk.bf16.mxu1 %vm1204_vm2, %v2061_v7 }
0x1159   :  { %v6853_v58 = vpop.eup %6852 }
0x115a   :  { %v2062_v11 = vpack.c.bf16 %v2056_v10, %v2055_v9  ;;  %v2057_v12 = vmul.f32 %v6853_v58, %v6837_v45 }
0x115b   :  { %v6855_v39 = vpop.eup %6854 }
0x115c   :  { %6271 = vmatmul.mubr.msk.bf16.vlgmr.msra.gmra.mrb[36].mxu1 %vm1204_vm2, %v2062_v11  ;;  %v2058_v31 = vmul.f32 %v6855_v39, %v6839_v52 }
0x115d   :  { %v6857_v32 = vpop.eup %6856 }
0x115e   :  { %v2063_v24 = vpack.c.bf16 %v2058_v31, %v2057_v12  ;;  %v2059_v15 = vmul.f32 %v6857_v32, %v6841_v54 }
0x115f   :  { %v6859_v13 = vpop.eup %6858 }
0x1160   :  { %6274 = vmatprep.mubr.msk.bf16.mxu1 %vm1204_vm2, %v2063_v24  ;;  %v2060_v16 = vmul.f32 %v6859_v13, %v6843_v41 }
0x1162   :  { %v2064_v29 = vpack.c.bf16 %v2060_v16, %v2059_v15  ;;  %v2253_v16 = vld [vmem:[%s9326_s3 + $0x50] sm:$0xff] }
0x1164   :  { %6275 = vmatmul.mubr.msk.bf16.gmra.mrb[40].mxu1 %vm1204_vm2, %v2064_v29 }
0x1165   :  { %6298 = vmatprep.mubr.msk.bf16.mxu1 %vm7041_vm0, %v7040_v0 }
0x122f   :  { %v6272_v28 = vpop.f32.mrb[36].mxu1 }
0x1230   :  { %v2145_v33 = vmul.f32 %v6272_v28, %v7467_v37  ;;  %v2112_v34 = vpop.f32.mrb[37].mxu1 }
0x1231   :  { %v2143_v35 = vmul.f32 %v2112_v34, %v7464_v57  ;;  %v6273_v30 = vpop.f32.mrb[38].mxu1 }
0x1232   :  { %v2146_v40 = vmul.f32 %v6273_v30, %v7467_v37  ;;  %v2115_v42 = vpop.f32.mrb[39].mxu1  ;;  %v5646_v30 = vld [vmem:[%s9323_s2 + $0x498] ss:$0 sm:$0xff] }
0x1233   :  { %v2147_v43 = vadd.f32 %v2145_v33, %v2143_v35  ;;  %v2144_v44 = vmul.f32 %v2115_v42, %v7464_v57 }
0x1235   :  { %v2148_v45 = vadd.f32 %v2146_v40, %v2144_v44 }
0x1237   :  { %v6276_v51 = vpop.f32.mrb[40].mxu1 }
0x1238   :  { %v2128_v52 = vpop.f32.mrb[41].mxu1  ;;  %v2153_v41 = vmul.f32 %v6276_v51, %v7473_v59 }
0x1239   :  { %v2149_v53 = vmul.f32 %v2128_v52, %v7470_v38  ;;  %v6277_v54 = vpop.f32.mrb[42].mxu1 }
0x123a   :  { %v2131_v36 = vpop.f32.mrb[43].mxu1  ;;  %v2154_v62 = vmul.f32 %v6277_v54, %v7473_v59 }
0x123b   :  { %v2151_v55 = vadd.f32 %v2149_v53, %v2147_v43  ;;  %v2150_v60 = vmul.f32 %v2131_v36, %v7470_v38  ;;  %v2332_v36 = vld [vmem:[%s9323_s2 + $0x4a8] sm:$0xff] }
0x123d   :  { %v2155_v61 = vadd.f32 %v2153_v41, %v2151_v55  ;;  %v2152_v63 = vadd.f32 %v2150_v60, %v2148_v45  ;;  %v5647_v45 = vld [vmem:[%s9323_s2 + $0x4a0] ss:$0 sm:$0xff]  ;;  %v2333_v41 = vld [vmem:[%s9323_s2 + $0x4b0] sm:$0xff]  ;;  %v2334_v60 = vld [vmem:[%s9323_s2 + $0x4b8] sm:$0xff] }
0x123e   :  { %v2350_v55 = vpack.c.bf16 %v2333_v41, %v2332_v36 }
0x123f   :  { %v2156_v1 = vadd.f32 %v2154_v62, %v2152_v63  ;;  %v2336_v63 = vld [vmem:[%s9323_s2 + $0x4c8] sm:$0xff] }
0x1241   :  { %v2157_v2 = vpack.c.bf16 %v2156_v1, %v2155_v61  ;;  %v2335_v61 = vld [vmem:[%s9323_s2 + $0x4c0] sm:$0xff]  ;;  %v2337_v1 = vld [vmem:[%s9323_s2 + $0x4d0] sm:$0xff] }
0x1242   :  { %v2351_v62 = vpack.c.bf16 %v2335_v61, %v2334_v60 }
0x1243   :  { %6287 = vmatmul.mubr.msk.bf16.vlgmr.msra.gmra.mrb[48].mxu0 %vm61_vm1, %v2157_v2  ;;  %v2352_v2 = vpack.c.bf16 %v2337_v1, %v2336_v63 }
0x1244   :  { %6318 = vmatprep.mubr.msk.bf16.mxu0 %vm7041_vm0, %v7040_v0  ;;  %6303 = vmatpush3.bf16.msra.mxu0 %v2350_v55 }
0x1245   :  { %6304 = vmatprep.subr.bf16.mxu0 %v7040_v0 }
0x1248   :  { %6305 = vmatpush3.bf16.msra.mxu0 %v2351_v62 }
0x1249   :  { %6306 = vmatprep.subr.bf16.mxu0 %v7040_v0 }
0x124c   :  { %6307 = vmatpush3.bf16.msra.mxu0 %v2352_v2 }
0x124d   :  { %6308 = vmatprep.subr.bf16.mxu0 %v7040_v0 }
0x1316   :  { %v2203_v47 = vpop.f32.mrb[48].mxu0 }
0x1317   :  { %v2204_v48 = vadd.f32 %v5644_v3, %v2203_v47  ;;  %v6288_v4 = vpop.f32.mrb[49].mxu0  ;;  %v2339_v47 = vld [vmem:[%s9323_s2 + $0x4e0] sm:$0xff] }
0x1318   :  { %v2206_v56 = vpop.f32.mrb[50].mxu0  ;;  %v2340_v4 = vld [vmem:[%s9323_s2 + $0x4e8] sm:$0xff] }
0x1319   :  { %v2207_v5 = vadd.f32 %v5644_v3, %v2206_v56  ;;  %v6289_v6 = vpop.f32.mrb[51].mxu0  ;;  %v2210_v7 = vadd.f32 %v2204_v48, %v7764_v49  ;;  %v2338_v3 = vld [vmem:[%s9323_s2 + $0x4d8] sm:$0xff]  ;;  %v2341_v56 = vld [vmem:[%s9323_s2 + $0x4f0] sm:$0xff] }
0x131a   :  { %v2353_v48 = vpack.c.bf16 %v2339_v47, %v2338_v3  ;;  %v2342_v6 = vld [vmem:[%s9323_s2 + $0x4f8] sm:$0xff] }
0x131b   :  { %v2214_v8 = vsel %vm61_vm1, %v2210_v7, 0.0  ;;  %v2211_v9 = vadd.f32 %v2207_v5, %v7766_v50  ;;  %v2252_v50 = vld [vmem:[%s9326_s3 + $0x48] sm:$0xff]  ;;  %v2354_v5 = vpack.c.bf16 %v2341_v56, %v2340_v4  ;;  %v2446_v56 = vld [vmem:[%s9323_s2 + $0xb80] sm:$0xff] }
0x131c   :  { %2215 = vadd.xlane.f32.xlu0 %v2214_v8  ;;  %v2262_v29 = vpack.c.bf16 %v2253_v16, %v2252_v50  ;;  %6309 = vmatpush3.bf16.msra.mxu0 %v2353_v48 }
0x131d   :  { %v2217_v10 = vsel %vm61_vm1, %v2211_v9, 0.0  ;;  %6310 = vmatprep.subr.bf16.mxu0 %v7040_v0 }
0x131e   :  { %2218 = vadd.xlane.f32.xlu1 %v2217_v10  ;;  %6291 = vmatpush3.bf16.msra.mxu1 %v2262_v29  ;;  %v2345_v10 = vld [vmem:[%s9323_s2 + $0x510] sm:$0xff] }
0x131f   :  { %6292 = vmatprep.subr.bf16.mxu1 %v7040_v0 }
0x1320   :  { %6311 = vmatpush3.bf16.msra.mxu0 %v2354_v5  ;;  %v2573_v5 = vld [vmem:[%s9323_s2 + $0x540] sm:$0xff] }
0x1321   :  { %6312 = vmatprep.subr.bf16.mxu0 %v7040_v0 }
0x1322   :  { %6293 = vmatpush3.bf16.msra.mxu1 %v2263_v18 }
0x1323   :  { %6294 = vmatprep.subr.bf16.mxu1 %v7040_v0 }
0x1326   :  { %6295 = vmatpush3.bf16.msra.mxu1 %v2264_v21 }
0x1327   :  { %6296 = vmatprep.subr.bf16.mxu1 %v7040_v0 }
0x132a   :  { %6297 = vmatpush3.bf16.msra.mxu1 %v2265_v46 }
0x132b   :  { %6322 = vmatprep.subr.bf16.mxu1 %v7040_v0 }
0x13a9   :  { %v2216_v58 = vpop.xlane.xlu0 %2215 }
0x13aa   :  { %v2220_v11 = vmul.f32 0.015625, %v2216_v58 }
0x13ab   :  { %v2219_v39 = vpop.xlane.xlu1 %2218 }
0x13ac   :  { %v2222_v12 = vsub.f32 %v2210_v7, %v2220_v11  ;;  %v2221_v31 = vmul.f32 0.015625, %v2219_v39  ;;  %v2343_v7 = vld [vmem:[%s9323_s2 + $0x500] sm:$0xff]  ;;  %v2346_v11 = vld [vmem:[%s9323_s2 + $0x518] sm:$0xff] }
0x13ad   :  { %v2355_v8 = vpack.c.bf16 %v2343_v7, %v2342_v6  ;;  %v2347_v39 = vld [vmem:[%s9323_s2 + $0x520] sm:$0xff]  ;;  %v2574_v7 = vld [vmem:[%s9323_s2 + $0x548] sm:$0xff] }
0x13ae   :  { %v2223_v32 = vsub.f32 %v2211_v9, %v2221_v31  ;;  %v2224_v24 = vmul.f32 %v2222_v12, %v2222_v12  ;;  %v2344_v9 = vld [vmem:[%s9323_s2 + $0x508] sm:$0xff] }
0x13af   :  { %6313 = vmatpush3.bf16.msra.mxu0 %v2355_v8  ;;  %v2356_v58 = vpack.c.bf16 %v2345_v10, %v2344_v9  ;;  %v5648_v31 = vld [vmem:[%s9326_s3 + $0x88] ss:$0 sm:$0xff]  ;;  %v2582_v8 = vpack.c.bf16 %v2574_v7, %v2573_v5  ;;  %v2448_v10 = vld [vmem:[%s9323_s2 + $0xb90] sm:$0xff] }
0x13b0   :  { %v2226_v13 = vsel %vm61_vm1, %v2224_v24, 0.0  ;;  %v2225_v15 = vmul.f32 %v2223_v32, %v2223_v32  ;;  %6314 = vmatprep.subr.bf16.mxu0 %v7040_v0  ;;  %v2447_v9 = vld [vmem:[%s9323_s2 + $0xb88] sm:$0xff] }
0x13b1   :  { %2227 = vadd.xlane.f32.xlu0 %v2226_v13 }
0x13b2   :  { %v2229_v49 = vsel %vm61_vm1, %v2225_v15, 0.0 }
0x13b3   :  { %2230 = vadd.xlane.f32.xlu1 %v2229_v49  ;;  %6315 = vmatpush3.bf16.msra.mxu0 %v2356_v58  ;;  %v2575_v58 = vld [vmem:[%s9323_s2 + $0x550] sm:$0xff] }
0x13b4   :  { %6316 = vmatprep.subr.bf16.mxu0 %v7040_v0 }
0x143e   :  { %v2228_v25 = vpop.xlane.xlu0 %2227 }
0x143f   :  { %v2232_v26 = vmul.f32 0.015625, %v2228_v25 }
0x1440   :  { %v2231_v27 = vpop.xlane.xlu1 %2230 }
0x1441   :  { %v2234_v28 = vadd.f32 1e-12, %v2232_v26  ;;  %v2233_v33 = vmul.f32 0.015625, %v2231_v27 }
0x1443   :  { %6860 = vrsqrt.f32 %v2234_v28  ;;  %v2235_v34 = vadd.f32 1e-12, %v2233_v33 }
0x1445   :  { %6862 = vrsqrt.f32 %v2235_v34 }
0x144d   :  { %v6861_v35 = vpop.eup %6860 }
0x144e   :  { %v2238_v40 = vmul.f32 %v6861_v35, %v2222_v12  ;;  %v2357_v12 = vpack.c.bf16 %v2347_v39, %v2346_v11  ;;  %v2456_v11 = vpack.c.bf16 %v2448_v10, %v2447_v9  ;;  %v2576_v39 = vld [vmem:[%s9323_s2 + $0x558] sm:$0xff] }
0x144f   :  { %v6863_v42 = vpop.eup %6862 }
0x1450   :  { %v2244_v43 = vmul.f32 %v5646_v30, %v2238_v40  ;;  %v2239_v44 = vmul.f32 %v6863_v42, %v2223_v32  ;;  %6317 = vmatpush3.bf16.msra.mxu0 %v2357_v12  ;;  %v5650_v40 = vld [vmem:[%s9323_s2 + $0x528] ss:$0 sm:$0xff]  ;;  %v2583_v12 = vpack.c.bf16 %v2576_v39, %v2575_v58  ;;  %v2633_v58 = vld [vmem:[%s9323_s2 + $0xbc0] sm:$0xff] }
0x1451   :  { %6346 = vmatprep.subr.bf16.mxu0 %v7040_v0 }
0x1452   :  { %v2245_v51 = vmul.f32 %v5646_v30, %v2239_v44  ;;  %v7935_v52 = vadd.f32 %v5647_v45, %v2244_v43 }
0x1454   :  { %v7937_v53 = vadd.f32 %v5647_v45, %v2245_v51 }
0x1456   :  { %v2261_v54 = vpack.c.bf16 %v7937_v53, %v7935_v52 }
0x1458   :  { %6299 = vmatmul.mubr.msk.bf16.vlgmr.msra.gmra.mrb[44].mxu1 %vm61_vm1, %v2261_v54 }
0x1459   :  { %6330 = vmatprep.mubr.msk.bf16.mxu1 %vm7041_vm0, %v7040_v0 }
0x152b   :  { %v2307_v32 = vpop.f32.mrb[44].mxu1 }
0x152c   :  { %v2308_v24 = vadd.f32 %v5648_v31, %v2307_v32  ;;  %v6300_v13 = vpop.f32.mrb[45].mxu1  ;;  %v2450_v32 = vld [vmem:[%s9323_s2 + $0xba0] sm:$0xff] }
0x152d   :  { %v2310_v15 = vpop.f32.mrb[46].mxu1 }
0x152e   :  { %v2314_v49 = vmul.f32 %v2308_v24, %v2308_v24  ;;  %v2311_v50 = vadd.f32 %v5648_v31, %v2310_v15  ;;  %v6301_v16 = vpop.f32.mrb[47].mxu1  ;;  %v2449_v31 = vld [vmem:[%s9323_s2 + $0xb98] sm:$0xff]  ;;  %v2578_v15 = vld [vmem:[%s9323_s2 + $0x568] sm:$0xff] }
0x152f   :  { %v2457_v13 = vpack.c.bf16 %v2450_v32, %v2449_v31  ;;  %v2452_v16 = vld [vmem:[%s9323_s2 + $0xbb0] sm:$0xff] }
0x1530   :  { %v2316_v29 = vmul.f32 %v2314_v49, %v2308_v24  ;;  %v2315_v17 = vmul.f32 %v2311_v50, %v2311_v50 }
0x1532   :  { %v2318_v14 = vmul.f32 0.044715, %v2316_v29  ;;  %v2317_v18 = vmul.f32 %v2315_v17, %v2311_v50  ;;  %v2579_v29 = vld [vmem:[%s9323_s2 + $0x570] sm:$0xff] }
0x1534   :  { %v2320_v19 = vadd.f32 %v2318_v14, %v2308_v24  ;;  %v2319_v20 = vmul.f32 0.044715, %v2317_v18  ;;  %v2580_v14 = vld [vmem:[%s9323_s2 + $0x578] sm:$0xff] }
0x1535   :  { %v2585_v18 = vpack.c.bf16 %v2580_v14, %v2579_v29  ;;  %v2639_v14 = vld [vmem:[%s9323_s2 + $0xbf0] sm:$0xff] }
0x1536   :  { %v2322_v21 = vmul.f32 0.7978846, %v2320_v19  ;;  %v2321_v22 = vadd.f32 %v2319_v20, %v2311_v50 }
0x1538   :  { %6864 = vtanh.f32 %v2322_v21  ;;  %v2323_v23 = vmul.f32 0.7978846, %v2321_v22 }
0x153a   :  { %6866 = vtanh.f32 %v2323_v23 }
0x1542   :  { %v6865_v46 = vpop.eup %6864 }
0x1543   :  { %v2326_v25 = vadd.f32 1.0, %v6865_v46 }
0x1544   :  { %v6867_v26 = vpop.eup %6866 }
0x1545   :  { %v2328_v27 = vmul.f32 0.5, %v2326_v25  ;;  %v2327_v28 = vadd.f32 1.0, %v6867_v26  ;;  %v5651_v26 = vld [vmem:[%s9323_s2 + $0x530] ss:$0 sm:$0xff] }
0x1547   :  { %v2329_v33 = vmul.f32 0.5, %v2327_v28  ;;  %v2330_v34 = vmul.f32 %v2328_v27, %v2308_v24  ;;  %v2577_v24 = vld [vmem:[%s9323_s2 + $0x560] sm:$0xff] }
0x1548   :  { %v2584_v49 = vpack.c.bf16 %v2578_v15, %v2577_v24  ;;  %v2635_v24 = vld [vmem:[%s9323_s2 + $0xbd0] sm:$0xff] }
0x1549   :  { %v2331_v35 = vmul.f32 %v2329_v33, %v2311_v50  ;;  %v2451_v50 = vld [vmem:[%s9323_s2 + $0xba8] sm:$0xff] }
0x154a   :  { %v2458_v17 = vpack.c.bf16 %v2452_v16, %v2451_v50  ;;  %v2638_v50 = vld [vmem:[%s9323_s2 + $0xbe8] sm:$0xff] }
0x154b   :  { %v2349_v30 = vpack.c.bf16 %v2331_v35, %v2330_v34  ;;  %v5652_v35 = vld [vmem:[%s9323_s2 + $0x538] ss:$0 sm:$0xff] }
0x154d   :  { %6319 = vmatmul.mubr.bf16.vlgmr.msra.gmra.mrb[52].mxu0 %v2349_v30 }
0x154e   :  { %6354 = vmatprep.mubr.msk.bf16.mxu0 %vm7041_vm0, %v7040_v0  ;;  %6347 = vmatpush3.bf16.msra.mxu0 %v2582_v8 }
0x154f   :  { %6348 = vmatprep.subr.bf16.mxu0 %v7040_v0 }
0x1552   :  { %6349 = vmatpush3.bf16.msra.mxu0 %v2583_v12 }
0x1553   :  { %6350 = vmatprep.subr.bf16.mxu0 %v7040_v0 }
0x1556   :  { %6351 = vmatpush3.bf16.msra.mxu0 %v2584_v49  ;;  %v2637_v49 = vld [vmem:[%s9323_s2 + $0xbe0] sm:$0xff] }
0x1557   :  { %6352 = vmatprep.subr.bf16.mxu0 %v7040_v0  ;;  %v2645_v29 = vpack.c.bf16 %v2638_v50, %v2637_v49  ;;  %v2827_v50 = vld [vmem:[%s9323_s2 + $0x5f0] sm:$0xff] }
0x155a   :  { %6353 = vmatpush3.bf16.msra.mxu0 %v2585_v18  ;;  %v2640_v18 = vld [vmem:[%s9323_s2 + $0xbf8] sm:$0xff] }
0x155b   :  { %6370 = vmatprep.subr.bf16.mxu0 %v7040_v0 }
0x1620   :  { %v2396_v42 = vpop.f32.mrb[52].mxu0 }
0x1621   :  { %v2397_v43 = vadd.f32 %v5650_v40, %v2396_v42  ;;  %v6320_v44 = vpop.f32.mrb[53].mxu0  ;;  %v2510_v42 = vld [vmem:[%s9326_s3 + $0x128] sm:$0xff] }
0x1622   :  { %v2399_v45 = vpop.f32.mrb[54].mxu0 }
0x1623   :  { %v2400_v51 = vadd.f32 %v5650_v40, %v2399_v45  ;;  %v6321_v54 = vpop.f32.mrb[55].mxu0  ;;  %v2403_v36 = vadd.f32 %v2397_v43, %v7935_v52  ;;  %v2509_v40 = vld [vmem:[%s9326_s3 + $0x120] sm:$0xff] }
0x1624   :  { %v2519_v45 = vpack.c.bf16 %v2510_v42, %v2509_v40  ;;  %v2511_v54 = vld [vmem:[%s9326_s3 + $0x130] sm:$0xff]  ;;  %v2761_v40 = vld [vmem:[%s9323_s2 + $0x588] sm:$0xff] }
0x1625   :  { %v2407_v41 = vsel %vm61_vm1, %v2403_v36, 0.0  ;;  %v2404_v55 = vadd.f32 %v2400_v51, %v7937_v53  ;;  %v2445_v53 = vld [vmem:[%s9323_s2 + $0xb78] sm:$0xff]  ;;  %v2762_v42 = vld [vmem:[%s9323_s2 + $0x590] sm:$0xff] }
0x1626   :  { %2408 = vadd.xlane.f32.xlu0 %v2407_v41  ;;  %v2455_v6 = vpack.c.bf16 %v2446_v56, %v2445_v53 }
0x1627   :  { %v2410_v60 = vsel %vm61_vm1, %v2404_v55, 0.0 }
0x1628   :  { %2411 = vadd.xlane.f32.xlu1 %v2410_v60  ;;  %6323 = vmatpush3.bf16.msra.mxu1 %v2455_v6  ;;  %v2514_v60 = vld [vmem:[%s9326_s3 + $0x148] sm:$0xff] }
0x1629   :  { %6324 = vmatprep.subr.bf16.mxu1 %v7040_v0 }
0x162c   :  { %6325 = vmatpush3.bf16.msra.mxu1 %v2456_v11  ;;  %v2634_v11 = vld [vmem:[%s9323_s2 + $0xbc8] sm:$0xff] }
0x162d   :  { %6326 = vmatprep.subr.bf16.mxu1 %v7040_v0  ;;  %v2643_v31 = vpack.c.bf16 %v2634_v11, %v2633_v58  ;;  %v2823_v11 = vld [vmem:[%s9323_s2 + $0x5d0] sm:$0xff] }
0x1630   :  { %6327 = vmatpush3.bf16.msra.mxu1 %v2457_v13  ;;  %v2636_v13 = vld [vmem:[%s9323_s2 + $0xbd8] sm:$0xff] }
0x1631   :  { %6328 = vmatprep.subr.bf16.mxu1 %v7040_v0  ;;  %v2644_v15 = vpack.c.bf16 %v2636_v13, %v2635_v24  ;;  %v2825_v13 = vld [vmem:[%s9323_s2 + $0x5e0] sm:$0xff] }
0x1634   :  { %6329 = vmatpush3.bf16.msra.mxu1 %v2458_v17 }
0x1635   :  { %6334 = vmatprep.subr.bf16.mxu1 %v7040_v0 }
0x16b3   :  { %v2409_v61 = vpop.xlane.xlu0 %2408 }
0x16b4   :  { %v2413_v62 = vmul.f32 0.015625, %v2409_v61 }
0x16b5   :  { %v2412_v63 = vpop.xlane.xlu1 %2411 }
0x16b6   :  { %v2415_v1 = vsub.f32 %v2403_v36, %v2413_v62  ;;  %v2414_v2 = vmul.f32 0.015625, %v2412_v63  ;;  %v2512_v36 = vld [vmem:[%s9326_s3 + $0x138] sm:$0xff]  ;;  %v2515_v62 = vld [vmem:[%s9326_s3 + $0x150] sm:$0xff] }
0x16b7   :  { %v2520_v41 = vpack.c.bf16 %v2512_v36, %v2511_v54  ;;  %v2516_v63 = vld [vmem:[%s9326_s3 + $0x158] sm:$0xff]  ;;  %v2765_v36 = vld [vmem:[%s9323_s2 + $0x5a8] sm:$0xff] }
0x16b8   :  { %v2416_v3 = vsub.f32 %v2404_v55, %v2414_v2  ;;  %v2417_v47 = vmul.f32 %v2415_v1, %v2415_v1  ;;  %v2513_v55 = vld [vmem:[%s9326_s3 + $0x140] sm:$0xff]  ;;  %v5653_v2 = vld [vmem:[%s9323_s2 + $0xbb8] ss:$0 sm:$0xff] }
0x16b9   :  { %v2521_v61 = vpack.c.bf16 %v2514_v60, %v2513_v55  ;;  %v2767_v60 = vld [vmem:[%s9323_s2 + $0x5b8] sm:$0xff] }
0x16ba   :  { %v2419_v48 = vsel %vm61_vm1, %v2417_v47, 0.0  ;;  %v2418_v4 = vmul.f32 %v2416_v3, %v2416_v3 }
0x16bb   :  { %2420 = vadd.xlane.f32.xlu0 %v2419_v48 }
0x16bc   :  { %v2422_v52 = vsel %vm61_vm1, %v2418_v4, 0.0 }
0x16bd   :  { %2423 = vadd.xlane.f32.xlu1 %v2422_v52 }
0x1748   :  { %v2421_v19 = vpop.xlane.xlu0 %2420 }
0x1749   :  { %v2425_v20 = vmul.f32 0.015625, %v2421_v19 }
0x174a   :  { %v2424_v21 = vpop.xlane.xlu1 %2423 }
0x174b   :  { %v2427_v22 = vadd.f32 1e-12, %v2425_v20  ;;  %v2426_v23 = vmul.f32 0.015625, %v2424_v21  ;;  %v2646_v20 = vpack.c.bf16 %v2640_v18, %v2639_v14  ;;  %v2697_v21 = vld [vmem:[%s9326_s3 + $0x1b0] sm:$0xff]  ;;  %v2830_v14 = vld [vmem:[%s9323_s2 + $0x608] sm:$0xff] }
0x174d   :  { %6868 = vrsqrt.f32 %v2427_v22  ;;  %v2428_v46 = vadd.f32 1e-12, %v2426_v23  ;;  %v2698_v22 = vld [vmem:[%s9326_s3 + $0x1b8] sm:$0xff]  ;;  %v2699_v23 = vld [vmem:[%s9326_s3 + $0x1c0] sm:$0xff] }
0x174f   :  { %6870 = vrsqrt.f32 %v2428_v46  ;;  %v2707_v46 = vpack.c.bf16 %v2698_v22, %v2697_v21 }
0x1757   :  { %v6869_v25 = vpop.eup %6868 }
0x1758   :  { %v2431_v27 = vmul.f32 %v6869_v25, %v2415_v1  ;;  %v2522_v1 = vpack.c.bf16 %v2516_v63, %v2515_v62  ;;  %v2700_v25 = vld [vmem:[%s9326_s3 + $0x1c8] sm:$0xff]  ;;  %v8212_v63 = vld [vmem:[%s9324_s0 + $0x10] sm:$0xff] }
0x1759   :  { %v6871_v28 = vpop.eup %6870 }
0x175a   :  { %v2437_v33 = vmul.f32 %v5651_v26, %v2431_v27  ;;  %v2432_v34 = vmul.f32 %v6871_v28, %v2416_v3  ;;  %v5657_v3 = vld [vmem:[%s9323_s2 + $0x580] ss:$0 sm:$0xff]  ;;  %v2701_v27 = vld [vmem:[%s9326_s3 + $0x1d0] sm:$0xff]  ;;  %v2702_v28 = vld [vmem:[%s9326_s3 + $0x1d8] sm:$0xff] }
0x175c   :  { %v2438_v30 = vmul.f32 %v5651_v26, %v2432_v34  ;;  %v2443_v43 = vadd.f32 %v5652_v35, %v2437_v33  ;;  %v2708_v26 = vpack.c.bf16 %v2700_v25, %v2699_v23  ;;  %v2709_v33 = vpack.c.bf16 %v2702_v28, %v2701_v27  ;;  %v2703_v34 = vld [vmem:[%s9326_s3 + $0x1e0] sm:$0xff] }
0x175e   :  { %v2444_v44 = vadd.f32 %v5652_v35, %v2438_v30  ;;  %v2704_v35 = vld [vmem:[%s9326_s3 + $0x1e8] sm:$0xff] }
0x175f   :  { %v2710_v30 = vpack.c.bf16 %v2704_v35, %v2703_v34 }
0x1760   :  { %v8082_v51 = vpack.c.bf16 %v2444_v44, %v2443_v43  ;;  %v2771_v43 = vpack.c.bf16 %v2762_v42, %v2761_v40  ;;  %v2763_v44 = vld [vmem:[%s9323_s2 + $0x598] sm:$0xff] }
0x1762   :  { %6331 = vmatmul.mubr.msk.bf16.vlgmr.msra.gmra.mrb[48].mxu1 %vm61_vm1, %v8082_v51  ;;  %6355 = vmatmul.mubr.msk.bf16.vlgmr.msra.gmra.mrb[56].mxu0 %vm61_vm1, %v8082_v51 }
0x1763   :  { %6335 = vmatpush3.bf16.msra.mxu1 %v2519_v45  ;;  %6342 = vmatprep.mubr.msk.bf16.mxu1 %vm7041_vm0, %v7040_v0  ;;  %v2764_v45 = vld [vmem:[%s9323_s2 + $0x5a0] sm:$0xff] }
0x1764   :  { %6336 = vmatprep.subr.bf16.mxu1 %v7040_v0  ;;  %6378 = vmatprep.mubr.msk.bf16.mxu0 %vm7041_vm0, %v7040_v0  ;;  %v2772_v54 = vpack.c.bf16 %v2764_v45, %v2763_v44 }
0x1765   :  { %6371 = vmatpush3.bf16.msra.mxu0 %v2707_v46 }
0x1766   :  { %6372 = vmatprep.subr.bf16.mxu0 %v7040_v0 }
0x1767   :  { %6337 = vmatpush3.bf16.msra.mxu1 %v2520_v41  ;;  %v2766_v41 = vld [vmem:[%s9323_s2 + $0x5b0] sm:$0xff] }
0x1768   :  { %6338 = vmatprep.subr.bf16.mxu1 %v7040_v0  ;;  %v2773_v55 = vpack.c.bf16 %v2766_v41, %v2765_v36 }
0x1769   :  { %6373 = vmatpush3.bf16.msra.mxu0 %v2708_v26 }
0x176a   :  { %6374 = vmatprep.subr.bf16.mxu0 %v7040_v0 }
0x176b   :  { %6339 = vmatpush3.bf16.msra.mxu1 %v2521_v61  ;;  %v2768_v61 = vld [vmem:[%s9323_s2 + $0x5c0] sm:$0xff] }
0x176c   :  { %6340 = vmatprep.subr.bf16.mxu1 %v7040_v0  ;;  %v2774_v62 = vpack.c.bf16 %v2768_v61, %v2767_v60 }
0x176d   :  { %6375 = vmatpush3.bf16.msra.mxu0 %v2709_v33 }
0x176e   :  { %6376 = vmatprep.subr.bf16.mxu0 %v7040_v0 }
0x176f   :  { %6341 = vmatpush3.bf16.msra.mxu1 %v2522_v1  ;;  %v8217_v1 = vld [vmem:[%s9324_s0 + $0x18] sm:$0xff] }
0x1770   :  { %6358 = vmatprep.subr.bf16.mxu1 %v7040_v0 }
0x1771   :  { %6377 = vmatpush3.bf16.msra.mxu0 %v2710_v30 }
0x1772   :  { %6394 = vmatprep.subr.bf16.mxu0 %v7040_v0 }
0x1835   :  { %v2500_v47 = vpop.f32.mrb[48].mxu1  ;;  %v2624_v48 = vpop.f32.mrb[56].mxu0 }
0x1836   :  { %v2501_v4 = vadd.f32 %v5653_v2, %v2500_v47  ;;  %v2625_v52 = vadd.f32 %v5657_v3, %v2624_v48  ;;  %v6332_v53 = vpop.f32.mrb[49].mxu1  ;;  %v6356_v56 = vpop.f32.mrb[57].mxu0 }
0x1837   :  { %v2503_v5 = vpop.f32.mrb[50].mxu1  ;;  %v2627_v6 = vpop.f32.mrb[58].mxu0 }
0x1838   :  { %v2504_v7 = vadd.f32 %v5653_v2, %v2503_v5  ;;  %v2628_v8 = vadd.f32 %v5657_v3, %v2627_v6  ;;  %v6333_v9 = vpop.f32.mrb[51].mxu1  ;;  %v6357_v10 = vpop.f32.mrb[59].mxu0  ;;  %6872 = vtanh.f32 %v2625_v52  ;;  %v2507_v39 = vmax.f32 %v2501_v4, 0.0  ;;  %v5655_v3 = vld [vmem:[%s9326_s3 + $0x160] ss:$0 sm:$0xff] }
0x1839   :  { %v8221_v2 = vpack.c.bf16 %v8217_v1, %v8212_v63  ;;  %v5659_v5 = vld [vmem:[%s9323_s2 + $0xc00] ss:$0 sm:$0xff] }
0x183a   :  { %v2508_v12 = vmax.f32 %v2504_v7, 0.0  ;;  %6874 = vtanh.f32 %v2628_v8 }
0x183c   :  { %v2518_v32 = vpack.c.bf16 %v2508_v12, %v2507_v39  ;;  %v2824_v39 = vld [vmem:[%s9323_s2 + $0x5d8] sm:$0xff] }
0x183e   :  { %6343 = vmatmul.mubr.msk.bf16.vlgmr.msra.gmra.mrb[52].mxu1 %vm61_vm1, %v2518_v32  ;;  %v2832_v32 = vpack.c.bf16 %v2824_v39, %v2823_v11  ;;  %v2885_v39 = vld [vmem:[%s9323_s2 + $0x638] sm:$0xff] }
0x183f   :  { %6359 = vmatpush3.bf16.msra.mxu1 %v2643_v31  ;;  %6366 = vmatprep.mubr.msk.bf16.mxu1 %vm7041_vm0, %v7040_v0 }
0x1840   :  { %6360 = vmatprep.subr.bf16.mxu1 %v7040_v0 }
0x1842   :  { %v6873_v16 = vpop.eup %6872 }
0x1843   :  { %6361 = vmatpush3.bf16.msra.mxu1 %v2644_v15  ;;  %v2826_v15 = vld [vmem:[%s9323_s2 + $0x5e8] sm:$0xff] }
0x1844   :  { %v6875_v17 = vpop.eup %6874  ;;  %6362 = vmatprep.subr.bf16.mxu1 %v7040_v0  ;;  %v2833_v49 = vpack.c.bf16 %v2826_v15, %v2825_v13 }
0x1845   :  { %v2642_v19 = vpack.c.bf16 %v6875_v17, %v6873_v16  ;;  %v2828_v16 = vld [vmem:[%s9323_s2 + $0x5f8] sm:$0xff]  ;;  %v2829_v17 = vld [vmem:[%s9323_s2 + $0x600] sm:$0xff] }
0x1846   :  { %v2835_v18 = vpack.c.bf16 %v2830_v14, %v2829_v17 }
0x1847   :  { %6363 = vmatpush3.bf16.msra.mxu1 %v2645_v29  ;;  %v2834_v29 = vpack.c.bf16 %v2828_v16, %v2827_v50  ;;  %v44_v50 = vld [vmem:[%s9325_s1 + $0x10] sm:$0xff] }
0x1848   :  { %6364 = vmatprep.subr.bf16.mxu1 %v7040_v0 }
0x184b   :  { %6365 = vmatpush3.bf16.msra.mxu1 %v2646_v20 }
0x184c   :  { %6382 = vmatprep.subr.bf16.mxu1 %v7040_v0 }
0x184e   :  { %6367 = vmatmul.mubr.msk.bf16.vlgmr.msra.gmra.mrb[56].mxu1 %vm61_vm1, %v2642_v19  ;;  %v5663_v19 = vld [vmem:[%s9323_s2 + $0x5c8] ss:$0 sm:$0xff] }
0x184f   :  { %6390 = vmatprep.mubr.msk.bf16.mxu1 %vm7041_vm0, %v7040_v0  ;;  %6383 = vmatpush3.bf16.msra.mxu1 %v2771_v43 }
0x1850   :  { %6384 = vmatprep.subr.bf16.mxu1 %v7040_v0 }
0x1853   :  { %6385 = vmatpush3.bf16.msra.mxu1 %v2772_v54  ;;  %v5661_v54 = vld [vmem:[%s9326_s3 + $0x1f0] ss:$0 sm:$0xff] }
0x1854   :  { %6386 = vmatprep.subr.bf16.mxu1 %v7040_v0 }
0x1857   :  { %6387 = vmatpush3.bf16.msra.mxu1 %v2773_v55 }
0x1858   :  { %6388 = vmatprep.subr.bf16.mxu1 %v7040_v0 }
0x185b   :  { %6389 = vmatpush3.bf16.msra.mxu1 %v2774_v62 }
0x185c   :  { %6406 = vmatprep.subr.bf16.mxu1 %v7040_v0 }
0x185e   :  { %6391 = vmatmul.mubr.msk.bf16.vlgmr.msra.gmra.mrb[60].mxu1 %vm61_vm1, %v8221_v2 }
0x185f   :  { %6414 = vmatprep.mubr.msk.bf16.mxu1 %vm7041_vm0, %v7040_v0 }
0x1911   :  { %v2564_v47 = vpop.f32.mrb[52].mxu1 }
0x1912   :  { %v2565_v48 = vadd.f32 %v5655_v3, %v2564_v47  ;;  %v6344_v4 = vpop.f32.mrb[53].mxu1 }
0x1913   :  { %v2567_v52 = vpop.f32.mrb[54].mxu1 }
0x1914   :  { %2571 = vst [vmem:[%s9327_s4] sm:$0xff] %v2565_v48  ;;  %v2568_v53 = vadd.f32 %v5655_v3, %v2567_v52  ;;  %v6345_v56 = vpop.f32.mrb[55].mxu1  ;;  %v5665_v3 = vld [vmem:[%s9323_s2 + $0x610] ss:$0 sm:$0xff] }
0x1916   :  { %2572 = vst [vmem:[%s9327_s4 + $0x8] sm:$0xff] %v2568_v53 }
0x1921   :  { %v2688_v6 = vpop.f32.mrb[56].mxu1 }
0x1922   :  { %v2689_v7 = vadd.f32 %v5659_v5, %v2688_v6  ;;  %v6368_v8 = vpop.f32.mrb[57].mxu1 }
0x1923   :  { %v2691_v9 = vpop.f32.mrb[58].mxu1  ;;  %v2882_v8 = vld [vmem:[%s9323_s2 + $0x620] sm:$0xff] }
0x1924   :  { %v2692_v10 = vadd.f32 %v5659_v5, %v2691_v9  ;;  %v6369_v58 = vpop.f32.mrb[59].mxu1  ;;  %v2695_v12 = vmax.f32 %v2689_v7, 0.0  ;;  %v2881_v7 = vld [vmem:[%s9323_s2 + $0x618] sm:$0xff]  ;;  %v2883_v9 = vld [vmem:[%s9323_s2 + $0x628] sm:$0xff] }
0x1925   :  { %v2884_v58 = vld [vmem:[%s9323_s2 + $0x630] sm:$0xff] }
0x1926   :  { %v2696_v31 = vmax.f32 %v2692_v10, 0.0  ;;  %v2890_v10 = vpack.c.bf16 %v2882_v8, %v2881_v7  ;;  %v2891_v11 = vpack.c.bf16 %v2884_v58, %v2883_v9 }
0x1928   :  { %v2706_v24 = vpack.c.bf16 %v2696_v31, %v2695_v12  ;;  %6407 = vmatpush3.bf16.msra.mxu1 %v2890_v10  ;;  %v2886_v12 = vld [vmem:[%s9323_s2 + $0x640] sm:$0xff] }
0x1929   :  { %6408 = vmatprep.subr.bf16.mxu1 %v7040_v0  ;;  %v2892_v31 = vpack.c.bf16 %v2886_v12, %v2885_v39 }
0x192a   :  { %6379 = vmatmul.mubr.msk.bf16.vlgmr.msra.gmra.mrb[60].mxu0 %vm61_vm1, %v2706_v24  ;;  %v2888_v24 = vld [vmem:[%s9323_s2 + $0x650] sm:$0xff] }
0x192b   :  { %6395 = vmatpush3.bf16.msra.mxu0 %v2832_v32  ;;  %6402 = vmatprep.mubr.msk.bf16.mxu0 %vm7041_vm0, %v7040_v0  ;;  %v2887_v32 = vld [vmem:[%s9323_s2 + $0x648] sm:$0xff] }
0x192c   :  { %6396 = vmatprep.subr.bf16.mxu0 %v7040_v0  ;;  %6409 = vmatpush3.bf16.msra.mxu1 %v2891_v11  ;;  %v2893_v13 = vpack.c.bf16 %v2888_v24, %v2887_v32 }
0x192d   :  { %6410 = vmatprep.subr.bf16.mxu1 %v7040_v0 }
0x192f   :  { %6397 = vmatpush3.bf16.msra.mxu0 %v2833_v49 }
0x1930   :  { %6398 = vmatprep.subr.bf16.mxu0 %v7040_v0  ;;  %6411 = vmatpush3.bf16.msra.mxu1 %v2892_v31 }
0x1931   :  { %v2816_v20 = vpop.f32.mrb[60].mxu1  ;;  %6412 = vmatprep.subr.bf16.mxu1 %v7040_v0 }
0x1932   :  { %v2817_v21 = vadd.f32 %v5663_v19, %v2816_v20  ;;  %v6392_v22 = vpop.f32.mrb[61].mxu1 }
0x1933   :  { %6399 = vmatpush3.bf16.msra.mxu0 %v2834_v29  ;;  %v2819_v23 = vpop.f32.mrb[62].mxu1 }
0x1934   :  { %6400 = vmatprep.subr.bf16.mxu0 %v7040_v0  ;;  %v2948_v46 = vmul.f32 %v2817_v21, %v7464_v57  ;;  %v6393_v25 = vpop.f32.mrb[63].mxu1  ;;  %v2950_v26 = vmul.f32 %v2817_v21, %v7467_v37  ;;  %v2952_v27 = vmul.f32 %v2817_v21, %v7470_v38  ;;  %v2954_v28 = vmul.f32 %v2817_v21, %v7473_v59 }
0x1935   :  { %v2820_v33 = vadd.f32 %v5663_v19, %v2819_v23  ;;  %6413 = vmatpush3.bf16.msra.mxu1 %v2893_v13 }
0x1937   :  { %6401 = vmatpush3.bf16.msra.mxu0 %v2835_v18  ;;  %v2949_v34 = vmul.f32 %v2820_v33, %v7464_v57  ;;  %v2951_v35 = vmul.f32 %v2820_v33, %v7467_v37  ;;  %v2953_v30 = vmul.f32 %v2820_v33, %v7470_v38  ;;  %v2955_v40 = vmul.f32 %v2820_v33, %v7473_v59  ;;  %v45_v18 = vld [vmem:[%s9325_s1 + $0x18] sm:$0xff] }
0x1938   :  { %6415 = vmatmul.mubr.msk.bf16.vlgmr.msra.gmra.mrb[64].mxu1 %vm61_vm1, %v8221_v2 }
0x1939   :  { %v2957_v42 = vpack.c.bf16 %v2951_v35, %v2950_v26  ;;  %v2956_v43 = vpack.c.bf16 %v2949_v34, %v2948_v46  ;;  %v2958_v44 = vpack.c.bf16 %v2953_v30, %v2952_v27  ;;  %v2959_v45 = vpack.c.bf16 %v2955_v40, %v2954_v28 }
0x193a   :  { %6403 = vmatmul.mubr.msk.bf16.vlgmr.msra.gmra.mrb[64].mxu0 %vm61_vm1, %v8221_v2 }
0x193b   :  { %6420 = vmatprep.mubr.msk.bf16.mxu0 %vm61_vm1, %v2956_v43 }
0x19fd   :  { %v2752_v36 = vpop.f32.mrb[60].mxu0 }
0x19fe   :  { %v2753_v41 = vadd.f32 %v5661_v54, %v2752_v36  ;;  %v6380_v55 = vpop.f32.mrb[61].mxu0 }
0x19ff   :  { %v2755_v60 = vpop.f32.mrb[62].mxu0 }
0x1a00   :  { %2759 = vst [vmem:[%s9327_s4 + $0x20] sm:$0xff] %v2753_v41  ;;  %v2756_v61 = vadd.f32 %v5661_v54, %v2755_v60  ;;  %v6381_v62 = vpop.f32.mrb[63].mxu0 }
0x1a02   :  { %2760 = vst [vmem:[%s9327_s4 + $0x28] sm:$0xff] %v2756_v61 }
0x1a0d   :  { %v2874_v47 = vpop.f32.mrb[64].mxu0 }
0x1a0e   :  { %v6404_v48 = vpop.f32.mrb[65].mxu0  ;;  %v2875_v52 = vadd.f32 %v5665_v3, %v2874_v47 }
0x1a0f   :  { %v2877_v4 = vpop.f32.mrb[66].mxu0 }
0x1a10   :  { %v2878_v53 = vadd.f32 %v5665_v3, %v2877_v4  ;;  %v6405_v56 = vpop.f32.mrb[67].mxu0 }
0x1a12   :  { %v2960_v5 = vpack.c.bf16 %v2878_v53, %v2875_v52 }
0x1a14   :  { %6744 = vmatprep.subr.msk.bf16.mxu0 %vm61_vm1, %v2960_v5  ;;  %v2974_v6 = vsel %vm61_vm1, %v2960_v5, 0 }
0x1a15   :  { %6419 = vmatpush3.bf16.xpose.msra.mxu0 %v2974_v6 }
0x1a16   :  { %6438 = vmatprep.subr.bf16.mxu0 %v7040_v0 }
0x1a1c   :  { %6421 = vmatmul.mubr.msk.bf16.vlgmr.msra.gmra.mrb[68].mxu0 %vm61_vm1, %v2957_v42 }
0x1a1d   :  { %6424 = vmatprep.mubr.msk.bf16.mxu0 %vm61_vm1, %v2958_v44 }
0x1a24   :  { %6425 = vmatmul.mubr.msk.bf16.gmra.mrb[72].mxu0 %vm61_vm1, %v2959_v45 }
0x1a25   :  { %6446 = vmatprep.mubr.msk.bf16.mxu0 %vm7041_vm0, %v7040_v0 }
0x1aef   :  { %v6422_v15 = vpop.f32.mrb[68].mxu0 }
0x1af0   :  { %v3010_v49 = vpop.f32.mrb[69].mxu0  ;;  %v3043_v16 = vmul.f32 0.25, %v6422_v15 }
0x1af1   :  { %v3041_v29 = vmul.f32 0.25, %v3010_v49  ;;  %v6423_v17 = vpop.f32.mrb[70].mxu0 }
0x1af2   :  { %v3013_v14 = vpop.f32.mrb[71].mxu0  ;;  %v3044_v19 = vmul.f32 0.25, %v6423_v17  ;;  %v3051_v23 = vadd.f32 %v3043_v16, %v44_v50 }
0x1af3   :  { %v3042_v20 = vmul.f32 0.25, %v3013_v14  ;;  %v3049_v21 = vadd.f32 %v3041_v29, %v44_v50 }
0x1af4   :  { %v3052_v26 = vadd.f32 %v3044_v19, %v45_v18  ;;  %v3063_v35 = vsel %vm1204_vm2, %v3051_v23, -inf }
0x1af5   :  { %v3057_v22 = vsel %vm1204_vm2, %v3049_v21, -inf  ;;  %v3050_v2 = vadd.f32 %v3042_v20, %v45_v18 }
0x1af6   :  { %3058 = vmax.xlane.f32.xlu0 %v3057_v22  ;;  %v3066_v43 = vsel %vm1204_vm2, %v3052_v26, -inf }
0x1af7   :  { %v6426_v46 = vpop.f32.mrb[72].mxu0  ;;  %v3060_v25 = vsel %vm1204_vm2, %v3050_v2, -inf }
0x1af8   :  { %3061 = vmax.xlane.f32.xlu1 %v3060_v25  ;;  %v3026_v27 = vpop.f32.mrb[73].mxu0  ;;  %v3047_v28 = vmul.f32 0.25, %v6426_v46 }
0x1af9   :  { %v3045_v33 = vmul.f32 0.25, %v3026_v27  ;;  %v6427_v34 = vpop.f32.mrb[74].mxu0 }
0x1afa   :  { %3064 = vmax.xlane.f32.xlu0 %v3063_v35  ;;  %v3029_v30 = vpop.f32.mrb[75].mxu0  ;;  %v3048_v40 = vmul.f32 0.25, %v6427_v34  ;;  %v3055_v36 = vadd.f32 %v3047_v28, %v44_v50  ;;  %v2932_v28 = vpop.f32.mrb[64].mxu1  ;;  %v5667_v34 = vld [vmem:[%s9323_s2 + $0x658] ss:$0 sm:$0xff] }
0x1afb   :  { %v3046_v42 = vmul.f32 0.25, %v3029_v30  ;;  %v3053_v44 = vadd.f32 %v3045_v33, %v44_v50  ;;  %v6416_v33 = vpop.f32.mrb[65].mxu1  ;;  %v2933_v35 = vadd.f32 %v5667_v34, %v2932_v28 }
0x1afc   :  { %3067 = vmax.xlane.f32.xlu1 %v3066_v43  ;;  %v3056_v55 = vadd.f32 %v3048_v40, %v45_v18  ;;  %v3075_v60 = vsel %vm1204_vm2, %v3055_v36, -inf  ;;  %v2935_v30 = vpop.f32.mrb[66].mxu1 }
0x1afd   :  { %v3069_v45 = vsel %vm1204_vm2, %v3053_v44, -inf  ;;  %v3054_v54 = vadd.f32 %v3046_v42, %v45_v18  ;;  %v2936_v40 = vadd.f32 %v5667_v34, %v2935_v30  ;;  %v6417_v42 = vpop.f32.mrb[67].mxu1 }
0x1afe   :  { %3070 = vmax.xlane.f32.xlu0 %v3069_v45  ;;  %v3078_v61 = vsel %vm1204_vm2, %v3056_v55, -inf }
0x1aff   :  { %v3072_v41 = vsel %vm1204_vm2, %v3054_v54, -inf  ;;  %v3149_v43 = vpack.c.bf16 %v2936_v40, %v2933_v35 }
0x1b00   :  { %3073 = vmax.xlane.f32.xlu1 %v3072_v41 }
0x1b01   :  { %6428 = vmatprep.subr.bf16.mxu1 %v3149_v43 }
0x1b02   :  { %3076 = vmax.xlane.f32.xlu0 %v3075_v60  ;;  %6429 = vmatpush3.bf16.msra.mxu1 %v3149_v43 }
0x1b03   :  { %6450 = vmatprep.subr.bf16.mxu1 %v7040_v0 }
0x1b04   :  { %3079 = vmax.xlane.f32.xlu1 %v3078_v61 }
0x1b83   :  { %v3059_v62 = vpop.xlane.xlu0 %3058 }
0x1b84   :  { %v3081_v3 = vsub.f32 %v3049_v21, %v3059_v62 }
0x1b85   :  { %v3062_v47 = vpop.xlane.xlu1 %3061 }
0x1b86   :  { %v3089_v48 = vmul.f32 1.442695, %v3081_v3  ;;  %v3082_v4 = vsub.f32 %v3050_v2, %v3062_v47 }
0x1b87   :  { %v3065_v52 = vpop.xlane.xlu0 %3064 }
0x1b88   :  { %6876 = vpow2.f32 %v3089_v48  ;;  %v3091_v53 = vmul.f32 1.442695, %v3082_v4  ;;  %v3083_v56 = vsub.f32 %v3051_v23, %v3065_v52 }
0x1b89   :  { %v3068_v5 = vpop.xlane.xlu1 %3067 }
0x1b8a   :  { %6878 = vpow2.f32 %v3091_v53  ;;  %v3093_v6 = vmul.f32 1.442695, %v3083_v56  ;;  %v3084_v7 = vsub.f32 %v3052_v26, %v3068_v5 }
0x1b8b   :  { %v3071_v8 = vpop.xlane.xlu0 %3070 }
0x1b8c   :  { %6880 = vpow2.f32 %v3093_v6  ;;  %v3095_v9 = vmul.f32 1.442695, %v3084_v7  ;;  %v3085_v10 = vsub.f32 %v3053_v44, %v3071_v8 }
0x1b8d   :  { %v3074_v58 = vpop.xlane.xlu1 %3073 }
0x1b8e   :  { %6882 = vpow2.f32 %v3095_v9  ;;  %v3097_v11 = vmul.f32 1.442695, %v3085_v10  ;;  %v3086_v39 = vsub.f32 %v3054_v54, %v3074_v58 }
0x1b8f   :  { %v3077_v12 = vpop.xlane.xlu0 %3076 }
0x1b90   :  { %6884 = vpow2.f32 %v3097_v11  ;;  %v3099_v31 = vmul.f32 1.442695, %v3086_v39  ;;  %v3087_v32 = vsub.f32 %v3055_v36, %v3077_v12 }
0x1b91   :  { %v3080_v24 = vpop.xlane.xlu1 %3079 }
0x1b92   :  { %v6877_v13 = vpop.eup %6876  ;;  %6886 = vpow2.f32 %v3099_v31  ;;  %v3101_v15 = vmul.f32 1.442695, %v3087_v32  ;;  %v3088_v49 = vsub.f32 %v3056_v55, %v3080_v24  ;;  %v2939_v24 = vld [vmem:[%s9323_s2 + $0x660] sm:$0xff] }
0x1b93   :  { %v3105_v50 = vsel %vm1204_vm2, %v6877_v13, 0.0 }
0x1b94   :  { %v6879_v16 = vpop.eup %6878  ;;  %6888 = vpow2.f32 %v3101_v15  ;;  %v3103_v29 = vmul.f32 1.442695, %v3088_v49  ;;  %3106 = vadd.xlane.f32.xlu0 %v3105_v50  ;;  %v2941_v49 = vld [vmem:[%s9323_s2 + $0x670] sm:$0xff]  ;;  %v2942_v50 = vld [vmem:[%s9323_s2 + $0x678] sm:$0xff] }
0x1b95   :  { %v3108_v17 = vsel %vm1204_vm2, %v6879_v16, 0.0 }
0x1b96   :  { %v6881_v14 = vpop.eup %6880  ;;  %6890 = vpow2.f32 %v3103_v29  ;;  %3109 = vadd.xlane.f32.xlu1 %v3108_v17  ;;  %v2943_v29 = vld [vmem:[%s9323_s2 + $0x680] sm:$0xff]  ;;  %v2944_v17 = vld [vmem:[%s9323_s2 + $0x688] sm:$0xff] }
0x1b97   :  { %v3111_v18 = vsel %vm1204_vm2, %v6881_v14, 0.0 }
0x1b98   :  { %v6883_v19 = vpop.eup %6882  ;;  %3112 = vadd.xlane.f32.xlu0 %v3111_v18  ;;  %v2945_v18 = vld [vmem:[%s9323_s2 + $0x690] sm:$0xff] }
0x1b99   :  { %v3114_v20 = vsel %vm1204_vm2, %v6883_v19, 0.0 }
0x1b9a   :  { %v6885_v21 = vpop.eup %6884  ;;  %3115 = vadd.xlane.f32.xlu1 %v3114_v20 }
0x1b9b   :  { %v3117_v22 = vsel %vm1204_vm2, %v6885_v21, 0.0 }
0x1b9c   :  { %v6887_v2 = vpop.eup %6886  ;;  %3118 = vadd.xlane.f32.xlu0 %v3117_v22 }
0x1b9d   :  { %v3120_v23 = vsel %vm1204_vm2, %v6887_v2, 0.0 }
0x1b9e   :  { %v6889_v46 = vpop.eup %6888  ;;  %3121 = vadd.xlane.f32.xlu1 %v3120_v23 }
0x1b9f   :  { %v3123_v25 = vsel %vm1204_vm2, %v6889_v46, 0.0 }
0x1ba0   :  { %v6891_v26 = vpop.eup %6890  ;;  %3124 = vadd.xlane.f32.xlu0 %v3123_v25 }
0x1ba1   :  { %v3126_v27 = vsel %vm1204_vm2, %v6891_v26, 0.0 }
0x1ba2   :  { %3127 = vadd.xlane.f32.xlu1 %v3126_v27 }
0x1c21   :  { %v3107_v44 = vpop.xlane.xlu0 %3106 }
0x1c22   :  { %6892 = vrcp.f32 %v3107_v44 }
0x1c23   :  { %v3110_v45 = vpop.xlane.xlu1 %3109 }
0x1c24   :  { %6894 = vrcp.f32 %v3110_v45 }
0x1c25   :  { %v3113_v54 = vpop.xlane.xlu0 %3112 }
0x1c26   :  { %6896 = vrcp.f32 %v3113_v54 }
0x1c27   :  { %v3116_v36 = vpop.xlane.xlu1 %3115 }
0x1c28   :  { %6898 = vrcp.f32 %v3116_v36 }
0x1c29   :  { %v3119_v41 = vpop.xlane.xlu0 %3118 }
0x1c2a   :  { %6900 = vrcp.f32 %v3119_v41 }
0x1c2b   :  { %v3122_v55 = vpop.xlane.xlu1 %3121 }
0x1c2c   :  { %v6893_v60 = vpop.eup %6892  ;;  %6902 = vrcp.f32 %v3122_v55  ;;  %v3398_v55 = vld [vmem:[%s9323_s2 + $0x6f0] sm:$0xff] }
0x1c2d   :  { %v3125_v61 = vpop.xlane.xlu0 %3124  ;;  %v3137_v47 = vmul.f32 %v6893_v60, %v6877_v13  ;;  %v2940_v13 = vld [vmem:[%s9323_s2 + $0x668] sm:$0xff]  ;;  %v3399_v60 = vld [vmem:[%s9323_s2 + $0x6f8] sm:$0xff] }
0x1c2e   :  { %v6895_v62 = vpop.eup %6894  ;;  %6904 = vrcp.f32 %v3125_v61  ;;  %v3242_v15 = vpack.c.bf16 %v2940_v13, %v2939_v24 }
0x1c2f   :  { %v3128_v3 = vpop.xlane.xlu1 %3127  ;;  %v3138_v48 = vmul.f32 %v6895_v62, %v6879_v16  ;;  %v3243_v16 = vpack.c.bf16 %v2942_v50, %v2941_v49  ;;  %v3407_v62 = vpack.c.bf16 %v3399_v60, %v3398_v55 }
0x1c30   :  { %v6897_v4 = vpop.eup %6896  ;;  %6906 = vrcp.f32 %v3128_v3  ;;  %6439 = vmatpush3.bf16.msra.mxu0 %v3242_v15  ;;  %v5683_v15 = vld [vmem:[%s9323_s2 + $0x730] ss:$0 sm:$0xff] }
0x1c31   :  { %v3145_v52 = vpack.c.bf16 %v3138_v48, %v3137_v47  ;;  %v3139_v56 = vmul.f32 %v6897_v4, %v6881_v14  ;;  %6440 = vmatprep.subr.bf16.mxu0 %v7040_v0  ;;  %v3244_v14 = vpack.c.bf16 %v2944_v17, %v2943_v29  ;;  %v3400_v47 = vld [vmem:[%s9323_s2 + $0x700] sm:$0xff]  ;;  %v3401_v48 = vld [vmem:[%s9323_s2 + $0x708] sm:$0xff] }
0x1c32   :  { %v6899_v53 = vpop.eup %6898  ;;  %v3408_v4 = vpack.c.bf16 %v3401_v48, %v3400_v47  ;;  %v5679_v47 = vld [vmem:[%s9323_s2 + $0x7c8] ss:$0 sm:$0xff] }
0x1c33   :  { %v3140_v5 = vmul.f32 %v6899_v53, %v6883_v19  ;;  %6430 = vmatprep.mubr.msk.bf16.mxu1 %vm1204_vm2, %v3145_v52  ;;  %v2946_v19 = vld [vmem:[%s9323_s2 + $0x698] sm:$0xff]  ;;  %v3402_v52 = vld [vmem:[%s9323_s2 + $0x710] sm:$0xff] }
0x1c34   :  { %v6901_v6 = vpop.eup %6900  ;;  %6441 = vmatpush3.bf16.msra.mxu0 %v3243_v16  ;;  %v3245_v20 = vpack.c.bf16 %v2946_v19, %v2945_v18  ;;  %v3403_v53 = vld [vmem:[%s9323_s2 + $0x718] sm:$0xff] }
0x1c35   :  { %v3146_v7 = vpack.c.bf16 %v3140_v5, %v3139_v56  ;;  %v3141_v9 = vmul.f32 %v6901_v6, %v6885_v21  ;;  %6442 = vmatprep.subr.bf16.mxu0 %v7040_v0  ;;  %v3409_v56 = vpack.c.bf16 %v3403_v53, %v3402_v52  ;;  %v3404_v5 = vld [vmem:[%s9323_s2 + $0x720] sm:$0xff]  ;;  %v3405_v6 = vld [vmem:[%s9323_s2 + $0x728] sm:$0xff] }
0x1c36   :  { %v6903_v8 = vpop.eup %6902 }
0x1c37   :  { %6431 = vmatmul.mubr.msk.bf16.vlgmr.msra.gmra.mrb[68].mxu1 %vm1204_vm2, %v3146_v7  ;;  %v3142_v10 = vmul.f32 %v6903_v8, %v6887_v2  ;;  %v3410_v7 = vpack.c.bf16 %v3405_v6, %v3404_v5  ;;  %v5677_v8 = vld [vmem:[%s9323_s2 + $0x6a0] ss:$0 sm:$0xff]  ;;  %v3456_v6 = vld [vmem:[%s9323_s2 + $0x738] sm:$0xff] }
0x1c38   :  { %v6905_v58 = vpop.eup %6904  ;;  %6443 = vmatpush3.bf16.msra.mxu0 %v3244_v14 }
0x1c39   :  { %v3147_v11 = vpack.c.bf16 %v3142_v10, %v3141_v9  ;;  %v3143_v12 = vmul.f32 %v6905_v58, %v6889_v46  ;;  %6444 = vmatprep.subr.bf16.mxu0 %v7040_v0 }
0x1c3a   :  { %v6907_v39 = vpop.eup %6906 }
0x1c3b   :  { %6434 = vmatprep.mubr.msk.bf16.mxu1 %vm1204_vm2, %v3147_v11  ;;  %v3144_v31 = vmul.f32 %v6907_v39, %v6891_v26 }
0x1c3c   :  { %6445 = vmatpush3.bf16.msra.mxu0 %v3245_v20 }
0x1c3d   :  { %v3148_v32 = vpack.c.bf16 %v3144_v31, %v3143_v12  ;;  %6462 = vmatprep.subr.bf16.mxu0 %v7040_v0 }
0x1c3f   :  { %6435 = vmatmul.mubr.msk.bf16.gmra.mrb[72].mxu1 %vm1204_vm2, %v3148_v32 }
0x1c40   :  { %6458 = vmatprep.mubr.msk.bf16.mxu1 %vm7041_vm0, %v7040_v0 }
0x1d0a   :  { %v6432_v21 = vpop.f32.mrb[68].mxu1 }
0x1d0b   :  { %v3229_v22 = vmul.f32 %v6432_v21, %v7467_v37  ;;  %v3196_v2 = vpop.f32.mrb[69].mxu1 }
0x1d0c   :  { %v3227_v23 = vmul.f32 %v3196_v2, %v7464_v57  ;;  %v6433_v46 = vpop.f32.mrb[70].mxu1 }
0x1d0d   :  { %v3230_v25 = vmul.f32 %v6433_v46, %v7467_v37  ;;  %v3199_v26 = vpop.f32.mrb[71].mxu1 }
0x1d0e   :  { %v3231_v27 = vadd.f32 %v3229_v22, %v3227_v23  ;;  %v3228_v28 = vmul.f32 %v3199_v26, %v7464_v57 }
0x1d10   :  { %v3232_v33 = vadd.f32 %v3230_v25, %v3228_v28  ;;  %v3337_v28 = vld [vmem:[%s9323_s2 + $0x6b0] sm:$0xff] }
0x1d12   :  { %v6436_v34 = vpop.f32.mrb[72].mxu1 }
0x1d13   :  { %v3212_v35 = vpop.f32.mrb[73].mxu1  ;;  %v3237_v43 = vmul.f32 %v6436_v34, %v7473_v59  ;;  %v3338_v34 = vld [vmem:[%s9323_s2 + $0x6b8] sm:$0xff] }
0x1d14   :  { %v3233_v30 = vmul.f32 %v3212_v35, %v7470_v38  ;;  %v6437_v40 = vpop.f32.mrb[74].mxu1  ;;  %v3339_v35 = vld [vmem:[%s9323_s2 + $0x6c0] sm:$0xff] }
0x1d15   :  { %v3215_v42 = vpop.f32.mrb[75].mxu1  ;;  %v3238_v36 = vmul.f32 %v6437_v40, %v7473_v59  ;;  %v3340_v40 = vld [vmem:[%s9323_s2 + $0x6c8] sm:$0xff] }
0x1d16   :  { %v3235_v44 = vadd.f32 %v3233_v30, %v3231_v27  ;;  %v3234_v45 = vmul.f32 %v3215_v42, %v7470_v38  ;;  %v3336_v27 = vld [vmem:[%s9323_s2 + $0x6a8] sm:$0xff]  ;;  %v3347_v30 = vpack.c.bf16 %v3339_v35, %v3338_v34  ;;  %v3341_v42 = vld [vmem:[%s9323_s2 + $0x6d0] sm:$0xff] }
0x1d18   :  { %v3239_v54 = vadd.f32 %v3237_v43, %v3235_v44  ;;  %v3236_v41 = vadd.f32 %v3234_v45, %v3232_v33  ;;  %v3346_v33 = vpack.c.bf16 %v3337_v28, %v3336_v27  ;;  %v3348_v43 = vpack.c.bf16 %v3341_v42, %v3340_v40  ;;  %v3342_v44 = vld [vmem:[%s9323_s2 + $0x6d8] sm:$0xff]  ;;  %v3343_v45 = vld [vmem:[%s9323_s2 + $0x6e0] sm:$0xff] }
0x1d1a   :  { %v3240_v61 = vadd.f32 %v3238_v36, %v3236_v41  ;;  %6451 = vmatpush3.bf16.msra.mxu1 %v3346_v33  ;;  %v5685_v33 = vld [vmem:[%s9323_s2 + $0x778] ss:$0 sm:$0xff] }
0x1d1b   :  { %6452 = vmatprep.subr.bf16.mxu1 %v7040_v0 }
0x1d1c   :  { %v3241_v3 = vpack.c.bf16 %v3240_v61, %v3239_v54  ;;  %v3349_v54 = vpack.c.bf16 %v3343_v45, %v3342_v44 }
0x1d1e   :  { %6447 = vmatmul.mubr.msk.bf16.vlgmr.msra.gmra.mrb[76].mxu0 %vm61_vm1, %v3241_v3  ;;  %6453 = vmatpush3.bf16.msra.mxu1 %v3347_v30 }
0x1d1f   :  { %6463 = vmatpush3.bf16.msra.mxu0 %v3407_v62  ;;  %6470 = vmatprep.mubr.msk.bf16.mxu0 %vm7041_vm0, %v7040_v0 }
0x1d20   :  { %6464 = vmatprep.subr.bf16.mxu0 %v7040_v0  ;;  %6454 = vmatprep.subr.bf16.mxu1 %v7040_v0 }
0x1d22   :  { %6455 = vmatpush3.bf16.msra.mxu1 %v3348_v43 }
0x1d23   :  { %6465 = vmatpush3.bf16.msra.mxu0 %v3408_v4  ;;  %6456 = vmatprep.subr.bf16.mxu1 %v7040_v0 }
0x1d24   :  { %6466 = vmatprep.subr.bf16.mxu0 %v7040_v0 }
0x1d26   :  { %6457 = vmatpush3.bf16.msra.mxu1 %v3349_v54 }
0x1d27   :  { %6467 = vmatpush3.bf16.msra.mxu0 %v3409_v56  ;;  %6474 = vmatprep.subr.bf16.mxu1 %v7040_v0  ;;  %v5680_v56 = vld [vmem:[%s9323_s2 + $0x7d0] ss:$0 sm:$0xff] }
0x1d28   :  { %6468 = vmatprep.subr.bf16.mxu0 %v7040_v0 }
0x1d2b   :  { %6469 = vmatpush3.bf16.msra.mxu0 %v3410_v7  ;;  %v3457_v7 = vld [vmem:[%s9323_s2 + $0x740] sm:$0xff] }
0x1d2e   :  { %6471 = vmatmul.mubr.msk.bf16.vlgmr.msra.gmra.mrb[80].mxu0 %vm61_vm1, %v8082_v51 }
0x1df1   :  { %v3287_v9 = vpop.f32.mrb[76].mxu0 }
0x1df2   :  { %v3288_v10 = vadd.f32 %v5677_v8, %v3287_v9  ;;  %v6448_v58 = vpop.f32.mrb[77].mxu0 }
0x1df3   :  { %v3290_v11 = vpop.f32.mrb[78].mxu0 }
0x1df4   :  { %v3291_v39 = vadd.f32 %v5677_v8, %v3290_v11  ;;  %v6449_v12 = vpop.f32.mrb[79].mxu0  ;;  %v3294_v31 = vadd.f32 %v3288_v10, %v8212_v63  ;;  %v3465_v10 = vpack.c.bf16 %v3457_v7, %v3456_v6  ;;  %v3458_v11 = vld [vmem:[%s9323_s2 + $0x748] sm:$0xff] }
0x1df6   :  { %v3298_v32 = vsel %vm61_vm1, %v3294_v31, 0.0  ;;  %v3295_v24 = vadd.f32 %v3291_v39, %v8217_v1  ;;  %v3459_v39 = vld [vmem:[%s9323_s2 + $0x750] sm:$0xff] }
0x1df7   :  { %3299 = vadd.xlane.f32.xlu0 %v3298_v32  ;;  %v3466_v12 = vpack.c.bf16 %v3459_v39, %v3458_v11  ;;  %v3461_v32 = vld [vmem:[%s9323_s2 + $0x760] sm:$0xff] }
0x1df8   :  { %v3301_v13 = vsel %vm61_vm1, %v3295_v24, 0.0 }
0x1df9   :  { %3302 = vadd.xlane.f32.xlu1 %v3301_v13  ;;  %v3462_v13 = vld [vmem:[%s9323_s2 + $0x768] sm:$0xff] }
0x1e01   :  { %v3449_v49 = vpop.f32.mrb[80].mxu0 }
0x1e02   :  { %v6472_v50 = vpop.f32.mrb[81].mxu0  ;;  %v3450_v29 = vadd.f32 %v5683_v15, %v3449_v49 }
0x1e03   :  { %v3452_v16 = vpop.f32.mrb[82].mxu0  ;;  %v5681_v50 = vld [vmem:[%s9323_s2 + $0x6e8] ss:$0 sm:$0xff] }
0x1e04   :  { %v3453_v17 = vadd.f32 %v5683_v15, %v3452_v16  ;;  %v6473_v14 = vpop.f32.mrb[83].mxu0  ;;  %v3463_v15 = vld [vmem:[%s9323_s2 + $0x770] sm:$0xff] }
0x1e05   :  { %v3468_v49 = vpack.c.bf16 %v3463_v15, %v3462_v13 }
0x1e06   :  { %v3535_v18 = vpack.c.bf16 %v3453_v17, %v3450_v29 }
0x1e08   :  { %6745 = vmatprep.subr.msk.bf16.mxu0 %vm61_vm1, %v3535_v18  ;;  %v3549_v63 = vsel %vm61_vm1, %v3535_v18, 0 }
0x1e09   :  { %6487 = vmatpush3.bf16.xpose.msra.mxu0 %v3549_v63 }
0x1e0a   :  { %6506 = vmatprep.subr.bf16.mxu0 %v7040_v0 }
0x1e84   :  { %v3300_v1 = vpop.xlane.xlu0 %3299 }
0x1e85   :  { %v3304_v19 = vmul.f32 0.015625, %v3300_v1 }
0x1e86   :  { %v3303_v20 = vpop.xlane.xlu1 %3302 }
0x1e87   :  { %v3306_v21 = vsub.f32 %v3294_v31, %v3304_v19  ;;  %v3305_v22 = vmul.f32 0.015625, %v3303_v20  ;;  %v3460_v31 = vld [vmem:[%s9323_s2 + $0x758] sm:$0xff] }
0x1e89   :  { %v3307_v2 = vsub.f32 %v3295_v24, %v3305_v22  ;;  %v3308_v23 = vmul.f32 %v3306_v21, %v3306_v21  ;;  %v3467_v24 = vpack.c.bf16 %v3461_v32, %v3460_v31 }
0x1e8b   :  { %v3310_v46 = vsel %vm61_vm1, %v3308_v23, 0.0  ;;  %v3309_v25 = vmul.f32 %v3307_v2, %v3307_v2 }
0x1e8c   :  { %3311 = vadd.xlane.f32.xlu0 %v3310_v46 }
0x1e8d   :  { %v3313_v26 = vsel %vm61_vm1, %v3309_v25, 0.0 }
0x1e8e   :  { %3314 = vadd.xlane.f32.xlu1 %v3313_v26 }
0x1f19   :  { %v3312_v36 = vpop.xlane.xlu0 %3311 }
0x1f1a   :  { %v3316_v41 = vmul.f32 0.015625, %v3312_v36  ;;  %v46_v36 = vld [vmem:[%s9325_s1 + $0x20] sm:$0xff] }
0x1f1b   :  { %v3315_v55 = vpop.xlane.xlu1 %3314 }
0x1f1c   :  { %v3318_v60 = vadd.f32 1e-12, %v3316_v41  ;;  %v3317_v61 = vmul.f32 0.015625, %v3315_v55 }
0x1f1e   :  { %6908 = vrsqrt.f32 %v3318_v60  ;;  %v3319_v62 = vadd.f32 1e-12, %v3317_v61 }
0x1f20   :  { %6910 = vrsqrt.f32 %v3319_v62  ;;  %v47_v62 = vld [vmem:[%s9325_s1 + $0x28] sm:$0xff] }
0x1f28   :  { %v6909_v3 = vpop.eup %6908 }
0x1f29   :  { %v3322_v48 = vmul.f32 %v6909_v3, %v3306_v21 }
0x1f2a   :  { %v6911_v4 = vpop.eup %6910 }
0x1f2b   :  { %v3328_v52 = vmul.f32 %v5679_v47, %v3322_v48  ;;  %v3323_v53 = vmul.f32 %v6911_v4, %v3307_v2 }
0x1f2d   :  { %v3329_v5 = vmul.f32 %v5679_v47, %v3323_v53  ;;  %v8488_v8 = vadd.f32 %v5680_v56, %v3328_v52 }
0x1f2f   :  { %v8490_v9 = vadd.f32 %v5680_v56, %v3329_v5 }
0x1f31   :  { %v3345_v58 = vpack.c.bf16 %v8490_v9, %v8488_v8 }
0x1f33   :  { %6459 = vmatmul.mubr.msk.bf16.vlgmr.msra.gmra.mrb[76].mxu1 %vm61_vm1, %v3345_v58 }
0x1f34   :  { %6475 = vmatpush3.bf16.msra.mxu1 %v3465_v10  ;;  %6482 = vmatprep.mubr.msk.bf16.mxu1 %vm7041_vm0, %v7040_v0 }
0x1f35   :  { %6476 = vmatprep.subr.bf16.mxu1 %v7040_v0 }
0x1f38   :  { %6477 = vmatpush3.bf16.msra.mxu1 %v3466_v12 }
0x1f39   :  { %6478 = vmatprep.subr.bf16.mxu1 %v7040_v0 }
0x1f3c   :  { %6479 = vmatpush3.bf16.msra.mxu1 %v3467_v24 }
0x1f3d   :  { %6480 = vmatprep.subr.bf16.mxu1 %v7040_v0 }
0x1f40   :  { %6481 = vmatpush3.bf16.msra.mxu1 %v3468_v49 }
0x1f43   :  { %6483 = vmatmul.mubr.msk.bf16.vlgmr.msra.gmra.mrb[80].mxu1 %vm61_vm1, %v8082_v51 }
0x2006   :  { %v3391_v16 = vpop.f32.mrb[76].mxu1 }
0x2007   :  { %v3392_v29 = vadd.f32 %v5681_v50, %v3391_v16  ;;  %v6460_v17 = vpop.f32.mrb[77].mxu1 }
0x2008   :  { %v3394_v14 = vpop.f32.mrb[78].mxu1 }
0x2009   :  { %v6461_v18 = vpop.f32.mrb[79].mxu1  ;;  %v3395_v63 = vadd.f32 %v5681_v50, %v3394_v14  ;;  %v3523_v1 = vmul.f32 %v3392_v29, %v7464_v57  ;;  %v3525_v19 = vmul.f32 %v3392_v29, %v7467_v37  ;;  %v3527_v20 = vmul.f32 %v3392_v29, %v7470_v38 }
0x200a   :  { %v3529_v21 = vmul.f32 %v3392_v29, %v7473_v59 }
0x200b   :  { %v3524_v22 = vmul.f32 %v3395_v63, %v7464_v57  ;;  %v3526_v2 = vmul.f32 %v3395_v63, %v7467_v37  ;;  %v3528_v23 = vmul.f32 %v3395_v63, %v7470_v38  ;;  %v3530_v46 = vmul.f32 %v3395_v63, %v7473_v59 }
0x200d   :  { %v3532_v25 = vpack.c.bf16 %v3526_v2, %v3525_v19  ;;  %v3531_v26 = vpack.c.bf16 %v3524_v22, %v3523_v1  ;;  %v3533_v27 = vpack.c.bf16 %v3528_v23, %v3527_v20  ;;  %v3534_v28 = vpack.c.bf16 %v3530_v46, %v3529_v21 }
0x200f   :  { %6488 = vmatprep.mubr.msk.bf16.mxu0 %vm61_vm1, %v3531_v26 }
0x2010   :  { %6489 = vmatmul.mubr.msk.bf16.vlgmr.msra.gmra.mrb[84].mxu0 %vm61_vm1, %v3532_v25 }
0x2011   :  { %6492 = vmatprep.mubr.msk.bf16.mxu0 %vm61_vm1, %v3533_v27 }
0x2016   :  { %v3507_v34 = vpop.f32.mrb[80].mxu1 }
0x2017   :  { %v6484_v35 = vpop.f32.mrb[81].mxu1  ;;  %v3508_v40 = vadd.f32 %v5685_v33, %v3507_v34 }
0x2018   :  { %v3510_v30 = vpop.f32.mrb[82].mxu1  ;;  %6493 = vmatmul.mubr.msk.bf16.gmra.mrb[88].mxu0 %vm61_vm1, %v3534_v28 }
0x2019   :  { %v3511_v42 = vadd.f32 %v5685_v33, %v3510_v30  ;;  %v6485_v43 = vpop.f32.mrb[83].mxu1  ;;  %6514 = vmatprep.mubr.msk.bf16.mxu0 %vm7041_vm0, %v7040_v0 }
0x201b   :  { %v3724_v44 = vpack.c.bf16 %v3511_v42, %v3508_v40 }
0x201d   :  { %6496 = vmatprep.subr.bf16.mxu1 %v3724_v44 }
0x201e   :  { %6497 = vmatpush3.bf16.msra.mxu1 %v3724_v44 }
0x201f   :  { %6518 = vmatprep.subr.bf16.mxu1 %v7040_v0 }
0x20e3   :  { %v6490_v45 = vpop.f32.mrb[84].mxu0 }
0x20e4   :  { %v3585_v54 = vpop.f32.mrb[85].mxu0  ;;  %v3618_v41 = vmul.f32 0.25, %v6490_v45 }
0x20e5   :  { %v3616_v55 = vmul.f32 0.25, %v3585_v54  ;;  %v6491_v60 = vpop.f32.mrb[86].mxu0 }
0x20e6   :  { %v3588_v61 = vpop.f32.mrb[87].mxu0  ;;  %v3619_v3 = vmul.f32 0.25, %v6491_v60  ;;  %v3626_v53 = vadd.f32 %v3618_v41, %v46_v36 }
0x20e7   :  { %v3617_v47 = vmul.f32 0.25, %v3588_v61  ;;  %v3624_v48 = vadd.f32 %v3616_v55, %v46_v36 }
0x20e8   :  { %v3627_v6 = vadd.f32 %v3619_v3, %v47_v62  ;;  %v3638_v39 = vsel %vm1204_vm2, %v3626_v53, -inf }
0x20e9   :  { %v3632_v4 = vsel %vm1204_vm2, %v3624_v48, -inf  ;;  %v3625_v52 = vadd.f32 %v3617_v47, %v47_v62 }
0x20ea   :  { %3633 = vmax.xlane.f32.xlu0 %v3632_v4  ;;  %v3641_v24 = vsel %vm1204_vm2, %v3627_v6, -inf }
0x20eb   :  { %v6494_v56 = vpop.f32.mrb[88].mxu0  ;;  %v3635_v5 = vsel %vm1204_vm2, %v3625_v52, -inf }
0x20ec   :  { %3636 = vmax.xlane.f32.xlu1 %v3635_v5  ;;  %v3601_v7 = vpop.f32.mrb[89].mxu0  ;;  %v3622_v10 = vmul.f32 0.25, %v6494_v56 }
0x20ed   :  { %v3620_v58 = vmul.f32 0.25, %v3601_v7  ;;  %v6495_v11 = vpop.f32.mrb[90].mxu0 }
0x20ee   :  { %3639 = vmax.xlane.f32.xlu0 %v3638_v39  ;;  %v3604_v12 = vpop.f32.mrb[91].mxu0  ;;  %v3623_v31 = vmul.f32 0.25, %v6495_v11  ;;  %v3630_v50 = vadd.f32 %v3622_v10, %v46_v36 }
0x20ef   :  { %v3621_v32 = vmul.f32 0.25, %v3604_v12  ;;  %v3628_v13 = vadd.f32 %v3620_v58, %v46_v36 }
0x20f0   :  { %3642 = vmax.xlane.f32.xlu1 %v3641_v24  ;;  %v3631_v29 = vadd.f32 %v3623_v31, %v47_v62  ;;  %v3650_v17 = vsel %vm1204_vm2, %v3630_v50, -inf }
0x20f1   :  { %v3644_v15 = vsel %vm1204_vm2, %v3628_v13, -inf  ;;  %v3629_v49 = vadd.f32 %v3621_v32, %v47_v62 }
0x20f2   :  { %3645 = vmax.xlane.f32.xlu0 %v3644_v15  ;;  %v3653_v14 = vsel %vm1204_vm2, %v3631_v29, -inf }
0x20f3   :  { %v3647_v16 = vsel %vm1204_vm2, %v3629_v49, -inf }
0x20f4   :  { %3648 = vmax.xlane.f32.xlu1 %v3647_v16 }
0x20f6   :  { %3651 = vmax.xlane.f32.xlu0 %v3650_v17 }
0x20f8   :  { %3654 = vmax.xlane.f32.xlu1 %v3653_v14 }
0x2177   :  { %v3634_v18 = vpop.xlane.xlu0 %3633 }
0x2178   :  { %v3656_v63 = vsub.f32 %v3624_v48, %v3634_v18 }
0x2179   :  { %v3637_v1 = vpop.xlane.xlu1 %3636 }
0x217a   :  { %v3664_v19 = vmul.f32 1.442695, %v3656_v63  ;;  %v3657_v20 = vsub.f32 %v3625_v52, %v3637_v1 }
0x217b   :  { %v3640_v21 = vpop.xlane.xlu0 %3639 }
0x217c   :  { %6912 = vpow2.f32 %v3664_v19  ;;  %v3666_v22 = vmul.f32 1.442695, %v3657_v20  ;;  %v3658_v2 = vsub.f32 %v3626_v53, %v3640_v21 }
0x217d   :  { %v3643_v23 = vpop.xlane.xlu1 %3642 }
0x217e   :  { %6914 = vpow2.f32 %v3666_v22  ;;  %v3668_v46 = vmul.f32 1.442695, %v3658_v2  ;;  %v3659_v25 = vsub.f32 %v3627_v6, %v3643_v23 }
0x217f   :  { %v3646_v26 = vpop.xlane.xlu0 %3645 }
0x2180   :  { %6916 = vpow2.f32 %v3668_v46  ;;  %v3670_v27 = vmul.f32 1.442695, %v3659_v25  ;;  %v3660_v28 = vsub.f32 %v3628_v13, %v3646_v26 }
0x2181   :  { %v3649_v33 = vpop.xlane.xlu1 %3648 }
0x2182   :  { %6918 = vpow2.f32 %v3670_v27  ;;  %v3672_v34 = vmul.f32 1.442695, %v3660_v28  ;;  %v3661_v35 = vsub.f32 %v3629_v49, %v3649_v33  ;;  %v3514_v27 = vld [vmem:[%s9323_s2 + $0x780] sm:$0xff]  ;;  %v3515_v28 = vld [vmem:[%s9323_s2 + $0x788] sm:$0xff] }
0x2183   :  { %v3652_v30 = vpop.xlane.xlu0 %3651  ;;  %v3817_v33 = vpack.c.bf16 %v3515_v28, %v3514_v27  ;;  %v3913_v28 = vld [vmem:[%s9326_s3 + $0xa0] sm:$0xff] }
0x2184   :  { %6920 = vpow2.f32 %v3672_v34  ;;  %v3674_v40 = vmul.f32 1.442695, %v3661_v35  ;;  %v3662_v42 = vsub.f32 %v3630_v50, %v3652_v30  ;;  %v3516_v34 = vld [vmem:[%s9323_s2 + $0x790] sm:$0xff]  ;;  %v3517_v35 = vld [vmem:[%s9323_s2 + $0x798] sm:$0xff] }
0x2185   :  { %v3655_v43 = vpop.xlane.xlu1 %3654  ;;  %6507 = vmatpush3.bf16.msra.mxu0 %v3817_v33  ;;  %v3818_v30 = vpack.c.bf16 %v3517_v35, %v3516_v34  ;;  %v3914_v33 = vld [vmem:[%s9326_s3 + $0xa8] sm:$0xff]  ;;  %v3915_v35 = vld [vmem:[%s9326_s3 + $0xb0] sm:$0xff] }
0x2186   :  { %v6913_v44 = vpop.eup %6912  ;;  %6922 = vpow2.f32 %v3674_v40  ;;  %v3676_v45 = vmul.f32 1.442695, %v3662_v42  ;;  %v3663_v54 = vsub.f32 %v3631_v29, %v3655_v43  ;;  %6508 = vmatprep.subr.bf16.mxu0 %v7040_v0  ;;  %v3518_v40 = vld [vmem:[%s9323_s2 + $0x7a0] sm:$0xff]  ;;  %v3519_v42 = vld [vmem:[%s9323_s2 + $0x7a8] sm:$0xff]  ;;  %v3922_v34 = vpack.c.bf16 %v3914_v33, %v3913_v28 }
0x2187   :  { %v3680_v36 = vsel %vm1204_vm2, %v6913_v44, 0.0  ;;  %v3819_v43 = vpack.c.bf16 %v3519_v42, %v3518_v40  ;;  %v3917_v42 = vld [vmem:[%s9326_s3 + $0xc0] sm:$0xff] }
0x2188   :  { %v6915_v41 = vpop.eup %6914  ;;  %6924 = vpow2.f32 %v3676_v45  ;;  %v3678_v55 = vmul.f32 1.442695, %v3663_v54  ;;  %3681 = vadd.xlane.f32.xlu0 %v3680_v36  ;;  %v3521_v45 = vld [vmem:[%s9323_s2 + $0x7b8] sm:$0xff] }
0x2189   :  { %v3683_v60 = vsel %vm1204_vm2, %v6915_v41, 0.0  ;;  %6509 = vmatpush3.bf16.msra.mxu0 %v3818_v30  ;;  %v3916_v30 = vld [vmem:[%s9326_s3 + $0xb8] sm:$0xff] }
0x218a   :  { %v6917_v61 = vpop.eup %6916  ;;  %6926 = vpow2.f32 %v3678_v55  ;;  %3684 = vadd.xlane.f32.xlu1 %v3683_v60  ;;  %6510 = vmatprep.subr.bf16.mxu0 %v7040_v0  ;;  %v3923_v40 = vpack.c.bf16 %v3916_v30, %v3915_v35 }
0x218b   :  { %v3686_v62 = vsel %vm1204_vm2, %v6917_v61, 0.0 }
0x218c   :  { %v6919_v3 = vpop.eup %6918  ;;  %3687 = vadd.xlane.f32.xlu0 %v3686_v62 }
0x218d   :  { %v3689_v47 = vsel %vm1204_vm2, %v6919_v3, 0.0  ;;  %6511 = vmatpush3.bf16.msra.mxu0 %v3819_v43  ;;  %v3918_v43 = vld [vmem:[%s9326_s3 + $0xc8] sm:$0xff] }
0x218e   :  { %v6921_v48 = vpop.eup %6920  ;;  %3690 = vadd.xlane.f32.xlu1 %v3689_v47  ;;  %6512 = vmatprep.subr.bf16.mxu0 %v7040_v0 }
0x218f   :  { %v3692_v4 = vsel %vm1204_vm2, %v6921_v48, 0.0 }
0x2190   :  { %v6923_v52 = vpop.eup %6922  ;;  %3693 = vadd.xlane.f32.xlu0 %v3692_v4 }
0x2191   :  { %v3695_v53 = vsel %vm1204_vm2, %v6923_v52, 0.0 }
0x2192   :  { %v6925_v56 = vpop.eup %6924  ;;  %3696 = vadd.xlane.f32.xlu1 %v3695_v53 }
0x2193   :  { %v3698_v5 = vsel %vm1204_vm2, %v6925_v56, 0.0 }
0x2194   :  { %v6927_v6 = vpop.eup %6926  ;;  %3699 = vadd.xlane.f32.xlu0 %v3698_v5 }
0x2195   :  { %v3701_v7 = vsel %vm1204_vm2, %v6927_v6, 0.0 }
0x2196   :  { %3702 = vadd.xlane.f32.xlu1 %v3701_v7 }
0x2215   :  { %v3682_v10 = vpop.xlane.xlu0 %3681 }
0x2216   :  { %6928 = vrcp.f32 %v3682_v10 }
0x2217   :  { %v3685_v58 = vpop.xlane.xlu1 %3684 }
0x2218   :  { %6930 = vrcp.f32 %v3685_v58 }
0x2219   :  { %v3688_v11 = vpop.xlane.xlu0 %3687 }
0x221a   :  { %6932 = vrcp.f32 %v3688_v11 }
0x221b   :  { %v3691_v39 = vpop.xlane.xlu1 %3690 }
0x221c   :  { %6934 = vrcp.f32 %v3691_v39 }
0x221d   :  { %v3694_v12 = vpop.xlane.xlu0 %3693 }
0x221e   :  { %6936 = vrcp.f32 %v3694_v12 }
0x221f   :  { %v3697_v31 = vpop.xlane.xlu1 %3696 }
0x2220   :  { %v6929_v32 = vpop.eup %6928  ;;  %6938 = vrcp.f32 %v3697_v31 }
0x2221   :  { %v3700_v24 = vpop.xlane.xlu0 %3699  ;;  %v3712_v49 = vmul.f32 %v6929_v32, %v6913_v44  ;;  %v3520_v44 = vld [vmem:[%s9323_s2 + $0x7b0] sm:$0xff] }
0x2222   :  { %v6931_v13 = vpop.eup %6930  ;;  %6940 = vrcp.f32 %v3700_v24  ;;  %v3820_v54 = vpack.c.bf16 %v3521_v45, %v3520_v44  ;;  %v5695_v24 = vld [vmem:[%s9323_s2 + $0x7c0] ss:$0 sm:$0xff]  ;;  %v3924_v44 = vpack.c.bf16 %v3918_v43, %v3917_v42 }
0x2223   :  { %v3703_v15 = vpop.xlane.xlu1 %3702  ;;  %v3713_v50 = vmul.f32 %v6931_v13, %v6915_v41 }
0x2224   :  { %v6933_v16 = vpop.eup %6932  ;;  %6942 = vrcp.f32 %v3703_v15  ;;  %6513 = vmatpush3.bf16.msra.mxu0 %v3820_v54 }
0x2225   :  { %v3720_v29 = vpack.c.bf16 %v3713_v50, %v3712_v49  ;;  %v3714_v14 = vmul.f32 %v6933_v16, %v6917_v61  ;;  %6530 = vmatprep.subr.bf16.mxu0 %v7040_v0 }
0x2226   :  { %v6935_v17 = vpop.eup %6934 }
0x2227   :  { %v3715_v18 = vmul.f32 %v6935_v17, %v6919_v3  ;;  %6498 = vmatprep.mubr.msk.bf16.mxu1 %vm1204_vm2, %v3720_v29 }
0x2228   :  { %v6937_v63 = vpop.eup %6936 }
0x2229   :  { %v3721_v1 = vpack.c.bf16 %v3715_v18, %v3714_v14  ;;  %v3716_v20 = vmul.f32 %v6937_v63, %v6921_v48 }
0x222a   :  { %v6939_v19 = vpop.eup %6938 }
0x222b   :  { %6499 = vmatmul.mubr.msk.bf16.vlgmr.msra.gmra.mrb[84].mxu1 %vm1204_vm2, %v3721_v1  ;;  %v3717_v21 = vmul.f32 %v6939_v19, %v6923_v52 }
0x222c   :  { %v6941_v22 = vpop.eup %6940 }
0x222d   :  { %v3722_v2 = vpack.c.bf16 %v3717_v21, %v3716_v20  ;;  %v3718_v46 = vmul.f32 %v6941_v22, %v6925_v56 }
0x222e   :  { %v6943_v23 = vpop.eup %6942 }
0x222f   :  { %6502 = vmatprep.mubr.msk.bf16.mxu1 %vm1204_vm2, %v3722_v2  ;;  %v3719_v25 = vmul.f32 %v6943_v23, %v6927_v6 }
0x2231   :  { %v3723_v26 = vpack.c.bf16 %v3719_v25, %v3718_v46 }
0x2233   :  { %6503 = vmatmul.mubr.msk.bf16.gmra.mrb[88].mxu1 %vm1204_vm2, %v3723_v26  ;;  %v3912_v26 = vld [vmem:[%s9326_s3 + $0x98] sm:$0xff] }
0x2234   :  { %6526 = vmatprep.mubr.msk.bf16.mxu1 %vm7041_vm0, %v7040_v0 }
0x22fe   :  { %v6500_v36 = vpop.f32.mrb[84].mxu1 }
0x22ff   :  { %v3804_v41 = vmul.f32 %v6500_v36, %v7467_v37  ;;  %v3771_v55 = vpop.f32.mrb[85].mxu1 }
0x2300   :  { %v3802_v60 = vmul.f32 %v3771_v55, %v7464_v57  ;;  %v6501_v61 = vpop.f32.mrb[86].mxu1 }
0x2301   :  { %v3805_v62 = vmul.f32 %v6501_v61, %v7467_v37  ;;  %v3774_v3 = vpop.f32.mrb[87].mxu1 }
0x2302   :  { %v3806_v47 = vadd.f32 %v3804_v41, %v3802_v60  ;;  %v3803_v48 = vmul.f32 %v3774_v3, %v7464_v57 }
0x2304   :  { %v3807_v4 = vadd.f32 %v3805_v62, %v3803_v48  ;;  %v5697_v62 = vld [vmem:[%s9323_s2 + $0x7d8] ss:$0 sm:$0xff] }
0x2306   :  { %v6504_v52 = vpop.f32.mrb[88].mxu1 }
0x2307   :  { %v3787_v53 = vpop.f32.mrb[89].mxu1  ;;  %v3812_v7 = vmul.f32 %v6504_v52, %v7473_v59  ;;  %v5698_v52 = vld [vmem:[%s9323_s2 + $0x7e0] ss:$0 sm:$0xff] }
0x2308   :  { %v3808_v56 = vmul.f32 %v3787_v53, %v7470_v38  ;;  %v6505_v5 = vpop.f32.mrb[90].mxu1 }
0x2309   :  { %v3790_v6 = vpop.f32.mrb[91].mxu1  ;;  %v3813_v39 = vmul.f32 %v6505_v5, %v7473_v59 }
0x230a   :  { %v3810_v10 = vadd.f32 %v3808_v56, %v3806_v47  ;;  %v3809_v58 = vmul.f32 %v3790_v6, %v7470_v38 }
0x230c   :  { %v3814_v11 = vadd.f32 %v3812_v7, %v3810_v10  ;;  %v3811_v12 = vadd.f32 %v3809_v58, %v3807_v4  ;;  %v3991_v7 = vld [vmem:[%s9323_s2 + $0x7f8] sm:$0xff]  ;;  %v3992_v10 = vld [vmem:[%s9323_s2 + $0x800] sm:$0xff] }
0x230d   :  { %v4009_v58 = vpack.c.bf16 %v3992_v10, %v3991_v7 }
0x230e   :  { %v3815_v31 = vadd.f32 %v3813_v39, %v3811_v12  ;;  %v3994_v39 = vld [vmem:[%s9323_s2 + $0x810] sm:$0xff] }
0x2310   :  { %v3816_v32 = vpack.c.bf16 %v3815_v31, %v3814_v11  ;;  %v3993_v11 = vld [vmem:[%s9323_s2 + $0x808] sm:$0xff]  ;;  %v3995_v31 = vld [vmem:[%s9323_s2 + $0x818] sm:$0xff] }
0x2311   :  { %v4010_v12 = vpack.c.bf16 %v3994_v39, %v3993_v11 }
0x2312   :  { %6515 = vmatmul.mubr.msk.bf16.vlgmr.msra.gmra.mrb[92].mxu0 %vm61_vm1, %v3816_v32  ;;  %v3996_v32 = vld [vmem:[%s9323_s2 + $0x820] sm:$0xff] }
0x2313   :  { %6546 = vmatprep.mubr.msk.bf16.mxu0 %vm7041_vm0, %v7040_v0  ;;  %6531 = vmatpush3.bf16.msra.mxu0 %v4009_v58 }
0x2314   :  { %6532 = vmatprep.subr.bf16.mxu0 %v7040_v0 }
0x2317   :  { %6533 = vmatpush3.bf16.msra.mxu0 %v4010_v12 }
0x2318   :  { %6534 = vmatprep.subr.bf16.mxu0 %v7040_v0 }
0x23e5   :  { %v3862_v13 = vpop.f32.mrb[92].mxu0 }
0x23e6   :  { %v3863_v15 = vadd.f32 %v5695_v24, %v3862_v13  ;;  %v6516_v49 = vpop.f32.mrb[93].mxu0  ;;  %v3997_v13 = vld [vmem:[%s9323_s2 + $0x828] sm:$0xff] }
0x23e7   :  { %v3865_v50 = vpop.f32.mrb[94].mxu0 }
0x23e8   :  { %v3866_v16 = vadd.f32 %v5695_v24, %v3865_v50  ;;  %v6517_v29 = vpop.f32.mrb[95].mxu0  ;;  %v3869_v17 = vadd.f32 %v3863_v15, %v8488_v8  ;;  %v4011_v24 = vpack.c.bf16 %v3996_v32, %v3995_v31  ;;  %v3998_v15 = vld [vmem:[%s9323_s2 + $0x830] sm:$0xff]  ;;  %v3999_v50 = vld [vmem:[%s9323_s2 + $0x838] sm:$0xff] }
0x23e9   :  { %v4012_v49 = vpack.c.bf16 %v3998_v15, %v3997_v13 }
0x23ea   :  { %v3873_v14 = vsel %vm61_vm1, %v3869_v17, 0.0  ;;  %v3870_v18 = vadd.f32 %v3866_v16, %v8490_v9  ;;  %v3911_v9 = vld [vmem:[%s9326_s3 + $0x90] sm:$0xff]  ;;  %6535 = vmatpush3.bf16.msra.mxu0 %v4011_v24  ;;  %v4000_v16 = vld [vmem:[%s9323_s2 + $0x840] sm:$0xff] }
0x23eb   :  { %3874 = vadd.xlane.f32.xlu0 %v3873_v14  ;;  %v3921_v27 = vpack.c.bf16 %v3912_v26, %v3911_v9  ;;  %6536 = vmatprep.subr.bf16.mxu0 %v7040_v0  ;;  %v4013_v29 = vpack.c.bf16 %v4000_v16, %v3999_v50  ;;  %v4002_v14 = vld [vmem:[%s9323_s2 + $0x850] sm:$0xff] }
0x23ec   :  { %v3876_v63 = vsel %vm61_vm1, %v3870_v18, 0.0 }
0x23ed   :  { %3877 = vadd.xlane.f32.xlu1 %v3876_v63  ;;  %6519 = vmatpush3.bf16.msra.mxu1 %v3921_v27  ;;  %v4003_v63 = vld [vmem:[%s9323_s2 + $0x858] sm:$0xff] }
0x23ee   :  { %6520 = vmatprep.subr.bf16.mxu1 %v7040_v0  ;;  %6537 = vmatpush3.bf16.msra.mxu0 %v4012_v49 }
0x23ef   :  { %6538 = vmatprep.subr.bf16.mxu0 %v7040_v0 }
0x23f1   :  { %6521 = vmatpush3.bf16.msra.mxu1 %v3922_v34 }
0x23f2   :  { %6522 = vmatprep.subr.bf16.mxu1 %v7040_v0  ;;  %6539 = vmatpush3.bf16.msra.mxu0 %v4013_v29  ;;  %v4105_v29 = vld [vmem:[%s9323_s2 + $0x888] sm:$0xff] }
0x23f3   :  { %6540 = vmatprep.subr.bf16.mxu0 %v7040_v0 }
0x23f5   :  { %6523 = vmatpush3.bf16.msra.mxu1 %v3923_v40 }
0x23f6   :  { %6524 = vmatprep.subr.bf16.mxu1 %v7040_v0 }
0x23f9   :  { %6525 = vmatpush3.bf16.msra.mxu1 %v3924_v44 }
0x23fa   :  { %6550 = vmatprep.subr.bf16.mxu1 %v7040_v0 }
0x2478   :  { %v3875_v1 = vpop.xlane.xlu0 %3874 }
0x2479   :  { %v3879_v19 = vmul.f32 0.015625, %v3875_v1  ;;  %v4004_v1 = vld [vmem:[%s9323_s2 + $0x860] sm:$0xff] }
0x247a   :  { %v3878_v20 = vpop.xlane.xlu1 %3877 }
0x247b   :  { %v3881_v21 = vsub.f32 %v3869_v17, %v3879_v19  ;;  %v3880_v22 = vmul.f32 0.015625, %v3878_v20  ;;  %v4001_v17 = vld [vmem:[%s9323_s2 + $0x848] sm:$0xff]  ;;  %v4015_v19 = vpack.c.bf16 %v4004_v1, %v4003_v63  ;;  %v4106_v1 = vld [vmem:[%s9323_s2 + $0x890] sm:$0xff] }
0x247c   :  { %v4005_v20 = vld [vmem:[%s9323_s2 + $0x868] sm:$0xff] }
0x247d   :  { %v3882_v2 = vsub.f32 %v3870_v18, %v3880_v22  ;;  %v3883_v23 = vmul.f32 %v3881_v21, %v3881_v21  ;;  %v4014_v18 = vpack.c.bf16 %v4002_v14, %v4001_v17  ;;  %v4224_v14 = vld [vmem:[%s9323_s2 + $0x910] sm:$0xff] }
0x247f   :  { %v3885_v46 = vsel %vm61_vm1, %v3883_v23, 0.0  ;;  %v3884_v25 = vmul.f32 %v3882_v2, %v3882_v2  ;;  %6541 = vmatpush3.bf16.msra.mxu0 %v4014_v18  ;;  %v4225_v18 = vld [vmem:[%s9323_s2 + $0x918] sm:$0xff] }
0x2480   :  { %3886 = vadd.xlane.f32.xlu0 %v3885_v46  ;;  %6542 = vmatprep.subr.bf16.mxu0 %v7040_v0  ;;  %v4233_v63 = vpack.c.bf16 %v4225_v18, %v4224_v14 }
0x2481   :  { %v3888_v8 = vsel %vm61_vm1, %v3884_v25, 0.0 }
0x2482   :  { %3889 = vadd.xlane.f32.xlu1 %v3888_v8 }
0x2483   :  { %6543 = vmatpush3.bf16.msra.mxu0 %v4015_v19  ;;  %v4107_v19 = vld [vmem:[%s9323_s2 + $0x898] sm:$0xff] }
0x2484   :  { %6544 = vmatprep.subr.bf16.mxu0 %v7040_v0 }
0x250d   :  { %v3887_v45 = vpop.xlane.xlu0 %3886 }
0x250e   :  { %v3891_v54 = vmul.f32 0.015625, %v3887_v45 }
0x250f   :  { %v3890_v36 = vpop.xlane.xlu1 %3889 }
0x2510   :  { %v3893_v41 = vadd.f32 1e-12, %v3891_v54  ;;  %v3892_v55 = vmul.f32 0.015625, %v3890_v36 }
0x2512   :  { %6944 = vrsqrt.f32 %v3893_v41  ;;  %v3894_v60 = vadd.f32 1e-12, %v3892_v55 }
0x2514   :  { %6946 = vrsqrt.f32 %v3894_v60 }
0x251c   :  { %v6945_v61 = vpop.eup %6944 }
0x251d   :  { %v3897_v3 = vmul.f32 %v6945_v61, %v3881_v21  ;;  %v4006_v21 = vld [vmem:[%s9323_s2 + $0x870] sm:$0xff] }
0x251e   :  { %v6947_v47 = vpop.eup %6946  ;;  %v4016_v22 = vpack.c.bf16 %v4006_v21, %v4005_v20  ;;  %v4115_v20 = vpack.c.bf16 %v4107_v19, %v4106_v1  ;;  %v4226_v21 = vld [vmem:[%s9323_s2 + $0x920] sm:$0xff] }
0x251f   :  { %v3903_v48 = vmul.f32 %v5697_v62, %v3897_v3  ;;  %v3898_v4 = vmul.f32 %v6947_v47, %v3882_v2  ;;  %v5699_v2 = vld [vmem:[%s9326_s3 + $0xd0] ss:$0 sm:$0xff]  ;;  %v5701_v47 = vld [vmem:[%s9323_s2 + $0x878] ss:$0 sm:$0xff] }
0x2520   :  { %6545 = vmatpush3.bf16.msra.mxu0 %v4016_v22  ;;  %v4227_v22 = vld [vmem:[%s9323_s2 + $0x928] sm:$0xff] }
0x2521   :  { %v3904_v53 = vmul.f32 %v5697_v62, %v3898_v4  ;;  %v8651_v56 = vadd.f32 %v5698_v52, %v3903_v48  ;;  %6574 = vmatprep.subr.bf16.mxu0 %v7040_v0 }
0x2523   :  { %v8653_v5 = vadd.f32 %v5698_v52, %v3904_v53 }
0x2525   :  { %v3920_v6 = vpack.c.bf16 %v8653_v5, %v8651_v56 }
0x2527   :  { %6527 = vmatmul.mubr.msk.bf16.vlgmr.msra.gmra.mrb[92].mxu1 %vm61_vm1, %v3920_v6 }
0x2528   :  { %6558 = vmatprep.mubr.msk.bf16.mxu1 %vm7041_vm0, %v7040_v0 }
0x25fa   :  { %v3966_v23 = vpop.f32.mrb[92].mxu1 }
0x25fb   :  { %v3967_v46 = vadd.f32 %v5699_v2, %v3966_v23  ;;  %v6528_v25 = vpop.f32.mrb[93].mxu1  ;;  %v4108_v23 = vld [vmem:[%s9323_s2 + $0x8a0] sm:$0xff] }
0x25fc   :  { %v3969_v8 = vpop.f32.mrb[94].mxu1 }
0x25fd   :  { %v3973_v9 = vmul.f32 %v3967_v46, %v3967_v46  ;;  %v3970_v26 = vadd.f32 %v5699_v2, %v3969_v8  ;;  %v6529_v27 = vpop.f32.mrb[95].mxu1  ;;  %v4234_v2 = vpack.c.bf16 %v4227_v22, %v4226_v21  ;;  %v4228_v8 = vld [vmem:[%s9323_s2 + $0x930] sm:$0xff] }
0x25fe   :  { %v4110_v27 = vld [vmem:[%s9323_s2 + $0x8b0] sm:$0xff] }
0x25ff   :  { %v3975_v28 = vmul.f32 %v3973_v9, %v3967_v46  ;;  %v3974_v33 = vmul.f32 %v3970_v26, %v3970_v26  ;;  %v4229_v9 = vld [vmem:[%s9323_s2 + $0x938] sm:$0xff] }
0x2601   :  { %v3977_v34 = vmul.f32 0.044715, %v3975_v28  ;;  %v3976_v35 = vmul.f32 %v3974_v33, %v3970_v26  ;;  %v4111_v28 = vld [vmem:[%s9323_s2 + $0x8b8] sm:$0xff] }
0x2602   :  { %v4117_v33 = vpack.c.bf16 %v4111_v28, %v4110_v27 }
0x2603   :  { %v3979_v30 = vadd.f32 %v3977_v34, %v3967_v46  ;;  %v3978_v40 = vmul.f32 0.044715, %v3976_v35  ;;  %v4230_v34 = vld [vmem:[%s9323_s2 + $0x940] sm:$0xff]  ;;  %v4231_v35 = vld [vmem:[%s9323_s2 + $0x948] sm:$0xff] }
0x2605   :  { %v3981_v42 = vmul.f32 0.7978846, %v3979_v30  ;;  %v3980_v43 = vadd.f32 %v3978_v40, %v3970_v26  ;;  %v4236_v30 = vpack.c.bf16 %v4231_v35, %v4230_v34  ;;  %v5706_v35 = vld [vmem:[%s9323_s2 + $0x908] ss:$0 sm:$0xff] }
0x2607   :  { %6948 = vtanh.f32 %v3981_v42  ;;  %v3982_v44 = vmul.f32 0.7978846, %v3980_v43 }
0x2609   :  { %6950 = vtanh.f32 %v3982_v44 }
0x2611   :  { %v6949_v45 = vpop.eup %6948 }
0x2612   :  { %v3985_v54 = vadd.f32 1.0, %v6949_v45 }
0x2613   :  { %v6951_v36 = vpop.eup %6950 }
0x2614   :  { %v3987_v41 = vmul.f32 0.5, %v3985_v54  ;;  %v3986_v55 = vadd.f32 1.0, %v6951_v36 }
0x2616   :  { %v3988_v60 = vmul.f32 0.5, %v3986_v55  ;;  %v3989_v61 = vmul.f32 %v3987_v41, %v3967_v46  ;;  %v4109_v46 = vld [vmem:[%s9323_s2 + $0x8a8] sm:$0xff] }
0x2617   :  { %v4116_v25 = vpack.c.bf16 %v4109_v46, %v4108_v23  ;;  %v5702_v41 = vld [vmem:[%s9323_s2 + $0x7e8] ss:$0 sm:$0xff] }
0x2618   :  { %v3990_v62 = vmul.f32 %v3988_v60, %v3970_v26  ;;  %v4235_v26 = vpack.c.bf16 %v4229_v9, %v4228_v8 }
0x261a   :  { %v4008_v3 = vpack.c.bf16 %v3990_v62, %v3989_v61 }
0x261c   :  { %6547 = vmatmul.mubr.bf16.vlgmr.msra.gmra.mrb[96].mxu0 %v4008_v3  ;;  %v5703_v3 = vld [vmem:[%s9323_s2 + $0x7f0] ss:$0 sm:$0xff] }
0x261d   :  { %6582 = vmatprep.mubr.msk.bf16.mxu0 %vm7041_vm0, %v7040_v0  ;;  %6575 = vmatpush3.bf16.msra.mxu0 %v4233_v63 }
0x261e   :  { %6576 = vmatprep.subr.bf16.mxu0 %v7040_v0 }
0x2621   :  { %6577 = vmatpush3.bf16.msra.mxu0 %v4234_v2 }
0x2622   :  { %6578 = vmatprep.subr.bf16.mxu0 %v7040_v0 }
0x2625   :  { %6579 = vmatpush3.bf16.msra.mxu0 %v4235_v26 }
0x2626   :  { %6580 = vmatprep.subr.bf16.mxu0 %v7040_v0 }
0x2629   :  { %6581 = vmatpush3.bf16.msra.mxu0 %v4236_v30 }
0x26ef   :  { %v4055_v48 = vpop.f32.mrb[96].mxu0 }
0x26f0   :  { %v4056_v4 = vadd.f32 %v5701_v47, %v4055_v48  ;;  %v6548_v52 = vpop.f32.mrb[97].mxu0  ;;  %v4166_v48 = vld [vmem:[%s9323_s2 + $0x8c8] sm:$0xff] }
0x26f1   :  { %v4058_v53 = vpop.f32.mrb[98].mxu0 }
0x26f2   :  { %v4059_v6 = vadd.f32 %v5701_v47, %v4058_v53  ;;  %v6549_v7 = vpop.f32.mrb[99].mxu0  ;;  %v4062_v10 = vadd.f32 %v4056_v4, %v8651_v56  ;;  %v4167_v4 = vld [vmem:[%s9323_s2 + $0x8d0] sm:$0xff] }
0x26f4   :  { %v4066_v58 = vsel %vm61_vm1, %v4062_v10, 0.0  ;;  %v4063_v11 = vadd.f32 %v4059_v6, %v8653_v5  ;;  %v4104_v5 = vld [vmem:[%s9323_s2 + $0x880] sm:$0xff]  ;;  %v4175_v6 = vpack.c.bf16 %v4167_v4, %v4166_v48  ;;  %v7036_v4 = vld [vmem:[%s9325_s1 + $0x10] sm:$0xff] }
0x26f5   :  { %4067 = vadd.xlane.f32.xlu0 %v4066_v58  ;;  %v4114_v17 = vpack.c.bf16 %v4105_v29, %v4104_v5  ;;  %v4169_v58 = vld [vmem:[%s9323_s2 + $0x8e0] sm:$0xff] }
0x26f6   :  { %v4069_v39 = vsel %vm61_vm1, %v4063_v11, 0.0 }
0x26f7   :  { %4070 = vadd.xlane.f32.xlu1 %v4069_v39  ;;  %6551 = vmatpush3.bf16.msra.mxu1 %v4114_v17  ;;  %v4170_v39 = vld [vmem:[%s9323_s2 + $0x8e8] sm:$0xff] }
0x26f8   :  { %6552 = vmatprep.subr.bf16.mxu1 %v7040_v0 }
0x26fb   :  { %6553 = vmatpush3.bf16.msra.mxu1 %v4115_v20 }
0x26fc   :  { %6554 = vmatprep.subr.bf16.mxu1 %v7040_v0 }
0x26ff   :  { %6555 = vmatpush3.bf16.msra.mxu1 %v4116_v25 }
0x2700   :  { %6556 = vmatprep.subr.bf16.mxu1 %v7040_v0 }
0x2703   :  { %6557 = vmatpush3.bf16.msra.mxu1 %v4117_v33 }
0x2704   :  { %6562 = vmatprep.subr.bf16.mxu1 %v7040_v0 }
0x2782   :  { %v4068_v12 = vpop.xlane.xlu0 %4067 }
0x2783   :  { %v4072_v31 = vmul.f32 0.015625, %v4068_v12  ;;  %v4171_v12 = vld [vmem:[%s9323_s2 + $0x8f0] sm:$0xff] }
0x2784   :  { %v4071_v32 = vpop.xlane.xlu1 %4070 }
0x2785   :  { %v4074_v24 = vsub.f32 %v4062_v10, %v4072_v31  ;;  %v4073_v13 = vmul.f32 0.015625, %v4071_v32  ;;  %v4168_v10 = vld [vmem:[%s9323_s2 + $0x8d8] sm:$0xff]  ;;  %v4177_v31 = vpack.c.bf16 %v4171_v12, %v4170_v39 }
0x2786   :  { %v4172_v32 = vld [vmem:[%s9323_s2 + $0x8f8] sm:$0xff] }
0x2787   :  { %v4075_v15 = vsub.f32 %v4063_v11, %v4073_v13  ;;  %v4076_v49 = vmul.f32 %v4074_v24, %v4074_v24  ;;  %v4176_v11 = vpack.c.bf16 %v4169_v58, %v4168_v10  ;;  %v7037_v58 = vld [vmem:[%s9325_s1 + $0x18] sm:$0xff] }
0x2789   :  { %v4078_v50 = vsel %vm61_vm1, %v4076_v49, 0.0  ;;  %v4077_v16 = vmul.f32 %v4075_v15, %v4075_v15 }
0x278a   :  { %4079 = vadd.xlane.f32.xlu0 %v4078_v50 }
0x278b   :  { %v4081_v56 = vsel %vm61_vm1, %v4077_v16, 0.0 }
0x278c   :  { %4082 = vadd.xlane.f32.xlu1 %v4081_v56  ;;  %v5708_v56 = vld [vmem:[%s9323_s2 + $0x950] ss:$0 sm:$0xff] }
0x2817   :  { %v4080_v40 = vpop.xlane.xlu0 %4079 }
0x2818   :  { %v4084_v42 = vmul.f32 0.015625, %v4080_v40 }
0x2819   :  { %v4083_v43 = vpop.xlane.xlu1 %4082 }
0x281a   :  { %v4086_v44 = vadd.f32 1e-12, %v4084_v42  ;;  %v4085_v45 = vmul.f32 0.015625, %v4083_v43 }
0x281c   :  { %6952 = vrsqrt.f32 %v4086_v44  ;;  %v4087_v54 = vadd.f32 1e-12, %v4085_v45 }
0x281e   :  { %6954 = vrsqrt.f32 %v4087_v54 }
0x2826   :  { %v6953_v36 = vpop.eup %6952 }
0x2827   :  { %v4090_v55 = vmul.f32 %v6953_v36, %v4074_v24  ;;  %v4173_v24 = vld [vmem:[%s9323_s2 + $0x900] sm:$0xff] }
0x2828   :  { %v6955_v60 = vpop.eup %6954  ;;  %v4178_v13 = vpack.c.bf16 %v4173_v24, %v4172_v32 }
0x2829   :  { %v4096_v61 = vmul.f32 %v5702_v41, %v4090_v55  ;;  %v4091_v62 = vmul.f32 %v6955_v60, %v4075_v15  ;;  %v5704_v15 = vld [vmem:[%s9323_s2 + $0x8c0] ss:$0 sm:$0xff] }
0x282b   :  { %v4097_v47 = vmul.f32 %v5702_v41, %v4091_v62  ;;  %v8797_v52 = vadd.f32 %v5703_v3, %v4096_v61 }
0x282d   :  { %v8799_v53 = vadd.f32 %v5703_v3, %v4097_v47 }
0x282f   :  { %v4113_v7 = vpack.c.bf16 %v8799_v53, %v8797_v52 }
0x2831   :  { %6559 = vmatmul.mubr.msk.bf16.vlgmr.msra.gmra.mrb[96].mxu1 %vm61_vm1, %v4113_v7  ;;  %6583 = vmatmul.mubr.msk.bf16.vlgmr.msra.gmra.mrb[100].mxu0 %vm61_vm1, %v4113_v7 }
0x2832   :  { %6563 = vmatpush3.bf16.msra.mxu1 %v4175_v6  ;;  %6570 = vmatprep.mubr.msk.bf16.mxu1 %vm7041_vm0, %v7040_v0 }
0x2833   :  { %6564 = vmatprep.subr.bf16.mxu1 %v7040_v0 }
0x2836   :  { %6565 = vmatpush3.bf16.msra.mxu1 %v4176_v11 }
0x2837   :  { %6566 = vmatprep.subr.bf16.mxu1 %v7040_v0 }
0x283a   :  { %6567 = vmatpush3.bf16.msra.mxu1 %v4177_v31 }
0x283b   :  { %6568 = vmatprep.subr.bf16.mxu1 %v7040_v0 }
0x283e   :  { %6569 = vmatpush3.bf16.msra.mxu1 %v4178_v13 }
0x2841   :  { %6571 = vmatmul.mubr.msk.bf16.vlgmr.msra.gmra.mrb[100].mxu1 %vm61_vm1, %v4113_v7 }
0x2904   :  { %v4159_v49 = vpop.f32.mrb[96].mxu1  ;;  %v4275_v50 = vpop.f32.mrb[100].mxu0 }
0x2905   :  { %v4160_v16 = vadd.f32 %v5704_v15, %v4159_v49  ;;  %v6560_v5 = vpop.f32.mrb[97].mxu1  ;;  %v6584_v29 = vpop.f32.mrb[101].mxu0  ;;  %v4276_v1 = vadd.f32 %v5708_v56, %v4275_v50 }
0x2906   :  { %v4162_v17 = vpop.f32.mrb[98].mxu1  ;;  %v4278_v14 = vpop.f32.mrb[102].mxu0 }
0x2907   :  { %v6561_v18 = vpop.f32.mrb[99].mxu1  ;;  %v6585_v63 = vpop.f32.mrb[103].mxu0  ;;  %v4163_v19 = vadd.f32 %v5704_v15, %v4162_v17  ;;  %v4279_v20 = vadd.f32 %v5708_v56, %v4278_v14  ;;  %v4291_v21 = vmul.f32 %v4160_v16, %v7464_v57  ;;  %v4293_v22 = vmul.f32 %v4160_v16, %v7467_v37 }
0x2908   :  { %v4295_v2 = vmul.f32 %v4160_v16, %v7470_v38  ;;  %v4297_v23 = vmul.f32 %v4160_v16, %v7473_v59 }
0x2909   :  { %v4292_v46 = vmul.f32 %v4163_v19, %v7464_v57  ;;  %v4294_v25 = vmul.f32 %v4163_v19, %v7467_v37  ;;  %v4296_v8 = vmul.f32 %v4163_v19, %v7470_v38  ;;  %v4298_v9 = vmul.f32 %v4163_v19, %v7473_v59 }
0x290a   :  { %v4492_v26 = vpack.c.bf16 %v4279_v20, %v4276_v1 }
0x290b   :  { %v4300_v27 = vpack.c.bf16 %v4294_v25, %v4293_v22  ;;  %v4299_v28 = vpack.c.bf16 %v4292_v46, %v4291_v21  ;;  %v4301_v33 = vpack.c.bf16 %v4296_v8, %v4295_v2  ;;  %v4302_v34 = vpack.c.bf16 %v4298_v9, %v4297_v23 }
0x290c   :  { %6596 = vmatprep.subr.bf16.mxu0 %v4492_v26 }
0x290d   :  { %6597 = vmatpush3.bf16.msra.mxu0 %v4492_v26  ;;  %6588 = vmatprep.mubr.msk.bf16.mxu1 %vm61_vm1, %v4299_v28 }
0x290e   :  { %6618 = vmatprep.subr.bf16.mxu0 %v7040_v0 }
0x2914   :  { %v4217_v30 = vpop.f32.mrb[100].mxu1 }
0x2915   :  { %v6572_v40 = vpop.f32.mrb[101].mxu1  ;;  %v4218_v43 = vadd.f32 %v5706_v35, %v4217_v30 }
0x2916   :  { %v4220_v42 = vpop.f32.mrb[102].mxu1 }
0x2917   :  { %v4221_v44 = vadd.f32 %v5706_v35, %v4220_v42  ;;  %v6573_v45 = vpop.f32.mrb[103].mxu1 }
0x2919   :  { %v4303_v54 = vpack.c.bf16 %v4221_v44, %v4218_v43 }
0x291b   :  { %6746 = vmatprep.subr.msk.bf16.mxu1 %vm61_vm1, %v4303_v54  ;;  %v4317_v36 = vsel %vm61_vm1, %v4303_v54, 0 }
0x291c   :  { %6587 = vmatpush3.bf16.xpose.msra.mxu1 %v4317_v36 }
0x291d   :  { %6606 = vmatprep.subr.bf16.mxu1 %v7040_v0 }
0x2923   :  { %6589 = vmatmul.mubr.msk.bf16.vlgmr.msra.gmra.mrb[104].mxu1 %vm61_vm1, %v4300_v27 }
0x2924   :  { %6592 = vmatprep.mubr.msk.bf16.mxu1 %vm61_vm1, %v4301_v33 }
0x292b   :  { %6593 = vmatmul.mubr.msk.bf16.gmra.mrb[108].mxu1 %vm61_vm1, %v4302_v34 }
0x292c   :  { %6614 = vmatprep.mubr.msk.bf16.mxu1 %vm7041_vm0, %v7040_v0 }
0x29f6   :  { %v6590_v41 = vpop.f32.mrb[104].mxu1 }
0x29f7   :  { %v4353_v55 = vpop.f32.mrb[105].mxu1  ;;  %v4386_v60 = vmul.f32 0.25, %v6590_v41 }
0x29f8   :  { %v4384_v61 = vmul.f32 0.25, %v4353_v55  ;;  %v6591_v62 = vpop.f32.mrb[106].mxu1 }
0x29f9   :  { %v4356_v3 = vpop.f32.mrb[107].mxu1  ;;  %v4387_v47 = vmul.f32 0.25, %v6591_v62  ;;  %v4394_v7 = vadd.f32 %v7036_v4, %v4386_v60 }
0x29fa   :  { %v4385_v48 = vmul.f32 0.25, %v4356_v3  ;;  %v4392_v6 = vadd.f32 %v7036_v4, %v4384_v61 }
0x29fb   :  { %v4395_v39 = vadd.f32 %v7037_v58, %v4387_v47  ;;  %v4406_v49 = vsel %vm1204_vm2, %v4394_v7, -inf }
0x29fc   :  { %v4400_v10 = vsel %vm1204_vm2, %v4392_v6, -inf  ;;  %v4393_v11 = vadd.f32 %v7037_v58, %v4385_v48 }
0x29fd   :  { %4401 = vmax.xlane.f32.xlu0 %v4400_v10  ;;  %v4409_v29 = vsel %vm1204_vm2, %v4395_v39, -inf }
0x29fe   :  { %v6594_v12 = vpop.f32.mrb[108].mxu1  ;;  %v4403_v31 = vsel %vm1204_vm2, %v4393_v11, -inf }
0x29ff   :  { %4404 = vmax.xlane.f32.xlu1 %v4403_v31  ;;  %v4369_v32 = vpop.f32.mrb[109].mxu1  ;;  %v4390_v24 = vmul.f32 0.25, %v6594_v12 }
0x2a00   :  { %v4388_v13 = vmul.f32 0.25, %v4369_v32  ;;  %v6595_v15 = vpop.f32.mrb[110].mxu1 }
0x2a01   :  { %4407 = vmax.xlane.f32.xlu0 %v4406_v49  ;;  %v4372_v50 = vpop.f32.mrb[111].mxu1  ;;  %v4391_v56 = vmul.f32 0.25, %v6595_v15  ;;  %v4398_v17 = vadd.f32 %v7036_v4, %v4390_v24 }
0x2a02   :  { %v4396_v16 = vadd.f32 %v7036_v4, %v4388_v13  ;;  %v4389_v5 = vmul.f32 0.25, %v4372_v50 }
0x2a03   :  { %4410 = vmax.xlane.f32.xlu1 %v4409_v29  ;;  %v4399_v63 = vadd.f32 %v7037_v58, %v4391_v56  ;;  %v4418_v19 = vsel %vm1204_vm2, %v4398_v17, -inf }
0x2a04   :  { %v4397_v14 = vadd.f32 %v7037_v58, %v4389_v5  ;;  %v4412_v18 = vsel %vm1204_vm2, %v4396_v16, -inf }
0x2a05   :  { %4413 = vmax.xlane.f32.xlu0 %v4412_v18  ;;  %v4421_v20 = vsel %vm1204_vm2, %v4399_v63, -inf }
0x2a06   :  { %v4415_v1 = vsel %vm1204_vm2, %v4397_v14, -inf }
0x2a07   :  { %4416 = vmax.xlane.f32.xlu1 %v4415_v1 }
0x2a09   :  { %4419 = vmax.xlane.f32.xlu0 %v4418_v19 }
0x2a0b   :  { %4422 = vmax.xlane.f32.xlu1 %v4421_v20 }
0x2a8a   :  { %v4402_v21 = vpop.xlane.xlu0 %4401 }
0x2a8b   :  { %v4424_v22 = vsub.f32 %v4392_v6, %v4402_v21 }
0x2a8c   :  { %v4405_v2 = vpop.xlane.xlu1 %4404 }
0x2a8d   :  { %v4432_v23 = vmul.f32 1.442695, %v4424_v22  ;;  %v4425_v46 = vsub.f32 %v4393_v11, %v4405_v2 }
0x2a8e   :  { %v4408_v25 = vpop.xlane.xlu0 %4407 }
0x2a8f   :  { %6956 = vpow2.f32 %v4432_v23  ;;  %v4434_v8 = vmul.f32 1.442695, %v4425_v46  ;;  %v4426_v9 = vsub.f32 %v4394_v7, %v4408_v25 }
0x2a90   :  { %v4411_v26 = vpop.xlane.xlu1 %4410 }
0x2a91   :  { %6958 = vpow2.f32 %v4434_v8  ;;  %v4436_v27 = vmul.f32 1.442695, %v4426_v9  ;;  %v4427_v28 = vsub.f32 %v4395_v39, %v4411_v26 }
0x2a92   :  { %v4414_v33 = vpop.xlane.xlu0 %4413 }
0x2a93   :  { %6960 = vpow2.f32 %v4436_v27  ;;  %v4438_v34 = vmul.f32 1.442695, %v4427_v28  ;;  %v4428_v35 = vsub.f32 %v4396_v16, %v4414_v33 }
0x2a94   :  { %v4417_v30 = vpop.xlane.xlu1 %4416 }
0x2a95   :  { %6962 = vpow2.f32 %v4438_v34  ;;  %v4440_v40 = vmul.f32 1.442695, %v4428_v35  ;;  %v4429_v42 = vsub.f32 %v4397_v14, %v4417_v30  ;;  %v4282_v34 = vld [vmem:[%s9323_s2 + $0x958] sm:$0xff]  ;;  %v4283_v35 = vld [vmem:[%s9323_s2 + $0x960] sm:$0xff] }
0x2a96   :  { %v4420_v43 = vpop.xlane.xlu0 %4419  ;;  %v4585_v30 = vpack.c.bf16 %v4283_v35, %v4282_v34 }
0x2a97   :  { %6964 = vpow2.f32 %v4440_v40  ;;  %v4442_v44 = vmul.f32 1.442695, %v4429_v42  ;;  %v4430_v45 = vsub.f32 %v4398_v17, %v4420_v43  ;;  %v4284_v40 = vld [vmem:[%s9323_s2 + $0x968] sm:$0xff]  ;;  %v4285_v42 = vld [vmem:[%s9323_s2 + $0x970] sm:$0xff] }
0x2a98   :  { %v4423_v54 = vpop.xlane.xlu1 %4422  ;;  %6607 = vmatpush3.bf16.msra.mxu1 %v4585_v30  ;;  %v4586_v43 = vpack.c.bf16 %v4285_v42, %v4284_v40  ;;  %v5724_v30 = vld [vmem:[%s9323_s2 + $0xa28] ss:$0 sm:$0xff] }
0x2a99   :  { %v6957_v36 = vpop.eup %6956  ;;  %6966 = vpow2.f32 %v4442_v44  ;;  %v4444_v41 = vmul.f32 1.442695, %v4430_v45  ;;  %v4431_v55 = vsub.f32 %v4399_v63, %v4423_v54  ;;  %6608 = vmatprep.subr.bf16.mxu1 %v7040_v0  ;;  %v4286_v44 = vld [vmem:[%s9323_s2 + $0x978] sm:$0xff]  ;;  %v4287_v45 = vld [vmem:[%s9323_s2 + $0x980] sm:$0xff] }
0x2a9a   :  { %v4448_v60 = vsel %vm1204_vm2, %v6957_v36, 0.0  ;;  %v4587_v54 = vpack.c.bf16 %v4287_v45, %v4286_v44 }
0x2a9b   :  { %v6959_v61 = vpop.eup %6958  ;;  %6968 = vpow2.f32 %v4444_v41  ;;  %v4446_v62 = vmul.f32 1.442695, %v4431_v55  ;;  %4449 = vadd.xlane.f32.xlu0 %v4448_v60  ;;  %v4289_v41 = vld [vmem:[%s9323_s2 + $0x990] sm:$0xff] }
0x2a9c   :  { %v4451_v3 = vsel %vm1204_vm2, %v6959_v61, 0.0  ;;  %6609 = vmatpush3.bf16.msra.mxu1 %v4586_v43 }
0x2a9d   :  { %v6961_v47 = vpop.eup %6960  ;;  %6970 = vpow2.f32 %v4446_v62  ;;  %4452 = vadd.xlane.f32.xlu1 %v4451_v3  ;;  %6610 = vmatprep.subr.bf16.mxu1 %v7040_v0 }
0x2a9e   :  { %v4454_v48 = vsel %vm1204_vm2, %v6961_v47, 0.0 }
0x2a9f   :  { %v6963_v4 = vpop.eup %6962  ;;  %4455 = vadd.xlane.f32.xlu0 %v4454_v48 }
0x2aa0   :  { %v4457_v6 = vsel %vm1204_vm2, %v6963_v4, 0.0  ;;  %6611 = vmatpush3.bf16.msra.mxu1 %v4587_v54 }
0x2aa1   :  { %v6965_v7 = vpop.eup %6964  ;;  %4458 = vadd.xlane.f32.xlu1 %v4457_v6  ;;  %6612 = vmatprep.subr.bf16.mxu1 %v7040_v0 }
0x2aa2   :  { %v4460_v10 = vsel %vm1204_vm2, %v6965_v7, 0.0 }
0x2aa3   :  { %v6967_v58 = vpop.eup %6966  ;;  %4461 = vadd.xlane.f32.xlu0 %v4460_v10 }
0x2aa4   :  { %v4463_v11 = vsel %vm1204_vm2, %v6967_v58, 0.0 }
0x2aa5   :  { %v6969_v39 = vpop.eup %6968  ;;  %4464 = vadd.xlane.f32.xlu1 %v4463_v11 }
0x2aa6   :  { %v4466_v12 = vsel %vm1204_vm2, %v6969_v39, 0.0 }
0x2aa7   :  { %v6971_v31 = vpop.eup %6970  ;;  %4467 = vadd.xlane.f32.xlu0 %v4466_v12 }
0x2aa8   :  { %v4469_v32 = vsel %vm1204_vm2, %v6971_v31, 0.0 }
0x2aa9   :  { %4470 = vadd.xlane.f32.xlu1 %v4469_v32 }
0x2b28   :  { %v4450_v24 = vpop.xlane.xlu0 %4449 }
0x2b29   :  { %6972 = vrcp.f32 %v4450_v24 }
0x2b2a   :  { %v4453_v13 = vpop.xlane.xlu1 %4452 }
0x2b2b   :  { %6974 = vrcp.f32 %v4453_v13 }
0x2b2c   :  { %v4456_v15 = vpop.xlane.xlu0 %4455 }
0x2b2d   :  { %6976 = vrcp.f32 %v4456_v15 }
0x2b2e   :  { %v4459_v49 = vpop.xlane.xlu1 %4458 }
0x2b2f   :  { %6978 = vrcp.f32 %v4459_v49 }
0x2b30   :  { %v4462_v50 = vpop.xlane.xlu0 %4461 }
0x2b31   :  { %6980 = vrcp.f32 %v4462_v50 }
0x2b32   :  { %v4465_v16 = vpop.xlane.xlu1 %4464 }
0x2b33   :  { %v6973_v56 = vpop.eup %6972  ;;  %6982 = vrcp.f32 %v4465_v16  ;;  %v4741_v16 = vld [vmem:[%s9323_s2 + $0x9e8] sm:$0xff] }
0x2b34   :  { %v4468_v5 = vpop.xlane.xlu0 %4467  ;;  %v4480_v14 = vmul.f32 %v6973_v56, %v6957_v36  ;;  %v4288_v36 = vld [vmem:[%s9323_s2 + $0x988] sm:$0xff]  ;;  %v4742_v56 = vld [vmem:[%s9323_s2 + $0x9f0] sm:$0xff] }
0x2b35   :  { %v6975_v29 = vpop.eup %6974  ;;  %6984 = vrcp.f32 %v4468_v5  ;;  %v4588_v55 = vpack.c.bf16 %v4289_v41, %v4288_v36 }
0x2b36   :  { %v4471_v17 = vpop.xlane.xlu1 %4470  ;;  %v4481_v18 = vmul.f32 %v6975_v29, %v6959_v61  ;;  %v4750_v29 = vpack.c.bf16 %v4742_v56, %v4741_v16 }
0x2b37   :  { %v6977_v63 = vpop.eup %6976  ;;  %6986 = vrcp.f32 %v4471_v17  ;;  %6613 = vmatpush3.bf16.msra.mxu1 %v4588_v55 }
0x2b38   :  { %v4488_v1 = vpack.c.bf16 %v4481_v18, %v4480_v14  ;;  %v4482_v20 = vmul.f32 %v6977_v63, %v6961_v47  ;;  %6630 = vmatprep.subr.bf16.mxu1 %v7040_v0  ;;  %v4743_v14 = vld [vmem:[%s9323_s2 + $0x9f8] sm:$0xff]  ;;  %v4744_v18 = vld [vmem:[%s9323_s2 + $0xa00] sm:$0xff] }
0x2b39   :  { %v6979_v19 = vpop.eup %6978  ;;  %v4751_v63 = vpack.c.bf16 %v4744_v18, %v4743_v14  ;;  %v5720_v14 = vld [vmem:[%s9323_s2 + $0xac0] ss:$0 sm:$0xff] }
0x2b3a   :  { %v4483_v21 = vmul.f32 %v6979_v19, %v6963_v4  ;;  %6598 = vmatprep.mubr.msk.bf16.mxu0 %vm1204_vm2, %v4488_v1  ;;  %v4745_v1 = vld [vmem:[%s9323_s2 + $0xa08] sm:$0xff]  ;;  %v4746_v19 = vld [vmem:[%s9323_s2 + $0xa10] sm:$0xff] }
0x2b3b   :  { %v6981_v22 = vpop.eup %6980 }
0x2b3c   :  { %v4489_v2 = vpack.c.bf16 %v4483_v21, %v4482_v20  ;;  %v4484_v46 = vmul.f32 %v6981_v22, %v6965_v7  ;;  %v4752_v20 = vpack.c.bf16 %v4746_v19, %v4745_v1  ;;  %v4747_v21 = vld [vmem:[%s9323_s2 + $0xa18] sm:$0xff]  ;;  %v4748_v22 = vld [vmem:[%s9323_s2 + $0xa20] sm:$0xff] }
0x2b3d   :  { %v6983_v23 = vpop.eup %6982 }
0x2b3e   :  { %6599 = vmatmul.mubr.msk.bf16.vlgmr.msra.gmra.mrb[104].mxu0 %vm1204_vm2, %v4489_v2  ;;  %v4485_v25 = vmul.f32 %v6983_v23, %v6967_v58  ;;  %v4753_v2 = vpack.c.bf16 %v4748_v22, %v4747_v21  ;;  %v5718_v23 = vld [vmem:[%s9323_s2 + $0x998] ss:$0 sm:$0xff]  ;;  %v4799_v22 = vld [vmem:[%s9323_s2 + $0xa30] sm:$0xff] }
0x2b3f   :  { %v6985_v8 = vpop.eup %6984 }
0x2b40   :  { %v4490_v9 = vpack.c.bf16 %v4485_v25, %v4484_v46  ;;  %v4486_v27 = vmul.f32 %v6985_v8, %v6969_v39 }
0x2b41   :  { %v6987_v26 = vpop.eup %6986 }
0x2b42   :  { %6602 = vmatprep.mubr.msk.bf16.mxu0 %vm1204_vm2, %v4490_v9  ;;  %v4487_v28 = vmul.f32 %v6987_v26, %v6971_v31 }
0x2b44   :  { %v4491_v33 = vpack.c.bf16 %v4487_v28, %v4486_v27 }
0x2b46   :  { %6603 = vmatmul.mubr.msk.bf16.gmra.mrb[108].mxu0 %vm1204_vm2, %v4491_v33 }
0x2b47   :  { %6626 = vmatprep.mubr.msk.bf16.mxu0 %vm7041_vm0, %v7040_v0 }
0x2c11   :  { %v6600_v60 = vpop.f32.mrb[104].mxu0 }
0x2c12   :  { %v4572_v61 = vmul.f32 %v6600_v60, %v7467_v37  ;;  %v4539_v62 = vpop.f32.mrb[105].mxu0 }
0x2c13   :  { %v4570_v3 = vmul.f32 %v4539_v62, %v7464_v57  ;;  %v6601_v47 = vpop.f32.mrb[106].mxu0 }
0x2c14   :  { %v4573_v48 = vmul.f32 %v6601_v47, %v7467_v37  ;;  %v4542_v4 = vpop.f32.mrb[107].mxu0 }
0x2c15   :  { %v4574_v6 = vadd.f32 %v4572_v61, %v4570_v3  ;;  %v4571_v7 = vmul.f32 %v4542_v4, %v7464_v57 }
0x2c17   :  { %v4575_v10 = vadd.f32 %v4573_v48, %v4571_v7  ;;  %v4680_v7 = vld [vmem:[%s9323_s2 + $0x9a8] sm:$0xff] }
0x2c19   :  { %v6604_v58 = vpop.f32.mrb[108].mxu0 }
0x2c1a   :  { %v4555_v11 = vpop.f32.mrb[109].mxu0  ;;  %v4580_v32 = vmul.f32 %v6604_v58, %v7473_v59  ;;  %v4681_v58 = vld [vmem:[%s9323_s2 + $0x9b0] sm:$0xff] }
0x2c1b   :  { %v4576_v39 = vmul.f32 %v4555_v11, %v7470_v38  ;;  %v6605_v12 = vpop.f32.mrb[110].mxu0  ;;  %v4682_v11 = vld [vmem:[%s9323_s2 + $0x9b8] sm:$0xff] }
0x2c1c   :  { %v4558_v31 = vpop.f32.mrb[111].mxu0  ;;  %v4581_v49 = vmul.f32 %v6605_v12, %v7473_v59  ;;  %v4683_v12 = vld [vmem:[%s9323_s2 + $0x9c0] sm:$0xff] }
0x2c1d   :  { %v4578_v24 = vadd.f32 %v4576_v39, %v4574_v6  ;;  %v4577_v13 = vmul.f32 %v4558_v31, %v7470_v38  ;;  %v4679_v6 = vld [vmem:[%s9323_s2 + $0x9a0] sm:$0xff]  ;;  %v4690_v39 = vpack.c.bf16 %v4682_v11, %v4681_v58  ;;  %v4684_v31 = vld [vmem:[%s9323_s2 + $0x9c8] sm:$0xff] }
0x2c1f   :  { %v4582_v15 = vadd.f32 %v4580_v32, %v4578_v24  ;;  %v4579_v50 = vadd.f32 %v4577_v13, %v4575_v10  ;;  %v4689_v10 = vpack.c.bf16 %v4680_v7, %v4679_v6  ;;  %v4691_v32 = vpack.c.bf16 %v4684_v31, %v4683_v12  ;;  %v4685_v24 = vld [vmem:[%s9323_s2 + $0x9d0] sm:$0xff]  ;;  %v4686_v13 = vld [vmem:[%s9323_s2 + $0x9d8] sm:$0xff] }
0x2c20   :  { %v5726_v7 = vld [vmem:[%s9323_s2 + $0xa70] ss:$0 sm:$0xff] }
0x2c21   :  { %v4583_v5 = vadd.f32 %v4581_v49, %v4579_v50  ;;  %6619 = vmatpush3.bf16.msra.mxu0 %v4689_v10 }
0x2c22   :  { %6620 = vmatprep.subr.bf16.mxu0 %v7040_v0 }
0x2c23   :  { %v4584_v17 = vpack.c.bf16 %v4583_v5, %v4582_v15  ;;  %v4692_v15 = vpack.c.bf16 %v4686_v13, %v4685_v24 }
0x2c25   :  { %6615 = vmatmul.mubr.msk.bf16.vlgmr.msra.gmra.mrb[112].mxu1 %vm61_vm1, %v4584_v17  ;;  %6621 = vmatpush3.bf16.msra.mxu0 %v4690_v39 }
0x2c26   :  { %6631 = vmatpush3.bf16.msra.mxu1 %v4750_v29  ;;  %6638 = vmatprep.mubr.msk.bf16.mxu1 %vm7041_vm0, %v7040_v0 }
0x2c27   :  { %6632 = vmatprep.subr.bf16.mxu1 %v7040_v0  ;;  %6622 = vmatprep.subr.bf16.mxu0 %v7040_v0 }
0x2c29   :  { %6623 = vmatpush3.bf16.msra.mxu0 %v4691_v32 }
0x2c2a   :  { %6633 = vmatpush3.bf16.msra.mxu1 %v4751_v63  ;;  %6624 = vmatprep.subr.bf16.mxu0 %v7040_v0 }
0x2c2b   :  { %6634 = vmatprep.subr.bf16.mxu1 %v7040_v0 }
0x2c2d   :  { %6625 = vmatpush3.bf16.msra.mxu0 %v4692_v15 }
0x2c2e   :  { %6635 = vmatpush3.bf16.msra.mxu1 %v4752_v20  ;;  %6642 = vmatprep.subr.bf16.mxu0 %v7040_v0  ;;  %v5721_v20 = vld [vmem:[%s9323_s2 + $0xac8] ss:$0 sm:$0xff] }
0x2c2f   :  { %6636 = vmatprep.subr.bf16.mxu1 %v7040_v0 }
0x2c32   :  { %6637 = vmatpush3.bf16.msra.mxu1 %v4753_v2  ;;  %v4800_v2 = vld [vmem:[%s9323_s2 + $0xa38] sm:$0xff] }
0x2c35   :  { %6639 = vmatmul.mubr.msk.bf16.vlgmr.msra.gmra.mrb[116].mxu1 %vm61_vm1, %v8082_v51 }
0x2cf8   :  { %v4630_v46 = vpop.f32.mrb[112].mxu1 }
0x2cf9   :  { %v4631_v25 = vadd.f32 %v5718_v23, %v4630_v46  ;;  %v6616_v8 = vpop.f32.mrb[113].mxu1 }
0x2cfa   :  { %v4633_v9 = vpop.f32.mrb[114].mxu1 }
0x2cfb   :  { %v4637_v26 = vadd.f32 %v4631_v25, %v8797_v52  ;;  %v4634_v27 = vadd.f32 %v5718_v23, %v4633_v9  ;;  %v6617_v28 = vpop.f32.mrb[115].mxu1  ;;  %v4808_v25 = vpack.c.bf16 %v4800_v2, %v4799_v22  ;;  %v4801_v9 = vld [vmem:[%s9323_s2 + $0xa40] sm:$0xff] }
0x2cfc   :  { %v4803_v28 = vld [vmem:[%s9323_s2 + $0xa50] sm:$0xff] }
0x2cfd   :  { %v4638_v33 = vadd.f32 %v4634_v27, %v8799_v53  ;;  %v4641_v34 = vsel %vm61_vm1, %v4637_v26, 0.0 }
0x2cfe   :  { %4642 = vadd.xlane.f32.xlu0 %v4641_v34 }
0x2cff   :  { %v4644_v35 = vsel %vm61_vm1, %v4638_v33, 0.0 }
0x2d00   :  { %4645 = vadd.xlane.f32.xlu1 %v4644_v35  ;;  %v4805_v35 = vld [vmem:[%s9323_s2 + $0xa60] sm:$0xff] }
0x2d08   :  { %v4792_v40 = vpop.f32.mrb[116].mxu1 }
0x2d09   :  { %v6640_v42 = vpop.f32.mrb[117].mxu1  ;;  %v4793_v44 = vadd.f32 %v5724_v30, %v4792_v40 }
0x2d0a   :  { %v4795_v43 = vpop.f32.mrb[118].mxu1  ;;  %v5722_v42 = vld [vmem:[%s9323_s2 + $0x9e0] ss:$0 sm:$0xff] }
0x2d0b   :  { %v4796_v45 = vadd.f32 %v5724_v30, %v4795_v43  ;;  %v6641_v52 = vpop.f32.mrb[119].mxu1  ;;  %v4806_v30 = vld [vmem:[%s9323_s2 + $0xa68] sm:$0xff] }
0x2d0c   :  { %v4811_v40 = vpack.c.bf16 %v4806_v30, %v4805_v35 }
0x2d0d   :  { %v4878_v54 = vpack.c.bf16 %v4796_v45, %v4793_v44 }
0x2d0f   :  { %6747 = vmatprep.subr.msk.bf16.mxu1 %vm61_vm1, %v4878_v54  ;;  %v4892_v53 = vsel %vm61_vm1, %v4878_v54, 0 }
0x2d10   :  { %6655 = vmatpush3.bf16.xpose.msra.mxu1 %v4892_v53 }
0x2d11   :  { %6674 = vmatprep.subr.bf16.mxu1 %v7040_v0 }
0x2d8b   :  { %v4643_v36 = vpop.xlane.xlu0 %4642 }
0x2d8c   :  { %v4647_v41 = vmul.f32 0.015625, %v4643_v36 }
0x2d8d   :  { %v4646_v55 = vpop.xlane.xlu1 %4645 }
0x2d8e   :  { %v4649_v60 = vsub.f32 %v4637_v26, %v4647_v41  ;;  %v4648_v61 = vmul.f32 0.015625, %v4646_v55  ;;  %v4802_v26 = vld [vmem:[%s9323_s2 + $0xa48] sm:$0xff] }
0x2d8f   :  { %v4809_v27 = vpack.c.bf16 %v4802_v26, %v4801_v9 }
0x2d90   :  { %v4650_v62 = vsub.f32 %v4638_v33, %v4648_v61  ;;  %v4651_v3 = vmul.f32 %v4649_v60, %v4649_v60  ;;  %v4804_v33 = vld [vmem:[%s9323_s2 + $0xa58] sm:$0xff] }
0x2d91   :  { %v4810_v34 = vpack.c.bf16 %v4804_v33, %v4803_v28 }
0x2d92   :  { %v4653_v47 = vsel %vm61_vm1, %v4651_v3, 0.0  ;;  %v4652_v48 = vmul.f32 %v4650_v62, %v4650_v62 }
0x2d93   :  { %4654 = vadd.xlane.f32.xlu0 %v4653_v47 }
0x2d94   :  { %v4656_v4 = vsel %vm61_vm1, %v4652_v48, 0.0 }
0x2d95   :  { %4657 = vadd.xlane.f32.xlu1 %v4656_v4 }
0x2e20   :  { %v4655_v49 = vpop.xlane.xlu0 %4654 }
0x2e21   :  { %v4659_v50 = vmul.f32 0.015625, %v4655_v49 }
0x2e22   :  { %v4658_v16 = vpop.xlane.xlu1 %4657 }
0x2e23   :  { %v4661_v56 = vadd.f32 1e-12, %v4659_v50  ;;  %v4660_v5 = vmul.f32 0.015625, %v4658_v16 }
0x2e25   :  { %6988 = vrsqrt.f32 %v4661_v56  ;;  %v4662_v29 = vadd.f32 1e-12, %v4660_v5  ;;  %v7038_v56 = vld [vmem:[%s9325_s1 + $0x20] sm:$0xff] }
0x2e27   :  { %6990 = vrsqrt.f32 %v4662_v29 }
0x2e2f   :  { %v6989_v17 = vpop.eup %6988 }
0x2e30   :  { %v4665_v18 = vmul.f32 %v6989_v17, %v4649_v60 }
0x2e31   :  { %v6991_v63 = vpop.eup %6990 }
0x2e32   :  { %v4671_v1 = vmul.f32 %v5720_v14, %v4665_v18  ;;  %v4666_v19 = vmul.f32 %v6991_v63, %v4650_v62  ;;  %v7039_v18 = vld [vmem:[%s9325_s1 + $0x28] sm:$0xff] }
0x2e34   :  { %v4672_v21 = vmul.f32 %v5720_v14, %v4666_v19  ;;  %v9007_v23 = vadd.f32 %v5721_v20, %v4671_v1 }
0x2e36   :  { %v9009_v46 = vadd.f32 %v5721_v20, %v4672_v21 }
0x2e38   :  { %v4688_v8 = vpack.c.bf16 %v9009_v46, %v9007_v23 }
0x2e3a   :  { %6627 = vmatmul.mubr.msk.bf16.vlgmr.msra.gmra.mrb[112].mxu0 %vm61_vm1, %v4688_v8 }
0x2e3b   :  { %6643 = vmatpush3.bf16.msra.mxu0 %v4808_v25  ;;  %6650 = vmatprep.mubr.msk.bf16.mxu0 %vm7041_vm0, %v7040_v0 }
0x2e3c   :  { %6644 = vmatprep.subr.bf16.mxu0 %v7040_v0 }
0x2e3f   :  { %6645 = vmatpush3.bf16.msra.mxu0 %v4809_v27 }
0x2e40   :  { %6646 = vmatprep.subr.bf16.mxu0 %v7040_v0 }
0x2e43   :  { %6647 = vmatpush3.bf16.msra.mxu0 %v4810_v34 }
0x2e44   :  { %6648 = vmatprep.subr.bf16.mxu0 %v7040_v0 }
0x2e47   :  { %6649 = vmatpush3.bf16.msra.mxu0 %v4811_v40 }
0x2e4a   :  { %6651 = vmatmul.mubr.msk.bf16.vlgmr.msra.gmra.mrb[116].mxu0 %vm61_vm1, %v8082_v51 }
0x2f0d   :  { %v4734_v43 = vpop.f32.mrb[112].mxu0 }
0x2f0e   :  { %v4735_v44 = vadd.f32 %v5722_v42, %v4734_v43  ;;  %v6628_v45 = vpop.f32.mrb[113].mxu0 }
0x2f0f   :  { %v4737_v52 = vpop.f32.mrb[114].mxu0 }
0x2f10   :  { %v6629_v54 = vpop.f32.mrb[115].mxu0  ;;  %v4738_v53 = vadd.f32 %v5722_v42, %v4737_v52  ;;  %v4866_v36 = vmul.f32 %v4735_v44, %v7464_v57  ;;  %v4868_v41 = vmul.f32 %v4735_v44, %v7467_v37  ;;  %v4870_v55 = vmul.f32 %v4735_v44, %v7470_v38 }
0x2f11   :  { %v4872_v60 = vmul.f32 %v4735_v44, %v7473_v59 }
0x2f12   :  { %v4867_v51 = vmul.f32 %v4738_v53, %v7464_v57  ;;  %v4869_v61 = vmul.f32 %v4738_v53, %v7467_v37  ;;  %v4871_v62 = vmul.f32 %v4738_v53, %v7470_v38  ;;  %v4873_v3 = vmul.f32 %v4738_v53, %v7473_v59 }
0x2f14   :  { %v4875_v47 = vpack.c.bf16 %v4869_v61, %v4868_v41  ;;  %v4874_v48 = vpack.c.bf16 %v4867_v51, %v4866_v36  ;;  %v4876_v4 = vpack.c.bf16 %v4871_v62, %v4870_v55  ;;  %v4877_v6 = vpack.c.bf16 %v4873_v3, %v4872_v60 }
0x2f16   :  { %6656 = vmatprep.mubr.msk.bf16.mxu1 %vm61_vm1, %v4874_v48 }
0x2f17   :  { %6657 = vmatmul.mubr.msk.bf16.vlgmr.msra.gmra.mrb[120].mxu1 %vm61_vm1, %v4875_v47 }
0x2f18   :  { %6660 = vmatprep.mubr.msk.bf16.mxu1 %vm61_vm1, %v4876_v4 }
0x2f1d   :  { %v4850_v10 = vpop.f32.mrb[116].mxu0 }
0x2f1e   :  { %v6652_v58 = vpop.f32.mrb[117].mxu0  ;;  %v4851_v39 = vadd.f32 %v5726_v7, %v4850_v10 }
0x2f1f   :  { %v4853_v11 = vpop.f32.mrb[118].mxu0  ;;  %6661 = vmatmul.mubr.msk.bf16.gmra.mrb[124].mxu1 %vm61_vm1, %v4877_v6 }
0x2f20   :  { %v4854_v12 = vadd.f32 %v5726_v7, %v4853_v11  ;;  %v6653_v31 = vpop.f32.mrb[119].mxu0  ;;  %6682 = vmatprep.mubr.msk.bf16.mxu1 %vm7041_vm0, %v7040_v0 }
0x2f22   :  { %v5067_v32 = vpack.c.bf16 %v4854_v12, %v4851_v39 }
0x2f24   :  { %6664 = vmatprep.subr.bf16.mxu0 %v5067_v32 }
0x2f25   :  { %6665 = vmatpush3.bf16.msra.mxu0 %v5067_v32 }
0x2f26   :  { %6686 = vmatprep.subr.bf16.mxu0 %v7040_v0 }
0x2fea   :  { %v6658_v24 = vpop.f32.mrb[120].mxu1 }
0x2feb   :  { %v4928_v13 = vpop.f32.mrb[121].mxu1  ;;  %v4961_v15 = vmul.f32 0.25, %v6658_v24 }
0x2fec   :  { %v4959_v49 = vmul.f32 0.25, %v4928_v13  ;;  %v6659_v50 = vpop.f32.mrb[122].mxu1 }
0x2fed   :  { %v4931_v16 = vpop.f32.mrb[123].mxu1  ;;  %v4962_v29 = vmul.f32 0.25, %v6659_v50  ;;  %v4969_v14 = vadd.f32 %v7038_v56, %v4961_v15 }
0x2fee   :  { %v4967_v5 = vadd.f32 %v7038_v56, %v4959_v49  ;;  %v4960_v17 = vmul.f32 0.25, %v4931_v16 }
0x2fef   :  { %v4970_v19 = vadd.f32 %v7039_v18, %v4962_v29  ;;  %v4981_v9 = vsel %vm1204_vm2, %v4969_v14, -inf }
0x2ff0   :  { %v4968_v63 = vadd.f32 %v7039_v18, %v4960_v17  ;;  %v4975_v1 = vsel %vm1204_vm2, %v4967_v5, -inf }
0x2ff1   :  { %4976 = vmax.xlane.f32.xlu0 %v4975_v1  ;;  %v4984_v34 = vsel %vm1204_vm2, %v4970_v19, -inf }
0x2ff2   :  { %v6662_v20 = vpop.f32.mrb[124].mxu1  ;;  %v4978_v21 = vsel %vm1204_vm2, %v4968_v63, -inf }
0x2ff3   :  { %4979 = vmax.xlane.f32.xlu1 %v4978_v21  ;;  %v4944_v22 = vpop.f32.mrb[125].mxu1  ;;  %v4965_v2 = vmul.f32 0.25, %v6662_v20 }
0x2ff4   :  { %v4963_v25 = vmul.f32 0.25, %v4944_v22  ;;  %v6663_v8 = vpop.f32.mrb[126].mxu1 }
0x2ff5   :  { %4982 = vmax.xlane.f32.xlu0 %v4981_v9  ;;  %v4947_v26 = vpop.f32.mrb[127].mxu1  ;;  %v4966_v28 = vmul.f32 0.25, %v6663_v8  ;;  %v4973_v35 = vadd.f32 %v7038_v56, %v4965_v2 }
0x2ff6   :  { %v4971_v27 = vadd.f32 %v7038_v56, %v4963_v25  ;;  %v4964_v33 = vmul.f32 0.25, %v4947_v26 }
0x2ff7   :  { %4985 = vmax.xlane.f32.xlu1 %v4984_v34  ;;  %v4974_v42 = vadd.f32 %v7039_v18, %v4966_v28  ;;  %v4993_v44 = vsel %vm1204_vm2, %v4973_v35, -inf }
0x2ff8   :  { %v4972_v30 = vadd.f32 %v7039_v18, %v4964_v33  ;;  %v4987_v40 = vsel %vm1204_vm2, %v4971_v27, -inf }
0x2ff9   :  { %4988 = vmax.xlane.f32.xlu0 %v4987_v40  ;;  %v4996_v45 = vsel %vm1204_vm2, %v4974_v42, -inf }
0x2ffa   :  { %v4990_v43 = vsel %vm1204_vm2, %v4972_v30, -inf }
0x2ffb   :  { %4991 = vmax.xlane.f32.xlu1 %v4990_v43 }
0x2ffd   :  { %4994 = vmax.xlane.f32.xlu0 %v4993_v44 }
0x2fff   :  { %4997 = vmax.xlane.f32.xlu1 %v4996_v45 }
0x307e   :  { %v4977_v52 = vpop.xlane.xlu0 %4976 }
0x307f   :  { %v4999_v54 = vsub.f32 %v4967_v5, %v4977_v52 }
0x3080   :  { %v4980_v53 = vpop.xlane.xlu1 %4979 }
0x3081   :  { %v5007_v36 = vmul.f32 1.442695, %v4999_v54  ;;  %v5000_v41 = vsub.f32 %v4968_v63, %v4980_v53 }
0x3082   :  { %v4983_v55 = vpop.xlane.xlu0 %4982 }
0x3083   :  { %6992 = vpow2.f32 %v5007_v36  ;;  %v5009_v60 = vmul.f32 1.442695, %v5000_v41  ;;  %v5001_v51 = vsub.f32 %v4969_v14, %v4983_v55 }
0x3084   :  { %v4986_v61 = vpop.xlane.xlu1 %4985 }
0x3085   :  { %6994 = vpow2.f32 %v5009_v60  ;;  %v5011_v62 = vmul.f32 1.442695, %v5001_v51  ;;  %v5002_v3 = vsub.f32 %v4970_v19, %v4986_v61 }
0x3086   :  { %v4989_v47 = vpop.xlane.xlu0 %4988 }
0x3087   :  { %6996 = vpow2.f32 %v5011_v62  ;;  %v5013_v48 = vmul.f32 1.442695, %v5002_v3  ;;  %v5003_v4 = vsub.f32 %v4971_v27, %v4989_v47  ;;  %v4857_v47 = vld [vmem:[%s9323_s2 + $0xa78] sm:$0xff] }
0x3088   :  { %v4992_v6 = vpop.xlane.xlu1 %4991 }
0x3089   :  { %6998 = vpow2.f32 %v5013_v48  ;;  %v5015_v7 = vmul.f32 1.442695, %v5003_v4  ;;  %v5004_v10 = vsub.f32 %v4972_v30, %v4992_v6  ;;  %v4858_v48 = vld [vmem:[%s9323_s2 + $0xa80] sm:$0xff]  ;;  %v4859_v6 = vld [vmem:[%s9323_s2 + $0xa88] sm:$0xff] }
0x308a   :  { %v4995_v58 = vpop.xlane.xlu0 %4994  ;;  %v5160_v4 = vpack.c.bf16 %v4858_v48, %v4857_v47  ;;  %v5259_v47 = vld [vmem:[%s9326_s3 + $0x100] sm:$0xff] }
0x308b   :  { %7000 = vpow2.f32 %v5015_v7  ;;  %v5017_v11 = vmul.f32 1.442695, %v5004_v10  ;;  %v5005_v39 = vsub.f32 %v4973_v35, %v4995_v58  ;;  %v4860_v7 = vld [vmem:[%s9323_s2 + $0xa90] sm:$0xff]  ;;  %v4861_v58 = vld [vmem:[%s9323_s2 + $0xa98] sm:$0xff] }
0x308c   :  { %v4998_v12 = vpop.xlane.xlu1 %4997  ;;  %6675 = vmatpush3.bf16.msra.mxu1 %v5160_v4  ;;  %v5161_v10 = vpack.c.bf16 %v4860_v7, %v4859_v6  ;;  %v5260_v4 = vld [vmem:[%s9326_s3 + $0x108] sm:$0xff]  ;;  %v5261_v6 = vld [vmem:[%s9326_s3 + $0x110] sm:$0xff] }
0x308d   :  { %v6993_v31 = vpop.eup %6992  ;;  %7002 = vpow2.f32 %v5017_v11  ;;  %v5019_v32 = vmul.f32 1.442695, %v5005_v39  ;;  %v5006_v24 = vsub.f32 %v4974_v42, %v4998_v12  ;;  %6676 = vmatprep.subr.bf16.mxu1 %v7040_v0  ;;  %v4862_v11 = vld [vmem:[%s9323_s2 + $0xaa0] sm:$0xff]  ;;  %v4863_v12 = vld [vmem:[%s9323_s2 + $0xaa8] sm:$0xff]  ;;  %v5267_v7 = vpack.c.bf16 %v5261_v6, %v5260_v4 }
0x308e   :  { %v5023_v13 = vsel %vm1204_vm2, %v6993_v31, 0.0  ;;  %v5162_v39 = vpack.c.bf16 %v4862_v11, %v4861_v58 }
0x308f   :  { %v6995_v15 = vpop.eup %6994  ;;  %7004 = vpow2.f32 %v5019_v32  ;;  %v5021_v49 = vmul.f32 1.442695, %v5006_v24  ;;  %5024 = vadd.xlane.f32.xlu0 %v5023_v13 }
0x3090   :  { %v5026_v50 = vsel %vm1204_vm2, %v6995_v15, 0.0  ;;  %6677 = vmatpush3.bf16.msra.mxu1 %v5161_v10 }
0x3091   :  { %v6997_v16 = vpop.eup %6996  ;;  %7006 = vpow2.f32 %v5021_v49  ;;  %5027 = vadd.xlane.f32.xlu1 %v5026_v50  ;;  %6678 = vmatprep.subr.bf16.mxu1 %v7040_v0 }
0x3092   :  { %v5029_v56 = vsel %vm1204_vm2, %v6997_v16, 0.0 }
0x3093   :  { %v6999_v5 = vpop.eup %6998  ;;  %5030 = vadd.xlane.f32.xlu0 %v5029_v56 }
0x3094   :  { %v5032_v29 = vsel %vm1204_vm2, %v6999_v5, 0.0  ;;  %6679 = vmatpush3.bf16.msra.mxu1 %v5162_v39 }
0x3095   :  { %v7001_v17 = vpop.eup %7000  ;;  %5033 = vadd.xlane.f32.xlu1 %v5032_v29  ;;  %6680 = vmatprep.subr.bf16.mxu1 %v7040_v0 }
0x3096   :  { %v5035_v14 = vsel %vm1204_vm2, %v7001_v17, 0.0 }
0x3097   :  { %v7003_v18 = vpop.eup %7002  ;;  %5036 = vadd.xlane.f32.xlu0 %v5035_v14 }
0x3098   :  { %v5038_v63 = vsel %vm1204_vm2, %v7003_v18, 0.0 }
0x3099   :  { %v7005_v1 = vpop.eup %7004  ;;  %5039 = vadd.xlane.f32.xlu1 %v5038_v63 }
0x309a   :  { %v5041_v19 = vsel %vm1204_vm2, %v7005_v1, 0.0 }
0x309b   :  { %v7007_v20 = vpop.eup %7006  ;;  %5042 = vadd.xlane.f32.xlu0 %v5041_v19 }
0x309c   :  { %v5044_v21 = vsel %vm1204_vm2, %v7007_v20, 0.0 }
0x309d   :  { %5045 = vadd.xlane.f32.xlu1 %v5044_v21 }
0x311c   :  { %v5025_v22 = vpop.xlane.xlu0 %5024 }
0x311d   :  { %7008 = vrcp.f32 %v5025_v22 }
0x311e   :  { %v5028_v2 = vpop.xlane.xlu1 %5027 }
0x311f   :  { %7010 = vrcp.f32 %v5028_v2 }
0x3120   :  { %v5031_v25 = vpop.xlane.xlu0 %5030 }
0x3121   :  { %7012 = vrcp.f32 %v5031_v25 }
0x3122   :  { %v5034_v8 = vpop.xlane.xlu1 %5033 }
0x3123   :  { %7014 = vrcp.f32 %v5034_v8 }
0x3124   :  { %v5037_v9 = vpop.xlane.xlu0 %5036 }
0x3125   :  { %7016 = vrcp.f32 %v5037_v9 }
0x3126   :  { %v5040_v26 = vpop.xlane.xlu1 %5039 }
0x3127   :  { %v7009_v27 = vpop.eup %7008  ;;  %7018 = vrcp.f32 %v5040_v26 }
0x3128   :  { %v5043_v28 = vpop.xlane.xlu0 %5042  ;;  %v5055_v35 = vmul.f32 %v7009_v27, %v6993_v31  ;;  %v4864_v31 = vld [vmem:[%s9323_s2 + $0xab0] sm:$0xff] }
0x3129   :  { %v7011_v33 = vpop.eup %7010  ;;  %7020 = vrcp.f32 %v5043_v28  ;;  %v5163_v32 = vpack.c.bf16 %v4864_v31, %v4863_v12 }
0x312a   :  { %v5046_v34 = vpop.xlane.xlu1 %5045  ;;  %v5056_v30 = vmul.f32 %v7011_v33, %v6995_v15 }
0x312b   :  { %v7013_v40 = vpop.eup %7012  ;;  %7022 = vrcp.f32 %v5046_v34  ;;  %6681 = vmatpush3.bf16.msra.mxu1 %v5163_v32 }
0x312c   :  { %v5063_v42 = vpack.c.bf16 %v5056_v30, %v5055_v35  ;;  %v5057_v44 = vmul.f32 %v7013_v40, %v6997_v16  ;;  %6698 = vmatprep.subr.bf16.mxu1 %v7040_v0 }
0x312d   :  { %v7015_v43 = vpop.eup %7014 }
0x312e   :  { %v5058_v45 = vmul.f32 %v7015_v43, %v6999_v5  ;;  %6666 = vmatprep.mubr.msk.bf16.mxu0 %vm1204_vm2, %v5063_v42 }
0x312f   :  { %v7017_v52 = vpop.eup %7016 }
0x3130   :  { %v5064_v54 = vpack.c.bf16 %v5058_v45, %v5057_v44  ;;  %v5059_v36 = vmul.f32 %v7017_v52, %v7001_v17 }
0x3131   :  { %v7019_v53 = vpop.eup %7018 }
0x3132   :  { %6667 = vmatmul.mubr.msk.bf16.vlgmr.msra.gmra.mrb[120].mxu0 %vm1204_vm2, %v5064_v54  ;;  %v5060_v41 = vmul.f32 %v7019_v53, %v7003_v18 }
0x3133   :  { %v7021_v55 = vpop.eup %7020 }
0x3134   :  { %v5065_v60 = vpack.c.bf16 %v5060_v41, %v5059_v36  ;;  %v5061_v61 = vmul.f32 %v7021_v55, %v7005_v1  ;;  %v5255_v55 = vld [vmem:[%s9326_s3 + $0xe0] sm:$0xff] }
0x3135   :  { %v7023_v51 = vpop.eup %7022 }
0x3136   :  { %6670 = vmatprep.mubr.msk.bf16.mxu0 %vm1204_vm2, %v5065_v60  ;;  %v5062_v62 = vmul.f32 %v7023_v51, %v7007_v20  ;;  %v5256_v51 = vld [vmem:[%s9326_s3 + $0xe8] sm:$0xff] }
0x3138   :  { %v5066_v3 = vpack.c.bf16 %v5062_v62, %v5061_v61  ;;  %v5257_v61 = vld [vmem:[%s9326_s3 + $0xf0] sm:$0xff] }
0x3139   :  { %v5265_v62 = vpack.c.bf16 %v5257_v61, %v5256_v51 }
0x313a   :  { %6671 = vmatmul.mubr.msk.bf16.gmra.mrb[124].mxu0 %vm1204_vm2, %v5066_v3  ;;  %v5258_v3 = vld [vmem:[%s9326_s3 + $0xf8] sm:$0xff] }
0x313b   :  { %6694 = vmatprep.mubr.msk.bf16.mxu0 %vm7041_vm0, %v7040_v0  ;;  %v5266_v48 = vpack.c.bf16 %v5259_v47, %v5258_v3 }
0x3205   :  { %v6668_v24 = vpop.f32.mrb[120].mxu0 }
0x3206   :  { %v5147_v13 = vmul.f32 %v6668_v24, %v7467_v37  ;;  %v5114_v15 = vpop.f32.mrb[121].mxu0  ;;  %v5738_v24 = vld [vmem:[%s9323_s2 + $0xad0] ss:$0 sm:$0xff] }
0x3207   :  { %v5145_v49 = vmul.f32 %v5114_v15, %v7464_v57  ;;  %v6669_v50 = vpop.f32.mrb[122].mxu0 }
0x3208   :  { %v5148_v16 = vmul.f32 %v6669_v50, %v7467_v37  ;;  %v5117_v56 = vpop.f32.mrb[123].mxu0 }
0x3209   :  { %v5149_v5 = vadd.f32 %v5147_v13, %v5145_v49  ;;  %v5146_v29 = vmul.f32 %v5117_v56, %v7464_v57  ;;  %v5736_v57 = vld [vmem:[%s9323_s2 + $0xab8] ss:$0 sm:$0xff] }
0x320b   :  { %v5150_v17 = vadd.f32 %v5148_v16, %v5146_v29  ;;  %v5739_v16 = vld [vmem:[%s9323_s2 + $0xad8] ss:$0 sm:$0xff] }
0x320d   :  { %v6672_v14 = vpop.f32.mrb[124].mxu0 }
0x320e   :  { %v5130_v18 = vpop.f32.mrb[125].mxu0  ;;  %v5155_v20 = vmul.f32 %v6672_v14, %v7473_v59  ;;  %v5334_v14 = vld [vmem:[%s9323_s2 + $0xaf0] sm:$0xff] }
0x320f   :  { %v5151_v63 = vmul.f32 %v5130_v18, %v7470_v38  ;;  %v6673_v1 = vpop.f32.mrb[126].mxu0  ;;  %v5335_v18 = vld [vmem:[%s9323_s2 + $0xaf8] sm:$0xff] }
0x3210   :  { %v5133_v19 = vpop.f32.mrb[127].mxu0  ;;  %v5156_v25 = vmul.f32 %v6673_v1, %v7473_v59  ;;  %v5336_v1 = vld [vmem:[%s9323_s2 + $0xb00] sm:$0xff] }
0x3211   :  { %v5153_v21 = vadd.f32 %v5151_v63, %v5149_v5  ;;  %v5152_v22 = vmul.f32 %v5133_v19, %v7470_v38  ;;  %v5352_v63 = vpack.c.bf16 %v5335_v18, %v5334_v14  ;;  %v5337_v19 = vld [vmem:[%s9323_s2 + $0xb08] sm:$0xff] }
0x3213   :  { %v5157_v2 = vadd.f32 %v5155_v20, %v5153_v21  ;;  %v5154_v37 = vadd.f32 %v5152_v22, %v5150_v17  ;;  %v5353_v20 = vpack.c.bf16 %v5337_v19, %v5336_v1  ;;  %v5338_v21 = vld [vmem:[%s9323_s2 + $0xb10] sm:$0xff]  ;;  %v5339_v22 = vld [vmem:[%s9323_s2 + $0xb18] sm:$0xff] }
0x3215   :  { %v5158_v8 = vadd.f32 %v5156_v25, %v5154_v37  ;;  %v5340_v25 = vld [vmem:[%s9323_s2 + $0xb20] sm:$0xff]  ;;  %v5341_v37 = vld [vmem:[%s9323_s2 + $0xb28] sm:$0xff] }
0x3217   :  { %v5159_v9 = vpack.c.bf16 %v5158_v8, %v5157_v2  ;;  %v5354_v2 = vpack.c.bf16 %v5339_v22, %v5338_v21  ;;  %v5355_v8 = vpack.c.bf16 %v5341_v37, %v5340_v25  ;;  %v5448_v25 = vld [vmem:[%s9323_s2 + $0xc10] sm:$0xff] }
0x3219   :  { %6683 = vmatmul.mubr.msk.bf16.vlgmr.msra.gmra.mrb[128].mxu1 %vm61_vm1, %v5159_v9  ;;  %v5342_v9 = vld [vmem:[%s9323_s2 + $0xb30] sm:$0xff] }
0x321a   :  { %6714 = vmatprep.mubr.msk.bf16.mxu1 %vm7041_vm0, %v7040_v0  ;;  %6699 = vmatpush3.bf16.msra.mxu1 %v5352_v63 }
0x321b   :  { %6700 = vmatprep.subr.bf16.mxu1 %v7040_v0 }
0x321e   :  { %6701 = vmatpush3.bf16.msra.mxu1 %v5353_v20 }
0x321f   :  { %6702 = vmatprep.subr.bf16.mxu1 %v7040_v0 }
0x3222   :  { %6703 = vmatpush3.bf16.msra.mxu1 %v5354_v2 }
0x3223   :  { %6704 = vmatprep.subr.bf16.mxu1 %v7040_v0 }
0x3226   :  { %6705 = vmatpush3.bf16.msra.mxu1 %v5355_v8  ;;  %v5449_v8 = vld [vmem:[%s9323_s2 + $0xc18] sm:$0xff] }
0x3227   :  { %6706 = vmatprep.subr.bf16.mxu1 %v7040_v0 }
0x32ec   :  { %v5205_v26 = vpop.f32.mrb[128].mxu1 }
0x32ed   :  { %v5206_v27 = vadd.f32 %v5736_v57, %v5205_v26  ;;  %v6684_v28 = vpop.f32.mrb[129].mxu1 }
0x32ee   :  { %v5208_v33 = vpop.f32.mrb[130].mxu1  ;;  %v5345_v28 = vld [vmem:[%s9323_s2 + $0xb48] sm:$0xff] }
0x32ef   :  { %v5212_v38 = vadd.f32 %v5206_v27, %v9007_v23  ;;  %v5209_v34 = vadd.f32 %v5736_v57, %v5208_v33  ;;  %v6685_v59 = vpop.f32.mrb[131].mxu1  ;;  %v5343_v57 = vld [vmem:[%s9323_s2 + $0xb38] sm:$0xff]  ;;  %v5344_v27 = vld [vmem:[%s9323_s2 + $0xb40] sm:$0xff] }
0x32f0   :  { %v5356_v26 = vpack.c.bf16 %v5343_v57, %v5342_v9  ;;  %v5357_v33 = vpack.c.bf16 %v5345_v28, %v5344_v27  ;;  %v5450_v9 = vld [vmem:[%s9323_s2 + $0xc20] sm:$0xff]  ;;  %v5452_v27 = vld [vmem:[%s9323_s2 + $0xc30] sm:$0xff] }
0x32f1   :  { %v5213_v35 = vadd.f32 %v5209_v34, %v9009_v46  ;;  %v5216_v30 = vsel %vm61_vm1, %v5212_v38, 0.0  ;;  %v5254_v46 = vld [vmem:[%s9326_s3 + $0xd8] sm:$0xff]  ;;  %v5458_v57 = vpack.c.bf16 %v5450_v9, %v5449_v8 }
0x32f2   :  { %5217 = vadd.xlane.f32.xlu0 %v5216_v30  ;;  %v5264_v60 = vpack.c.bf16 %v5255_v55, %v5254_v46  ;;  %6707 = vmatpush3.bf16.msra.mxu1 %v5356_v26  ;;  %v5347_v34 = vld [vmem:[%s9323_s2 + $0xb58] sm:$0xff]  ;;  %v5349_v30 = vld [vmem:[%s9323_s2 + $0xb68] sm:$0xff] }
0x32f3   :  { %v5219_v40 = vsel %vm61_vm1, %v5213_v35, 0.0  ;;  %6708 = vmatprep.subr.bf16.mxu1 %v7040_v0  ;;  %v5451_v26 = vld [vmem:[%s9323_s2 + $0xc28] sm:$0xff] }
0x32f4   :  { %5220 = vadd.xlane.f32.xlu1 %v5219_v40  ;;  %6687 = vmatpush3.bf16.msra.mxu0 %v5264_v60  ;;  %v5459_v28 = vpack.c.bf16 %v5452_v27, %v5451_v26 }
0x32f5   :  { %6688 = vmatprep.subr.bf16.mxu0 %v7040_v0 }
0x32f6   :  { %6709 = vmatpush3.bf16.msra.mxu1 %v5357_v33  ;;  %v5453_v33 = vld [vmem:[%s9323_s2 + $0xc38] sm:$0xff] }
0x32f7   :  { %6710 = vmatprep.subr.bf16.mxu1 %v7040_v0 }
0x32f8   :  { %6689 = vmatpush3.bf16.msra.mxu0 %v5265_v62 }
0x32f9   :  { %6690 = vmatprep.subr.bf16.mxu0 %v7040_v0 }
0x32fc   :  { %6691 = vmatpush3.bf16.msra.mxu0 %v5266_v48 }
0x32fd   :  { %6692 = vmatprep.subr.bf16.mxu0 %v7040_v0 }
0x3300   :  { %6693 = vmatpush3.bf16.msra.mxu0 %v5267_v7 }
0x3301   :  { %6718 = vmatprep.subr.bf16.mxu0 %v7040_v0 }
0x337f   :  { %v5218_v42 = vpop.xlane.xlu0 %5217 }
0x3380   :  { %v5222_v43 = vmul.f32 0.015625, %v5218_v42  ;;  %v5740_v42 = vld [vmem:[%s9326_s3 + $0x118] ss:$0 sm:$0xff] }
0x3381   :  { %v5221_v44 = vpop.xlane.xlu1 %5220 }
0x3382   :  { %v5224_v45 = vsub.f32 %v5212_v38, %v5222_v43  ;;  %v5223_v52 = vmul.f32 0.015625, %v5221_v44  ;;  %v5346_v38 = vld [vmem:[%s9323_s2 + $0xb50] sm:$0xff] }
0x3383   :  { %v5358_v59 = vpack.c.bf16 %v5347_v34, %v5346_v38  ;;  %v5454_v38 = vld [vmem:[%s9323_s2 + $0xc40] sm:$0xff] }
0x3384   :  { %v5225_v54 = vsub.f32 %v5213_v35, %v5223_v52  ;;  %v5226_v53 = vmul.f32 %v5224_v45, %v5224_v45  ;;  %v5348_v35 = vld [vmem:[%s9323_s2 + $0xb60] sm:$0xff]  ;;  %v5460_v34 = vpack.c.bf16 %v5454_v38, %v5453_v33 }
0x3385   :  { %6711 = vmatpush3.bf16.msra.mxu1 %v5358_v59  ;;  %v5359_v40 = vpack.c.bf16 %v5349_v30, %v5348_v35 }
0x3386   :  { %v5228_v36 = vsel %vm61_vm1, %v5226_v53, 0.0  ;;  %v5227_v23 = vmul.f32 %v5225_v54, %v5225_v54  ;;  %6712 = vmatprep.subr.bf16.mxu1 %v7040_v0 }
0x3387   :  { %5229 = vadd.xlane.f32.xlu0 %v5228_v36 }
0x3388   :  { %v5231_v41 = vsel %vm61_vm1, %v5227_v23, 0.0 }
0x3389   :  { %5232 = vadd.xlane.f32.xlu1 %v5231_v41  ;;  %6713 = vmatpush3.bf16.msra.mxu1 %v5359_v40 }
0x3414   :  { %v5230_v10 = vpop.xlane.xlu0 %5229 }
0x3415   :  { %v5234_v58 = vmul.f32 0.015625, %v5230_v10 }
0x3416   :  { %v5233_v11 = vpop.xlane.xlu1 %5232 }
0x3417   :  { %v5236_v39 = vadd.f32 1e-12, %v5234_v58  ;;  %v5235_v12 = vmul.f32 0.015625, %v5233_v11 }
0x3419   :  { %7024 = vrsqrt.f32 %v5236_v39  ;;  %v5237_v31 = vadd.f32 1e-12, %v5235_v12  ;;  %v5742_v12 = vld [vmem:[%s9323_s2 + $0xb70] ss:$0 sm:$0xff] }
0x341b   :  { %7026 = vrsqrt.f32 %v5237_v31 }
0x3423   :  { %v7025_v32 = vpop.eup %7024 }
0x3424   :  { %v5240_v13 = vmul.f32 %v7025_v32, %v5224_v45 }
0x3425   :  { %v7027_v15 = vpop.eup %7026 }
0x3426   :  { %v5246_v49 = vmul.f32 %v5738_v24, %v5240_v13  ;;  %v5241_v50 = vmul.f32 %v7027_v15, %v5225_v54 }
0x3428   :  { %v5247_v56 = vmul.f32 %v5738_v24, %v5241_v50  ;;  %v9170_v5 = vadd.f32 %v5739_v16, %v5246_v49 }
0x342a   :  { %v9172_v29 = vadd.f32 %v5739_v16, %v5247_v56 }
0x342c   :  { %v5263_v17 = vpack.c.bf16 %v9172_v29, %v9170_v5 }
0x342e   :  { %6695 = vmatmul.mubr.msk.bf16.vlgmr.msra.gmra.mrb[128].mxu0 %vm61_vm1, %v5263_v17 }
0x342f   :  { %6726 = vmatprep.mubr.msk.bf16.mxu0 %vm7041_vm0, %v7040_v0 }
0x3501   :  { %v5309_v43 = vpop.f32.mrb[128].mxu0 }
0x3502   :  { %v5310_v44 = vadd.f32 %v5740_v42, %v5309_v43  ;;  %v6696_v45 = vpop.f32.mrb[129].mxu0 }
0x3503   :  { %v5312_v52 = vpop.f32.mrb[130].mxu0  ;;  %v5743_v45 = vld [vmem:[%s9323_s2 + $0xae0] ss:$0 sm:$0xff] }
0x3504   :  { %v5316_v54 = vmul.f32 %v5310_v44, %v5310_v44  ;;  %v5313_v53 = vadd.f32 %v5740_v42, %v5312_v52  ;;  %v6697_v36 = vpop.f32.mrb[131].mxu0 }
0x3506   :  { %v5318_v23 = vmul.f32 %v5316_v54, %v5310_v44  ;;  %v5317_v41 = vmul.f32 %v5313_v53, %v5313_v53 }
0x3508   :  { %v5320_v46 = vmul.f32 0.044715, %v5318_v23  ;;  %v5319_v55 = vmul.f32 %v5317_v41, %v5313_v53  ;;  %v5744_v23 = vld [vmem:[%s9323_s2 + $0xae8] ss:$0 sm:$0xff] }
0x350a   :  { %v5322_v60 = vadd.f32 %v5320_v46, %v5310_v44  ;;  %v5321_v51 = vmul.f32 0.044715, %v5319_v55  ;;  %v5511_v46 = vld [vmem:[%s9326_s3 + $0x168] sm:$0xff]  ;;  %v5512_v55 = vld [vmem:[%s9326_s3 + $0x170] sm:$0xff] }
0x350c   :  { %v5324_v61 = vmul.f32 0.7978846, %v5322_v60  ;;  %v5323_v62 = vadd.f32 %v5321_v51, %v5313_v53 }
0x350e   :  { %7028 = vtanh.f32 %v5324_v61  ;;  %v5325_v3 = vmul.f32 0.7978846, %v5323_v62  ;;  %v5521_v61 = vpack.c.bf16 %v5512_v55, %v5511_v46 }
0x3510   :  { %7030 = vtanh.f32 %v5325_v3  ;;  %v5513_v3 = vld [vmem:[%s9326_s3 + $0x178] sm:$0xff] }
0x3518   :  { %v7029_v47 = vpop.eup %7028 }
0x3519   :  { %v5328_v48 = vadd.f32 1.0, %v7029_v47  ;;  %v5514_v47 = vld [vmem:[%s9326_s3 + $0x180] sm:$0xff] }
0x351a   :  { %v7031_v4 = vpop.eup %7030 }
0x351b   :  { %v5330_v6 = vmul.f32 0.5, %v5328_v48  ;;  %v5329_v7 = vadd.f32 1.0, %v7031_v4  ;;  %v5522_v48 = vpack.c.bf16 %v5514_v47, %v5513_v3  ;;  %v5515_v4 = vld [vmem:[%s9326_s3 + $0x188] sm:$0xff] }
0x351d   :  { %v5331_v10 = vmul.f32 0.5, %v5329_v7  ;;  %v5332_v58 = vmul.f32 %v5330_v6, %v5310_v44  ;;  %v5516_v6 = vld [vmem:[%s9326_s3 + $0x190] sm:$0xff] }
0x351e   :  { %v5523_v7 = vpack.c.bf16 %v5516_v6, %v5515_v4 }
0x351f   :  { %v5333_v11 = vmul.f32 %v5331_v10, %v5313_v53  ;;  %v5517_v10 = vld [vmem:[%s9326_s3 + $0x198] sm:$0xff] }
0x3521   :  { %v5351_v39 = vpack.c.bf16 %v5333_v11, %v5332_v58  ;;  %v5518_v58 = vld [vmem:[%s9326_s3 + $0x1a0] sm:$0xff] }
0x3522   :  { %v5524_v11 = vpack.c.bf16 %v5518_v58, %v5517_v10 }
0x3523   :  { %6715 = vmatmul.mubr.bf16.vlgmr.msra.gmra.mrb[132].mxu1 %v5351_v39  ;;  %v5745_v39 = vld [vmem:[%s9323_s2 + $0xc48] ss:$0 sm:$0xff] }
0x35f6   :  { %v5398_v31 = vpop.f32.mrb[132].mxu1 }
0x35f7   :  { %v5399_v32 = vadd.f32 %v5742_v12, %v5398_v31  ;;  %v6716_v24 = vpop.f32.mrb[133].mxu1 }
0x35f8   :  { %v5401_v13 = vpop.f32.mrb[134].mxu1 }
0x35f9   :  { %v5405_v15 = vadd.f32 %v5399_v32, %v9170_v5  ;;  %v5402_v49 = vadd.f32 %v5742_v12, %v5401_v13  ;;  %v6717_v50 = vpop.f32.mrb[135].mxu1 }
0x35fb   :  { %v5406_v16 = vadd.f32 %v5402_v49, %v9172_v29  ;;  %v5409_v56 = vsel %vm61_vm1, %v5405_v15, 0.0  ;;  %v5447_v29 = vld [vmem:[%s9323_s2 + $0xc08] sm:$0xff] }
0x35fc   :  { %5410 = vadd.xlane.f32.xlu0 %v5409_v56  ;;  %v5457_v37 = vpack.c.bf16 %v5448_v25, %v5447_v29 }
0x35fd   :  { %v5412_v17 = vsel %vm61_vm1, %v5406_v16, 0.0 }
0x35fe   :  { %5413 = vadd.xlane.f32.xlu1 %v5412_v17  ;;  %6719 = vmatpush3.bf16.msra.mxu0 %v5457_v37 }
0x35ff   :  { %6720 = vmatprep.subr.bf16.mxu0 %v7040_v0 }
0x3602   :  { %6721 = vmatpush3.bf16.msra.mxu0 %v5458_v57 }
0x3603   :  { %6722 = vmatprep.subr.bf16.mxu0 %v7040_v0 }
0x3606   :  { %6723 = vmatpush3.bf16.msra.mxu0 %v5459_v28 }
0x3607   :  { %6724 = vmatprep.subr.bf16.mxu0 %v7040_v0 }
0x360a   :  { %6725 = vmatpush3.bf16.msra.mxu0 %v5460_v34 }
0x360b   :  { %6730 = vmatprep.subr.bf16.mxu0 %v7040_v0 }
0x3689   :  { %v5411_v14 = vpop.xlane.xlu0 %5410 }
0x368a   :  { %v5415_v18 = vmul.f32 0.015625, %v5411_v14 }
0x368b   :  { %v5414_v63 = vpop.xlane.xlu1 %5413 }
0x368c   :  { %v5417_v1 = vsub.f32 %v5405_v15, %v5415_v18  ;;  %v5416_v19 = vmul.f32 0.015625, %v5414_v63 }
0x368e   :  { %v5418_v20 = vsub.f32 %v5406_v16, %v5416_v19  ;;  %v5419_v21 = vmul.f32 %v5417_v1, %v5417_v1  ;;  %v5747_v16 = vld [vmem:[%s9326_s3 + $0x1a8] ss:$0 sm:$0xff] }
0x3690   :  { %v5421_v22 = vsel %vm61_vm1, %v5419_v21, 0.0  ;;  %v5420_v5 = vmul.f32 %v5418_v20, %v5418_v20 }
0x3691   :  { %5422 = vadd.xlane.f32.xlu0 %v5421_v22 }
0x3692   :  { %v5424_v2 = vsel %vm61_vm1, %v5420_v5, 0.0 }
0x3693   :  { %5425 = vadd.xlane.f32.xlu1 %v5424_v2 }
0x371e   :  { %v5423_v59 = vpop.xlane.xlu0 %5422 }
0x371f   :  { %v5427_v35 = vmul.f32 0.015625, %v5423_v59 }
0x3720   :  { %v5426_v30 = vpop.xlane.xlu1 %5425 }
0x3721   :  { %v5429_v40 = vadd.f32 1e-12, %v5427_v35  ;;  %v5428_v42 = vmul.f32 0.015625, %v5426_v30 }
0x3723   :  { %7032 = vrsqrt.f32 %v5429_v40  ;;  %v5430_v43 = vadd.f32 1e-12, %v5428_v42 }
0x3725   :  { %7034 = vrsqrt.f32 %v5430_v43 }
0x372d   :  { %v7033_v44 = vpop.eup %7032 }
0x372e   :  { %v5433_v52 = vmul.f32 %v7033_v44, %v5417_v1 }
0x372f   :  { %v7035_v54 = vpop.eup %7034 }
0x3730   :  { %v5439_v53 = vmul.f32 %v5743_v45, %v5433_v52  ;;  %v5434_v36 = vmul.f32 %v7035_v54, %v5418_v20 }
0x3732   :  { %v5440_v41 = vmul.f32 %v5743_v45, %v5434_v36  ;;  %v5445_v60 = vadd.f32 %v5744_v23, %v5439_v53 }
0x3734   :  { %v5446_v51 = vadd.f32 %v5744_v23, %v5440_v41 }
0x3736   :  { %v5456_v62 = vpack.c.bf16 %v5446_v51, %v5445_v60 }
0x3738   :  { %6727 = vmatmul.mubr.msk.bf16.vlgmr.msra.gmra.mrb[132].mxu0 %vm61_vm1, %v5456_v62 }
0x3739   :  { %6731 = vmatpush3.bf16.msra.mxu0 %v5521_v61  ;;  %6738 = vmatprep.mubr.msk.bf16.mxu0 %vm7041_vm0, %v7040_v0 }
0x373a   :  { %6732 = vmatprep.subr.bf16.mxu0 %v7040_v0 }
0x373d   :  { %6733 = vmatpush3.bf16.msra.mxu0 %v5522_v48 }
0x373e   :  { %6734 = vmatprep.subr.bf16.mxu0 %v7040_v0 }
0x3741   :  { %6735 = vmatpush3.bf16.msra.mxu0 %v5523_v7 }
0x3742   :  { %6736 = vmatprep.subr.bf16.mxu0 %v7040_v0 }
0x3745   :  { %6737 = vmatpush3.bf16.msra.mxu0 %v5524_v11 }
0x380b   :  { %v5502_v12 = vpop.f32.mrb[132].mxu0 }
0x380c   :  { %v5503_v31 = vadd.f32 %v5745_v39, %v5502_v12  ;;  %v6728_v32 = vpop.f32.mrb[133].mxu0 }
0x380d   :  { %v5505_v24 = vpop.f32.mrb[134].mxu0 }
0x380e   :  { %v5506_v13 = vadd.f32 %v5745_v39, %v5505_v24  ;;  %v6729_v0 = vpop.f32.mrb[135].mxu0  ;;  %v5509_v15 = vmax.f32 %v5503_v31, 0.0 }
0x3810   :  { %v5510_v49 = vmax.f32 %v5506_v13, 0.0 }
0x3812   :  { %v5520_v50 = vpack.c.bf16 %v5510_v49, %v5509_v15 }
0x3814   :  { %6739 = vmatmul.mubr.msk.bf16.vlgmr.msra.gmra.mrb[136].mxu0 %vm61_vm1, %v5520_v50 }
0x38e7   :  { %v5566_v56 = vpop.f32.mrb[136].mxu0 }
0x38e8   :  { %v5567_v17 = vadd.f32 %v5747_v16, %v5566_v56  ;;  %v6740_v14 = vpop.f32.mrb[137].mxu0 }
0x38e9   :  { %v5569_v18 = vpop.f32.mrb[138].mxu0 }
0x38ea   :  { %5573 = vst [vmem:[%s9327_s4 + $0x10] sm:$0xff] %v5567_v17  ;;  %v5570_v63 = vadd.f32 %v5747_v16, %v5569_v18  ;;  %v6741_v1 = vpop.f32.mrb[139].mxu0 }
0x38ec   :  { %5574 = vst [vmem:[%s9327_s4 + $0x18] sm:$0xff] %v5570_v63 }

</bundles_post_ra>
